<compile_context>
chip_gen: v7x
topology: tpu7x:2x2x1
jax: 0.10.0
libtpu: 0.0.40
codegen_flags: <defaults>
</compile_context>

<pallas_src>
import functools

import jax
import jax.numpy as jnp
from jax import lax
from jax.experimental import pallas as pl
from jax.experimental.pallas import tpu as pltpu

_VMEM_LIMIT_BYTES = 48 * 1024 * 1024      # fits v5e/v6e/v7x physical VMEM
_VMEM_BUDGET_BYTES = 40 * 1024 * 1024     # tile chooser target (double-buffered)


def _pick_tile_h(H, W, cin, cmid, cout):
    """Largest band height TH (divisor of H, <=128) whose working set fits VMEM."""
    def need(th):
        in_blk = (th + 4) * (W + 4) * cin * 2          # bf16 input band
        out_blk = 4 * th * W * cout * 4                # f32 phase-major output band
        acc = (th + 2) * (W + 2) * cmid * 4            # f32 accumulator scratch
        y_scr = (th + 2) * (W + 2) * cmid * 2          # bf16 intermediate scratch
        work = (th + 2) * (W + 2) * max(cin, cmid) * 4 # per-tap patch temporaries
        return 2 * (in_blk + out_blk) + acc + y_scr + 2 * work
    th = min(H, 128)
    while th > 1 and (H % th != 0 or need(th) > _VMEM_BUDGET_BYTES):
        th -= 1
    return max(th, 1)


# ----------------------------------------------------------------------------
# Fused kernel: one (image, row-band) per grid step.
#   xb_ref : (1, TH+4, W+4, Cin)  bf16   x padded by 2, banded over rows
#   w1_ref : (9, Cin, Cmid)       bf16   3x3 conv taps, tap = kh*3 + kw
#   b1_ref : (1, Cmid)            f32
#   k2_ref : (4, 4, Cmid, Cout)   bf16   [phase = 2r+s, tap = 2dh+dw]
#   bt_ref : (1, Cout)            f32
#   o_ref  : (1, 4, TH, W, Cout)  f32    phase-major output band
#   acc_scr: ((TH+2)*(W+2), Cmid) f32    stage-1 accumulator
#   y_scr  : (TH+2, W+2, Cmid)    bf16   intermediate y band (with halo)
# ----------------------------------------------------------------------------
def _decoder_block_kernel(xb_ref, w1_ref, b1_ref, k2_ref, bt_ref, o_ref,
                          acc_scr, y_scr, *, nb):
    TH = o_ref.shape[2]
    W = o_ref.shape[3]
    Cout = o_ref.shape[4]
    Cin = xb_ref.shape[-1]
    Cmid = b1_ref.shape[-1]

    t = pl.program_id(0) % nb                 # band index within the image

    # ---------------- stage 1: 3x3 conv + bias + ReLU on an extended band ----
    xb = xb_ref[0]                            # (TH+4, W+4, Cin) bf16
    for tap, (kh, kw) in enumerate((kh, kw) for kh in range(3) for kw in range(3)):
        patch = xb[kh:kh + TH + 2, kw:kw + W + 2, :].reshape((TH + 2) * (W + 2), Cin)
        contrib = jnp.dot(patch, w1_ref[tap], preferred_element_type=jnp.float32)
        if tap == 0:
            acc_scr[...] = contrib
        else:
            acc_scr[...] += contrib
    y = jnp.maximum(acc_scr[...] + b1_ref[...], 0.0)          # f32 epilogue
    y = y.reshape(TH + 2, W + 2, Cmid)

    # The transposed conv needs y with ZERO halo at the true image border but
    # REAL y values at interior band borders -> mask by global position.
    row = lax.broadcasted_iota(jnp.int32, (TH + 2, W + 2, 1), 0)
    col = lax.broadcasted_iota(jnp.int32, (TH + 2, W + 2, 1), 1)
    interior = ((col >= 1) & (col <= W)
                & ((row >= 1) | (t > 0))
                & ((row <= TH) | (t < nb - 1)))
    y_scr[...] = jnp.where(interior, y, 0.0).astype(y_scr.dtype)

    # ---------------- stage 2: ConvTranspose2d(4,2,1)+ReLU as 4 phase convs --
    for r in range(2):
        for s in range(2):
            acc = jnp.zeros((TH * W, Cout), jnp.float32)
            for dh in range(2):
                for dw in range(2):
                    patch = y_scr[r + dh:r + dh + TH, s + dw:s + dw + W, :]
                    acc = acc + jnp.dot(patch.reshape(TH * W, Cmid),
                                        k2_ref[2 * r + s, 2 * dh + dw],
                                        preferred_element_type=jnp.float32)
            z = jnp.maximum(acc + bt_ref[...], 0.0)
            o_ref[0, 2 * r + s] = z.reshape(TH, W, Cout).astype(o_ref.dtype)


# ----------------------------------------------------------------------------
# DecoderBlockV2 forward (is_deconv=True path)
# ----------------------------------------------------------------------------
@functools.partial(jax.jit, static_argnames=("tile_h",))
def decoder_block_v2_forward(x_nchw, params, tile_h=None):
    """x_nchw: (N, Cin, H, W) f32.  Returns (N, Cout, 2H, 2W) f32."""
    w1, b1, wt, bt = params["w1"], params["b1"], params["wt"], params["bt"]
    N, Cin, H, W = x_nchw.shape
    Cmid = w1.shape[0]
    Cout = wt.shape[1]

    TH = _pick_tile_h(H, W, Cin, Cmid, Cout) if tile_h is None else tile_h
    assert H % TH == 0, (H, TH)
    nb = H // TH

    # --- glue: NCHW -> NHWC (bf16), pad by 2, overlapping row bands ---------
    x = jnp.transpose(x_nchw, (0, 2, 3, 1)).astype(jnp.bfloat16)   # (N,H,W,Cin)
    xpad = jnp.pad(x, ((0, 0), (2, 2), (2, 2), (0, 0)))            # (N,H+4,W+4,Cin)
    rows = (jnp.arange(nb) * TH)[:, None] + jnp.arange(TH + 4)[None, :]
    xb = xpad[:, rows]                                             # (N,nb,TH+4,W+4,Cin)
    xb = xb.reshape(N * nb, TH + 4, W + 4, Cin)

    # conv3x3 weight (Cmid, Cin, 3, 3) -> (9, Cin, Cmid), tap = kh*3 + kw
    w1m = jnp.transpose(w1, (2, 3, 1, 0)).reshape(9, Cin, Cmid).astype(jnp.bfloat16)
    b1m = b1[None, :].astype(jnp.float32)

    # ConvTranspose2d weight (Cmid, Cout, 4, 4) -> phase kernels
    # k2[r, s, dh, dw, ic, oc] = wt[ic, oc, 3-2dh-r, 3-2dw-s]
    wf = jnp.transpose(jnp.flip(wt, (2, 3)), (2, 3, 0, 1))         # (4,4,Cmid,Cout)
    wf = wf.reshape(2, 2, 2, 2, Cmid, Cout)                        # [dh,r,dw,s,ic,oc]
    k2 = jnp.transpose(wf, (1, 3, 0, 2, 4, 5))                     # [r,s,dh,dw,ic,oc]
    k2 = k2.reshape(4, 4, Cmid, Cout).astype(jnp.bfloat16)
    btm = bt[None, :].astype(jnp.float32)

    kernel = functools.partial(_decoder_block_kernel, nb=nb)
    out = pl.pallas_call(
        kernel,
        out_shape=jax.ShapeDtypeStruct((N * nb, 4, TH, W, Cout), jnp.float32),
        grid=(N * nb,),
        in_specs=[
            pl.BlockSpec((1, TH + 4, W + 4, Cin), lambda g: (g, 0, 0, 0)),
            pl.BlockSpec((9, Cin, Cmid), lambda g: (0, 0, 0)),
            pl.BlockSpec((1, Cmid), lambda g: (0, 0)),
            pl.BlockSpec((4, 4, Cmid, Cout), lambda g: (0, 0, 0, 0)),
            pl.BlockSpec((1, Cout), lambda g: (0, 0)),
        ],
        out_specs=pl.BlockSpec((1, 4, TH, W, Cout), lambda g: (g, 0, 0, 0, 0)),
        scratch_shapes=[
            pltpu.VMEM(((TH + 2) * (W + 2), Cmid), jnp.float32),
            pltpu.VMEM((TH + 2, W + 2, Cmid), jnp.bfloat16),
        ],
        compiler_params=pltpu.CompilerParams(
            dimension_semantics=("parallel",),
            vmem_limit_bytes=_VMEM_LIMIT_BYTES),
    )(xb, w1m, b1m, k2, btm)

    # phase-major (N, nb, r, s, i, j, c) -> NCHW (N, Cout, 2H, 2W)
    out = out.reshape(N, nb, 2, 2, TH, W, Cout)
    out = jnp.transpose(out, (0, 6, 1, 4, 2, 5, 3)).reshape(N, Cout, 2 * H, 2 * W)
    return out


# ----------------------------------------------------------------------------
# Pure-JAX reference (XLA convs) for the correctness check.
# ----------------------------------------------------------------------------
def reference_forward(x_nchw, params):
    w1, b1, wt, bt = params["w1"], params["b1"], params["wt"], params["bt"]
    y = lax.conv_general_dilated(
        x_nchw, w1, window_strides=(1, 1), padding=((1, 1), (1, 1)),
        dimension_numbers=("NCHW", "OIHW", "NCHW"))
    y = jax.nn.relu(y + b1[None, :, None, None])
    wt_oihw = jnp.transpose(jnp.flip(wt, axis=(2, 3)), (1, 0, 2, 3))
    z = lax.conv_general_dilated(
        y, wt_oihw, window_strides=(1, 1), padding=((2, 2), (2, 2)),
        lhs_dilation=(2, 2), dimension_numbers=("NCHW", "OIHW", "NCHW"))
    return jax.nn.relu(z + bt[None, :, None, None])


def init_params(key, in_channels, middle_channels, out_channels):
    k1, k2, k3, k4 = jax.random.split(key, 4)
    s1 = 1.0 / jnp.sqrt(in_channels * 9.0)
    st = 1.0 / jnp.sqrt(middle_channels * 16.0)
    return {
        # Conv2d(in, mid, 3, padding=1): weight (mid, in, 3, 3), bias (mid,)
        "w1": jax.random.uniform(k1, (middle_channels, in_channels, 3, 3),
                                 jnp.float32, -s1, s1),
        "b1": jax.random.uniform(k2, (middle_channels,), jnp.float32, -s1, s1),
        # ConvTranspose2d(mid, out, 4, 2, 1): weight (mid, out, 4, 4), bias (out,)
        "wt": jax.random.uniform(k3, (middle_channels, out_channels, 4, 4),
                                 jnp.float32, -st, st),
        "bt": jax.random.uniform(k4, (out_channels,), jnp.float32, -st, st),
    }


if __name__ == "__main__":
    key = jax.random.PRNGKey(0)
    kx, kp = jax.random.split(key)

    N, Cin, Cmid, Cout, H, W = 2, 4, 8, 4, 16, 16
    x = jax.random.normal(kx, (N, Cin, H, W), jnp.float32)
    params = init_params(kp, Cin, Cmid, Cout)

    ref = jax.block_until_ready(reference_forward(x, params))

    # Exercise both the multi-band path (halo + boundary masking) and the
    # auto-picked tile path.
    for tile_h in (8, None):
        out = jax.block_until_ready(
            decoder_block_v2_forward(x, params, tile_h=tile_h))
        assert out.shape == (N, Cout, 2 * H, 2 * W), out.shape
        err = float(jnp.max(jnp.abs(out - ref)))
        assert jnp.allclose(out, ref, rtol=3e-2, atol=3e-2), err

    print("KERNEL_OK")
</pallas_src>

<mosaic_0001>
module attributes {stable_mosaic.version = 11 : i64} {
  func.func @_decoder_block_kernel(%arg0: i32, %arg1: memref<1x12x20x4xbf16, #tpu.memory_space<vmem>>, %arg2: memref<9x4x8xbf16, #tpu.memory_space<vmem>>, %arg3: memref<1x8xf32, #tpu.memory_space<vmem>>, %arg4: memref<4x4x8x4xbf16, #tpu.memory_space<vmem>>, %arg5: memref<1x4xf32, #tpu.memory_space<vmem>>, %arg6: memref<1x4x8x16x4xf32, #tpu.memory_space<vmem>>, %arg7: memref<180x8xf32, #tpu.memory_space<vmem>>, %arg8: memref<10x18x8xbf16, #tpu.memory_space<vmem>>) attributes {dimension_semantics = [#tpu.dimension_semantics<parallel>], iteration_bounds = array<i64: 4>, scalar_prefetch = 0 : i64, scratch_operands = 2 : i64, tpu.core_type = #tpu.core_type<tc>, window_params = [{transform_indices = @transform_0, window_bounds = array<i64: 1, 12, 20, 4>}, {pipeline_mode = #tpu.pipeline_mode<synchronous>, transform_indices = @transform_1, window_bounds = array<i64: 9, 4, 8>}, {pipeline_mode = #tpu.pipeline_mode<synchronous>, transform_indices = @transform_2, window_bounds = array<i64: 1, 8>}, {pipeline_mode = #tpu.pipeline_mode<synchronous>, transform_indices = @transform_3, window_bounds = array<i64: 4, 4, 8, 4>}, {pipeline_mode = #tpu.pipeline_mode<synchronous>, transform_indices = @transform_4, window_bounds = array<i64: 1, 4>}, {transform_indices = @transform_5, window_bounds = array<i64: 1, 4, 8, 16, 4>}]} {
    %c2_i32 = arith.constant 2 : i32
    %c0_i32 = arith.constant 0 : i32
    %0 = arith.cmpi eq, %c2_i32, %c0_i32 : i32
    %c1_i32 = arith.constant 1 : i32
    %1 = arith.select %0, %c1_i32, %c2_i32 : i32
    %2 = arith.remsi %arg0, %1 : i32
    %c0_i32_0 = arith.constant 0 : i32
    %3 = arith.cmpi ne, %2, %c0_i32_0 : i32
    %c0_i32_1 = arith.constant 0 : i32
    %4 = arith.cmpi slt, %2, %c0_i32_1 : i32
    %c0_i32_2 = arith.constant 0 : i32
    %5 = arith.cmpi slt, %1, %c0_i32_2 : i32
    %6 = arith.xori %4, %5 : i1
    %7 = arith.andi %6, %3 : i1
    %8 = arith.addi %2, %1 : i32
    %9 = arith.select %7, %8, %2 : i32
    %c0 = arith.constant 0 : index
    %c0_3 = arith.constant 0 : index
    %c0_4 = arith.constant 0 : index
    %c0_5 = arith.constant 0 : index
    %10 = vector.load %arg1[%c0, %c0_3, %c0_4, %c0_5] : memref<1x12x20x4xbf16, #tpu.memory_space<vmem>>, vector<1x12x20x4xbf16>
    %11 = vector.shape_cast %10 : vector<1x12x20x4xbf16> to vector<12x20x4xbf16>
    %12 = vector.extract_strided_slice %11 {offsets = [0, 0, 0], sizes = [10, 18, 4], strides = [1, 1, 1]} : vector<12x20x4xbf16> to vector<10x18x4xbf16>
    %13 = vector.shape_cast %12 : vector<10x18x4xbf16> to vector<180x4xbf16>
    %c0_6 = arith.constant 0 : index
    %c0_7 = arith.constant 0 : index
    %c0_8 = arith.constant 0 : index
    %14 = vector.load %arg2[%c0_6, %c0_7, %c0_8] : memref<9x4x8xbf16, #tpu.memory_space<vmem>>, vector<1x4x8xbf16>
    %15 = vector.shape_cast %14 : vector<1x4x8xbf16> to vector<4x8xbf16>
    %cst = arith.constant dense<0.000000e+00> : vector<180x8xf32>
    %16 = tpu.matmul %13, %15, %cst {dimension_numbers = #tpu.dot_dimension_numbers<[1], [0], [0], [1], [0, 0, 1, 1], [], []>} : vector<180x4xbf16>, vector<4x8xbf16>, vector<180x8xf32> -> vector<180x8xf32>
    %c0_9 = arith.constant 0 : index
    %c0_10 = arith.constant 0 : index
    %17 = vector.load %arg7[%c0_9, %c0_10] : memref<180x8xf32, #tpu.memory_space<vmem>>, vector<180x8xf32>
    tpu.vector_store %arg7[%c0_9, %c0_10], %16 {strides = array<i32>} : memref<180x8xf32, #tpu.memory_space<vmem>>, vector<180x8xf32>,
    %18 = vector.extract_strided_slice %11 {offsets = [0, 1, 0], sizes = [10, 18, 4], strides = [1, 1, 1]} : vector<12x20x4xbf16> to vector<10x18x4xbf16>
    %19 = vector.shape_cast %18 : vector<10x18x4xbf16> to vector<180x4xbf16>
    %c1 = arith.constant 1 : index
    %c0_11 = arith.constant 0 : index
    %c0_12 = arith.constant 0 : index
    %20 = vector.load %arg2[%c1, %c0_11, %c0_12] : memref<9x4x8xbf16, #tpu.memory_space<vmem>>, vector<1x4x8xbf16>
    %21 = vector.shape_cast %20 : vector<1x4x8xbf16> to vector<4x8xbf16>
    %cst_13 = arith.constant dense<0.000000e+00> : vector<180x8xf32>
    %22 = tpu.matmul %19, %21, %cst_13 {dimension_numbers = #tpu.dot_dimension_numbers<[1], [0], [0], [1], [0, 0, 1, 1], [], []>} : vector<180x4xbf16>, vector<4x8xbf16>, vector<180x8xf32> -> vector<180x8xf32>
    %c0_14 = arith.constant 0 : index
    %c0_15 = arith.constant 0 : index
    %23 = vector.load %arg7[%c0_14, %c0_15] : memref<180x8xf32, #tpu.memory_space<vmem>>, vector<180x8xf32>
    %24 = arith.addf %23, %22 : vector<180x8xf32>
    %c0_16 = arith.constant 0 : index
    %c0_17 = arith.constant 0 : index
    %25 = vector.load %arg7[%c0_16, %c0_17] : memref<180x8xf32, #tpu.memory_space<vmem>>, vector<180x8xf32>
    tpu.vector_store %arg7[%c0_16, %c0_17], %24 {strides = array<i32>} : memref<180x8xf32, #tpu.memory_space<vmem>>, vector<180x8xf32>,
    %26 = vector.extract_strided_slice %11 {offsets = [0, 2, 0], sizes = [10, 18, 4], strides = [1, 1, 1]} : vector<12x20x4xbf16> to vector<10x18x4xbf16>
    %27 = vector.shape_cast %26 : vector<10x18x4xbf16> to vector<180x4xbf16>
    %c2 = arith.constant 2 : index
    %c0_18 = arith.constant 0 : index
    %c0_19 = arith.constant 0 : index
    %28 = vector.load %arg2[%c2, %c0_18, %c0_19] : memref<9x4x8xbf16, #tpu.memory_space<vmem>>, vector<1x4x8xbf16>
    %29 = vector.shape_cast %28 : vector<1x4x8xbf16> to vector<4x8xbf16>
    %cst_20 = arith.constant dense<0.000000e+00> : vector<180x8xf32>
    %30 = tpu.matmul %27, %29, %cst_20 {dimension_numbers = #tpu.dot_dimension_numbers<[1], [0], [0], [1], [0, 0, 1, 1], [], []>} : vector<180x4xbf16>, vector<4x8xbf16>, vector<180x8xf32> -> vector<180x8xf32>
    %c0_21 = arith.constant 0 : index
    %c0_22 = arith.constant 0 : index
    %31 = vector.load %arg7[%c0_21, %c0_22] : memref<180x8xf32, #tpu.memory_space<vmem>>, vector<180x8xf32>
    %32 = arith.addf %31, %30 : vector<180x8xf32>
    %c0_23 = arith.constant 0 : index
    %c0_24 = arith.constant 0 : index
    %33 = vector.load %arg7[%c0_23, %c0_24] : memref<180x8xf32, #tpu.memory_space<vmem>>, vector<180x8xf32>
    tpu.vector_store %arg7[%c0_23, %c0_24], %32 {strides = array<i32>} : memref<180x8xf32, #tpu.memory_space<vmem>>, vector<180x8xf32>,
    %34 = vector.extract_strided_slice %11 {offsets = [1, 0, 0], sizes = [10, 18, 4], strides = [1, 1, 1]} : vector<12x20x4xbf16> to vector<10x18x4xbf16>
    %35 = vector.shape_cast %34 : vector<10x18x4xbf16> to vector<180x4xbf16>
    %c3 = arith.constant 3 : index
    %c0_25 = arith.constant 0 : index
    %c0_26 = arith.constant 0 : index
    %36 = vector.load %arg2[%c3, %c0_25, %c0_26] : memref<9x4x8xbf16, #tpu.memory_space<vmem>>, vector<1x4x8xbf16>
    %37 = vector.shape_cast %36 : vector<1x4x8xbf16> to vector<4x8xbf16>
    %cst_27 = arith.constant dense<0.000000e+00> : vector<180x8xf32>
    %38 = tpu.matmul %35, %37, %cst_27 {dimension_numbers = #tpu.dot_dimension_numbers<[1], [0], [0], [1], [0, 0, 1, 1], [], []>} : vector<180x4xbf16>, vector<4x8xbf16>, vector<180x8xf32> -> vector<180x8xf32>
    %c0_28 = arith.constant 0 : index
    %c0_29 = arith.constant 0 : index
    %39 = vector.load %arg7[%c0_28, %c0_29] : memref<180x8xf32, #tpu.memory_space<vmem>>, vector<180x8xf32>
    %40 = arith.addf %39, %38 : vector<180x8xf32>
    %c0_30 = arith.constant 0 : index
    %c0_31 = arith.constant 0 : index
    %41 = vector.load %arg7[%c0_30, %c0_31] : memref<180x8xf32, #tpu.memory_space<vmem>>, vector<180x8xf32>
    tpu.vector_store %arg7[%c0_30, %c0_31], %40 {strides = array<i32>} : memref<180x8xf32, #tpu.memory_space<vmem>>, vector<180x8xf32>,
    %42 = vector.extract_strided_slice %11 {offsets = [1, 1, 0], sizes = [10, 18, 4], strides = [1, 1, 1]} : vector<12x20x4xbf16> to vector<10x18x4xbf16>
    %43 = vector.shape_cast %42 : vector<10x18x4xbf16> to vector<180x4xbf16>
    %c4 = arith.constant 4 : index
    %c0_32 = arith.constant 0 : index
    %c0_33 = arith.constant 0 : index
    %44 = vector.load %arg2[%c4, %c0_32, %c0_33] : memref<9x4x8xbf16, #tpu.memory_space<vmem>>, vector<1x4x8xbf16>
    %45 = vector.shape_cast %44 : vector<1x4x8xbf16> to vector<4x8xbf16>
    %cst_34 = arith.constant dense<0.000000e+00> : vector<180x8xf32>
    %46 = tpu.matmul %43, %45, %cst_34 {dimension_numbers = #tpu.dot_dimension_numbers<[1], [0], [0], [1], [0, 0, 1, 1], [], []>} : vector<180x4xbf16>, vector<4x8xbf16>, vector<180x8xf32> -> vector<180x8xf32>
    %c0_35 = arith.constant 0 : index
    %c0_36 = arith.constant 0 : index
    %47 = vector.load %arg7[%c0_35, %c0_36] : memref<180x8xf32, #tpu.memory_space<vmem>>, vector<180x8xf32>
    %48 = arith.addf %47, %46 : vector<180x8xf32>
    %c0_37 = arith.constant 0 : index
    %c0_38 = arith.constant 0 : index
    %49 = vector.load %arg7[%c0_37, %c0_38] : memref<180x8xf32, #tpu.memory_space<vmem>>, vector<180x8xf32>
    tpu.vector_store %arg7[%c0_37, %c0_38], %48 {strides = array<i32>} : memref<180x8xf32, #tpu.memory_space<vmem>>, vector<180x8xf32>,
    %50 = vector.extract_strided_slice %11 {offsets = [1, 2, 0], sizes = [10, 18, 4], strides = [1, 1, 1]} : vector<12x20x4xbf16> to vector<10x18x4xbf16>
    %51 = vector.shape_cast %50 : vector<10x18x4xbf16> to vector<180x4xbf16>
    %c5 = arith.constant 5 : index
    %c0_39 = arith.constant 0 : index
    %c0_40 = arith.constant 0 : index
    %52 = vector.load %arg2[%c5, %c0_39, %c0_40] : memref<9x4x8xbf16, #tpu.memory_space<vmem>>, vector<1x4x8xbf16>
    %53 = vector.shape_cast %52 : vector<1x4x8xbf16> to vector<4x8xbf16>
    %cst_41 = arith.constant dense<0.000000e+00> : vector<180x8xf32>
    %54 = tpu.matmul %51, %53, %cst_41 {dimension_numbers = #tpu.dot_dimension_numbers<[1], [0], [0], [1], [0, 0, 1, 1], [], []>} : vector<180x4xbf16>, vector<4x8xbf16>, vector<180x8xf32> -> vector<180x8xf32>
    %c0_42 = arith.constant 0 : index
    %c0_43 = arith.constant 0 : index
    %55 = vector.load %arg7[%c0_42, %c0_43] : memref<180x8xf32, #tpu.memory_space<vmem>>, vector<180x8xf32>
    %56 = arith.addf %55, %54 : vector<180x8xf32>
    %c0_44 = arith.constant 0 : index
    %c0_45 = arith.constant 0 : index
    %57 = vector.load %arg7[%c0_44, %c0_45] : memref<180x8xf32, #tpu.memory_space<vmem>>, vector<180x8xf32>
    tpu.vector_store %arg7[%c0_44, %c0_45], %56 {strides = array<i32>} : memref<180x8xf32, #tpu.memory_space<vmem>>, vector<180x8xf32>,
    %58 = vector.extract_strided_slice %11 {offsets = [2, 0, 0], sizes = [10, 18, 4], strides = [1, 1, 1]} : vector<12x20x4xbf16> to vector<10x18x4xbf16>
    %59 = vector.shape_cast %58 : vector<10x18x4xbf16> to vector<180x4xbf16>
    %c6 = arith.constant 6 : index
    %c0_46 = arith.constant 0 : index
    %c0_47 = arith.constant 0 : index
    %60 = vector.load %arg2[%c6, %c0_46, %c0_47] : memref<9x4x8xbf16, #tpu.memory_space<vmem>>, vector<1x4x8xbf16>
    %61 = vector.shape_cast %60 : vector<1x4x8xbf16> to vector<4x8xbf16>
    %cst_48 = arith.constant dense<0.000000e+00> : vector<180x8xf32>
    %62 = tpu.matmul %59, %61, %cst_48 {dimension_numbers = #tpu.dot_dimension_numbers<[1], [0], [0], [1], [0, 0, 1, 1], [], []>} : vector<180x4xbf16>, vector<4x8xbf16>, vector<180x8xf32> -> vector<180x8xf32>
    %c0_49 = arith.constant 0 : index
    %c0_50 = arith.constant 0 : index
    %63 = vector.load %arg7[%c0_49, %c0_50] : memref<180x8xf32, #tpu.memory_space<vmem>>, vector<180x8xf32>
    %64 = arith.addf %63, %62 : vector<180x8xf32>
    %c0_51 = arith.constant 0 : index
    %c0_52 = arith.constant 0 : index
    %65 = vector.load %arg7[%c0_51, %c0_52] : memref<180x8xf32, #tpu.memory_space<vmem>>, vector<180x8xf32>
    tpu.vector_store %arg7[%c0_51, %c0_52], %64 {strides = array<i32>} : memref<180x8xf32, #tpu.memory_space<vmem>>, vector<180x8xf32>,
    %66 = vector.extract_strided_slice %11 {offsets = [2, 1, 0], sizes = [10, 18, 4], strides = [1, 1, 1]} : vector<12x20x4xbf16> to vector<10x18x4xbf16>
    %67 = vector.shape_cast %66 : vector<10x18x4xbf16> to vector<180x4xbf16>
    %c7 = arith.constant 7 : index
    %c0_53 = arith.constant 0 : index
    %c0_54 = arith.constant 0 : index
    %68 = vector.load %arg2[%c7, %c0_53, %c0_54] : memref<9x4x8xbf16, #tpu.memory_space<vmem>>, vector<1x4x8xbf16>
    %69 = vector.shape_cast %68 : vector<1x4x8xbf16> to vector<4x8xbf16>
    %cst_55 = arith.constant dense<0.000000e+00> : vector<180x8xf32>
    %70 = tpu.matmul %67, %69, %cst_55 {dimension_numbers = #tpu.dot_dimension_numbers<[1], [0], [0], [1], [0, 0, 1, 1], [], []>} : vector<180x4xbf16>, vector<4x8xbf16>, vector<180x8xf32> -> vector<180x8xf32>
    %c0_56 = arith.constant 0 : index
    %c0_57 = arith.constant 0 : index
    %71 = vector.load %arg7[%c0_56, %c0_57] : memref<180x8xf32, #tpu.memory_space<vmem>>, vector<180x8xf32>
    %72 = arith.addf %71, %70 : vector<180x8xf32>
    %c0_58 = arith.constant 0 : index
    %c0_59 = arith.constant 0 : index
    %73 = vector.load %arg7[%c0_58, %c0_59] : memref<180x8xf32, #tpu.memory_space<vmem>>, vector<180x8xf32>
    tpu.vector_store %arg7[%c0_58, %c0_59], %72 {strides = array<i32>} : memref<180x8xf32, #tpu.memory_space<vmem>>, vector<180x8xf32>,
    %74 = vector.extract_strided_slice %11 {offsets = [2, 2, 0], sizes = [10, 18, 4], strides = [1, 1, 1]} : vector<12x20x4xbf16> to vector<10x18x4xbf16>
    %75 = vector.shape_cast %74 : vector<10x18x4xbf16> to vector<180x4xbf16>
    %c8 = arith.constant 8 : index
    %c0_60 = arith.constant 0 : index
    %c0_61 = arith.constant 0 : index
    %76 = vector.load %arg2[%c8, %c0_60, %c0_61] : memref<9x4x8xbf16, #tpu.memory_space<vmem>>, vector<1x4x8xbf16>
    %77 = vector.shape_cast %76 : vector<1x4x8xbf16> to vector<4x8xbf16>
    %cst_62 = arith.constant dense<0.000000e+00> : vector<180x8xf32>
    %78 = tpu.matmul %75, %77, %cst_62 {dimension_numbers = #tpu.dot_dimension_numbers<[1], [0], [0], [1], [0, 0, 1, 1], [], []>} : vector<180x4xbf16>, vector<4x8xbf16>, vector<180x8xf32> -> vector<180x8xf32>
    %c0_63 = arith.constant 0 : index
    %c0_64 = arith.constant 0 : index
    %79 = vector.load %arg7[%c0_63, %c0_64] : memref<180x8xf32, #tpu.memory_space<vmem>>, vector<180x8xf32>
    %80 = arith.addf %79, %78 : vector<180x8xf32>
    %c0_65 = arith.constant 0 : index
    %c0_66 = arith.constant 0 : index
    %81 = vector.load %arg7[%c0_65, %c0_66] : memref<180x8xf32, #tpu.memory_space<vmem>>, vector<180x8xf32>
    tpu.vector_store %arg7[%c0_65, %c0_66], %80 {strides = array<i32>} : memref<180x8xf32, #tpu.memory_space<vmem>>, vector<180x8xf32>,
    %c0_67 = arith.constant 0 : index
    %c0_68 = arith.constant 0 : index
    %82 = vector.load %arg7[%c0_67, %c0_68] : memref<180x8xf32, #tpu.memory_space<vmem>>, vector<180x8xf32>
    %c0_69 = arith.constant 0 : index
    %c0_70 = arith.constant 0 : index
    %83 = vector.load %arg3[%c0_69, %c0_70] : memref<1x8xf32, #tpu.memory_space<vmem>>, vector<1x8xf32>
    %84 = vector.broadcast %83 : vector<1x8xf32> to vector<180x8xf32>
    %85 = arith.addf %82, %84 : vector<180x8xf32>
    %cst_71 = arith.constant 0.000000e+00 : f32
    %86 = vector.broadcast %cst_71 : f32 to vector<180x8xf32>
    %87 = arith.maximumf %85, %86 : vector<180x8xf32>
    %88 = vector.shape_cast %87 : vector<180x8xf32> to vector<10x18x8xf32>
    %89 = tpu.iota {dimensions = array<i32: 0>} : vector<10x18x1xi32>
    %90 = tpu.iota {dimensions = array<i32: 1>} : vector<10x18x1xi32>
    %c1_i32_72 = arith.constant 1 : i32
    %91 = vector.broadcast %c1_i32_72 : i32 to vector<10x18x1xi32>
    %92 = arith.cmpi sge, %90, %91 : vector<10x18x1xi32>
    %c16_i32 = arith.constant 16 : i32
    %93 = vector.broadcast %c16_i32 : i32 to vector<10x18x1xi32>
    %94 = arith.cmpi sle, %90, %93 : vector<10x18x1xi32>
    %95 = arith.andi %92, %94 : vector<10x18x1xi1>
    %c1_i32_73 = arith.constant 1 : i32
    %96 = vector.broadcast %c1_i32_73 : i32 to vector<10x18x1xi32>
    %97 = arith.cmpi sge, %89, %96 : vector<10x18x1xi32>
    %c0_i32_74 = arith.constant 0 : i32
    %98 = arith.cmpi sgt, %9, %c0_i32_74 : i32
    %99 = vector.broadcast %98 : i1 to vector<10x18x1xi1>
    %100 = arith.ori %97, %99 : vector<10x18x1xi1>
    %101 = arith.andi %95, %100 : vector<10x18x1xi1>
    %c8_i32 = arith.constant 8 : i32
    %102 = vector.broadcast %c8_i32 : i32 to vector<10x18x1xi32>
    %103 = arith.cmpi sle, %89, %102 : vector<10x18x1xi32>
    %c1_i32_75 = arith.constant 1 : i32
    %104 = arith.cmpi slt, %9, %c1_i32_75 : i32
    %105 = vector.broadcast %104 : i1 to vector<10x18x1xi1>
    %106 = arith.ori %103, %105 : vector<10x18x1xi1>
    %107 = arith.andi %101, %106 : vector<10x18x1xi1>
    %cst_76 = arith.constant 0.000000e+00 : f32
    %108 = vector.shape_cast %107 : vector<10x18x1xi1> to vector<10x18x1xi1>
    %109 = vector.broadcast %108 : vector<10x18x1xi1> to vector<10x18x8xi1>
    %110 = vector.broadcast %cst_76 : f32 to vector<10x18x8xf32>
    %111 = arith.select %109, %88, %110 : vector<10x18x8xi1>, vector<10x18x8xf32>
    %112 = arith.truncf %111 : vector<10x18x8xf32> to vector<10x18x8xbf16>
    %c0_77 = arith.constant 0 : index
    %c0_78 = arith.constant 0 : index
    %c0_79 = arith.constant 0 : index
    %113 = vector.load %arg8[%c0_77, %c0_78, %c0_79] : memref<10x18x8xbf16, #tpu.memory_space<vmem>>, vector<10x18x8xbf16>
    tpu.vector_store %arg8[%c0_77, %c0_78, %c0_79], %112 {strides = array<i32>} : memref<10x18x8xbf16, #tpu.memory_space<vmem>>, vector<10x18x8xbf16>,
    %cst_80 = arith.constant 0.000000e+00 : f32
    %114 = vector.broadcast %cst_80 : f32 to vector<128x4xf32>
    %c0_81 = arith.constant 0 : index
    %c0_82 = arith.constant 0 : index
    %c0_83 = arith.constant 0 : index
    %115 = vector.load %arg8[%c0_81, %c0_82, %c0_83] : memref<10x18x8xbf16, #tpu.memory_space<vmem>>, vector<8x16x8xbf16>
    %116 = vector.shape_cast %115 : vector<8x16x8xbf16> to vector<128x8xbf16>
    %c0_84 = arith.constant 0 : index
    %c0_85 = arith.constant 0 : index
    %c0_86 = arith.constant 0 : index
    %c0_87 = arith.constant 0 : index
    %117 = vector.load %arg4[%c0_84, %c0_85, %c0_86, %c0_87] : memref<4x4x8x4xbf16, #tpu.memory_space<vmem>>, vector<1x1x8x4xbf16>
    %118 = vector.shape_cast %117 : vector<1x1x8x4xbf16> to vector<8x4xbf16>
    %cst_88 = arith.constant dense<0.000000e+00> : vector<128x4xf32>
    %119 = tpu.matmul %116, %118, %cst_88 {dimension_numbers = #tpu.dot_dimension_numbers<[1], [0], [0], [1], [0, 0, 1, 1], [], []>} : vector<128x8xbf16>, vector<8x4xbf16>, vector<128x4xf32> -> vector<128x4xf32>
    %120 = arith.addf %114, %119 : vector<128x4xf32>
    %c0_89 = arith.constant 0 : index
    %c1_90 = arith.constant 1 : index
    %c0_91 = arith.constant 0 : index
    %121 = vector.load %arg8[%c0_89, %c1_90, %c0_91] : memref<10x18x8xbf16, #tpu.memory_space<vmem>>, vector<8x16x8xbf16>
    %122 = vector.shape_cast %121 : vector<8x16x8xbf16> to vector<128x8xbf16>
    %c0_92 = arith.constant 0 : index
    %c1_93 = arith.constant 1 : index
    %c0_94 = arith.constant 0 : index
    %c0_95 = arith.constant 0 : index
    %123 = vector.load %arg4[%c0_92, %c1_93, %c0_94, %c0_95] : memref<4x4x8x4xbf16, #tpu.memory_space<vmem>>, vector<1x1x8x4xbf16>
    %124 = vector.shape_cast %123 : vector<1x1x8x4xbf16> to vector<8x4xbf16>
    %cst_96 = arith.constant dense<0.000000e+00> : vector<128x4xf32>
    %125 = tpu.matmul %122, %124, %cst_96 {dimension_numbers = #tpu.dot_dimension_numbers<[1], [0], [0], [1], [0, 0, 1, 1], [], []>} : vector<128x8xbf16>, vector<8x4xbf16>, vector<128x4xf32> -> vector<128x4xf32>
    %126 = arith.addf %120, %125 : vector<128x4xf32>
    %c1_97 = arith.constant 1 : index
    %c0_98 = arith.constant 0 : index
    %c0_99 = arith.constant 0 : index
    %127 = vector.load %arg8[%c1_97, %c0_98, %c0_99] : memref<10x18x8xbf16, #tpu.memory_space<vmem>>, vector<8x16x8xbf16>
    %128 = vector.shape_cast %127 : vector<8x16x8xbf16> to vector<128x8xbf16>
    %c0_100 = arith.constant 0 : index
    %c2_101 = arith.constant 2 : index
    %c0_102 = arith.constant 0 : index
    %c0_103 = arith.constant 0 : index
    %129 = vector.load %arg4[%c0_100, %c2_101, %c0_102, %c0_103] : memref<4x4x8x4xbf16, #tpu.memory_space<vmem>>, vector<1x1x8x4xbf16>
    %130 = vector.shape_cast %129 : vector<1x1x8x4xbf16> to vector<8x4xbf16>
    %cst_104 = arith.constant dense<0.000000e+00> : vector<128x4xf32>
    %131 = tpu.matmul %128, %130, %cst_104 {dimension_numbers = #tpu.dot_dimension_numbers<[1], [0], [0], [1], [0, 0, 1, 1], [], []>} : vector<128x8xbf16>, vector<8x4xbf16>, vector<128x4xf32> -> vector<128x4xf32>
    %132 = arith.addf %126, %131 : vector<128x4xf32>
    %c1_105 = arith.constant 1 : index
    %c1_106 = arith.constant 1 : index
    %c0_107 = arith.constant 0 : index
    %133 = vector.load %arg8[%c1_105, %c1_106, %c0_107] : memref<10x18x8xbf16, #tpu.memory_space<vmem>>, vector<8x16x8xbf16>
    %134 = vector.shape_cast %133 : vector<8x16x8xbf16> to vector<128x8xbf16>
    %c0_108 = arith.constant 0 : index
    %c3_109 = arith.constant 3 : index
    %c0_110 = arith.constant 0 : index
    %c0_111 = arith.constant 0 : index
    %135 = vector.load %arg4[%c0_108, %c3_109, %c0_110, %c0_111] : memref<4x4x8x4xbf16, #tpu.memory_space<vmem>>, vector<1x1x8x4xbf16>
    %136 = vector.shape_cast %135 : vector<1x1x8x4xbf16> to vector<8x4xbf16>
    %cst_112 = arith.constant dense<0.000000e+00> : vector<128x4xf32>
    %137 = tpu.matmul %134, %136, %cst_112 {dimension_numbers = #tpu.dot_dimension_numbers<[1], [0], [0], [1], [0, 0, 1, 1], [], []>} : vector<128x8xbf16>, vector<8x4xbf16>, vector<128x4xf32> -> vector<128x4xf32>
    %138 = arith.addf %132, %137 : vector<128x4xf32>
    %c0_113 = arith.constant 0 : index
    %c0_114 = arith.constant 0 : index
    %139 = vector.load %arg5[%c0_113, %c0_114] : memref<1x4xf32, #tpu.memory_space<vmem>>, vector<1x4xf32>
    %140 = vector.broadcast %139 : vector<1x4xf32> to vector<128x4xf32>
    %141 = arith.addf %138, %140 : vector<128x4xf32>
    %cst_115 = arith.constant 0.000000e+00 : f32
    %142 = vector.broadcast %cst_115 : f32 to vector<128x4xf32>
    %143 = arith.maximumf %141, %142 : vector<128x4xf32>
    %144 = vector.shape_cast %143 : vector<128x4xf32> to vector<8x16x4xf32>
    %c0_116 = arith.constant 0 : index
    %c0_117 = arith.constant 0 : index
    %c0_118 = arith.constant 0 : index
    %c0_119 = arith.constant 0 : index
    %c0_120 = arith.constant 0 : index
    %145 = vector.load %arg6[%c0_116, %c0_117, %c0_118, %c0_119, %c0_120] : memref<1x4x8x16x4xf32, #tpu.memory_space<vmem>>, vector<1x1x8x16x4xf32>
    %146 = vector.shape_cast %145 : vector<1x1x8x16x4xf32> to vector<8x16x4xf32>
    %147 = vector.shape_cast %144 : vector<8x16x4xf32> to vector<1x1x8x16x4xf32>
    tpu.vector_store %arg6[%c0_116, %c0_117, %c0_118, %c0_119, %c0_120], %147 {strides = array<i32>} : memref<1x4x8x16x4xf32, #tpu.memory_space<vmem>>, vector<1x1x8x16x4xf32>,
    %cst_121 = arith.constant 0.000000e+00 : f32
    %148 = vector.broadcast %cst_121 : f32 to vector<128x4xf32>
    %c0_122 = arith.constant 0 : index
    %c1_123 = arith.constant 1 : index
    %c0_124 = arith.constant 0 : index
    %149 = vector.load %arg8[%c0_122, %c1_123, %c0_124] : memref<10x18x8xbf16, #tpu.memory_space<vmem>>, vector<8x16x8xbf16>
    %150 = vector.shape_cast %149 : vector<8x16x8xbf16> to vector<128x8xbf16>
    %c1_125 = arith.constant 1 : index
    %c0_126 = arith.constant 0 : index
    %c0_127 = arith.constant 0 : index
    %c0_128 = arith.constant 0 : index
    %151 = vector.load %arg4[%c1_125, %c0_126, %c0_127, %c0_128] : memref<4x4x8x4xbf16, #tpu.memory_space<vmem>>, vector<1x1x8x4xbf16>
    %152 = vector.shape_cast %151 : vector<1x1x8x4xbf16> to vector<8x4xbf16>
    %cst_129 = arith.constant dense<0.000000e+00> : vector<128x4xf32>
    %153 = tpu.matmul %150, %152, %cst_129 {dimension_numbers = #tpu.dot_dimension_numbers<[1], [0], [0], [1], [0, 0, 1, 1], [], []>} : vector<128x8xbf16>, vector<8x4xbf16>, vector<128x4xf32> -> vector<128x4xf32>
    %154 = arith.addf %148, %153 : vector<128x4xf32>
    %c0_130 = arith.constant 0 : index
    %c2_131 = arith.constant 2 : index
    %c0_132 = arith.constant 0 : index
    %155 = vector.load %arg8[%c0_130, %c2_131, %c0_132] : memref<10x18x8xbf16, #tpu.memory_space<vmem>>, vector<8x16x8xbf16>
    %156 = vector.shape_cast %155 : vector<8x16x8xbf16> to vector<128x8xbf16>
    %c1_133 = arith.constant 1 : index
    %c1_134 = arith.constant 1 : index
    %c0_135 = arith.constant 0 : index
    %c0_136 = arith.constant 0 : index
    %157 = vector.load %arg4[%c1_133, %c1_134, %c0_135, %c0_136] : memref<4x4x8x4xbf16, #tpu.memory_space<vmem>>, vector<1x1x8x4xbf16>
    %158 = vector.shape_cast %157 : vector<1x1x8x4xbf16> to vector<8x4xbf16>
    %cst_137 = arith.constant dense<0.000000e+00> : vector<128x4xf32>
    %159 = tpu.matmul %156, %158, %cst_137 {dimension_numbers = #tpu.dot_dimension_numbers<[1], [0], [0], [1], [0, 0, 1, 1], [], []>} : vector<128x8xbf16>, vector<8x4xbf16>, vector<128x4xf32> -> vector<128x4xf32>
    %160 = arith.addf %154, %159 : vector<128x4xf32>
    %c1_138 = arith.constant 1 : index
    %c1_139 = arith.constant 1 : index
    %c0_140 = arith.constant 0 : index
    %161 = vector.load %arg8[%c1_138, %c1_139, %c0_140] : memref<10x18x8xbf16, #tpu.memory_space<vmem>>, vector<8x16x8xbf16>
    %162 = vector.shape_cast %161 : vector<8x16x8xbf16> to vector<128x8xbf16>
    %c1_141 = arith.constant 1 : index
    %c2_142 = arith.constant 2 : index
    %c0_143 = arith.constant 0 : index
    %c0_144 = arith.constant 0 : index
    %163 = vector.load %arg4[%c1_141, %c2_142, %c0_143, %c0_144] : memref<4x4x8x4xbf16, #tpu.memory_space<vmem>>, vector<1x1x8x4xbf16>
    %164 = vector.shape_cast %163 : vector<1x1x8x4xbf16> to vector<8x4xbf16>
    %cst_145 = arith.constant dense<0.000000e+00> : vector<128x4xf32>
    %165 = tpu.matmul %162, %164, %cst_145 {dimension_numbers = #tpu.dot_dimension_numbers<[1], [0], [0], [1], [0, 0, 1, 1], [], []>} : vector<128x8xbf16>, vector<8x4xbf16>, vector<128x4xf32> -> vector<128x4xf32>
    %166 = arith.addf %160, %165 : vector<128x4xf32>
    %c1_146 = arith.constant 1 : index
    %c2_147 = arith.constant 2 : index
    %c0_148 = arith.constant 0 : index
    %167 = vector.load %arg8[%c1_146, %c2_147, %c0_148] : memref<10x18x8xbf16, #tpu.memory_space<vmem>>, vector<8x16x8xbf16>
    %168 = vector.shape_cast %167 : vector<8x16x8xbf16> to vector<128x8xbf16>
    %c1_149 = arith.constant 1 : index
    %c3_150 = arith.constant 3 : index
    %c0_151 = arith.constant 0 : index
    %c0_152 = arith.constant 0 : index
    %169 = vector.load %arg4[%c1_149, %c3_150, %c0_151, %c0_152] : memref<4x4x8x4xbf16, #tpu.memory_space<vmem>>, vector<1x1x8x4xbf16>
    %170 = vector.shape_cast %169 : vector<1x1x8x4xbf16> to vector<8x4xbf16>
    %cst_153 = arith.constant dense<0.000000e+00> : vector<128x4xf32>
    %171 = tpu.matmul %168, %170, %cst_153 {dimension_numbers = #tpu.dot_dimension_numbers<[1], [0], [0], [1], [0, 0, 1, 1], [], []>} : vector<128x8xbf16>, vector<8x4xbf16>, vector<128x4xf32> -> vector<128x4xf32>
    %172 = arith.addf %166, %171 : vector<128x4xf32>
    %c0_154 = arith.constant 0 : index
    %c0_155 = arith.constant 0 : index
    %173 = vector.load %arg5[%c0_154, %c0_155] : memref<1x4xf32, #tpu.memory_space<vmem>>, vector<1x4xf32>
    %174 = vector.broadcast %173 : vector<1x4xf32> to vector<128x4xf32>
    %175 = arith.addf %172, %174 : vector<128x4xf32>
    %cst_156 = arith.constant 0.000000e+00 : f32
    %176 = vector.broadcast %cst_156 : f32 to vector<128x4xf32>
    %177 = arith.maximumf %175, %176 : vector<128x4xf32>
    %178 = vector.shape_cast %177 : vector<128x4xf32> to vector<8x16x4xf32>
    %c0_157 = arith.constant 0 : index
    %c1_158 = arith.constant 1 : index
    %c0_159 = arith.constant 0 : index
    %c0_160 = arith.constant 0 : index
    %c0_161 = arith.constant 0 : index
    %179 = vector.load %arg6[%c0_157, %c1_158, %c0_159, %c0_160, %c0_161] : memref<1x4x8x16x4xf32, #tpu.memory_space<vmem>>, vector<1x1x8x16x4xf32>
    %180 = vector.shape_cast %179 : vector<1x1x8x16x4xf32> to vector<8x16x4xf32>
    %181 = vector.shape_cast %178 : vector<8x16x4xf32> to vector<1x1x8x16x4xf32>
    tpu.vector_store %arg6[%c0_157, %c1_158, %c0_159, %c0_160, %c0_161], %181 {strides = array<i32>} : memref<1x4x8x16x4xf32, #tpu.memory_space<vmem>>, vector<1x1x8x16x4xf32>,
    %cst_162 = arith.constant 0.000000e+00 : f32
    %182 = vector.broadcast %cst_162 : f32 to vector<128x4xf32>
    %c1_163 = arith.constant 1 : index
    %c0_164 = arith.constant 0 : index
    %c0_165 = arith.constant 0 : index
    %183 = vector.load %arg8[%c1_163, %c0_164, %c0_165] : memref<10x18x8xbf16, #tpu.memory_space<vmem>>, vector<8x16x8xbf16>
    %184 = vector.shape_cast %183 : vector<8x16x8xbf16> to vector<128x8xbf16>
    %c2_166 = arith.constant 2 : index
    %c0_167 = arith.constant 0 : index
    %c0_168 = arith.constant 0 : index
    %c0_169 = arith.constant 0 : index
    %185 = vector.load %arg4[%c2_166, %c0_167, %c0_168, %c0_169] : memref<4x4x8x4xbf16, #tpu.memory_space<vmem>>, vector<1x1x8x4xbf16>
    %186 = vector.shape_cast %185 : vector<1x1x8x4xbf16> to vector<8x4xbf16>
    %cst_170 = arith.constant dense<0.000000e+00> : vector<128x4xf32>
    %187 = tpu.matmul %184, %186, %cst_170 {dimension_numbers = #tpu.dot_dimension_numbers<[1], [0], [0], [1], [0, 0, 1, 1], [], []>} : vector<128x8xbf16>, vector<8x4xbf16>, vector<128x4xf32> -> vector<128x4xf32>
    %188 = arith.addf %182, %187 : vector<128x4xf32>
    %c1_171 = arith.constant 1 : index
    %c1_172 = arith.constant 1 : index
    %c0_173 = arith.constant 0 : index
    %189 = vector.load %arg8[%c1_171, %c1_172, %c0_173] : memref<10x18x8xbf16, #tpu.memory_space<vmem>>, vector<8x16x8xbf16>
    %190 = vector.shape_cast %189 : vector<8x16x8xbf16> to vector<128x8xbf16>
    %c2_174 = arith.constant 2 : index
    %c1_175 = arith.constant 1 : index
    %c0_176 = arith.constant 0 : index
    %c0_177 = arith.constant 0 : index
    %191 = vector.load %arg4[%c2_174, %c1_175, %c0_176, %c0_177] : memref<4x4x8x4xbf16, #tpu.memory_space<vmem>>, vector<1x1x8x4xbf16>
    %192 = vector.shape_cast %191 : vector<1x1x8x4xbf16> to vector<8x4xbf16>
    %cst_178 = arith.constant dense<0.000000e+00> : vector<128x4xf32>
    %193 = tpu.matmul %190, %192, %cst_178 {dimension_numbers = #tpu.dot_dimension_numbers<[1], [0], [0], [1], [0, 0, 1, 1], [], []>} : vector<128x8xbf16>, vector<8x4xbf16>, vector<128x4xf32> -> vector<128x4xf32>
    %194 = arith.addf %188, %193 : vector<128x4xf32>
    %c2_179 = arith.constant 2 : index
    %c0_180 = arith.constant 0 : index
    %c0_181 = arith.constant 0 : index
    %195 = vector.load %arg8[%c2_179, %c0_180, %c0_181] : memref<10x18x8xbf16, #tpu.memory_space<vmem>>, vector<8x16x8xbf16>
    %196 = vector.shape_cast %195 : vector<8x16x8xbf16> to vector<128x8xbf16>
    %c2_182 = arith.constant 2 : index
    %c2_183 = arith.constant 2 : index
    %c0_184 = arith.constant 0 : index
    %c0_185 = arith.constant 0 : index
    %197 = vector.load %arg4[%c2_182, %c2_183, %c0_184, %c0_185] : memref<4x4x8x4xbf16, #tpu.memory_space<vmem>>, vector<1x1x8x4xbf16>
    %198 = vector.shape_cast %197 : vector<1x1x8x4xbf16> to vector<8x4xbf16>
    %cst_186 = arith.constant dense<0.000000e+00> : vector<128x4xf32>
    %199 = tpu.matmul %196, %198, %cst_186 {dimension_numbers = #tpu.dot_dimension_numbers<[1], [0], [0], [1], [0, 0, 1, 1], [], []>} : vector<128x8xbf16>, vector<8x4xbf16>, vector<128x4xf32> -> vector<128x4xf32>
    %200 = arith.addf %194, %199 : vector<128x4xf32>
    %c2_187 = arith.constant 2 : index
    %c1_188 = arith.constant 1 : index
    %c0_189 = arith.constant 0 : index
    %201 = vector.load %arg8[%c2_187, %c1_188, %c0_189] : memref<10x18x8xbf16, #tpu.memory_space<vmem>>, vector<8x16x8xbf16>
    %202 = vector.shape_cast %201 : vector<8x16x8xbf16> to vector<128x8xbf16>
    %c2_190 = arith.constant 2 : index
    %c3_191 = arith.constant 3 : index
    %c0_192 = arith.constant 0 : index
    %c0_193 = arith.constant 0 : index
    %203 = vector.load %arg4[%c2_190, %c3_191, %c0_192, %c0_193] : memref<4x4x8x4xbf16, #tpu.memory_space<vmem>>, vector<1x1x8x4xbf16>
    %204 = vector.shape_cast %203 : vector<1x1x8x4xbf16> to vector<8x4xbf16>
    %cst_194 = arith.constant dense<0.000000e+00> : vector<128x4xf32>
    %205 = tpu.matmul %202, %204, %cst_194 {dimension_numbers = #tpu.dot_dimension_numbers<[1], [0], [0], [1], [0, 0, 1, 1], [], []>} : vector<128x8xbf16>, vector<8x4xbf16>, vector<128x4xf32> -> vector<128x4xf32>
    %206 = arith.addf %200, %205 : vector<128x4xf32>
    %c0_195 = arith.constant 0 : index
    %c0_196 = arith.constant 0 : index
    %207 = vector.load %arg5[%c0_195, %c0_196] : memref<1x4xf32, #tpu.memory_space<vmem>>, vector<1x4xf32>
    %208 = vector.broadcast %207 : vector<1x4xf32> to vector<128x4xf32>
    %209 = arith.addf %206, %208 : vector<128x4xf32>
    %cst_197 = arith.constant 0.000000e+00 : f32
    %210 = vector.broadcast %cst_197 : f32 to vector<128x4xf32>
    %211 = arith.maximumf %209, %210 : vector<128x4xf32>
    %212 = vector.shape_cast %211 : vector<128x4xf32> to vector<8x16x4xf32>
    %c0_198 = arith.constant 0 : index
    %c2_199 = arith.constant 2 : index
    %c0_200 = arith.constant 0 : index
    %c0_201 = arith.constant 0 : index
    %c0_202 = arith.constant 0 : index
    %213 = vector.load %arg6[%c0_198, %c2_199, %c0_200, %c0_201, %c0_202] : memref<1x4x8x16x4xf32, #tpu.memory_space<vmem>>, vector<1x1x8x16x4xf32>
    %214 = vector.shape_cast %213 : vector<1x1x8x16x4xf32> to vector<8x16x4xf32>
    %215 = vector.shape_cast %212 : vector<8x16x4xf32> to vector<1x1x8x16x4xf32>
    tpu.vector_store %arg6[%c0_198, %c2_199, %c0_200, %c0_201, %c0_202], %215 {strides = array<i32>} : memref<1x4x8x16x4xf32, #tpu.memory_space<vmem>>, vector<1x1x8x16x4xf32>,
    %cst_203 = arith.constant 0.000000e+00 : f32
    %216 = vector.broadcast %cst_203 : f32 to vector<128x4xf32>
    %c1_204 = arith.constant 1 : index
    %c1_205 = arith.constant 1 : index
    %c0_206 = arith.constant 0 : index
    %217 = vector.load %arg8[%c1_204, %c1_205, %c0_206] : memref<10x18x8xbf16, #tpu.memory_space<vmem>>, vector<8x16x8xbf16>
    %218 = vector.shape_cast %217 : vector<8x16x8xbf16> to vector<128x8xbf16>
    %c3_207 = arith.constant 3 : index
    %c0_208 = arith.constant 0 : index
    %c0_209 = arith.constant 0 : index
    %c0_210 = arith.constant 0 : index
    %219 = vector.load %arg4[%c3_207, %c0_208, %c0_209, %c0_210] : memref<4x4x8x4xbf16, #tpu.memory_space<vmem>>, vector<1x1x8x4xbf16>
    %220 = vector.shape_cast %219 : vector<1x1x8x4xbf16> to vector<8x4xbf16>
    %cst_211 = arith.constant dense<0.000000e+00> : vector<128x4xf32>
    %221 = tpu.matmul %218, %220, %cst_211 {dimension_numbers = #tpu.dot_dimension_numbers<[1], [0], [0], [1], [0, 0, 1, 1], [], []>} : vector<128x8xbf16>, vector<8x4xbf16>, vector<128x4xf32> -> vector<128x4xf32>
    %222 = arith.addf %216, %221 : vector<128x4xf32>
    %c1_212 = arith.constant 1 : index
    %c2_213 = arith.constant 2 : index
    %c0_214 = arith.constant 0 : index
    %223 = vector.load %arg8[%c1_212, %c2_213, %c0_214] : memref<10x18x8xbf16, #tpu.memory_space<vmem>>, vector<8x16x8xbf16>
    %224 = vector.shape_cast %223 : vector<8x16x8xbf16> to vector<128x8xbf16>
    %c3_215 = arith.constant 3 : index
    %c1_216 = arith.constant 1 : index
    %c0_217 = arith.constant 0 : index
    %c0_218 = arith.constant 0 : index
    %225 = vector.load %arg4[%c3_215, %c1_216, %c0_217, %c0_218] : memref<4x4x8x4xbf16, #tpu.memory_space<vmem>>, vector<1x1x8x4xbf16>
    %226 = vector.shape_cast %225 : vector<1x1x8x4xbf16> to vector<8x4xbf16>
    %cst_219 = arith.constant dense<0.000000e+00> : vector<128x4xf32>
    %227 = tpu.matmul %224, %226, %cst_219 {dimension_numbers = #tpu.dot_dimension_numbers<[1], [0], [0], [1], [0, 0, 1, 1], [], []>} : vector<128x8xbf16>, vector<8x4xbf16>, vector<128x4xf32> -> vector<128x4xf32>
    %228 = arith.addf %222, %227 : vector<128x4xf32>
    %c2_220 = arith.constant 2 : index
    %c1_221 = arith.constant 1 : index
    %c0_222 = arith.constant 0 : index
    %229 = vector.load %arg8[%c2_220, %c1_221, %c0_222] : memref<10x18x8xbf16, #tpu.memory_space<vmem>>, vector<8x16x8xbf16>
    %230 = vector.shape_cast %229 : vector<8x16x8xbf16> to vector<128x8xbf16>
    %c3_223 = arith.constant 3 : index
    %c2_224 = arith.constant 2 : index
    %c0_225 = arith.constant 0 : index
    %c0_226 = arith.constant 0 : index
    %231 = vector.load %arg4[%c3_223, %c2_224, %c0_225, %c0_226] : memref<4x4x8x4xbf16, #tpu.memory_space<vmem>>, vector<1x1x8x4xbf16>
    %232 = vector.shape_cast %231 : vector<1x1x8x4xbf16> to vector<8x4xbf16>
    %cst_227 = arith.constant dense<0.000000e+00> : vector<128x4xf32>
    %233 = tpu.matmul %230, %232, %cst_227 {dimension_numbers = #tpu.dot_dimension_numbers<[1], [0], [0], [1], [0, 0, 1, 1], [], []>} : vector<128x8xbf16>, vector<8x4xbf16>, vector<128x4xf32> -> vector<128x4xf32>
    %234 = arith.addf %228, %233 : vector<128x4xf32>
    %c2_228 = arith.constant 2 : index
    %c2_229 = arith.constant 2 : index
    %c0_230 = arith.constant 0 : index
    %235 = vector.load %arg8[%c2_228, %c2_229, %c0_230] : memref<10x18x8xbf16, #tpu.memory_space<vmem>>, vector<8x16x8xbf16>
    %236 = vector.shape_cast %235 : vector<8x16x8xbf16> to vector<128x8xbf16>
    %c3_231 = arith.constant 3 : index
    %c3_232 = arith.constant 3 : index
    %c0_233 = arith.constant 0 : index
    %c0_234 = arith.constant 0 : index
    %237 = vector.load %arg4[%c3_231, %c3_232, %c0_233, %c0_234] : memref<4x4x8x4xbf16, #tpu.memory_space<vmem>>, vector<1x1x8x4xbf16>
    %238 = vector.shape_cast %237 : vector<1x1x8x4xbf16> to vector<8x4xbf16>
    %cst_235 = arith.constant dense<0.000000e+00> : vector<128x4xf32>
    %239 = tpu.matmul %236, %238, %cst_235 {dimension_numbers = #tpu.dot_dimension_numbers<[1], [0], [0], [1], [0, 0, 1, 1], [], []>} : vector<128x8xbf16>, vector<8x4xbf16>, vector<128x4xf32> -> vector<128x4xf32>
    %240 = arith.addf %234, %239 : vector<128x4xf32>
    %c0_236 = arith.constant 0 : index
    %c0_237 = arith.constant 0 : index
    %241 = vector.load %arg5[%c0_236, %c0_237] : memref<1x4xf32, #tpu.memory_space<vmem>>, vector<1x4xf32>
    %242 = vector.broadcast %241 : vector<1x4xf32> to vector<128x4xf32>
    %243 = arith.addf %240, %242 : vector<128x4xf32>
    %cst_238 = arith.constant 0.000000e+00 : f32
    %244 = vector.broadcast %cst_238 : f32 to vector<128x4xf32>
    %245 = arith.maximumf %243, %244 : vector<128x4xf32>
    %246 = vector.shape_cast %245 : vector<128x4xf32> to vector<8x16x4xf32>
    %c0_239 = arith.constant 0 : index
    %c3_240 = arith.constant 3 : index
    %c0_241 = arith.constant 0 : index
    %c0_242 = arith.constant 0 : index
    %c0_243 = arith.constant 0 : index
    %247 = vector.load %arg6[%c0_239, %c3_240, %c0_241, %c0_242, %c0_243] : memref<1x4x8x16x4xf32, #tpu.memory_space<vmem>>, vector<1x1x8x16x4xf32>
    %248 = vector.shape_cast %247 : vector<1x1x8x16x4xf32> to vector<8x16x4xf32>
    %249 = vector.shape_cast %246 : vector<8x16x4xf32> to vector<1x1x8x16x4xf32>
    tpu.vector_store %arg6[%c0_239, %c3_240, %c0_241, %c0_242, %c0_243], %249 {strides = array<i32>} : memref<1x4x8x16x4xf32, #tpu.memory_space<vmem>>, vector<1x1x8x16x4xf32>,
    return
  }
  func.func @transform_0(%arg0: i32) -> (i32, i32, i32, i32) {
    %c0_i32 = arith.constant 0 : i32
    %c0_i32_0 = arith.constant 0 : i32
    %c0_i32_1 = arith.constant 0 : i32
    %c0_i32_2 = arith.constant 0 : i32
    return %arg0, %c0_i32, %c0_i32_0, %c0_i32_1 : i32, i32, i32, i32
  }
  func.func @transform_1(%arg0: i32) -> (i32, i32, i32) {
    %c0_i32 = arith.constant 0 : i32
    %c0_i32_0 = arith.constant 0 : i32
    %c0_i32_1 = arith.constant 0 : i32
    %c0_i32_2 = arith.constant 0 : i32
    return %c0_i32, %c0_i32_0, %c0_i32_1 : i32, i32, i32
  }
  func.func @transform_2(%arg0: i32) -> (i32, i32) {
    %c0_i32 = arith.constant 0 : i32
    %c0_i32_0 = arith.constant 0 : i32
    %c0_i32_1 = arith.constant 0 : i32
    return %c0_i32, %c0_i32_0 : i32, i32
  }
  func.func @transform_3(%arg0: i32) -> (i32, i32, i32, i32) {
    %c0_i32 = arith.constant 0 : i32
    %c0_i32_0 = arith.constant 0 : i32
    %c0_i32_1 = arith.constant 0 : i32
    %c0_i32_2 = arith.constant 0 : i32
    %c0_i32_3 = arith.constant 0 : i32
    return %c0_i32, %c0_i32_0, %c0_i32_1, %c0_i32_2 : i32, i32, i32, i32
  }
  func.func @transform_4(%arg0: i32) -> (i32, i32) {
    %c0_i32 = arith.constant 0 : i32
    %c0_i32_0 = arith.constant 0 : i32
    %c0_i32_1 = arith.constant 0 : i32
    return %c0_i32, %c0_i32_0 : i32, i32
  }
  func.func @transform_5(%arg0: i32) -> (i32, i32, i32, i32, i32) {
    %c0_i32 = arith.constant 0 : i32
    %c0_i32_0 = arith.constant 0 : i32
    %c0_i32_1 = arith.constant 0 : i32
    %c0_i32_2 = arith.constant 0 : i32
    %c0_i32_3 = arith.constant 0 : i32
    return %arg0, %c0_i32, %c0_i32_0, %c0_i32_1, %c0_i32_2 : i32, i32, i32, i32, i32
  }
}

</mosaic_0001>

<bundles_post_ra>
// kernel: decoder_block_v2_forward.1
= control target key start
LH: loop header
LB: loop body
LE: loop exit
PB: predicated region body
PF: predicated region fallthrough
CT: control target
= control target key end

     0   :  { %s15471_s18 = smov 0   ;;  %s20580_s0 = inlined_call_operand.vmem [shape: bf16[4,12,20,4], index: 0, kind: input, shape index: {}]   ;;  %s20581_s1 = inlined_call_operand.vmem [shape: bf16[9,4,8], index: 1, kind: input, shape index: {}]   ;;  %s20582_s2 = inlined_call_operand.vmem [shape: f32[1,8], index: 2, kind: input, shape index: {}]   ;;  %s20583_s3 = inlined_call_operand.vmem [shape: bf16[4,4,8,4], index: 3, kind: input, shape index: {}]   ;;  %s20584_s4 = inlined_call_operand.vmem [shape: f32[1,4], index: 4, kind: input, shape index: {}]   ;;  %s20585_s5 = inlined_call_operand.vmem [shape: f32[4,4,8,16,4], index: 5, kind: output, shape index: {}]  }
   0x1 LB: > { %s15477_s19 = sadd.s32 4294967295, %s15437_s18   ;;  %p13675_p0 = scmp.ge.s32.totalorder %s15437_s18, 1  ;;  %s15437_s18 = sphi %s15471_s18, %s15_s18  }
   0x2   : > { %p187_p1 = scmp.lt.s32.totalorder %s15437_s18, 5 }
   0x4   : > { %p188_p2 = pnand %p13675_p0, %p187_p1 }
   0x6   : > { %191 = sbr.rel (%p188_p2) target bundleno = 1251 (0x4e3), region = 40 }
   0xd   : > { %v924_v0 = vld [vmem:[%s20581_s1] sm:$0x3]  ;;  %vm1516_vm0 = vcmask 1041408   ;;  %p215_p3 = scmp.lt.s32.totalorder %s15477_s19, 3  ;;  %v315_v1 = vlaneseq  ;;  %v15439_v3 = vmov 1966171168  }
   0xe   : > { %15363 = vmatprep.subr.msk.bf16.mxu1 %vm1516_vm0, %v924_v0  ;;  %v1518_v2 = vsel %vm1516_vm0, %v924_v0, 0  ;;  %v313_v4 = vunpack.c.l.s4 %v15439_v3  ;;  %v13824_v5 = vld [vmem:[%s20581_s1 + $0x2] sm:$0x3]  ;;  %15362 = vmatprep.subr.msk.bf16.mxu0 %vm1516_vm0, %v924_v0  ;;  %v13837_v6 = vld [vmem:[%s20581_s1 + $0x4] sm:$0x3]  ;;  %vm1479_vm1 = vcmask 31744  }
   0xf   : > { %15169 = vmatpush3.bf16.msra.mxu1 %v1518_v2  ;;  %s15495_s26 = scalar_select %p215_p3, %s15477_s19, 3  ;;  %v15497_v7 = vshrl.u32 %v315_v1, 7  ;;  %14647 = vmatpush3.bf16.msra.mxu0 %v1518_v2  ;;  %v15547_v26 = vld [vmem:[%s20581_s1 + $0x6] sm:$0x3]  ;;  %v15567_v33 = vld [vmem:[%s20581_s1 + $0x8] sm:$0x3] }
  0x10   : > { %v314_v8 = vunpack.c.0.s8 %v313_v4  ;;  %15364 = vmatprep.subr.msk.bf16.mxu1 %vm1516_vm0, %v13824_v5  ;;  %15365 = vmatprep.subr.msk.bf16.mxu0 %vm1516_vm0, %v13837_v6  ;;  %v15572_v35 = vsel %vm1516_vm0, %v13824_v5, 0  ;;  %v15575_v36 = vsel %vm1516_vm0, %v13837_v6, 0  ;;  %v15579_v37 = vsel %vm1516_vm0, %v15547_v26, 0  ;;  %s227_s24 = ssub.s32 0, %s15477_s19  ;;  %p226_p4 = scmp.lt.s32.totalorder %s15477_s19, 0 }
  0x11   : > { %20887 = vst [vmem:[#allocation4_spill] sm:$0xff] %v15497_v7  ;;  %s15388_s27 = smul.u32 144, %s15495_s26  ;;  %v15605_v47 = vsel %vm1516_vm0, %v15567_v33, 0  ;;  %vm1753_vm2 = vsmask.f32 256  ;;  %s18671_s25 = smin.u32 %s15477_s19, %s227_s24 }
  0x12   : > { %v15503_v9 = vsub.s32 %v314_v8, %v15497_v7  ;;  %vm1754_vm3 = vsmask.f32 1284  ;;  %vm1756_vm4 = vsmask.f32 2312  ;;  %vm1758_vm5 = vsmask.f32 3340 }
  0x13   : > { %s15508_s30 = scalar_lea.vmem %s20580_s0, %s15388_s27  ;;  %vm1760_vm6 = vsmask.f32 4368  ;;  %vm15966_vm7 = vmor %vm1753_vm2, %vm1754_vm3  ;;  %vm1762_vm8 = vsmask.f32 5396  ;;  %vm1764_vm10 = vsmask.f32 6424 }
  0x14   : > { %v13697_v10 = vld.sshfl [vmem:[%s15508_s30 + $0x3c] sm:$0x33 pattern:$0x75316420]  ;;  %vm16001_vm9 = vmor %vm15966_vm7, %vm1756_vm4  ;;  %vm1766_vm12 = vsmask.f32 7452 }
  0x15   : > { %v13698_v11 = vld.sshfl [vmem:[%s15508_s30 + $0x40] sm:$0x33 pattern:$0x75316420]  ;;  %v621_v12 = vcombine.high %v13697_v10, %v13697_v10  ;;  %v15513_v13 = vrot.slane %v13697_v10, %v15503_v9  ;;  %vm16045_vm11 = vmor %vm16001_vm9, %vm1758_vm5  ;;  %vm1671_vm3 = vcmask 60416   ;;  %vm8951_vm4 = vcmask 1043456  }
  0x16   : > { %v15516_v14 = vld.sshfl [vmem:[%s15508_s30 + $0x44] sm:$0x11 pattern:$0x75316420]  ;;  %v645_v15 = vcombine.high %v13698_v11, %v13698_v11  ;;  %v15519_v16 = vrot.slane %v13698_v11, %v15503_v9  ;;  %vm16084_vm13 = vmor %vm16045_vm11, %vm1760_vm6  ;;  %s229_s27 = sand.u32 1, %s18671_s25   ;;  %vm8652_vm7 = vcmask 57344  }
  0x17   : > { %20888 = vst [vmem:[#allocation5_spill] sm:$0xff] %v15513_v13  ;;  %20889 = vst [vmem:[#allocation6_spill] sm:$0xff] %v15516_v14  ;;  %v13700_v17 = vld.sshfl [vmem:[%s15508_s30 + $0x48] sm:$0x33 pattern:$0x75316420]  ;;  %v15523_v18 = vrot.slane %v621_v12, %v15503_v9  ;;  %v15527_v19 = vcombine.high %v15513_v13, %v15513_v13  ;;  %v15531_v20 = vrot.slane %v15516_v14, %v15503_v9 }
  0x18   : > { %20890 = vst [vmem:[#allocation7_spill] sm:$0xff] %v15519_v16  ;;  %v15534_v21 = vrot.slane %v645_v15, %v15503_v9  ;;  %v15538_v22 = vcombine.high %v15519_v16, %v15519_v16  ;;  %v683_v23 = vcombine.high %v13700_v17, %v13700_v17  ;;  %v15541_v24 = vrot.slane %v13700_v17, %v15503_v9  ;;  %v13701_v25 = vld.sshfl [vmem:[%s15508_s30 + $0x4c] sm:$0x33 pattern:$0x75316420]  ;;  %vm1763_vm14 = vmor %vm16084_vm13, %vm1762_vm8  ;;  %s230_s28 = ssub.s32 0, %s229_s27 }
  0x19   : > { %20891 = vst [vmem:[#allocation8_spill] sm:$0xff] %v15523_v18  ;;  %20892 = vst [vmem:[#allocation9_spill] sm:$0xff] %v15527_v19  ;;  %v15551_v27 = vcombine.high %v15523_v18, %v15523_v18  ;;  %v1173_v28 = vcombine.low %v15523_v18, %v15527_v19  ;;  %v707_v32 = vcombine.high %v13701_v25, %v13701_v25  ;;  %v13702_v42 = vld.sshfl [vmem:[%s15508_s30 + $0x50] sm:$0x11 pattern:$0x75316420]  ;;  %s21452_s28 = smov (!%p226_p4, %s230_s28), %s229_s27 }
  0x1a   : > { %20893 = vst [vmem:[#allocation10_spill] sm:$0xff] %v15531_v20  ;;  %20894 = vst [vmem:[#allocation11_spill] sm:$0xff] %v15534_v21  ;;  %v15557_v29 = vcombine.high %v15534_v21, %v15534_v21  ;;  %v15560_v30 = vrot.slane %v683_v23, %v15503_v9  ;;  %v1220_v31 = vcombine.low %v15534_v21, %v15538_v22  ;;  %v15598_v45 = vld.sshfl [vmem:[%s15508_s30 + $0x54] sm:$0x33 pattern:$0x75316420] }
  0x1b   : > { %20895 = vst [vmem:[#allocation12_spill] sm:$0xff] %v15538_v22  ;;  %20896 = vst [vmem:[#allocation13_spill] sm:$0xff] %v15541_v24  ;;  %v1219_v34 = vcombine.low %v15551_v27, %v15519_v16  ;;  %v15592_v43 = vrot.slane %v1173_v28, %v15503_v9  ;;  %v15601_v46 = vrot.slane %v13701_v25, %v15503_v9  ;;  %v13682_v56 = vld.sshfl [vmem:[%s15508_s30] sm:$0x33 pattern:$0x75316420] }
  0x1c   : > { %20897 = vst [vmem:[#allocation14_spill] sm:$0xff] %v15551_v27  ;;  %20898 = vst [vmem:[#allocation15_spill] sm:$0xff] %v15560_v30  ;;  %v1221_v38 = vcombine.low %v15557_v29, %v15531_v20  ;;  %v1222_v39 = vcombine.low %v15541_v24, %v15560_v30  ;;  %v15586_v40 = vrot.slane %v1220_v31, %v15503_v9  ;;  %v13683_v61 = vld.sshfl [vmem:[%s15508_s30 + $0x4] sm:$0x33 pattern:$0x75316420] }
  0x1d   : > { %v13718_v41 = vcombine.high %v15541_v24, %v15560_v30  ;;  %20900 = vst [vmem:[#allocation17_spill] sm:$0xff] %v15592_v43  ;;  %v15595_v44 = vrot.slane %v1219_v34, %v15503_v9  ;;  %20902 = vst [vmem:[#allocation19_spill] sm:$0xff] %v15601_v46  ;;  %v15615_v51 = vrot.slane %v707_v32, %v15503_v9  ;;  %v15646_v2 = vld.sshfl [vmem:[%s15508_s30 + $0x8] sm:$0x11 pattern:$0x75316420] }
  0x1e   : > { %20899 = vst [vmem:[#allocation16_spill] sm:$0xff] %v15586_v40  ;;  %v15608_v48 = vrot.slane %v1221_v38, %v15503_v9  ;;  %v15611_v49 = vrot.slane %v1222_v39, %v15503_v9  ;;  %v15623_v55 = vrot.slane %v13702_v42, %v15503_v9  ;;  %v15635_v60 = vrot.slane %v15598_v45, %v15503_v9  ;;  %v13685_v8 = vld.sshfl [vmem:[%s15508_s30 + $0xc] sm:$0x33 pattern:$0x75316420]  ;;  %vm1765_vm15 = vmor %vm1763_vm14, %vm1764_vm10  ;;  %p13681_p5 = scmp.lt.s32.totalorder %s21452_s28, 0 }
  0x1f   : > { %20901 = vst [vmem:[#allocation18_spill] sm:$0xff] %v15595_v44  ;;  %20905 = vst [vmem:[#allocation22_spill] sm:$0xff] %v15615_v51  ;;  %v1251_v52 = vcombine.low %v15595_v44, %v15586_v40  ;;  %v15629_v58 = vrot.slane %v13718_v41, %v15503_v9  ;;  %v745_v63 = vcombine.high %v15598_v45, %v15598_v45  ;;  %v13686_v17 = vld.sshfl [vmem:[%s15508_s30 + $0x10] sm:$0x33 pattern:$0x75316420] }
  0x20   : > { %20903 = vst [vmem:[#allocation20_spill] sm:$0xff] %v15608_v48  ;;  %20904 = vst [vmem:[#allocation21_spill] sm:$0xff] %v15611_v49  ;;  %v1252_v57 = vcombine.low %v15608_v48, %v15611_v49  ;;  %v1269_v0 = vcombine.low %v15601_v46, %v15615_v51  ;;  %v13719_v1 = vcombine.high %v15601_v46, %v15615_v51  ;;  %v13706_v54 = vld.sshfl [vmem:[%s15508_s30 + $0x60] sm:$0x33 pattern:$0x75316420] }
  0x21   : > { %20906 = vst [vmem:[#allocation23_spill] sm:$0xff] %v15623_v55  ;;  %20907 = vst [vmem:[#allocation24_spill] sm:$0xff] %v15629_v58  ;;  %v1259_v62 = vrot.slane %v1251_v52, %v15503_v9  ;;  %v1271_v4 = vcombine.low %v15623_v55, %v15635_v60  ;;  %v311_v5 = vcombine.high %v13682_v56, %v13682_v56  ;;  %v13689_v49 = vld.sshfl [vmem:[%s15508_s30 + $0x1c] sm:$0x33 pattern:$0x75316420] }
  0x22   : > { %20908 = vst [vmem:[#allocation25_spill] sm:$0xff] %v15635_v60  ;;  %v1266_v3 = vrot.slane %v1252_v57, %v15503_v9  ;;  %v15652_v6 = vrot.slane %v13682_v56, %v15503_v9  ;;  %v15656_v10 = vrot.slane %v1269_v0, %v15503_v9  ;;  %v15659_v11 = vrot.slane %v13719_v1, %v15503_v9  ;;  %v13711_v51 = vld.sshfl [vmem:[%s15508_s30 + $0x74] sm:$0x11 pattern:$0x75316420]  ;;  %vm16182_vm2 = vmor %vm1765_vm15, %vm1766_vm12  ;;  %s236_s19 = sadd.s32 2, %s21452_s28 }
  0x23   : > { %v335_v12 = vcombine.high %v13683_v61, %v13683_v61  ;;  %v15662_v15 = vrot.slane %v13683_v61, %v15503_v9  ;;  %v15666_v25 = vrot.slane %v1271_v4, %v15503_v9  ;;  %v15669_v28 = vrot.slane %v311_v5, %v15503_v9  ;;  %v13695_v30 = vld.sshfl [vmem:[%s15508_s30 + $0x34] sm:$0x33 pattern:$0x75316420]  ;;  %s21454_s19 = smov (!%p13681_p5, %s236_s19), %s21452_s28  ;;  %s14354_s15 = sshll.u32 %s15495_s26, 9 }
  0x24   : > { %20909 = vst [vmem:[#allocation26_spill] sm:$0xff] %v15656_v10  ;;  %20910 = vst [vmem:[#allocation27_spill] sm:$0xff] %v15659_v11  ;;  %v1267_v23 = vcombine.low %v1259_v62, %v1266_v3  ;;  %v15673_v31 = vrot.slane %v15646_v2, %v15503_v9  ;;  %v1300_v32 = vcombine.low %v15629_v58, %v15656_v10  ;;  %p8012_p6 = scmp.gt.s32.totalorder %s21454_s19, 0  ;;  %p8022_p7 = scmp.lt.s32.totalorder %s21454_s19, 1  ;;  %vm10102_vm11 = vcmask 1042432  }
  0x25   : > { %20911 = vst [vmem:[#allocation28_spill] sm:$0xff] %v15666_v25  ;;  %v15678_v34 = vrot.slane %v335_v12, %v15503_v9  ;;  %v373_v38 = vcombine.high %v13685_v8, %v13685_v8  ;;  %v15681_v39 = vrot.slane %v13685_v8, %v15503_v9  ;;  %v1301_v41 = vcombine.low %v15659_v11, %v15666_v25  ;;  %s20384_s20 = scalar_lea.vmem %s20585_s5, %s14354_s15 }
  0x26   : > { %14660 = vmatprep.mubr.msk.bf16.mxu1 %vm1479_vm1, %v1267_v23  ;;  %v925_v42 = vcombine.low %v15652_v6, %v15669_v28  ;;  %v13712_v45 = vcombine.high %v15652_v6, %v15669_v28  ;;  %v397_v52 = vcombine.high %v13686_v17, %v13686_v17  ;;  %v1308_v56 = vrot.slane %v1300_v32, %v15503_v9  ;;  %s18723_s8 = scalar_select %p8012_p6, 1, 0 }
  0x27   : > { %v927_v57 = vcombine.low %v15662_v15, %v15678_v34  ;;  %v13713_v61 = vcombine.high %v15662_v15, %v15678_v34  ;;  %v15696_v62 = vrot.slane %v373_v38, %v15503_v9  ;;  %v1315_v0 = vrot.slane %v1301_v41, %v15503_v9  ;;  %s18741_s11 = scalar_select %p8022_p7, 1, 0 }
  0x28   : > { %v935_v1 = vrot.slane %v925_v42, %v15503_v9  ;;  %v942_v3 = vrot.slane %v13712_v45, %v15503_v9  ;;  %v15703_v4 = vcombine.high %v15681_v39, %v15681_v39  ;;  %v15712_v23 = vrot.slane %v13686_v17, %v15503_v9 }
  0x29   : > { %v949_v5 = vrot.slane %v927_v57, %v15503_v9  ;;  %v956_v8 = vrot.slane %v13713_v61, %v15503_v9  ;;  %v15709_v12 = vcombine.high %v15696_v62, %v15696_v62  ;;  %v1316_v32 = vcombine.low %v1308_v56, %v1315_v0 }
  0x2a   : > { %v957_v38 = vcombine.low %v935_v1, %v942_v3  ;;  %v15715_v41 = vrot.slane %v397_v52, %v15503_v9  ;;  %v974_v42 = vcombine.low %v15673_v31, %v15681_v39  ;;  %v15721_v57 = vcombine.high %v15712_v23, %v15712_v23 }
  0x2b   : > { %v958_v45 = vcombine.low %v949_v5, %v956_v8  ;;  %v975_v61 = vcombine.low %v15696_v62, %v15703_v4  ;;  %v976_v17 = vcombine.low %v15709_v12, %v15712_v23  ;;  %v15728_v56 = vrot.slane %v745_v63, %v15503_v9  ;;  %14661 = vmatmul.mubr.msk.bf16.vlgmr.msra.gmra.mrb[0].mxu1 %vm1479_vm1, %v1316_v32  ;;  %v13704_v32 = vld.sshfl [vmem:[%s15508_s30 + $0x58] sm:$0x33 pattern:$0x75316420] }
  0x2c   : > { %v965_v52 = vrot.slane %v957_v38, %v15503_v9  ;;  %v984_v0 = vrot.slane %v974_v42, %v15503_v9  ;;  %v1673_v1 = vcombine.high %v15646_v2, %v15646_v2  ;;  %14673 = vmatpush3.bf16.msra.mxu1 %v15572_v35  ;;  %v977_v5 = vcombine.low %v15715_v41, %v15721_v57  ;;  %v13705_v35 = vld.sshfl [vmem:[%s15508_s30 + $0x5c] sm:$0x11 pattern:$0x75316420] }
  0x2d   : > { %20912 = vst [vmem:[#allocation29_spill] sm:$0xff] %v15728_v56  ;;  %v972_v3 = vrot.slane %v958_v45, %v15503_v9  ;;  %v15740_v63 = vrot.slane %v975_v61, %v15503_v9  ;;  %v15743_v8 = vrot.slane %v976_v17, %v15503_v9  ;;  %15366 = vmatprep.subr.msk.bf16.mxu1 %vm1516_vm0, %v15547_v26  ;;  %v1777_v19 = vshrl.u32 %v15669_v28, 16 }
  0x2e   : > { %v15754_v61 = vrot.slane %v977_v5, %v15503_v9  ;;  %v15760_v50 = vrot.slane %v1673_v1, %v15503_v9  ;;  %v15765_v42 = vcombine.high %v15635_v60, %v15635_v60  ;;  %v15769_v26 = vcombine.high %v15728_v56, %v15728_v56  ;;  %v13707_v5 = vld.sshfl [vmem:[%s15508_s30 + $0x64] sm:$0x33 pattern:$0x75316420] }
  0x2f   : > { %20913 = vst [vmem:[#allocation30_spill] sm:$0xff] %v15740_v63  ;;  %20914 = vst [vmem:[#allocation31_spill] sm:$0xff] %v15743_v8  ;;  %v973_v45 = vcombine.low %v965_v52, %v972_v3  ;;  %v1006_v17 = vcombine.low %v984_v0, %v15740_v63  ;;  %v769_v1 = vcombine.high %v13704_v32, %v13704_v32  ;;  %vm10103_vm12 = vcmask 1046532  }
  0x30   : > { %20915 = vst [vmem:[#allocation32_spill] sm:$0xff] %v15754_v61  ;;  %20916 = vst [vmem:[#allocation33_spill] sm:$0xff] %v15765_v42  ;;  %v1007_v52 = vcombine.low %v15743_v8, %v15754_v61  ;;  %v15776_v3 = vrot.slane %v13704_v32, %v15503_v9  ;;  %v15780_v38 = vrot.slane %v13705_v35, %v15503_v9  ;;  %vm8706_vm14 = vsmask.f32 3328 }
  0x31   : > { %20917 = vst [vmem:[#allocation34_spill] sm:$0xff] %v15769_v26  ;;  %14648 = vmatprep.mubr.msk.bf16.mxu0 %vm1479_vm1, %v973_v45  ;;  %v1014_v0 = vrot.slane %v1006_v17, %v15503_v9  ;;  %v1317_v53 = vcombine.low %v15728_v56, %v15765_v42  ;;  %v807_v59 = vcombine.high %v13706_v54, %v13706_v54  ;;  %vm19062_vm13 = vmor %vm10102_vm11, %vm10103_vm12  ;;  %vm8707_vm15 = vsmask.f32 7440 }
  0x32   : > { %20918 = vst [vmem:[#allocation35_spill] sm:$0xff] %v15776_v3  ;;  %20919 = vst [vmem:[#allocation36_spill] sm:$0xff] %v15780_v38  ;;  %v15785_v45 = vrot.slane %v13706_v54, %v15503_v9  ;;  %v1021_v2 = vrot.slane %v1007_v52, %v15503_v9  ;;  %v15789_v17 = vrot.slane %v769_v1, %v15503_v9  ;;  %v15807_v1 = vld.sshfl [vmem:[%s15508_s30 + $0x14] sm:$0x11 pattern:$0x75316420] }
  0x33   : > { %v15793_v32 = vcombine.high %v15776_v3, %v15776_v3  ;;  %v1318_v35 = vcombine.low %v15769_v26, %v15776_v3  ;;  %v15798_v7 = vrot.slane %v1317_v53, %v15503_v9  ;;  %v15801_v25 = vrot.slane %v807_v59, %v15503_v9 }
  0x34   : > { %20920 = vst [vmem:[#allocation37_spill] sm:$0xff] %v15785_v45  ;;  %20921 = vst [vmem:[#allocation38_spill] sm:$0xff] %v15789_v17  ;;  %v831_v54 = vcombine.high %v13707_v5, %v13707_v5  ;;  %v15804_v52 = vrot.slane %v13707_v5, %v15503_v9  ;;  %v1022_v10 = vcombine.low %v1014_v0, %v1021_v2  ;;  %v13688_v2 = vld.sshfl [vmem:[%s15508_s30 + $0x18] sm:$0x33 pattern:$0x75316420] }
  0x35   : > { %20922 = vst [vmem:[#allocation39_spill] sm:$0xff] %v15793_v32  ;;  %20923 = vst [vmem:[#allocation40_spill] sm:$0xff] %v15798_v7  ;;  %v15811_v11 = vcombine.high %v15789_v17, %v15789_v17  ;;  %v1319_v48 = vcombine.low %v15789_v17, %v15793_v32  ;;  %v15816_v53 = vrot.slane %v1318_v35, %v15503_v9 }
  0x36   : > { %20924 = vst [vmem:[#allocation41_spill] sm:$0xff] %v15801_v25  ;;  %20925 = vst [vmem:[#allocation42_spill] sm:$0xff] %v15804_v52  ;;  %v15819_v59 = vrot.slane %v831_v54, %v15503_v9  ;;  %v1366_v5 = vcombine.low %v15785_v45, %v15801_v25  ;;  %v13720_v40 = vcombine.high %v15785_v45, %v15801_v25  ;;  %14649 = vmatmul.mubr.msk.bf16.vlgmr.msra.gmra.mrb[0].mxu0 %vm1479_vm1, %v1022_v10 }
  0x37   : > { %20926 = vst [vmem:[#allocation43_spill] sm:$0xff] %v15811_v11  ;;  %20927 = vst [vmem:[#allocation44_spill] sm:$0xff] %v15816_v53  ;;  %v15828_v0 = vcombine.high %v15715_v41, %v15715_v41  ;;  %v1320_v35 = vcombine.low %v15811_v11, %v15780_v38  ;;  %v15834_v44 = vrot.slane %v1319_v48, %v15503_v9  ;;  %14699 = vmatpush3.bf16.msra.mxu0 %v15575_v36 }
  0x38   : > { %20928 = vst [vmem:[#allocation45_spill] sm:$0xff] %v15819_v59  ;;  %v1349_v54 = vcombine.low %v15798_v7, %v15816_v53  ;;  %v15841_v58 = vrot.slane %v15807_v1, %v15503_v9  ;;  %v1368_v61 = vcombine.low %v15804_v52, %v15819_v59  ;;  %v13721_v10 = vcombine.high %v15804_v52, %v15819_v59 }
  0x39   : > { %20929 = vst [vmem:[#allocation46_spill] sm:$0xff] %v15834_v44  ;;  %v15848_v63 = vrot.slane %v1366_v5, %v15503_v9  ;;  %v15851_v48 = vrot.slane %v13720_v40, %v15503_v9  ;;  %v15855_v53 = vrot.slane %v1320_v35, %v15503_v9  ;;  %v435_v8 = vcombine.high %v13688_v2, %v13688_v2 }
  0x3a   : > { %v1357_v7 = vrot.slane %v1349_v54, %v15503_v9  ;;  %v15859_v25 = vrot.slane %v13688_v2, %v15503_v9  ;;  %15367 = vmatprep.subr.msk.bf16.mxu0 %vm1516_vm0, %v15567_v33  ;;  %v15864_v40 = vrot.slane %v1368_v61, %v15503_v9  ;;  %v15867_v36 = vrot.slane %v13721_v10, %v15503_v9 }
  0x3b   : > { %20930 = vst [vmem:[#allocation47_spill] sm:$0xff] %v15848_v63  ;;  %20931 = vst [vmem:[#allocation48_spill] sm:$0xff] %v15851_v48  ;;  %v1398_v5 = vcombine.low %v15848_v63, %v15851_v48  ;;  %v459_v35 = vcombine.high %v13689_v49, %v13689_v49  ;;  %v1350_v2 = vcombine.low %v15834_v44, %v15855_v53 }
  0x3c   : > { %20932 = vst [vmem:[#allocation49_spill] sm:$0xff] %v15855_v53  ;;  %20933 = vst [vmem:[#allocation50_spill] sm:$0xff] %v15864_v40  ;;  %v15874_v54 = vrot.slane %v435_v8, %v15503_v9  ;;  %v15877_v59 = vrot.slane %v13689_v49, %v15503_v9  ;;  %v1023_v33 = vcombine.low %v15828_v0, %v15841_v58  ;;  %v15889_v53 = vld.sshfl [vmem:[%s15508_s30 + $0x20] sm:$0x11 pattern:$0x75316420] }
  0x3d   : > { %20934 = vst [vmem:[#allocation51_spill] sm:$0xff] %v15867_v36  ;;  %v1399_v10 = vcombine.low %v15864_v40, %v15867_v36  ;;  %v1406_v48 = vrot.slane %v1398_v5, %v15503_v9  ;;  %v15886_v63 = vrot.slane %v459_v35, %v15503_v9  ;;  %v1364_v49 = vrot.slane %v1350_v2, %v15503_v9  ;;  %v13691_v5 = vld.sshfl [vmem:[%s15508_s30 + $0x24] sm:$0x33 pattern:$0x75316420] }
  0x3e   : > { %v1024_v8 = vcombine.low %v15859_v25, %v15874_v54  ;;  %v13714_v61 = vcombine.high %v15859_v25, %v15874_v54  ;;  %v15897_v44 = vrot.slane %v1023_v33, %v15503_v9  ;;  %v15912_v33 = vld.sshfl [vmem:[%s15508_s30 + $0x28] sm:$0x33 pattern:$0x75316420]  ;;  %v15916_v36 = vrot.slane %v15889_v53, %v15503_v9 }
  0x3f   : > { %v1413_v40 = vrot.slane %v1399_v10, %v15503_v9  ;;  %v1026_v2 = vcombine.low %v15877_v59, %v15886_v63  ;;  %v1365_v52 = vcombine.low %v1357_v7, %v1364_v49  ;;  %v497_v7 = vcombine.high %v13691_v5, %v13691_v5  ;;  %v13708_v49 = vld.sshfl [vmem:[%s15508_s30 + $0x68] sm:$0x11 pattern:$0x75316420] }
  0x40   : > { %20935 = vst [vmem:[#allocation52_spill] sm:$0xff] %v15897_v44  ;;  %v15906_v45 = vrot.slane %v1024_v8, %v15503_v9  ;;  %v15909_v38 = vrot.slane %v13714_v61, %v15503_v9  ;;  %20938 = vst [vmem:[#allocation55_spill] sm:$0xff] %v15916_v36  ;;  %v15928_v32 = vrot.slane %v13691_v5, %v15503_v9 }
  0x41   : > { %v1414_v35 = vcombine.low %v1406_v48, %v1413_v40  ;;  %v15920_v11 = vrot.slane %v1026_v2, %v15503_v9  ;;  %14664 = vmatprep.mubr.msk.bf16.mxu1 %vm1479_vm1, %v1365_v52  ;;  %v13715_v10 = vcombine.high %v15877_v59, %v15886_v63  ;;  %v13709_v48 = vld.sshfl [vmem:[%s15508_s30 + $0x6c] sm:$0x33 pattern:$0x75316420]  ;;  %v1681_v2 = vcombine.high %v15807_v1, %v15807_v1 }
  0x42   : > { %20936 = vst [vmem:[#allocation53_spill] sm:$0xff] %v15906_v45  ;;  %20937 = vst [vmem:[#allocation54_spill] sm:$0xff] %v15909_v38  ;;  %v1055_v61 = vcombine.low %v15897_v44, %v15906_v45  ;;  %v15939_v52 = vrot.slane %v497_v7, %v15503_v9  ;;  %v15943_v8 = vrot.slane %v15912_v33, %v15503_v9  ;;  %v13710_v1 = vld.sshfl [vmem:[%s15508_s30 + $0x70] sm:$0x33 pattern:$0x75316420] }
  0x43   : > { %20939 = vst [vmem:[#allocation56_spill] sm:$0xff] %v15920_v11  ;;  %14665 = vmatmul.mubr.msk.bf16.gmra.mrb[4].mxu1 %vm1479_vm1, %v1414_v35  ;;  %v1056_v40 = vcombine.low %v15909_v38, %v15920_v11  ;;  %v15948_v45 = vcombine.high %v15928_v32, %v15928_v32  ;;  %v1073_v35 = vcombine.low %v15916_v36, %v15928_v32  ;;  %v16040_v11 = vld.sshfl [vmem:[%s15508_s30 + $0x2c] sm:$0x11 pattern:$0x75316420] }
  0x44   : > { %v1063_v5 = vrot.slane %v1055_v61, %v15503_v9  ;;  %v15953_v44 = vrot.slane %v13715_v10, %v15503_v9  ;;  %v15959_v38 = vcombine.high %v15939_v52, %v15939_v52  ;;  %v15962_v61 = vrot.slane %v13708_v49, %v15503_v9 }
  0x45   : > { %v1070_v7 = vrot.slane %v1056_v40, %v15503_v9  ;;  %v869_v17 = vcombine.high %v13709_v48, %v13709_v48  ;;  %v1074_v10 = vcombine.low %v15939_v52, %v15948_v45  ;;  %v15973_v26 = vrot.slane %v1073_v35, %v15503_v9 }
  0x46   : > { %20940 = vst [vmem:[#allocation57_spill] sm:$0xff] %v15953_v44  ;;  %20941 = vst [vmem:[#allocation58_spill] sm:$0xff] %v15962_v61  ;;  %v15978_v42 = vrot.slane %v13709_v48, %v15503_v9  ;;  %v1075_v56 = vcombine.low %v15959_v38, %v15943_v8  ;;  %v893_v55 = vcombine.high %v13710_v1, %v13710_v1 }
  0x47   : > { %20944 = vst [vmem:[#allocation59_spill] sm:$0xff] %v15973_v26  ;;  %v1071_v49 = vcombine.low %v1063_v5, %v1070_v7  ;;  %v15983_v60 = vrot.slane %v869_v17, %v15503_v9  ;;  %v15987_v46 = vrot.slane %v1681_v2, %v15503_v9  ;;  %v15990_v35 = vrot.slane %v1074_v10, %v15503_v9 }
  0x48   : > { %20945 = vst [vmem:[#allocation60_spill] sm:$0xff] %v15978_v42  ;;  %v1104_v48 = vcombine.low %v15953_v44, %v15973_v26  ;;  %v15996_v5 = vcombine.high %v15978_v42, %v15978_v42  ;;  %v16007_v2 = vrot.slane %v1075_v56, %v15503_v9  ;;  %v16014_v10 = vrot.slane %v13710_v1, %v15503_v9 }
  0x49   : > { %20946 = vst [vmem:[#allocation61_spill] sm:$0xff] %v15983_v60  ;;  %20947 = vst [vmem:[#allocation62_spill] sm:$0xff] %v15990_v35  ;;  %14652 = vmatprep.mubr.msk.bf16.mxu0 %vm1479_vm1, %v1071_v49  ;;  %v16011_v7 = vcombine.high %v15983_v60, %v15983_v60  ;;  %v16017_v3 = vrot.slane %v893_v55, %v15503_v9  ;;  %v1415_v49 = vcombine.low %v15962_v61, %v15978_v42 }
  0x4a   : > { %20948 = vst [vmem:[#allocation63_spill] sm:$0xff] %v15996_v5  ;;  %20951 = vst [vmem:[#allocation64_spill] sm:$0xff] %v16007_v2  ;;  %v1112_v40 = vrot.slane %v1104_v48, %v15503_v9  ;;  %v1416_v56 = vcombine.low %v15983_v60, %v15996_v5  ;;  %v16025_v26 = vrot.slane %v13711_v51, %v15503_v9 }
  0x4b   : > { %20952 = vst [vmem:[#allocation65_spill] sm:$0xff] %v16011_v7  ;;  %20953 = vst [vmem:[#allocation66_spill] sm:$0xff] %v16014_v10  ;;  %v1105_v44 = vcombine.low %v15990_v35, %v16007_v2  ;;  %v16031_v1 = vcombine.high %v16014_v10, %v16014_v10  ;;  %v1417_v55 = vcombine.low %v16011_v7, %v16014_v10  ;;  %v13694_v10 = vld.sshfl [vmem:[%s15508_s30 + $0x30] sm:$0x33 pattern:$0x75316420] }
  0x4c   : > { %20954 = vst [vmem:[#allocation67_spill] sm:$0xff] %v16017_v3  ;;  %20955 = vst [vmem:[#allocation68_spill] sm:$0xff] %v16025_v26  ;;  %v16037_v48 = vcombine.high %v16017_v3, %v16017_v3  ;;  %v16050_v35 = vrot.slane %v1415_v49, %v15503_v9  ;;  %v16053_v2 = vrot.slane %v1416_v56, %v15503_v9 }
  0x4d   : > { %20956 = vst [vmem:[#allocation69_spill] sm:$0xff] %v16031_v1  ;;  %v521_v7 = vcombine.high %v15912_v33, %v15912_v33  ;;  %v16060_v5 = vcombine.high %v15943_v8, %v15943_v8  ;;  %v1119_v17 = vrot.slane %v1105_v44, %v15503_v9  ;;  %v1418_v60 = vcombine.low %v16017_v3, %v16031_v1 }
  0x4e   : > { %20959 = vst [vmem:[#allocation70_spill] sm:$0xff] %v16050_v35  ;;  %20960 = vst [vmem:[#allocation71_spill] sm:$0xff] %v16053_v2  ;;  %v16066_v49 = vrot.slane %v1417_v55, %v15503_v9  ;;  %v1464_v56 = vcombine.low %v16037_v48, %v16025_v26  ;;  %v1447_v33 = vcombine.low %v16050_v35, %v16053_v2  ;;  %v16095_v35 = vld.sshfl [vmem:[%s15508_s30 + $0x38] sm:$0x11 pattern:$0x75316420] }
  0x4f   : > { %v16074_v61 = vrot.slane %v521_v7, %v15503_v9  ;;  %v16078_v44 = vrot.slane %v16040_v11, %v15503_v9  ;;  %v1120_v26 = vcombine.low %v1112_v40, %v1119_v17  ;;  %v16089_v42 = vrot.slane %v1418_v60, %v15503_v9  ;;  %20966 = vst [vmem:[#allocation75_spill] sm:$0xff] %v16095_v35 }
  0x50   : > { %20961 = vst [vmem:[#allocation72_spill] sm:$0xff] %v16066_v49  ;;  %v16092_v2 = vrot.slane %v1464_v56, %v15503_v9  ;;  %v559_v7 = vcombine.high %v13694_v10, %v13694_v10  ;;  %v1455_v1 = vrot.slane %v1447_v33, %v15503_v9  ;;  %v16103_v51 = vrot.slane %v13694_v10, %v15503_v9 }
  0x51   : > { %20964 = vst [vmem:[#allocation73_spill] sm:$0xff] %v16089_v42  ;;  %v16100_v3 = vcombine.high %v16074_v61, %v16074_v61  ;;  %v1121_v40 = vcombine.low %v16074_v61, %v16060_v5  ;;  %14653 = vmatmul.mubr.msk.bf16.gmra.mrb[4].mxu0 %vm1479_vm1, %v1120_v26  ;;  %v1448_v60 = vcombine.low %v16066_v49, %v16089_v42 }
  0x52   : > { %20965 = vst [vmem:[#allocation74_spill] sm:$0xff] %v16092_v2  ;;  %v1478_v17 = vrot.slane %v16092_v2, %v15503_v9  ;;  %v16113_v56 = vrot.slane %v559_v7, %v15503_v9  ;;  %v583_v33 = vcombine.high %v13695_v30, %v13695_v30  ;;  %v16124_v26 = vrot.slane %v13695_v30, %v15503_v9 }
  0x53   : > { %v1122_v10 = vcombine.low %v16100_v3, %v16078_v44  ;;  %v16121_v20 = vrot.slane %v1121_v40, %v15503_v9  ;;  %v16128_v42 = vrot.slane %v16095_v35, %v15503_v9  ;;  %v1462_v7 = vrot.slane %v1448_v60, %v15503_v9 }
  0x54   : > { %20967 = vst [vmem:[#allocation76_spill] sm:$0xff] %v16113_v56  ;;  %20969 = vst [vmem:[#allocation78_spill] sm:$0xff] %v16124_v26  ;;  %v1123_v2 = vcombine.low %v16103_v51, %v16113_v56  ;;  %v13716_v55 = vcombine.high %v16103_v51, %v16113_v56  ;;  %v16136_v49 = vrot.slane %v583_v33, %v15503_v9 }
  0x55   : > { %20968 = vst [vmem:[#allocation77_spill] sm:$0xff] %v16121_v20  ;;  %20970 = vst [vmem:[#allocation79_spill] sm:$0xff] %v16128_v42  ;;  %v16139_v40 = vrot.slane %v1122_v10, %v15503_v9  ;;  %v1172_v30 = vcombine.low %v16128_v42, %v15513_v13  ;;  %v16145_v22 = vcombine.high %v15652_v6, %v15652_v6  ;;  %v1798_v42 = vshll.u32 %v15662_v15, 16 }
  0x56   : > { %20971 = vst [vmem:[#allocation80_spill] sm:$0xff] %v16136_v49  ;;  %v16149_v60 = vcombine.high %v15669_v28, %v15669_v28  ;;  %v1463_v21 = vcombine.low %v1455_v1, %v1462_v7  ;;  %v16153_v33 = vrot.slane %v1123_v2, %v15503_v9  ;;  %v16156_v10 = vrot.slane %v13716_v55, %v15503_v9 }
  0x57   : > { %20972 = vst [vmem:[#allocation81_spill] sm:$0xff] %v16139_v40  ;;  %v1170_v16 = vcombine.low %v16124_v26, %v16136_v49  ;;  %v1153_v14 = vcombine.low %v16121_v20, %v16139_v40  ;;  %v13717_v24 = vcombine.high %v16124_v26, %v16136_v49  ;;  %v16165_v27 = vrot.slane %v1172_v30, %v15503_v9 }
  0x58   : > { %20973 = vst [vmem:[#allocation82_spill] sm:$0xff] %v16153_v33  ;;  %20974 = vst [vmem:[#allocation83_spill] sm:$0xff] %v16156_v10  ;;  %v16169_v1 = vcombine.high %v15662_v15, %v15662_v15  ;;  %14668 = vmatprep.mubr.msk.bf16.mxu1 %vm1479_vm1, %v1463_v21  ;;  %v1154_v2 = vcombine.low %v16153_v33, %v16156_v10  ;;  %v16179_v55 = vcombine.high %v15678_v34, %v15678_v34 }
  0x59   : > { %20975 = vst [vmem:[#allocation84_spill] sm:$0xff] %v16165_v27  ;;  %v16175_v7 = vrot.slane %v1170_v16, %v15503_v9  ;;  %v1769_v40 = vshrl.u32 %v15652_v6, 16  ;;  %14669 = vmatmul.mubr.msk.bf16.gmra.mrb[8].mxu1 %vm1479_vm1, %v1478_v17  ;;  %v1161_v21 = vrot.slane %v1153_v14, %v15503_v9  ;;  %v16190_v33 = vrot.slane %v13717_v24, %v15503_v9 }
  0x5a   : > { %v1203_v16 = vcombine.low %v16165_v27, %v15592_v43  ;;  %v1774_v10 = vshll.u32 %v15669_v28, 16  ;;  %v1168_v20 = vrot.slane %v1154_v2, %v15503_v9  ;;  %v1782_v18 = vshll.u32 %v16145_v22, 16 }
  0x5b   : > { %20976 = vst [vmem:[#allocation85_spill] sm:$0xff] %v16175_v7  ;;  %20979 = vst [vmem:[#allocation86_spill] sm:$0xff] %v16190_v33  ;;  %v1785_v6 = vshrl.u32 %v16145_v22, 16  ;;  %v1202_v17 = vcombine.low %v16175_v7, %v16190_v33  ;;  %v1790_v27 = vshll.u32 %v16149_v60, 16  ;;  %v1793_v13 = vshrl.u32 %v16149_v60, 16 }
  0x5c   : > { %v1217_v14 = vrot.slane %v1203_v16, %v15503_v9  ;;  %v1776_v24 = vsel %vm16182_vm2, %v1769_v40, %v1774_v10  ;;  %v1169_v43 = vcombine.low %v1161_v21, %v1168_v20  ;;  %v1784_v2 = vsel %vm16182_vm2, %v1777_v19, %v1782_v18 }
  0x5d   : > { %v1210_v35 = vrot.slane %v1202_v17, %v15503_v9  ;;  %v1792_v33 = vsel %vm16182_vm2, %v1785_v6, %v1790_v27  ;;  %v1801_v16 = vshrl.u32 %v15662_v15, 16  ;;  %v1806_v7 = vshll.u32 %v15678_v34, 16 }
  0x5e   : > { %14656 = vmatprep.mubr.msk.bf16.mxu0 %vm1479_vm1, %v1169_v43  ;;  %v1800_v20 = vsel %vm16182_vm2, %v1793_v13, %v1798_v42  ;;  %v1809_v18 = vshrl.u32 %v15678_v34, 16  ;;  %v1814_v19 = vshll.u32 %v16169_v1, 16  ;;  %v1817_v40 = vshrl.u32 %v16169_v1, 16 }
  0x5f   : > { %v1218_v10 = vcombine.low %v1210_v35, %v1217_v14  ;;  %v1808_v21 = vsel %vm16182_vm2, %v1801_v16, %v1806_v7  ;;  %v1822_v27 = vshll.u32 %v16179_v55, 16  ;;  %v1825_v6 = vshrl.u32 %v16179_v55, 16 }
  0x60   : > { %v1816_v43 = vsel %vm16182_vm2, %v1809_v18, %v1814_v19  ;;  %v1830_v17 = vshll.u32 %v15673_v31, 16  ;;  %v2500_v13 = vcombine.low %v1776_v24, %v1784_v2  ;;  %v2501_v42 = vcombine.low %v1792_v33, %v1800_v20 }
  0x61   : > { %14657 = vmatmul.mubr.msk.bf16.gmra.mrb[8].mxu0 %vm1479_vm1, %v1218_v10  ;;  %v1824_v49 = vsel %vm16182_vm2, %v1817_v40, %v1822_v27  ;;  %v2502_v35 = vcombine.low %v1808_v21, %v1816_v43  ;;  %v1833_v14 = vshrl.u32 %v15673_v31, 16  ;;  %v1842_v7 = vshrl.u32 %v15681_v39, 16 }
  0x62   : > { %v1832_v16 = vsel %vm16182_vm2, %v1825_v6, %v1830_v17  ;;  %v2510_v26 = vrot.slane %v2500_v13, %v15503_v9  ;;  %v2517_v18 = vrot.slane %v2501_v42, %v15503_v9  ;;  %v1847_v24 = vshll.u32 %v15696_v62, 16 }
  0x63   : > { %v2503_v33 = vcombine.low %v1824_v49, %v1832_v16  ;;  %v2524_v2 = vrot.slane %v2502_v35, %v15503_v9  ;;  %v20980_v20 = vshll.u32 %v15760_v50, 16  ;;  %v1850_v40 = vshrl.u32 %v15696_v62, 16 }
  0x64   : > { %v2532_v10 = vcombine.low %v2510_v26, %v2517_v18  ;;  %v16245_v21 = vsel %vm16182_vm2, %v1842_v7, %v1847_v24  ;;  %v20981_v27 = vshll.u32 %v15709_v12, 16  ;;  %v20982_v6 = vshrl.u32 %v15703_v4, 16 }
  0x65   : > { %v1840_v19 = vsel %vm16182_vm2, %v1833_v14, %v20980_v20  ;;  %v1871_v43 = vshll.u32 %v15712_v23, 16  ;;  %v2531_v17 = vrot.slane %v2503_v33, %v15503_v9  ;;  %v20983_v13 = vshll.u32 %v15703_v4, 16 }
  0x66   : > { %v16253_v49 = vsel %vm16182_vm2, %v20982_v6, %v20981_v27  ;;  %v1874_v42 = vshrl.u32 %v15712_v23, 16  ;;  %v1879_v35 = vshll.u32 %v15715_v41, 16  ;;  %v2540_v14 = vrot.slane %v2532_v10, %v15503_v9 }
  0x67   : > { %v16261_v26 = vsel %vm16182_vm2, %v1850_v40, %v20983_v13  ;;  %v20984_v7 = vshrl.u32 %v15709_v12, 16  ;;  %v1882_v18 = vshrl.u32 %v15715_v41, 16  ;;  %v20985_v4 = vshll.u32 %v15828_v0, 16 }
  0x68   : > { %v20986_v24 = vshrl.u32 %v15721_v57, 16  ;;  %v2533_v20 = vcombine.low %v2524_v2, %v2531_v17  ;;  %v16283_v40 = vsel %vm16182_vm2, %v1874_v42, %v1879_v35  ;;  %v2549_v12 = vcombine.low %v1840_v19, %v16245_v21 }
  0x69   : > { %v16270_v16 = vsel %vm16182_vm2, %v20984_v7, %v1871_v43  ;;  %v2550_v10 = vcombine.low %v16261_v26, %v16253_v49  ;;  %v20988_v27 = vshll.u32 %v15721_v57, 16  ;;  %v3292_v2 = vcombine.low %v15669_v28, %v16145_v22 }
  0x6a   : > { %v16279_v33 = vsel %vm16182_vm2, %v20986_v24, %v20985_v4  ;;  %v2551_v43 = vcombine.low %v16270_v16, %v16283_v40  ;;  %v3293_v17 = vcombine.low %v16149_v60, %v15662_v15  ;;  %v2547_v19 = vrot.slane %v2533_v20, %v15503_v9 }
  0x6b   : > { %20987 = vst [vmem:[#allocation87_spill] sm:$0xff] %v16279_v33  ;;  %v16292_v6 = vsel %vm16182_vm2, %v1882_v18, %v20988_v27  ;;  %v2559_v57 = vrot.slane %v2549_v12, %v15503_v9  ;;  %v2566_v42 = vrot.slane %v2550_v10, %v15503_v9  ;;  %v3294_v7 = vcombine.low %v15678_v34, %v16169_v1 }
  0x6c   : > { %v2552_v13 = vcombine.low %v16292_v6, %v16279_v33  ;;  %v2573_v35 = vrot.slane %v2551_v43, %v15503_v9  ;;  %v3295_v22 = vcombine.low %v16179_v55, %v15673_v31  ;;  %v3302_v28 = vrot.slane %v3292_v2, %v15503_v9 }
  0x6d   : > { %v2548_v15 = vcombine.low %v2540_v14, %v2547_v19  ;;  %v2581_v18 = vcombine.low %v2559_v57, %v2566_v42  ;;  %v3309_v4 = vrot.slane %v3293_v17, %v15503_v9  ;;  %v3316_v24 = vrot.slane %v3294_v7, %v15503_v9 }
  0x6e   : > { %v2580_v60 = vrot.slane %v2552_v13, %v15503_v9  ;;  %v3323_v20 = vrot.slane %v3295_v22, %v15503_v9  ;;  %v16317_v12 = vcombine.high %v15859_v25, %v15859_v25  ;;  %v16321_v34 = vcombine.high %v15874_v54, %v15874_v54 }
  0x6f   : > { %14674 = vmatprep.mubr.msk.bf16.mxu1 %vm1479_vm1, %v2548_v15  ;;  %v2589_v1 = vrot.slane %v2581_v18, %v15503_v9  ;;  %v3324_v55 = vcombine.low %v3302_v28, %v3309_v4  ;;  %v16327_v14 = vcombine.high %v15877_v59, %v15877_v59  ;;  %v1898_v27 = vshrl.u32 %v15828_v0, 16 }
  0x70   : > { %v2582_v31 = vcombine.low %v2573_v35, %v2580_v60  ;;  %v3325_v10 = vcombine.low %v3316_v24, %v3323_v20  ;;  %v1903_v43 = vshll.u32 %v15841_v58, 16  ;;  %v1906_v2 = vshrl.u32 %v15841_v58, 16 }
  0x71   : > { %v3332_v19 = vrot.slane %v3324_v55, %v15503_v9  ;;  %v1911_v13 = vshll.u32 %v15987_v46, 16  ;;  %v1915_v57 = vshrl.u32 %v15859_v25, 16  ;;  %v1920_v0 = vshll.u32 %v15874_v54, 16 }
  0x72   : > { %v2596_v17 = vrot.slane %v2582_v31, %v15503_v9  ;;  %v3339_v42 = vrot.slane %v3325_v10, %v15503_v9  ;;  %v16339_v35 = vsel %vm16182_vm2, %v1898_v27, %v1903_v43  ;;  %v1923_v7 = vshrl.u32 %v15874_v54, 16 }
  0x73   : > { %20989 = vst [vmem:[#allocation88_spill] sm:$0xff] %v16339_v35  ;;  %v16345_v28 = vsel %vm16182_vm2, %v1906_v2, %v1911_v13  ;;  %v1928_v15 = vshll.u32 %v16317_v12, 16  ;;  %v1931_v60 = vshrl.u32 %v16317_v12, 16  ;;  %v16351_v4 = vsel %vm16182_vm2, %v1915_v57, %v1920_v0 }
  0x74   : > { %v2597_v22 = vcombine.low %v2589_v1, %v2596_v17  ;;  %v3340_v18 = vcombine.low %v3332_v19, %v3339_v42  ;;  %v1936_v24 = vshll.u32 %v16321_v34, 16  ;;  %v1939_v20 = vshrl.u32 %v16321_v34, 16 }
  0x75   : > { %v16358_v31 = vsel %vm16182_vm2, %v1923_v7, %v1928_v15  ;;  %v1944_v1 = vshll.u32 %v15877_v59, 16  ;;  %v1947_v55 = vshrl.u32 %v15877_v59, 16  ;;  %v1952_v10 = vshll.u32 %v15886_v63, 16 }
  0x76   : > { %14675 = vmatmul.mubr.msk.bf16.vlgmr.msra.gmra.mrb[12].mxu1 %vm1479_vm1, %v2597_v22  ;;  %14700 = vmatprep.mubr.msk.bf16.mxu0 %vm1479_vm1, %v3340_v18  ;;  %v16367_v27 = vsel %vm16182_vm2, %v1931_v60, %v1936_v24  ;;  %v1955_v43 = vshrl.u32 %v15886_v63, 16  ;;  %v1960_v2 = vshll.u32 %v16327_v14, 16  ;;  %v2598_v17 = vcombine.low %v16339_v35, %v16345_v28 }
  0x77   : > { %14725 = vmatpush3.bf16.msra.mxu1 %v15579_v37  ;;  %v16375_v19 = vsel %vm16182_vm2, %v1939_v20, %v1944_v1  ;;  %v16379_v37 = vsel %vm16182_vm2, %v1947_v55, %v1952_v10  ;;  %v2599_v13 = vcombine.low %v16351_v4, %v16358_v31  ;;  %v3341_v55 = vcombine.low %v15760_v50, %v15696_v62 }
  0x78   : > { %v16387_v42 = vsel %vm16182_vm2, %v1955_v43, %v1960_v2  ;;  %v2600_v0 = vcombine.low %v16367_v27, %v16375_v19  ;;  %v2608_v7 = vrot.slane %v2598_v17, %v15503_v9  ;;  %v13838_v10 = vcombine.high %v15681_v39, %v15696_v62 }
  0x79   : > { %v2601_v60 = vcombine.low %v16379_v37, %v16387_v42  ;;  %v16398_v18 = vrot.slane %v2599_v13, %v15503_v9  ;;  %v5491_v43 = vcombine.low %v15987_v46, %v15874_v54  ;;  %v3343_v13 = vcombine.low %v15712_v23, %v15715_v41 }
  0x7a   : > { %v16404_v1 = vrot.slane %v2600_v0, %v15503_v9  ;;  %v13839_v0 = vcombine.high %v15712_v23, %v15715_v41  ;;  %v3351_v20 = vrot.slane %v3341_v55, %v15503_v9  ;;  %v16422_v50 = vrot.slane %v13838_v10, %v15503_v9 }
  0x7b   : > { %20990 = vst [vmem:[#allocation89_spill] sm:$0xff] %v16398_v18  ;;  %v16413_v2 = vrot.slane %v2601_v60, %v15503_v9  ;;  %v2630_v17 = vcombine.low %v2608_v7, %v16398_v18  ;;  %v16426_v15 = vcombine.high %v15886_v63, %v15886_v63  ;;  %v16431_v60 = vld [vmem:[%s20581_s1 + $0xa] sm:$0x3]  ;;  %v3365_v23 = vrot.slane %v3343_v13, %v15503_v9 }
  0x7c   : > { %20991 = vst [vmem:[#allocation90_spill] sm:$0xff] %v16404_v1  ;;  %20993 = vst [vmem:[#allocation92_spill] sm:$0xff] %v16422_v50  ;;  %v1689_v41 = vcombine.high %v15889_v53, %v15889_v53  ;;  %15368 = vmatprep.subr.msk.bf16.mxu1 %vm1516_vm0, %v16431_v60  ;;  %v3372_v55 = vrot.slane %v13839_v0, %v15503_v9  ;;  %v3373_v10 = vcombine.low %v3351_v20, %v16422_v50 }
  0x7d   : > { %20992 = vst [vmem:[#allocation91_spill] sm:$0xff] %v16413_v2  ;;  %v2631_v7 = vcombine.low %v16404_v1, %v16413_v2  ;;  %v2638_v24 = vrot.slane %v2630_v17, %v15503_v9  ;;  %v1963_v22 = vshrl.u32 %v16327_v14, 16  ;;  %v1968_v57 = vshll.u32 %v16426_v15, 16 }
  0x7e   : > { %v16447_v17 = vrot.slane %v1689_v41, %v15503_v9  ;;  %v1971_v13 = vshrl.u32 %v16426_v15, 16  ;;  %v1976_v53 = vshll.u32 %v15916_v36, 16  ;;  %v3374_v18 = vcombine.low %v3365_v23, %v3372_v55 }
  0x7f   : > { %v2645_v2 = vrot.slane %v2631_v7, %v15503_v9  ;;  %v3381_v1 = vrot.slane %v3373_v10, %v15503_v9  ;;  %v16454_v0 = vsel %vm16182_vm2, %v1963_v22, %v1968_v57  ;;  %v1979_v20 = vshrl.u32 %v15916_v36, 16 }
  0x80   : > { %20994 = vst [vmem:[#allocation93_spill] sm:$0xff] %v16447_v17  ;;  %v16459_v7 = vsel %vm16182_vm2, %v1971_v13, %v1976_v53  ;;  %v1984_v41 = vshll.u32 %v16447_v17, 16  ;;  %v1988_v33 = vshrl.u32 %v15928_v32, 16  ;;  %v16464_v35 = vrot.slane %v3374_v18, %v15503_v9 }
  0x81   : > { %v2646_v50 = vcombine.low %v2638_v24, %v2645_v2  ;;  %v1993_v23 = vshll.u32 %v15939_v52, 16  ;;  %v1996_v55 = vshrl.u32 %v15939_v52, 16  ;;  %v2001_v57 = vshll.u32 %v15948_v45, 16 }
  0x82   : > { %v16472_v22 = vsel %vm16182_vm2, %v1979_v20, %v1984_v41  ;;  %v2004_v24 = vshrl.u32 %v15948_v45, 16  ;;  %v2009_v2 = vshll.u32 %v15959_v38, 16  ;;  %v2012_v10 = vshrl.u32 %v15959_v38, 16 }
  0x83   : > { %14678 = vmatprep.mubr.msk.bf16.mxu1 %vm1479_vm1, %v2646_v50  ;;  %v3389_v18 = vcombine.low %v3381_v1, %v16464_v35  ;;  %v16480_v13 = vsel %vm16182_vm2, %v1988_v33, %v1993_v23  ;;  %v16484_v53 = vsel %vm16182_vm2, %v1996_v55, %v2001_v57  ;;  %v2017_v50 = vshll.u32 %v15943_v8, 16  ;;  %v16498_v33 = vld [vmem:[%s20581_s1 + $0xc] sm:$0x3] }
  0x84   : > { %v16489_v20 = vsel %vm16182_vm2, %v2004_v24, %v2009_v2  ;;  %v2020_v45 = vshrl.u32 %v15943_v8, 16  ;;  %v2025_v38 = vshll.u32 %v16074_v61, 16  ;;  %v2647_v1 = vcombine.low %v16454_v0, %v16459_v7 }
  0x85   : > { %14701 = vmatmul.mubr.msk.bf16.vlgmr.msra.gmra.mrb[12].mxu0 %vm1479_vm1, %v3389_v18  ;;  %v16503_v41 = vsel %vm16182_vm2, %v2012_v10, %v2017_v50  ;;  %v2648_v23 = vcombine.low %v16472_v22, %v16480_v13  ;;  %v2649_v55 = vcombine.low %v16484_v53, %v16489_v20  ;;  %v3390_v10 = vcombine.low %v15841_v58, %v15987_v46 }
  0x86   : > { %v16513_v24 = vsel %vm16182_vm2, %v2020_v45, %v2025_v38  ;;  %v16516_v2 = vrot.slane %v2647_v1, %v15503_v9  ;;  %14751 = vmatpush3.bf16.msra.mxu0 %v15605_v47  ;;  %v3391_v18 = vcombine.low %v15874_v54, %v16317_v12  ;;  %v16524_v50 = vrot.slane %v5491_v43, %v15503_v9 }
  0x87   : > { %20995 = vst [vmem:[#allocation94_spill] sm:$0xff] %v16513_v24  ;;  %v2650_v57 = vcombine.low %v16503_v41, %v16513_v24  ;;  %v16529_v45 = vrot.slane %v2648_v23, %v15503_v9  ;;  %v16532_v38 = vrot.slane %v2649_v55, %v15503_v9  ;;  %15369 = vmatprep.subr.msk.bf16.mxu0 %vm1516_vm0, %v16498_v33 }
  0x88   : > { %20996 = vst [vmem:[#allocation95_spill] sm:$0xff] %v16516_v2  ;;  %20997 = vst [vmem:[#allocation96_spill] sm:$0xff] %v16524_v50  ;;  %v3392_v46 = vcombine.low %v16321_v34, %v15877_v59  ;;  %v3393_v47 = vcombine.low %v15886_v63, %v16327_v14  ;;  %v3400_v54 = vrot.slane %v3390_v10, %v15503_v9 }
  0x89   : > { %20998 = vst [vmem:[#allocation97_spill] sm:$0xff] %v16529_v45  ;;  %20999 = vst [vmem:[#allocation98_spill] sm:$0xff] %v16532_v38  ;;  %v16542_v12 = vrot.slane %v3391_v18, %v15503_v9  ;;  %v16545_v43 = vrot.slane %v2650_v57, %v15503_v9  ;;  %v2679_v1 = vcombine.low %v16516_v2, %v16529_v45 }
  0x8a   : > { %v4166_v59 = vcombine.low %v15841_v58, %v15859_v25  ;;  %v16555_v63 = vrot.slane %v3392_v46, %v15503_v9  ;;  %v16558_v14 = vrot.slane %v3393_v47, %v15503_v9  ;;  %v21004_v57 = vcombine.low %v16345_v28, %v16351_v4 }
  0x8b   : > { %21000 = vst [vmem:[#allocation99_spill] sm:$0xff] %v16542_v12  ;;  %21001 = vst [vmem:[#allocation100_spill] sm:$0xff] %v16545_v43  ;;  %v3422_v55 = vcombine.low %v3400_v54, %v16542_v12  ;;  %v2680_v18 = vcombine.low %v16532_v38, %v16545_v43  ;;  %v2687_v58 = vrot.slane %v2679_v1, %v15503_v9 }
  0x8c   : > { %21002 = vst [vmem:[#allocation101_spill] sm:$0xff] %v16555_v63  ;;  %21003 = vst [vmem:[#allocation102_spill] sm:$0xff] %v16558_v14  ;;  %v16565_v10 = vrot.slane %v21004_v57, %v15503_v9  ;;  %v4173_v25 = vrot.slane %v4166_v59, %v15503_v9  ;;  %v21005_v46 = vcombine.low %v16358_v31, %v16367_v27  ;;  %v2028_v59 = vshrl.u32 %v16074_v61, 16 }
  0x8d   : > { %v3423_v54 = vcombine.low %v16555_v63, %v16558_v14  ;;  %v3430_v28 = vrot.slane %v3422_v55, %v15503_v9  ;;  %v1697_v4 = vcombine.high %v16040_v11, %v16040_v11  ;;  %v2694_v57 = vrot.slane %v2680_v18, %v15503_v9 }
  0x8e   : > { %v16575_v47 = vrot.slane %v21005_v46, %v15503_v9  ;;  %v16585_v1 = vcombine.high %v16103_v51, %v16103_v51  ;;  %v2033_v31 = vshll.u32 %v16060_v5, 16  ;;  %v2036_v55 = vshrl.u32 %v16060_v5, 16 }
  0x8f   : > { %v16590_v27 = vrot.slane %v3423_v54, %v15503_v9  ;;  %v16593_v46 = vrot.slane %v1697_v4, %v15503_v9  ;;  %v2041_v11 = vshll.u32 %v16100_v3, 16  ;;  %v2695_v23 = vcombine.low %v2687_v58, %v2694_v57 }
  0x90   : > { %v4174_v18 = vcombine.low %v4173_v25, %v16542_v12  ;;  %v16600_v34 = vcombine.high %v16113_v56, %v16113_v56  ;;  %v2044_v14 = vshrl.u32 %v16100_v3, 16  ;;  %v2049_v4 = vshll.u32 %v16078_v44, 16 }
  0x91   : > { %21006 = vst [vmem:[#allocation103_spill] sm:$0xff] %v16590_v27  ;;  %21007 = vst [vmem:[#allocation104_spill] sm:$0xff] %v16593_v46  ;;  %v3438_v63 = vcombine.low %v3430_v28, %v16590_v27  ;;  %v16606_v54 = vsel %vm16182_vm2, %v2036_v55, %v2041_v11  ;;  %v2052_v5 = vshrl.u32 %v16078_v44, 16  ;;  %14679 = vmatmul.mubr.msk.bf16.gmra.mrb[16].mxu1 %vm1479_vm1, %v2695_v23  ;;  %v2057_v25 = vshll.u32 %v16593_v46, 16 }
  0x92   : > { %21008 = vst [vmem:[#allocation105_spill] sm:$0xff] %v16606_v54  ;;  %v16613_v58 = vsel %vm16182_vm2, %v2028_v59, %v2033_v31  ;;  %v2061_v3 = vshrl.u32 %v16103_v51, 16  ;;  %v2066_v28 = vshll.u32 %v16113_v56, 16  ;;  %v16621_v57 = vsel %vm16182_vm2, %v2044_v14, %v2049_v4  ;;  %v21014_v4 = vld [vmem:[#allocation78_spill] sm:$0xff] }
  0x93   : > { %21009 = vst [vmem:[#allocation106_spill] sm:$0xff] %v16613_v58  ;;  %14704 = vmatprep.mubr.msk.bf16.mxu0 %vm1479_vm1, %v3438_v63  ;;  %21010 = vst [vmem:[#allocation107_spill] sm:$0xff] %v16621_v57  ;;  %v2069_v55 = vshrl.u32 %v16113_v56, 16  ;;  %v2074_v23 = vshll.u32 %v16585_v1, 16  ;;  %v2077_v11 = vshrl.u32 %v16585_v1, 16  ;;  %v16628_v59 = vsel %vm16182_vm2, %v2052_v5, %v2057_v25 }
  0x94   : > { %21011 = vst [vmem:[#allocation108_spill] sm:$0xff] %v16628_v59  ;;  %v16632_v31 = vsel %vm16182_vm2, %v2061_v3, %v2066_v28  ;;  %v2082_v63 = vshll.u32 %v16600_v34, 16  ;;  %v2085_v12 = vshrl.u32 %v16600_v34, 16  ;;  %v2090_v2 = vshll.u32 %v21014_v4, 16 }
  0x95   : > { %21012 = vst [vmem:[#allocation109_spill] sm:$0xff] %v16632_v31  ;;  %v16638_v14 = vsel %vm16182_vm2, %v2069_v55, %v2074_v23  ;;  %v2696_v38 = vcombine.low %v16613_v58, %v16606_v54  ;;  %v2697_v5 = vcombine.low %v16621_v57, %v16628_v59  ;;  %v3439_v28 = vcombine.low %v16426_v15, %v15916_v36  ;;  %v21034_v59 = vld [vmem:[#allocation79_spill] sm:$0xff]  ;;  %v21039_v54 = vld [vmem:[#allocation9_spill] sm:$0xff] }
  0x96   : > { %21013 = vst [vmem:[#allocation110_spill] sm:$0xff] %v16638_v14  ;;  %v16647_v25 = vsel %vm16182_vm2, %v2077_v11, %v2082_v63  ;;  %v2698_v3 = vcombine.low %v16632_v31, %v16638_v14  ;;  %v3440_v55 = vcombine.low %v16447_v17, %v15939_v52  ;;  %v16657_v23 = vsel %vm16182_vm2, %v2085_v12, %v2090_v2 }
  0x97   : > { %21015 = vst [vmem:[#allocation78_spill] sm:$0xff] %v16647_v25  ;;  %21016 = vst [vmem:[#allocation111_spill] sm:$0xff] %v16657_v23  ;;  %v16660_v45 = vrot.slane %v2696_v38, %v15503_v9  ;;  %v16663_v50 = vrot.slane %v2697_v5, %v15503_v9  ;;  %v13840_v11 = vcombine.high %v15928_v32, %v15939_v52  ;;  %v2093_v43 = vshrl.u32 %v21014_v4, 16 }
  0x98   : > { %v2699_v63 = vcombine.low %v16647_v25, %v16657_v23  ;;  %v16670_v15 = vrot.slane %v2698_v3, %v15503_v9  ;;  %v3442_v36 = vcombine.low %v15943_v8, %v16074_v61  ;;  %v16675_v2 = vrot.slane %v3439_v28, %v15503_v9 }
  0x99   : > { %21017 = vst [vmem:[#allocation112_spill] sm:$0xff] %v16660_v45  ;;  %21018 = vst [vmem:[#allocation113_spill] sm:$0xff] %v16663_v50  ;;  %v2728_v38 = vcombine.low %v16660_v45, %v16663_v50  ;;  %v16682_v5 = vrot.slane %v3440_v55, %v15503_v9  ;;  %v16685_v17 = vrot.slane %v13840_v11, %v15503_v9  ;;  %v2122_v31 = vshll.u32 %v21034_v59, 16 }
  0x9a   : > { %21019 = vst [vmem:[#allocation114_spill] sm:$0xff] %v16670_v15  ;;  %v21022_v3 = vcombine.low %v16375_v19, %v16379_v37  ;;  %v16694_v28 = vrot.slane %v4174_v18, %v15503_v9  ;;  %v16697_v50 = vrot.slane %v2699_v63, %v15503_v9  ;;  %v16700_v12 = vrot.slane %v3442_v36, %v15503_v9 }
  0x9b   : > { %21020 = vst [vmem:[#allocation115_spill] sm:$0xff] %v16682_v5  ;;  %21021 = vst [vmem:[#allocation116_spill] sm:$0xff] %v16685_v17  ;;  %v21026_v55 = vcombine.low %v16387_v42, %v16454_v0  ;;  %v3471_v19 = vcombine.low %v16675_v2, %v16682_v5  ;;  %v16714_v18 = vcombine.high %v21014_v4, %v21014_v4  ;;  %v21028_v5 = vld [vmem:[#allocation75_spill] sm:$0xff]  ;;  %v2150_v27 = vshrl.u32 %v21039_v54, 16 }
  0x9c   : > { %v16691_v23 = vrot.slane %v21022_v3, %v15503_v9  ;;  %21023 = vst [vmem:[#allocation117_spill] sm:$0xff] %v16694_v28  ;;  %21024 = vst [vmem:[#allocation118_spill] sm:$0xff] %v16697_v50  ;;  %v2729_v36 = vcombine.low %v16670_v15, %v16697_v50  ;;  %v2736_v63 = vrot.slane %v2728_v38, %v15503_v9 }
  0x9d   : > { %21025 = vst [vmem:[#allocation119_spill] sm:$0xff] %v16700_v12  ;;  %v16706_v11 = vrot.slane %v21026_v55, %v15503_v9  ;;  %v3472_v42 = vcombine.low %v16685_v17, %v16700_v12  ;;  %v13841_v0 = vcombine.high %v15943_v8, %v16074_v61  ;;  %v3479_v3 = vrot.slane %v3471_v19, %v15503_v9  ;;  %v21027_v55 = vld [vmem:[#allocation80_spill] sm:$0xff] }
  0x9e   : > { %v16726_v37 = vcombine.high %v21027_v55, %v21027_v55  ;;  %v1705_v45 = vcombine.high %v21028_v5, %v21028_v5  ;;  %v2743_v50 = vrot.slane %v2729_v36, %v15503_v9  ;;  %v2098_v8 = vshll.u32 %v21027_v55, 16 }
  0x9f   : > { %v16735_v15 = vrot.slane %v3472_v42, %v15503_v9  ;;  %v2101_v19 = vshrl.u32 %v21027_v55, 16  ;;  %v2106_v17 = vshll.u32 %v16714_v18, 16  ;;  %v2109_v5 = vshrl.u32 %v16714_v18, 16 }
  0xa0   : > { %v16739_v61 = vrot.slane %v1705_v45, %v15503_v9  ;;  %v2744_v12 = vcombine.low %v2736_v63, %v2743_v50  ;;  %v16746_v38 = vrot.slane %v13841_v0, %v15503_v9  ;;  %v16750_v36 = vsel %vm16182_vm2, %v2093_v43, %v2098_v8  ;;  %v21035_v43 = vld [vmem:[#allocation5_spill] sm:$0xff] }
  0xa1   : > { %21029 = vst [vmem:[#allocation80_spill] sm:$0xff] %v16735_v15  ;;  %v3487_v14 = vcombine.low %v3479_v3, %v16735_v15  ;;  %21032 = vst [vmem:[#allocation121_spill] sm:$0xff] %v16750_v36  ;;  %v16754_v45 = vsel %vm16182_vm2, %v2101_v19, %v2106_v17  ;;  %v2114_v42 = vshll.u32 %v16726_v37, 16  ;;  %v2117_v25 = vshrl.u32 %v16726_v37, 16  ;;  %v21036_v3 = vld [vmem:[#allocation8_spill] sm:$0xff] }
  0xa2   : > { %21030 = vst [vmem:[#allocation75_spill] sm:$0xff] %v16739_v61  ;;  %21031 = vst [vmem:[#allocation120_spill] sm:$0xff] %v16746_v38  ;;  %14682 = vmatprep.mubr.msk.bf16.mxu1 %vm1479_vm1, %v2744_v12  ;;  %v2125_v50 = vshrl.u32 %v21034_v59, 16  ;;  %v2130_v63 = vshll.u32 %v16739_v61, 16  ;;  %v2134_v0 = vshrl.u32 %v21035_v43, 16  ;;  %v2139_v8 = vshll.u32 %v21036_v3, 16 }
  0xa3   : > { %21033 = vst [vmem:[#allocation122_spill] sm:$0xff] %v16754_v45  ;;  %14705 = vmatmul.mubr.msk.bf16.gmra.mrb[16].mxu0 %vm1479_vm1, %v3487_v14  ;;  %v16767_v17 = vsel %vm16182_vm2, %v2109_v5, %v2114_v42  ;;  %v16771_v19 = vsel %vm16182_vm2, %v2117_v25, %v2122_v31  ;;  %v2142_v12 = vshrl.u32 %v21036_v3, 16  ;;  %v2147_v14 = vshll.u32 %v21039_v54, 16 }
  0xa4   : > { %21037 = vst [vmem:[#allocation8_spill] sm:$0xff] %v16767_v17  ;;  %21038 = vst [vmem:[#allocation123_spill] sm:$0xff] %v16771_v19  ;;  %v16777_v57 = vsel %vm16182_vm2, %v2125_v50, %v2130_v63  ;;  %v16781_v15 = vsel %vm16182_vm2, %v2134_v0, %v2139_v8  ;;  %v2745_v5 = vcombine.low %v16750_v36, %v16754_v45  ;;  %v21043_v63 = vld [vmem:[#allocation14_spill] sm:$0xff]  ;;  %v21058_v45 = vld [vmem:[#allocation11_spill] sm:$0xff] }
  0xa5   : > { %21040 = vst [vmem:[#allocation9_spill] sm:$0xff] %v16777_v57  ;;  %21041 = vst [vmem:[#allocation124_spill] sm:$0xff] %v16781_v15  ;;  %v16788_v31 = vsel %vm16182_vm2, %v2142_v12, %v2147_v14  ;;  %v2746_v25 = vcombine.low %v16767_v17, %v16771_v19  ;;  %v2747_v42 = vcombine.low %v16777_v57, %v16781_v15  ;;  %v21044_v0 = vshll.u32 %v21043_v63, 16  ;;  %v21063_v36 = vld [vmem:[#allocation12_spill] sm:$0xff] }
  0xa6   : > { %21042 = vst [vmem:[#allocation125_spill] sm:$0xff] %v16788_v31  ;;  %v3489_v50 = vcombine.low %v16078_v44, %v16593_v46  ;;  %v16803_v8 = vrot.slane %v2745_v5, %v15503_v9  ;;  %v3490_v12 = vcombine.low %v16113_v56, %v16585_v1  ;;  %v3491_v14 = vcombine.low %v16600_v34, %v21014_v4  ;;  %v21053_v4 = vld [vmem:[#allocation6_spill] sm:$0xff] }
  0xa7   : > { %v16800_v54 = vsel %vm16182_vm2, %v2150_v27, %v21044_v0  ;;  %v16812_v46 = vrot.slane %v2746_v25, %v15503_v9  ;;  %v16815_v19 = vrot.slane %v2747_v42, %v15503_v9  ;;  %v21052_v0 = vld [vmem:[#allocation13_spill] sm:$0xff]  ;;  %v21054_v25 = vcombine.high %v21053_v4, %v21053_v4 }
  0xa8   : > { %21045 = vst [vmem:[#allocation14_spill] sm:$0xff] %v16800_v54  ;;  %21046 = vst [vmem:[#allocation126_spill] sm:$0xff] %v16803_v8  ;;  %v2748_v15 = vcombine.low %v16788_v31, %v16800_v54  ;;  %v16818_v27 = vrot.slane %v3489_v50, %v15503_v9  ;;  %v16821_v5 = vrot.slane %v3490_v12, %v15503_v9  ;;  %v2171_v4 = vshll.u32 %v21058_v45, 16 }
  0xa9   : > { %21047 = vst [vmem:[#allocation127_spill] sm:$0xff] %v16812_v46  ;;  %21048 = vst [vmem:[#allocation128_spill] sm:$0xff] %v16815_v19  ;;  %v16824_v1 = vrot.slane %v3491_v14, %v15503_v9  ;;  %v16828_v34 = vcombine.high %v21052_v0, %v21052_v0  ;;  %v16834_v56 = vrot.slane %v21054_v25, %v15503_v9  ;;  %v21057_v14 = vld [vmem:[#allocation7_spill] sm:$0xff]  ;;  %v2174_v25 = vshrl.u32 %v21058_v45, 16 }
  0xaa   : > { %21049 = vst [vmem:[#allocation129_spill] sm:$0xff] %v16818_v27  ;;  %21050 = vst [vmem:[#allocation130_spill] sm:$0xff] %v16821_v5  ;;  %v16837_v42 = vrot.slane %v2748_v15, %v15503_v9  ;;  %v2777_v50 = vcombine.low %v16803_v8, %v16812_v46  ;;  %v3520_v12 = vcombine.low %v16746_v38, %v16818_v27  ;;  %v2163_v54 = vshll.u32 %v21057_v14, 16 }
  0xab   : > { %21051 = vst [vmem:[#allocation131_spill] sm:$0xff] %v16824_v1  ;;  %21055 = vst [vmem:[#allocation6_spill] sm:$0xff] %v16834_v56  ;;  %v3521_v31 = vcombine.low %v16821_v5, %v16824_v1  ;;  %v2166_v57 = vshrl.u32 %v21057_v14, 16  ;;  %v21059_v27 = vshrl.u32 %v21043_v63, 16  ;;  %v21064_v38 = vshll.u32 %v21063_v36, 16 }
  0xac   : > { %21056 = vst [vmem:[#allocation132_spill] sm:$0xff] %v16837_v42  ;;  %v2778_v15 = vcombine.low %v16815_v19, %v16837_v42  ;;  %v2785_v17 = vrot.slane %v2777_v50, %v15503_v9  ;;  %v3528_v46 = vrot.slane %v3520_v12, %v15503_v9  ;;  %v21066_v12 = vshll.u32 %v15557_v29, 16 }
  0xad   : > { %v16857_v8 = vsel %vm16182_vm2, %v21059_v27, %v2163_v54  ;;  %v16860_v1 = vrot.slane %v3521_v31, %v15503_v9  ;;  %v16864_v5 = vsel %vm16182_vm2, %v2166_v57, %v2171_v4  ;;  %v16870_v50 = vsel %vm16182_vm2, %v2174_v25, %v21064_v38  ;;  %v21069_v27 = vld [vmem:[#allocation10_spill] sm:$0xff]  ;;  %v21070_v25 = vld [vmem:[#allocation15_spill] sm:$0xff] }
  0xae   : > { %21060 = vst [vmem:[#allocation7_spill] sm:$0xff] %v16857_v8  ;;  %21062 = vst [vmem:[#allocation133_spill] sm:$0xff] %v16864_v5  ;;  %v21067_v63 = vshrl.u32 %v21063_v36, 16  ;;  %v2792_v31 = vrot.slane %v2778_v15, %v15503_v9  ;;  %v2195_v42 = vshll.u32 %v21069_v27, 16  ;;  %v2198_v57 = vshrl.u32 %v21069_v27, 16 }
  0xaf   : > { %21061 = vst [vmem:[#allocation11_spill] sm:$0xff] %v16860_v1  ;;  %21065 = vst [vmem:[#allocation12_spill] sm:$0xff] %v16870_v50  ;;  %v2203_v4 = vshll.u32 %v16834_v56, 16  ;;  %v3536_v19 = vcombine.low %v3528_v46, %v16860_v1  ;;  %v2207_v38 = vshrl.u32 %v21052_v0, 16  ;;  %v2212_v28 = vshll.u32 %v21070_v25, 16  ;;  %v21120_v1 = vld [vmem:[#allocation36_spill] sm:$0xff] }
  0xb0   : > { %v16878_v54 = vsel %vm16182_vm2, %v21067_v63, %v21066_v12  ;;  %v2215_v36 = vshrl.u32 %v21070_v25, 16  ;;  %v2793_v24 = vcombine.low %v2785_v17, %v2792_v31  ;;  %v21071_v12 = vshrl.u32 %v15557_v29, 16 }
  0xb1   : > { %21068 = vst [vmem:[#allocation134_spill] sm:$0xff] %v16878_v54  ;;  %v16896_v63 = vsel %vm16182_vm2, %v2198_v57, %v2203_v4  ;;  %v2220_v58 = vshll.u32 %v16828_v34, 16  ;;  %14708 = vmatprep.mubr.msk.bf16.mxu0 %vm1479_vm1, %v3536_v19  ;;  %v16902_v46 = vsel %vm16182_vm2, %v2207_v38, %v2212_v28  ;;  %v2794_v17 = vcombine.low %v16857_v8, %v16864_v5 }
  0xb2   : > { %v16892_v15 = vsel %vm16182_vm2, %v21071_v12, %v2195_v42  ;;  %21073 = vst [vmem:[#allocation136_spill] sm:$0xff] %v16896_v63  ;;  %21074 = vst [vmem:[#allocation137_spill] sm:$0xff] %v16902_v46  ;;  %v2795_v29 = vcombine.low %v16870_v50, %v16878_v54  ;;  %14683 = vmatmul.mubr.msk.bf16.gmra.mrb[20].mxu1 %vm1479_vm1, %v2793_v24  ;;  %v3537_v19 = vcombine.low %v21027_v55, %v16714_v18 }
  0xb3   : > { %21072 = vst [vmem:[#allocation135_spill] sm:$0xff] %v16892_v15  ;;  %v2796_v42 = vcombine.low %v16892_v15, %v16896_v63  ;;  %v16913_v31 = vsel %vm16182_vm2, %v2215_v36, %v2220_v58  ;;  %v3538_v28 = vcombine.low %v16726_v37, %v21034_v59  ;;  %v3539_v57 = vcombine.low %v16739_v61, %v21036_v3  ;;  %v21085_v59 = vld [vmem:[#allocation22_spill] sm:$0xff]  ;;  %v15424_v61 = vld.sshfl [vmem:[%s15508_s30 + $0x50] sm:$0x11 pattern:$0x75316420] }
  0xb4   : > { %21075 = vst [vmem:[#allocation138_spill] sm:$0xff] %v16913_v31  ;;  %v2797_v4 = vcombine.low %v16902_v46, %v16913_v31  ;;  %v16924_v38 = vrot.slane %v2794_v17, %v15503_v9  ;;  %v16927_v24 = vrot.slane %v2795_v29, %v15503_v9  ;;  %v13842_v18 = vcombine.high %v21035_v43, %v21036_v3 }
  0xb5   : > { %v16930_v58 = vrot.slane %v2796_v42, %v15503_v9  ;;  %v16935_v37 = vrot.slane %v3537_v19, %v15503_v9  ;;  %v16938_v55 = vrot.slane %v3538_v28, %v15503_v9  ;;  %v16941_v36 = vrot.slane %v3539_v57, %v15503_v9  ;;  %v21083_v42 = vld [vmem:[#allocation19_spill] sm:$0xff] }
  0xb6   : > { %21076 = vst [vmem:[#allocation139_spill] sm:$0xff] %v16924_v38  ;;  %21077 = vst [vmem:[#allocation140_spill] sm:$0xff] %v16927_v24  ;;  %v16944_v12 = vrot.slane %v2797_v4, %v15503_v9  ;;  %v2826_v17 = vcombine.low %v16924_v38, %v16927_v24  ;;  %v16950_v29 = vcombine.high %v21070_v25, %v21070_v25  ;;  %v2223_v63 = vshrl.u32 %v16828_v34, 16 }
  0xb7   : > { %21078 = vst [vmem:[#allocation141_spill] sm:$0xff] %v16930_v58  ;;  %21079 = vst [vmem:[#allocation142_spill] sm:$0xff] %v16935_v37  ;;  %v16954_v19 = vcombine.high %v21083_v42, %v21083_v42  ;;  %v16957_v28 = vrot.slane %v13842_v18, %v15503_v9  ;;  %v3569_v57 = vcombine.low %v16935_v37, %v16938_v55  ;;  %v2247_v15 = vshrl.u32 %v21085_v59, 16 }
  0xb8   : > { %21080 = vst [vmem:[#allocation143_spill] sm:$0xff] %v16938_v55  ;;  %21081 = vst [vmem:[#allocation144_spill] sm:$0xff] %v16941_v36  ;;  %v16963_v4 = vcombine.high %v21085_v59, %v21085_v59  ;;  %v1721_v24 = vcombine.high %v15424_v61, %v15424_v61  ;;  %v2827_v38 = vcombine.low %v16930_v58, %v16944_v12  ;;  %v2228_v46 = vshll.u32 %v16950_v29, 16 }
  0xb9   : > { %21082 = vst [vmem:[#allocation145_spill] sm:$0xff] %v16944_v12  ;;  %21084 = vst [vmem:[#allocation19_spill] sm:$0xff] %v16957_v28  ;;  %v2834_v31 = vrot.slane %v2826_v17, %v15503_v9  ;;  %v3570_v18 = vcombine.low %v16941_v36, %v16957_v28  ;;  %v16974_v55 = vrot.slane %v3569_v57, %v15503_v9  ;;  %v2231_v61 = vshrl.u32 %v16950_v29, 16 }
  0xba   : > { %v16977_v37 = vrot.slane %v1721_v24, %v15503_v9  ;;  %v2841_v54 = vrot.slane %v2827_v38, %v15503_v9  ;;  %v16983_v17 = vsel %vm16182_vm2, %v2223_v63, %v2228_v46  ;;  %v2236_v12 = vshll.u32 %v21083_v42, 16 }
  0xbb   : > { %21086 = vst [vmem:[#allocation22_spill] sm:$0xff] %v16974_v55  ;;  %21088 = vst [vmem:[#allocation147_spill] sm:$0xff] %v16983_v17  ;;  %v2239_v58 = vshrl.u32 %v21083_v42, 16  ;;  %v3584_v36 = vrot.slane %v3570_v18, %v15503_v9  ;;  %v2244_v57 = vshll.u32 %v21085_v59, 16  ;;  %v2252_v24 = vshll.u32 %v16954_v19, 16 }
  0xbc   : > { %21087 = vst [vmem:[#allocation146_spill] sm:$0xff] %v16977_v37  ;;  %v2842_v5 = vcombine.low %v2834_v31, %v2841_v54  ;;  %v16993_v38 = vsel %vm16182_vm2, %v2231_v61, %v2236_v12  ;;  %v2255_v63 = vshrl.u32 %v16954_v19, 16  ;;  %v2260_v46 = vshll.u32 %v16963_v4, 16  ;;  %v21093_v12 = vld [vmem:[#allocation23_spill] sm:$0xff] }
  0xbd   : > { %21089 = vst [vmem:[#allocation148_spill] sm:$0xff] %v16993_v38  ;;  %v3585_v50 = vcombine.low %v16974_v55, %v3584_v36  ;;  %v17000_v18 = vsel %vm16182_vm2, %v2239_v58, %v2244_v57  ;;  %v17004_v8 = vsel %vm16182_vm2, %v2247_v15, %v2252_v24  ;;  %v2263_v54 = vshrl.u32 %v16963_v4, 16  ;;  %v21094_v58 = vld [vmem:[#allocation25_spill] sm:$0xff] }
  0xbe   : > { %21090 = vst [vmem:[#allocation149_spill] sm:$0xff] %v17000_v18  ;;  %21091 = vst [vmem:[#allocation150_spill] sm:$0xff] %v17004_v8  ;;  %14686 = vmatprep.mubr.msk.bf16.mxu1 %vm1479_vm1, %v2842_v5  ;;  %v17010_v31 = vsel %vm16182_vm2, %v2255_v63, %v2260_v46  ;;  %v2268_v61 = vshll.u32 %v21093_v12, 16  ;;  %v2271_v36 = vshrl.u32 %v21093_v12, 16  ;;  %v2276_v55 = vshll.u32 %v16977_v37, 16  ;;  %v21095_v15 = vld [vmem:[#allocation29_spill] sm:$0xff] }
  0xbf   : > { %21092 = vst [vmem:[#allocation151_spill] sm:$0xff] %v17010_v31  ;;  %14709 = vmatmul.mubr.msk.bf16.gmra.mrb[20].mxu0 %vm1479_vm1, %v3585_v50  ;;  %v2280_v57 = vshrl.u32 %v21094_v58, 16  ;;  %v2285_v24 = vshll.u32 %v21095_v15, 16  ;;  %v2843_v0 = vcombine.low %v16983_v17, %v16993_v38  ;;  %v2844_v5 = vcombine.low %v17000_v18, %v17004_v8  ;;  %v21116_v18 = vld [vmem:[#allocation39_spill] sm:$0xff] }
  0xc0   : > { %v17024_v63 = vsel %vm16182_vm2, %v2263_v54, %v2268_v61  ;;  %v17028_v46 = vsel %vm16182_vm2, %v2271_v36, %v2276_v55  ;;  %v3586_v50 = vcombine.low %v21057_v14, %v21058_v45  ;;  %v13843_v28 = vcombine.high %v21057_v14, %v21058_v45 }
  0xc1   : > { %21096 = vst [vmem:[#allocation29_spill] sm:$0xff] %v17024_v63  ;;  %21097 = vst [vmem:[#allocation152_spill] sm:$0xff] %v17028_v46  ;;  %v17036_v38 = vsel %vm16182_vm2, %v2280_v57, %v2285_v24  ;;  %v2845_v8 = vcombine.low %v17010_v31, %v17024_v63  ;;  %v17041_v54 = vrot.slane %v2843_v0, %v15503_v9  ;;  %v2325_v17 = vshll.u32 %v21116_v18, 16 }
  0xc2   : > { %21098 = vst [vmem:[#allocation153_spill] sm:$0xff] %v17036_v38  ;;  %v17044_v61 = vrot.slane %v2844_v5, %v15503_v9  ;;  %v2846_v55 = vcombine.low %v17028_v46, %v17036_v38  ;;  %v3588_v36 = vcombine.low %v21069_v27, %v16834_v56  ;;  %v3589_v45 = vcombine.low %v21070_v25, %v16828_v34  ;;  %v15425_v5 = vld.sshfl [vmem:[%s15508_s30 + $0x5c] sm:$0x11 pattern:$0x75316420]  ;;  %v21109_v25 = vld [vmem:[#allocation34_spill] sm:$0xff] }
  0xc3   : > { %21099 = vst [vmem:[#allocation154_spill] sm:$0xff] %v17041_v54  ;;  %v17053_v14 = vrot.slane %v3586_v50, %v15503_v9  ;;  %v17056_v57 = vrot.slane %v2845_v8, %v15503_v9  ;;  %v17061_v24 = vrot.slane %v13843_v28, %v15503_v9  ;;  %v1729_v38 = vcombine.high %v15425_v5, %v15425_v5  ;;  %v21108_v5 = vld [vmem:[#allocation33_spill] sm:$0xff]  ;;  %v21117_v27 = vld [vmem:[#allocation43_spill] sm:$0xff] }
  0xc4   : > { %21100 = vst [vmem:[#allocation155_spill] sm:$0xff] %v17044_v61  ;;  %v2875_v0 = vcombine.low %v17041_v54, %v17044_v61  ;;  %v17065_v63 = vrot.slane %v2846_v55, %v15503_v9  ;;  %v17068_v56 = vrot.slane %v3588_v36, %v15503_v9  ;;  %v17071_v34 = vrot.slane %v3589_v45, %v15503_v9 }
  0xc5   : > { %21101 = vst [vmem:[#allocation156_spill] sm:$0xff] %v17053_v14  ;;  %21102 = vst [vmem:[#allocation157_spill] sm:$0xff] %v17056_v57  ;;  %v2288_v8 = vshrl.u32 %v21095_v15, 16  ;;  %v3618_v61 = vcombine.low %v17053_v14, %v17061_v24  ;;  %v17078_v28 = vrot.slane %v1729_v38, %v15503_v9  ;;  %v2293_v54 = vshll.u32 %v21108_v5, 16  ;;  %v21112_v14 = vld [vmem:[#allocation35_spill] sm:$0xff] }
  0xc6   : > { %21103 = vst [vmem:[#allocation158_spill] sm:$0xff] %v17061_v24  ;;  %21104 = vst [vmem:[#allocation159_spill] sm:$0xff] %v17065_v63  ;;  %v2883_v50 = vrot.slane %v2875_v0, %v15503_v9  ;;  %v2876_v55 = vcombine.low %v17056_v57, %v17065_v63  ;;  %v3619_v36 = vcombine.low %v17068_v56, %v17071_v34  ;;  %v2296_v45 = vshrl.u32 %v21108_v5, 16 }
  0xc7   : > { %21105 = vst [vmem:[#allocation160_spill] sm:$0xff] %v17068_v56  ;;  %21106 = vst [vmem:[#allocation161_spill] sm:$0xff] %v17071_v34  ;;  %v2301_v46 = vshll.u32 %v21109_v25, 16  ;;  %v17088_v0 = vrot.slane %v3618_v61, %v15503_v9  ;;  %v17092_v24 = vsel %vm16182_vm2, %v2288_v8, %v2293_v54  ;;  %v2304_v38 = vshrl.u32 %v21109_v25, 16  ;;  %v21115_v54 = vld [vmem:[#allocation38_spill] sm:$0xff] }
  0xc8   : > { %21107 = vst [vmem:[#allocation162_spill] sm:$0xff] %v17078_v28  ;;  %21111 = vst [vmem:[#allocation34_spill] sm:$0xff] %v17092_v24  ;;  %v2309_v31 = vshll.u32 %v21112_v14, 16  ;;  %v2890_v63 = vrot.slane %v2876_v55, %v15503_v9  ;;  %v3633_v57 = vrot.slane %v3619_v36, %v15503_v9  ;;  %v2312_v56 = vshrl.u32 %v21112_v14, 16 }
  0xc9   : > { %21110 = vst [vmem:[#allocation33_spill] sm:$0xff] %v17088_v0  ;;  %v17100_v5 = vsel %vm16182_vm2, %v2296_v45, %v2301_v46  ;;  %v2317_v8 = vshll.u32 %v21115_v54, 16  ;;  %v2320_v25 = vshrl.u32 %v21115_v54, 16  ;;  %v2328_v36 = vshrl.u32 %v21116_v18, 16 }
  0xca   : > { %21113 = vst [vmem:[#allocation35_spill] sm:$0xff] %v17100_v5  ;;  %v17105_v61 = vsel %vm16182_vm2, %v2304_v38, %v2309_v31  ;;  %v2891_v34 = vcombine.low %v2883_v50, %v2890_v63  ;;  %v3634_v55 = vcombine.low %v17088_v0, %v3633_v57  ;;  %v2333_v46 = vshll.u32 %v21117_v27, 16  ;;  %v21158_v0 = vld [vmem:[#allocation66_spill] sm:$0xff] }
  0xcb   : > { %21114 = vst [vmem:[#allocation163_spill] sm:$0xff] %v17105_v61  ;;  %v17115_v45 = vsel %vm16182_vm2, %v2312_v56, %v2317_v8  ;;  %v17119_v31 = vsel %vm16182_vm2, %v2320_v25, %v2325_v17  ;;  %v2336_v38 = vshrl.u32 %v21117_v27, 16  ;;  %v2341_v43 = vshll.u32 %v21120_v1, 16 }
  0xcc   : > { %21118 = vst [vmem:[#allocation38_spill] sm:$0xff] %v17115_v45  ;;  %21119 = vst [vmem:[#allocation39_spill] sm:$0xff] %v17119_v31  ;;  %14687 = vmatmul.mubr.msk.bf16.gmra.mrb[24].mxu1 %vm1479_vm1, %v2891_v34  ;;  %14712 = vmatprep.mubr.msk.bf16.mxu0 %vm1479_vm1, %v3634_v55  ;;  %v17127_v18 = vsel %vm16182_vm2, %v2328_v36, %v2333_v46  ;;  %v2344_v63 = vshrl.u32 %v21120_v1, 16  ;;  %v2349_v56 = vshll.u32 %v17078_v28, 16 }
  0xcd   : > { %21121 = vst [vmem:[#allocation43_spill] sm:$0xff] %v17127_v18  ;;  %v2892_v17 = vcombine.low %v17092_v24, %v17100_v5  ;;  %v17135_v27 = vsel %vm16182_vm2, %v2336_v38, %v2341_v43  ;;  %v2893_v57 = vcombine.low %v17105_v61, %v17115_v45  ;;  %v2894_v34 = vcombine.low %v17119_v31, %v17127_v18 }
  0xce   : > { %21122 = vst [vmem:[#allocation164_spill] sm:$0xff] %v17135_v27  ;;  %v3635_v50 = vcombine.low %v16950_v29, %v21083_v42  ;;  %v17145_v8 = vsel %vm16182_vm2, %v2344_v63, %v2349_v56  ;;  %v3636_v43 = vcombine.low %v21085_v59, %v16954_v19  ;;  %v3637_v55 = vcombine.low %v16963_v4, %v21093_v12  ;;  %v21130_v4 = vld [vmem:[#allocation37_spill] sm:$0xff] }
  0xcf   : > { %21123 = vst [vmem:[#allocation165_spill] sm:$0xff] %v17145_v8  ;;  %v17148_v25 = vrot.slane %v2892_v17, %v15503_v9  ;;  %v2895_v36 = vcombine.low %v17135_v27, %v17145_v8  ;;  %v17157_v46 = vrot.slane %v2893_v57, %v15503_v9  ;;  %v17160_v29 = vrot.slane %v2894_v34, %v15503_v9  ;;  %v21133_v34 = vld [vmem:[#allocation41_spill] sm:$0xff] }
  0xd0   : > { %v3638_v42 = vcombine.low %v16977_v37, %v21095_v15  ;;  %v17165_v38 = vrot.slane %v3635_v50, %v15503_v9  ;;  %v17168_v59 = vrot.slane %v3636_v43, %v15503_v9  ;;  %v17171_v19 = vrot.slane %v3637_v55, %v15503_v9  ;;  %v21134_v55 = vld [vmem:[#allocation42_spill] sm:$0xff]  ;;  %v21135_v37 = vld [vmem:[#allocation45_spill] sm:$0xff] }
  0xd1   : > { %21124 = vst [vmem:[#allocation166_spill] sm:$0xff] %v17148_v25  ;;  %21125 = vst [vmem:[#allocation167_spill] sm:$0xff] %v17157_v46  ;;  %v17175_v63 = vcombine.high %v21130_v4, %v21130_v4  ;;  %v17178_v56 = vrot.slane %v2895_v36, %v15503_v9  ;;  %v2924_v17 = vcombine.low %v17148_v25, %v17157_v46  ;;  %v2353_v46 = vshrl.u32 %v21130_v4, 16 }
  0xd2   : > { %21126 = vst [vmem:[#allocation168_spill] sm:$0xff] %v17160_v29  ;;  %21127 = vst [vmem:[#allocation169_spill] sm:$0xff] %v17165_v38  ;;  %v17183_v57 = vrot.slane %v3638_v42, %v15503_v9  ;;  %v17187_v50 = vcombine.high %v21133_v34, %v21133_v34  ;;  %v3667_v43 = vcombine.low %v17165_v38, %v17168_v59  ;;  %v2361_v18 = vshrl.u32 %v21133_v34, 16 }
  0xd3   : > { %21128 = vst [vmem:[#allocation170_spill] sm:$0xff] %v17168_v59  ;;  %21129 = vst [vmem:[#allocation171_spill] sm:$0xff] %v17171_v19  ;;  %v17193_v12 = vcombine.high %v21134_v55, %v21134_v55  ;;  %v17197_v36 = vcombine.high %v21135_v37, %v21135_v37  ;;  %v2925_v42 = vcombine.low %v17160_v29, %v17178_v56  ;;  %v2358_v59 = vshll.u32 %v21133_v34, 16 }
  0xd4   : > { %21131 = vst [vmem:[#allocation172_spill] sm:$0xff] %v17178_v56  ;;  %21132 = vst [vmem:[#allocation173_spill] sm:$0xff] %v17183_v57  ;;  %v2932_v25 = vrot.slane %v2924_v17, %v15503_v9  ;;  %v3668_v8 = vcombine.low %v17171_v19, %v17183_v57  ;;  %v17207_v38 = vrot.slane %v3667_v43, %v15503_v9  ;;  %v2366_v27 = vshll.u32 %v17175_v63, 16 }
  0xd5   : > { %v2369_v45 = vshrl.u32 %v17175_v63, 16  ;;  %v2939_v31 = vrot.slane %v2925_v42, %v15503_v9  ;;  %v17216_v17 = vsel %vm16182_vm2, %v2353_v46, %v2358_v59  ;;  %v2374_v57 = vshll.u32 %v17187_v50, 16 }
  0xd6   : > { %21136 = vst [vmem:[#allocation42_spill] sm:$0xff] %v17207_v38  ;;  %v3682_v56 = vrot.slane %v3668_v8, %v15503_v9  ;;  %21137 = vst [vmem:[#allocation45_spill] sm:$0xff] %v17216_v17  ;;  %v17221_v43 = vsel %vm16182_vm2, %v2361_v18, %v2366_v27  ;;  %v2377_v29 = vshrl.u32 %v17187_v50, 16  ;;  %v2382_v5 = vshll.u32 %v21134_v55, 16 }
  0xd7   : > { %21138 = vst [vmem:[#allocation174_spill] sm:$0xff] %v17221_v43  ;;  %v2385_v61 = vshrl.u32 %v21134_v55, 16  ;;  %v2940_v24 = vcombine.low %v2932_v25, %v2939_v31  ;;  %v17229_v8 = vsel %vm16182_vm2, %v2369_v45, %v2374_v57  ;;  %v2390_v46 = vshll.u32 %v21135_v37, 16 }
  0xd8   : > { %v3683_v42 = vcombine.low %v17207_v38, %v3682_v56  ;;  %21139 = vst [vmem:[#allocation175_spill] sm:$0xff] %v17229_v8  ;;  %v17234_v59 = vsel %vm16182_vm2, %v2377_v29, %v2382_v5  ;;  %v2393_v18 = vshrl.u32 %v21135_v37, 16  ;;  %v2398_v27 = vshll.u32 %v17193_v12, 16  ;;  %v21142_v5 = vld [vmem:[#allocation58_spill] sm:$0xff] }
  0xd9   : > { %21140 = vst [vmem:[#allocation176_spill] sm:$0xff] %v17234_v59  ;;  %v2401_v4 = vshrl.u32 %v17193_v12, 16  ;;  %14690 = vmatprep.mubr.msk.bf16.mxu1 %vm1479_vm1, %v2940_v24  ;;  %v17243_v45 = vsel %vm16182_vm2, %v2385_v61, %v2390_v46  ;;  %v2406_v31 = vshll.u32 %v17197_v36, 16  ;;  %v2409_v25 = vshrl.u32 %v17197_v36, 16 }
  0xda   : > { %14713 = vmatmul.mubr.msk.bf16.gmra.mrb[24].mxu0 %vm1479_vm1, %v3683_v42  ;;  %21141 = vst [vmem:[#allocation177_spill] sm:$0xff] %v17243_v45  ;;  %v2414_v29 = vshll.u32 %v21142_v5, 16  ;;  %v17250_v56 = vsel %vm16182_vm2, %v2393_v18, %v2398_v27  ;;  %v2941_v57 = vcombine.low %v17216_v17, %v17221_v43  ;;  %v2942_v24 = vcombine.low %v17229_v8, %v17234_v59 }
  0xdb   : > { %21143 = vst [vmem:[#allocation178_spill] sm:$0xff] %v17250_v56  ;;  %v13844_v61 = vcombine.high %v21094_v58, %v21095_v15  ;;  %v17260_v42 = vsel %vm16182_vm2, %v2401_v4, %v2406_v31  ;;  %v2943_v18 = vcombine.low %v17243_v45, %v17250_v56  ;;  %v3685_v27 = vcombine.low %v21112_v14, %v21115_v54 }
  0xdc   : > { %21144 = vst [vmem:[#allocation179_spill] sm:$0xff] %v17260_v42  ;;  %v17264_v46 = vsel %vm16182_vm2, %v2409_v25, %v2414_v29  ;;  %v17273_v43 = vrot.slane %v2941_v57, %v15503_v9  ;;  %v17276_v8 = vrot.slane %v2942_v24, %v15503_v9  ;;  %v13845_v4 = vcombine.high %v21112_v14, %v21115_v54  ;;  %v15426_v54 = vld.sshfl [vmem:[%s15508_s30 + $0x68] sm:$0x11 pattern:$0x75316420] }
  0xdd   : > { %21145 = vst [vmem:[#allocation180_spill] sm:$0xff] %v17264_v46  ;;  %v2944_v59 = vcombine.low %v17260_v42, %v17264_v46  ;;  %v17281_v31 = vrot.slane %v2943_v18, %v15503_v9  ;;  %v3687_v25 = vcombine.low %v21120_v1, %v17078_v28  ;;  %v17286_v29 = vrot.slane %v13844_v61, %v15503_v9  ;;  %v21154_v28 = vld [vmem:[#allocation60_spill] sm:$0xff] }
  0xde   : > { %21146 = vst [vmem:[#allocation181_spill] sm:$0xff] %v17273_v43  ;;  %21147 = vst [vmem:[#allocation182_spill] sm:$0xff] %v17276_v8  ;;  %v17289_v46 = vrot.slane %v3685_v27, %v15503_v9  ;;  %v2973_v24 = vcombine.low %v17273_v43, %v17276_v8  ;;  %v17297_v14 = vrot.slane %v13845_v4, %v15503_v9  ;;  %v2417_v27 = vshrl.u32 %v21142_v5, 16  ;;  %v21155_v43 = vld [vmem:[#allocation61_spill] sm:$0xff] }
  0xdf   : > { %21148 = vst [vmem:[#allocation183_spill] sm:$0xff] %v17281_v31  ;;  %21149 = vst [vmem:[#allocation184_spill] sm:$0xff] %v17286_v29  ;;  %v17292_v57 = vrot.slane %v2944_v59, %v15503_v9  ;;  %v1737_v18 = vcombine.high %v15426_v54, %v15426_v54  ;;  %v17301_v56 = vrot.slane %v3687_v25, %v15503_v9  ;;  %v2426_v42 = vshrl.u32 %v21154_v28, 16 }
  0xe0   : > { %21150 = vst [vmem:[#allocation185_spill] sm:$0xff] %v17289_v46  ;;  %21152 = vst [vmem:[#allocation187_spill] sm:$0xff] %v17297_v14  ;;  %v3716_v61 = vcombine.low %v17286_v29, %v17289_v46  ;;  %v2981_v8 = vrot.slane %v2973_v24, %v15503_v9  ;;  %v2431_v54 = vshll.u32 %v21155_v43, 16  ;;  %v2434_v46 = vshrl.u32 %v21155_v43, 16  ;;  %v21156_v29 = vld [vmem:[#allocation63_spill] sm:$0xff] }
  0xe1   : > { %21151 = vst [vmem:[#allocation186_spill] sm:$0xff] %v17292_v57  ;;  %21153 = vst [vmem:[#allocation188_spill] sm:$0xff] %v17301_v56  ;;  %v2974_v59 = vcombine.low %v17281_v31, %v17292_v57  ;;  %v17311_v4 = vrot.slane %v1737_v18, %v15503_v9  ;;  %v3717_v25 = vcombine.low %v17297_v14, %v17301_v56  ;;  %v2439_v17 = vshll.u32 %v21156_v29, 16  ;;  %v21157_v56 = vld [vmem:[#allocation65_spill] sm:$0xff] }
  0xe2   : > { %v17317_v45 = vrot.slane %v3716_v61, %v15503_v9  ;;  %v17325_v24 = vsel %vm16182_vm2, %v2426_v42, %v2431_v54  ;;  %v2442_v18 = vshrl.u32 %v21156_v29, 16  ;;  %v2447_v14 = vshll.u32 %v21157_v56, 16 }
  0xe3   : > { %v2988_v38 = vrot.slane %v2974_v59, %v15503_v9  ;;  %v2422_v57 = vshll.u32 %v17311_v4, 16  ;;  %v3731_v31 = vrot.slane %v3717_v25, %v15503_v9  ;;  %v17331_v61 = vsel %vm16182_vm2, %v2434_v46, %v2439_v17  ;;  %v21159_v17 = vld [vmem:[#allocation67_spill] sm:$0xff] }
  0xe4   : > { %v2450_v1 = vshrl.u32 %v21157_v56, 16  ;;  %v2455_v42 = vshll.u32 %v21158_v0, 16  ;;  %v2458_v54 = vshrl.u32 %v21158_v0, 16  ;;  %v17344_v25 = vsel %vm16182_vm2, %v2442_v18, %v2447_v14 }
  0xe5   : > { %v2989_v19 = vcombine.low %v2981_v8, %v2988_v38  ;;  %v17337_v59 = vsel %vm16182_vm2, %v2417_v27, %v2422_v57  ;;  %v3732_v29 = vcombine.low %v17317_v45, %v3731_v31  ;;  %v2463_v46 = vshll.u32 %v21159_v17, 16  ;;  %v21160_v8 = vld [vmem:[#allocation69_spill] sm:$0xff] }
  0xe6   : > { %v2466_v58 = vshrl.u32 %v21159_v17, 16  ;;  %v17351_v38 = vsel %vm16182_vm2, %v2450_v1, %v2455_v42  ;;  %v2471_v56 = vshll.u32 %v21160_v8, 16  ;;  %v2474_v57 = vshrl.u32 %v21160_v8, 16 }
  0xe7   : > { %14691 = vmatmul.mubr.msk.bf16.gmra.mrb[28].mxu1 %vm1479_vm1, %v2989_v19  ;;  %v2990_v31 = vcombine.low %v17337_v59, %v17325_v24  ;;  %14716 = vmatprep.mubr.msk.bf16.mxu0 %vm1479_vm1, %v3732_v29  ;;  %v17360_v14 = vsel %vm16182_vm2, %v2458_v54, %v2463_v46  ;;  %v2991_v19 = vcombine.low %v17331_v61, %v17344_v25  ;;  %v21161_v42 = vshll.u32 %v16037_v48, 16 }
  0xe8   : > { %v3733_v1 = vcombine.low %v21133_v34, %v17175_v63  ;;  %v3734_v27 = vcombine.low %v17187_v50, %v21134_v55  ;;  %v17370_v18 = vsel %vm16182_vm2, %v2466_v58, %v2471_v56  ;;  %v2992_v54 = vcombine.low %v17351_v38, %v17360_v14 }
  0xe9   : > { %v17376_v29 = vsel %vm16182_vm2, %v2474_v57, %v21161_v42  ;;  %v17381_v46 = vrot.slane %v2990_v31, %v15503_v9  ;;  %v17386_v50 = vrot.slane %v2991_v19, %v15503_v9  ;;  %v3735_v58 = vcombine.low %v21135_v37, %v17193_v12  ;;  %v15427_v31 = vld.sshfl [vmem:[%s15508_s30 + $0x74] sm:$0x11 pattern:$0x75316420] }
  0xea   : > { %v2993_v63 = vcombine.low %v17370_v18, %v17376_v29  ;;  %v3736_v55 = vcombine.low %v17197_v36, %v21142_v5  ;;  %v17393_v8 = vrot.slane %v2992_v54, %v15503_v9  ;;  %v17396_v56 = vrot.slane %v3733_v1, %v15503_v9  ;;  %v13860_v54 = vld.sshfl [vmem:[%s15508_s30 + $0x78] sm:$0x33 pattern:$0x75316420] }
  0xeb   : > { %21162 = vst [vmem:[#allocation60_spill] sm:$0xff] %v17381_v46  ;;  %21163 = vst [vmem:[#allocation61_spill] sm:$0xff] %v17386_v50  ;;  %v17399_v57 = vrot.slane %v3734_v27, %v15503_v9  ;;  %v1745_v42 = vcombine.high %v15427_v31, %v15427_v31  ;;  %v3022_v37 = vcombine.low %v17381_v46, %v17386_v50  ;;  %v2482_v31 = vshrl.u32 %v16037_v48, 16 }
  0xec   : > { %21164 = vst [vmem:[#allocation63_spill] sm:$0xff] %v17393_v8  ;;  %21165 = vst [vmem:[#allocation65_spill] sm:$0xff] %v17396_v56  ;;  %v17403_v19 = vrot.slane %v2993_v63, %v15503_v9  ;;  %v17408_v12 = vrot.slane %v3735_v58, %v15503_v9  ;;  %v17411_v36 = vrot.slane %v3736_v55, %v15503_v9  ;;  %v21170_v63 = vld [vmem:[#allocation68_spill] sm:$0xff] }
  0xed   : > { %21166 = vst [vmem:[#allocation66_spill] sm:$0xff] %v17399_v57  ;;  %v3765_v1 = vcombine.low %v17396_v56, %v17399_v57  ;;  %v17417_v27 = vrot.slane %v1745_v42, %v15503_v9  ;;  %v2487_v5 = vshll.u32 %v21170_v63, 16  ;;  %v3030_v58 = vrot.slane %v3022_v37, %v15503_v9 }
  0xee   : > { %21167 = vst [vmem:[#allocation67_spill] sm:$0xff] %v17403_v19  ;;  %21168 = vst [vmem:[#allocation69_spill] sm:$0xff] %v17408_v12  ;;  %v3023_v50 = vcombine.low %v17393_v8, %v17403_v19  ;;  %v3766_v55 = vcombine.low %v17408_v12, %v17411_v36  ;;  %v2490_v46 = vshrl.u32 %v21170_v63, 16  ;;  %v4092_v57 = vcombine.high %v13860_v54, %v13860_v54 }
  0xef   : > { %21169 = vst [vmem:[#allocation189_spill] sm:$0xff] %v17411_v36  ;;  %v3773_v34 = vrot.slane %v3765_v1, %v15503_v9  ;;  %v17430_v42 = vsel %vm16182_vm2, %v2482_v31, %v2487_v5  ;;  %v2495_v48 = vshll.u32 %v17417_v27, 16  ;;  %v17436_v37 = vrot.slane %v13860_v54, %v15503_v9 }
  0xf0   : > { %v3037_v56 = vrot.slane %v3023_v50, %v15503_v9  ;;  %v3780_v19 = vrot.slane %v3766_v55, %v15503_v9  ;;  %v17445_v5 = vrot.slane %v4092_v57, %v15503_v9  ;;  %v3782_v31 = vcombine.low %v17311_v4, %v21155_v43 }
  0xf1   : > { %v17442_v1 = vsel %vm16182_vm2, %v2490_v46, %v2495_v48  ;;  %v13846_v50 = vcombine.high %v21154_v28, %v21155_v43  ;;  %v4608_v36 = vshrl.u32 %v17436_v37, 16  ;;  %v3784_v57 = vcombine.low %v21158_v0, %v21159_v17 }
  0xf2   : > { %v3038_v55 = vcombine.low %v3030_v58, %v3037_v56  ;;  %v17451_v12 = vcombine.low %v3773_v34, %v3780_v19  ;;  %v3039_v54 = vcombine.low %v17430_v42, %v17442_v1  ;;  %v4613_v46 = vshll.u32 %v17445_v5, 16 }
  0xf3   : > { %v13847_v48 = vcombine.high %v21158_v0, %v21159_v17  ;;  %v17462_v8 = vrot.slane %v3782_v31, %v15503_v9  ;;  %v17471_v56 = vrot.slane %v13846_v50, %v15503_v9  ;;  %v3831_v19 = vcombine.low %v21170_v63, %v17417_v27 }
  0xf4   : > { %14694 = vmatprep.mubr.msk.bf16.mxu1 %vm1479_vm1, %v3038_v55  ;;  %14717 = vmatmul.mubr.msk.bf16.gmra.mrb[28].mxu0 %vm1479_vm1, %v17451_v12  ;;  %v17468_v34 = vrot.slane %v3039_v54, %v15503_v9  ;;  %v5809_v0 = vsel %vm1516_vm0, %v16431_v60, 0  ;;  %v17479_v17 = vsel %vm16182_vm2, %v4608_v36, %v4613_v46  ;;  %v17482_v58 = vrot.slane %v3784_v57, %v15503_v9 }
  0xf5   : > { %21171 = vst [vmem:[#allocation68_spill] sm:$0xff] %v17462_v8  ;;  %21173 = vst [vmem:[#allocation191_spill] sm:$0xff] %v17471_v56  ;;  %v17485_v31 = vrot.slane %v13847_v48, %v15503_v9  ;;  %v4149_v50 = vcombine.low %v15681_v39, %v15696_v62  ;;  %v3814_v60 = vcombine.low %v17462_v8, %v17471_v56  ;;  %v21178_v8 = vld [vmem:[#allocation88_spill] sm:$0xff] }
  0xf6   : > { %21172 = vst [vmem:[#allocation190_spill] sm:$0xff] %v17468_v34  ;;  %21174 = vst [vmem:[#allocation192_spill] sm:$0xff] %v17479_v17  ;;  %v3053_v55 = vrot.slane %v17468_v34, %v15503_v9  ;;  %v17496_v36 = vrot.slane %v3831_v19, %v15503_v9  ;;  %v4682_v39 = vcombine.low %v16245_v21, %v16261_v26  ;;  %v21180_v21 = vld [vmem:[#allocation92_spill] sm:$0xff] }
  0xf7   : > { %21175 = vst [vmem:[#allocation193_spill] sm:$0xff] %v17482_v58  ;;  %21176 = vst [vmem:[#allocation194_spill] sm:$0xff] %v17485_v31  ;;  %v3815_v46 = vcombine.low %v17482_v58, %v17485_v31  ;;  %v4156_v57 = vrot.slane %v4149_v50, %v15503_v9  ;;  %v4683_v62 = vcombine.low %v16253_v49, %v16270_v16  ;;  %v21179_v31 = vld [vmem:[#allocation87_spill] sm:$0xff] }
  0xf8   : > { %21177 = vst [vmem:[#allocation195_spill] sm:$0xff] %v17496_v36  ;;  %14695 = vmatmul.mubr.msk.bf16.gmra.mrb[32].mxu1 %vm1479_vm1, %v3053_v55  ;;  %v3822_v48 = vrot.slane %v3814_v60, %v15503_v9  ;;  %v3845_v54 = vrot.slane %v17496_v36, %v15503_v9  ;;  %v4684_v19 = vcombine.low %v16283_v40, %v16292_v6 }
  0xf9   : > { %v4685_v58 = vcombine.low %v21179_v31, %v21178_v8  ;;  %v17514_v50 = vrot.slane %v3815_v46, %v15503_v9  ;;  %v4157_v26 = vcombine.low %v4156_v57, %v21180_v21  ;;  %v4692_v49 = vrot.slane %v4682_v39, %v15503_v9  ;;  %v21183_v21 = vld [vmem:[#allocation117_spill] sm:$0xff] }
  0xfa   : > { %v4699_v16 = vrot.slane %v4683_v62, %v15503_v9  ;;  %v4706_v55 = vrot.slane %v4684_v19, %v15503_v9  ;;  %v4183_v36 = vcombine.low %v15928_v32, %v15939_v52  ;;  %v4763_v40 = vcombine.low %v16565_v10, %v16575_v47 }
  0xfb   : > { %v4713_v60 = vrot.slane %v4685_v58, %v15503_v9  ;;  %v3830_v6 = vcombine.low %v3822_v48, %v17514_v50  ;;  %v4164_v8 = vrot.slane %v4157_v26, %v15503_v9  ;;  %v4764_v46 = vcombine.low %v16691_v23, %v16706_v11  ;;  %v21181_v48 = vld [vmem:[#allocation106_spill] sm:$0xff]  ;;  %v21184_v26 = vld [vmem:[#allocation103_spill] sm:$0xff] }
  0xfc   : > { %v4714_v31 = vcombine.low %v4692_v49, %v4699_v16  ;;  %v4190_v39 = vrot.slane %v4183_v36, %v15503_v9  ;;  %v4771_v62 = vrot.slane %v4763_v40, %v15503_v9  ;;  %v4200_v58 = vcombine.low %v16078_v44, %v16103_v51  ;;  %v21187_v40 = vld [vmem:[#allocation5_spill] sm:$0xff] }
  0xfd   : > { %v4715_v57 = vcombine.low %v4706_v55, %v4713_v60  ;;  %14720 = vmatprep.mubr.msk.bf16.mxu0 %vm1479_vm1, %v3830_v6  ;;  %v4165_v32 = vcombine.low %v4164_v8, %v16464_v35  ;;  %v4778_v10 = vrot.slane %v4764_v46, %v15503_v9  ;;  %v6262_v47 = vsel %vm1516_vm0, %v16498_v33, 0  ;;  %v21188_v8 = vld [vmem:[#allocation80_spill] sm:$0xff] }
  0xfe   : > { %v4722_v52 = vrot.slane %v4714_v31, %v15503_v9  ;;  %14721 = vmatmul.mubr.msk.bf16.gmra.mrb[32].mxu0 %vm1479_vm1, %v3845_v54  ;;  %v4191_v11 = vcombine.low %v16675_v2, %v4190_v39  ;;  %v4207_v36 = vrot.slane %v4200_v58, %v15503_v9  ;;  %v4780_v44 = vcombine.low %v16459_v7, %v16472_v22  ;;  %v21182_v54 = vld [vmem:[#allocation94_spill] sm:$0xff]  ;;  %v21186_v22 = vld [vmem:[#allocation120_spill] sm:$0xff]  ;;  %v21190_v39 = vld [vmem:[#allocation105_spill] sm:$0xff] }
  0xff   : > { %v4729_v23 = vrot.slane %v4715_v57, %v15503_v9  ;;  %14726 = vmatprep.mubr.msk.bf16.mxu1 %vm1479_vm1, %v4165_v32  ;;  %v4779_v51 = vcombine.low %v4771_v62, %v4778_v10  ;;  %v4781_v35 = vcombine.low %v16480_v13, %v16484_v53  ;;  %v4782_v33 = vcombine.low %v16489_v20, %v16503_v41  ;;  %v17562_v13 = vld [vmem:[%s20581_s1 + $0xe] sm:$0x3]  ;;  %v21191_v58 = vld [vmem:[#allocation109_spill] sm:$0xff] }
 0x100   : > { %v4783_v19 = vcombine.low %v21182_v54, %v21181_v48  ;;  %v21185_v49 = vcombine.low %v21183_v21, %v21184_v26  ;;  %v4198_v7 = vrot.slane %v4191_v11, %v15503_v9  ;;  %v4208_v55 = vcombine.low %v21186_v22, %v4207_v36  ;;  %v21189_v57 = vld [vmem:[#allocation107_spill] sm:$0xff]  ;;  %v21193_v11 = vld [vmem:[#allocation78_spill] sm:$0xff] }
 0x101   : > { %v4730_v16 = vcombine.low %v4722_v52, %v4729_v23  ;;  %v4790_v60 = vrot.slane %v4780_v44, %v15503_v9  ;;  %v4797_v53 = vrot.slane %v4781_v35, %v15503_v9  ;;  %v4804_v20 = vrot.slane %v4782_v33, %v15503_v9  ;;  %v21194_v36 = vld [vmem:[#allocation110_spill] sm:$0xff]  ;;  %v21196_v33 = vld [vmem:[#allocation121_spill] sm:$0xff]  ;;  %v21197_v48 = vld [vmem:[#allocation111_spill] sm:$0xff] }
 0x102   : > { %14727 = vmatmul.mubr.msk.bf16.vlgmr.msra.gmra.mrb[36].mxu1 %vm1479_vm1, %v21185_v49  ;;  %v4811_v41 = vrot.slane %v4783_v19, %v15503_v9  ;;  %v4217_v6 = vcombine.low %v21187_v40, %v21036_v3  ;;  %v4199_v31 = vcombine.low %v4198_v7, %v21188_v8  ;;  %v4215_v46 = vrot.slane %v4208_v55, %v15503_v9  ;;  %v21195_v3 = vld [vmem:[#allocation11_spill] sm:$0xff]  ;;  %v21202_v8 = vld [vmem:[#allocation122_spill] sm:$0xff] }
 0x103   : > { %14777 = vmatpush3.bf16.msra.mxu1 %v5809_v0  ;;  %14752 = vmatprep.mubr.msk.bf16.mxu0 %vm1479_vm1, %v4730_v16  ;;  %v4829_v62 = vcombine.low %v21190_v39, %v21189_v57  ;;  %v21192_v0 = vld [vmem:[#allocation108_spill] sm:$0xff]  ;;  %v4812_v52 = vcombine.low %v4790_v60, %v4797_v53  ;;  %v4831_v44 = vcombine.low %v21194_v36, %v21193_v11  ;;  %v21198_v16 = vld [vmem:[#allocation19_spill] sm:$0xff]  ;;  %v21203_v39 = vld [vmem:[#allocation9_spill] sm:$0xff] }
 0x104   : > { %v4830_v32 = vcombine.low %v21192_v0, %v21191_v58  ;;  %v4813_v10 = vcombine.low %v4804_v20, %v4811_v41  ;;  %v4224_v23 = vrot.slane %v4217_v6, %v15503_v9  ;;  %15370 = vmatprep.subr.msk.bf16.mxu1 %vm1516_vm0, %v17562_v13  ;;  %14730 = vmatprep.mubr.msk.bf16.mxu1 %vm1479_vm1, %v4199_v31  ;;  %v21199_v20 = vld [vmem:[#allocation13_spill] sm:$0xff]  ;;  %v21200_v41 = vld [vmem:[#allocation10_spill] sm:$0xff]  ;;  %v21201_v6 = vld [vmem:[#allocation8_spill] sm:$0xff] }
 0x105   : > { %v4216_v35 = vcombine.low %v4215_v46, %v21195_v3  ;;  %v4832_v54 = vcombine.low %v21197_v48, %v21196_v33  ;;  %v4839_v19 = vrot.slane %v4829_v62, %v15503_v9  ;;  %v4820_v26 = vrot.slane %v4812_v52, %v15503_v9  ;;  %v21204_v62 = vld [vmem:[#allocation123_spill] sm:$0xff]  ;;  %v21205_v0 = vld [vmem:[#allocation125_spill] sm:$0xff]  ;;  %v21208_v36 = vld [vmem:[#allocation14_spill] sm:$0xff] }
 0x106   : > { %v4846_v21 = vrot.slane %v4830_v32, %v15503_v9  ;;  %v4827_v49 = vrot.slane %v4813_v10, %v15503_v9  ;;  %v4225_v7 = vcombine.low %v4224_v23, %v21198_v16  ;;  %v4853_v55 = vrot.slane %v4831_v44, %v15503_v9  ;;  %14753 = vmatmul.mubr.msk.bf16.vlgmr.msra.gmra.mrb[36].mxu0 %vm1479_vm1, %v4779_v51  ;;  %v21206_v32 = vld [vmem:[#allocation124_spill] sm:$0xff]  ;;  %v21207_v11 = vld [vmem:[#allocation7_spill] sm:$0xff]  ;;  %v21209_v3 = vld [vmem:[#allocation22_spill] sm:$0xff] }
 0x107   : > { %v4860_v60 = vrot.slane %v4832_v54, %v15503_v9  ;;  %v4234_v40 = vcombine.low %v21200_v41, %v21199_v20  ;;  %v4878_v31 = vcombine.low %v21202_v8, %v21201_v6  ;;  %14803 = vmatpush3.bf16.msra.mxu0 %v6262_v47  ;;  %v4879_v58 = vcombine.low %v21204_v62, %v21203_v39  ;;  %v17605_v51 = vld [vmem:[%s20581_s1 + $0x10] sm:$0x3]  ;;  %v21213_v20 = vld [vmem:[#allocation133_spill] sm:$0xff]  ;;  %v21215_v6 = vld [vmem:[#allocation134_spill] sm:$0xff] }
 0x108   : > { %v4861_v53 = vcombine.low %v4839_v19, %v4846_v21  ;;  %v4828_v46 = vcombine.low %v4820_v26, %v4827_v49  ;;  %v4232_v57 = vrot.slane %v4225_v7, %v15503_v9  ;;  %v4880_v52 = vcombine.low %v21206_v32, %v21205_v0  ;;  %v21210_v21 = vld [vmem:[#allocation161_spill] sm:$0xff]  ;;  %15371 = vmatprep.subr.msk.bf16.mxu0 %vm1516_vm0, %v17605_v51  ;;  %v21218_v32 = vld [vmem:[#allocation147_spill] sm:$0xff]  ;;  %v21304_v16 = vld [vmem:[#allocation28_spill] sm:$0xff] }
 0x109   : > { %v4862_v10 = vcombine.low %v4853_v55, %v4860_v60  ;;  %v4241_v47 = vrot.slane %v4234_v40, %v15503_v9  ;;  %v4881_v44 = vcombine.low %v21208_v36, %v21207_v11  ;;  %v4888_v48 = vrot.slane %v4878_v31, %v15503_v9  ;;  %v21211_v7 = vld [vmem:[#allocation25_spill] sm:$0xff]  ;;  %v21214_v40 = vld [vmem:[#allocation135_spill] sm:$0xff] }
 0x10a   : > { %14731 = vmatmul.mubr.msk.bf16.gmra.mrb[40].mxu1 %vm1479_vm1, %v4216_v35  ;;  %v4869_v23 = vrot.slane %v4861_v53, %v15503_v9  ;;  %14756 = vmatprep.mubr.msk.bf16.mxu0 %vm1479_vm1, %v4828_v46  ;;  %v4233_v33 = vcombine.low %v21209_v3, %v4232_v57  ;;  %v4895_v54 = vrot.slane %v4879_v58, %v15503_v9  ;;  %v21212_v53 = vld [vmem:[#allocation12_spill] sm:$0xff]  ;;  %v21216_v31 = vld [vmem:[#allocation137_spill] sm:$0xff]  ;;  %v21221_v3 = vld [vmem:[#allocation171_spill] sm:$0xff] }
 0x10b   : > { %v4902_v19 = vrot.slane %v4880_v52, %v15503_v9  ;;  %v4876_v35 = vrot.slane %v4862_v10, %v15503_v9  ;;  %v4242_v26 = vcombine.low %v4241_v47, %v21210_v21  ;;  %v4909_v49 = vrot.slane %v4881_v44, %v15503_v9  ;;  %v21217_v46 = vld [vmem:[#allocation136_spill] sm:$0xff]  ;;  %v21219_v52 = vld [vmem:[#allocation138_spill] sm:$0xff]  ;;  %v21220_v36 = vld [vmem:[#allocation33_spill] sm:$0xff] }
 0x10c   : > { %v4251_v55 = vcombine.low %v21211_v7, %v21095_v15  ;;  %14734 = vmatprep.mubr.msk.bf16.mxu1 %vm1479_vm1, %v4233_v33  ;;  %v4910_v60 = vcombine.low %v4888_v48, %v4895_v54  ;;  %v4927_v41 = vcombine.low %v21213_v20, %v21212_v53  ;;  %v4928_v8 = vcombine.low %v21215_v6, %v21214_v40  ;;  %v21224_v7 = vld [vmem:[#allocation149_spill] sm:$0xff]  ;;  %v21227_v40 = vld [vmem:[#allocation150_spill] sm:$0xff]  ;;  %v21303_v21 = vld [vmem:[#allocation40_spill] sm:$0xff] }
 0x10d   : > { %v4929_v57 = vcombine.low %v21217_v46, %v21216_v31  ;;  %v4877_v39 = vcombine.low %v4869_v23, %v4876_v35  ;;  %v4249_v62 = vrot.slane %v4242_v26, %v15503_v9  ;;  %v4911_v58 = vcombine.low %v4902_v19, %v4909_v49  ;;  %v21222_v35 = vld [vmem:[#allocation37_spill] sm:$0xff]  ;;  %v21223_v26 = vld [vmem:[#allocation36_spill] sm:$0xff] }
 0x10e   : > { %v4258_v15 = vrot.slane %v4251_v55, %v15503_v9  ;;  %v4918_v0 = vrot.slane %v4910_v60, %v15503_v9  ;;  %v4930_v10 = vcombine.low %v21219_v52, %v21218_v32  ;;  %v4937_v47 = vrot.slane %v4927_v41, %v15503_v9  ;;  %v21225_v55 = vld [vmem:[#allocation148_spill] sm:$0xff]  ;;  %v21226_v41 = vld [vmem:[#allocation151_spill] sm:$0xff]  ;;  %v21229_v31 = vld [vmem:[#allocation29_spill] sm:$0xff] }
 0x10f   : > { %v4944_v11 = vrot.slane %v4928_v8, %v15503_v9  ;;  %14757 = vmatmul.mubr.msk.bf16.gmra.mrb[40].mxu0 %vm1479_vm1, %v4877_v39  ;;  %v4250_v44 = vcombine.low %v21220_v36, %v4249_v62  ;;  %v4925_v23 = vrot.slane %v4911_v58, %v15503_v9  ;;  %v4951_v48 = vrot.slane %v4929_v57, %v15503_v9  ;;  %v21228_v8 = vld [vmem:[#allocation152_spill] sm:$0xff]  ;;  %v17654_v57 = vpop.f32.mrb[0].mxu1  ;;  %v21231_v32 = vld [vmem:[#allocation153_spill] sm:$0xff] }
 0x110   : > { %v4259_v33 = vcombine.low %v21221_v3, %v4258_v15  ;;  %v4958_v54 = vrot.slane %v4930_v10, %v15503_v9  ;;  %v4268_v49 = vcombine.low %v21223_v26, %v21222_v35  ;;  %v4976_v60 = vcombine.low %v21225_v55, %v21224_v7  ;;  %v21230_v15 = vld [vmem:[#allocation34_spill] sm:$0xff]  ;;  %v17660_v10 = vpop.f32.mrb[1].mxu1  ;;  %v21234_v26 = vld [vmem:[#allocation163_spill] sm:$0xff] }
 0x111   : > { %v4959_v19 = vcombine.low %v4937_v47, %v4944_v11  ;;  %v4926_v53 = vcombine.low %v4918_v0, %v4925_v23  ;;  %v4977_v6 = vcombine.low %v21227_v40, %v21226_v41  ;;  %v4978_v46 = vcombine.low %v21229_v31, %v21228_v8  ;;  %v17662_v0 = vpop.f32.mrb[0].mxu0  ;;  %v21232_v47 = vld [vmem:[#allocation42_spill] sm:$0xff]  ;;  %v21238_v40 = vld [vmem:[#allocation164_spill] sm:$0xff]  ;;  %v21240_v31 = vld [vmem:[#allocation45_spill] sm:$0xff] }
 0x112   : > { %14735 = vmatmul.mubr.msk.bf16.gmra.mrb[44].mxu1 %vm1479_vm1, %v4250_v44  ;;  %v4266_v20 = vrot.slane %v4259_v33, %v15503_v9  ;;  %v4960_v39 = vcombine.low %v4951_v48, %v4958_v54  ;;  %v4275_v58 = vrot.slane %v4268_v49, %v15503_v9  ;;  %v4979_v52 = vcombine.low %v21231_v32, %v21230_v15  ;;  %v17669_v33 = vpop.f32.mrb[2].mxu1  ;;  %v21233_v54 = vld [vmem:[#allocation187_spill] sm:$0xff] }
 0x113   : > { %v4967_v62 = vrot.slane %v4959_v19, %v15503_v9  ;;  %14760 = vmatprep.mubr.msk.bf16.mxu0 %vm1479_vm1, %v4926_v53  ;;  %v4986_v36 = vrot.slane %v4976_v60, %v15503_v9  ;;  %v4993_v44 = vrot.slane %v4977_v6, %v15503_v9  ;;  %v5000_v23 = vrot.slane %v4978_v46, %v15503_v9  ;;  %v21235_v49 = vld [vmem:[#allocation35_spill] sm:$0xff]  ;;  %v17676_v55 = vpop.f32.mrb[3].mxu1  ;;  %v21241_v46 = vld [vmem:[#allocation165_spill] sm:$0xff] }
 0x114   : > { %v4267_v11 = vcombine.low %v21232_v47, %v4266_v20  ;;  %v4974_v48 = vrot.slane %v4960_v39, %v15503_v9  ;;  %v4276_v19 = vcombine.low %v21233_v54, %v4275_v58  ;;  %v5007_v35 = vrot.slane %v4979_v52, %v15503_v9  ;;  %v21236_v53 = vld [vmem:[#allocation39_spill] sm:$0xff]  ;;  %v21237_v20 = vld [vmem:[#allocation38_spill] sm:$0xff] }
 0x115   : > { %v5025_v7 = vcombine.low %v21235_v49, %v21234_v26  ;;  %v5008_v60 = vcombine.low %v4986_v36, %v4993_v44  ;;  %v5026_v41 = vcombine.low %v21237_v20, %v21236_v53  ;;  %v21239_v6 = vld [vmem:[#allocation43_spill] sm:$0xff]  ;;  %v5028_v39 = vcombine.low %v21241_v46, %v21240_v31  ;;  %v21245_v53 = vld [vmem:[#allocation176_spill] sm:$0xff] }
 0x116   : > { %14738 = vmatprep.mubr.msk.bf16.mxu1 %vm1479_vm1, %v4267_v11  ;;  %v5027_v8 = vcombine.low %v21239_v6, %v21238_v40  ;;  %v4975_v58 = vcombine.low %v4967_v62, %v4974_v48  ;;  %v4283_v15 = vrot.slane %v4276_v19, %v15503_v9  ;;  %v5009_v32 = vcombine.low %v5000_v23, %v5007_v35  ;;  %v21242_v48 = vld [vmem:[#allocation175_spill] sm:$0xff]  ;;  %v21243_v19 = vld [vmem:[#allocation174_spill] sm:$0xff] }
 0x117   : > { %v5035_v52 = vrot.slane %v5025_v7, %v15503_v9  ;;  %v5016_v47 = vrot.slane %v5008_v60, %v15503_v9  ;;  %v5042_v11 = vrot.slane %v5026_v41, %v15503_v9  ;;  %v5056_v44 = vrot.slane %v5028_v39, %v15503_v9  ;;  %v21244_v60 = vld [vmem:[#allocation177_spill] sm:$0xff]  ;;  %v21246_v41 = vld [vmem:[#allocation179_spill] sm:$0xff]  ;;  %v21247_v40 = vld [vmem:[#allocation178_spill] sm:$0xff] }
 0x118   : > { %v5049_v36 = vrot.slane %v5027_v8, %v15503_v9  ;;  %14761 = vmatmul.mubr.msk.bf16.gmra.mrb[44].mxu0 %vm1479_vm1, %v4975_v58  ;;  %v4284_v26 = vcombine.low %v17317_v45, %v4283_v15  ;;  %v5023_v62 = vrot.slane %v5009_v32, %v15503_v9  ;;  %v4285_v23 = vcombine.low %v21154_v28, %v21155_v43  ;;  %v17702_v8 = vpop.f32.mrb[1].mxu0  ;;  %v21248_v28 = vld [vmem:[#allocation180_spill] sm:$0xff]  ;;  %v13861_v39 = vld.sshfl [vmem:[%s15508_s30 + $0x7c] sm:$0x33 pattern:$0x75316420] }
 0x119   : > { %v5074_v35 = vcombine.low %v21243_v19, %v21242_v48  ;;  %v5057_v49 = vcombine.low %v5035_v52, %v5042_v11  ;;  %v5075_v20 = vcombine.low %v21245_v53, %v21244_v60  ;;  %v5076_v6 = vcombine.low %v21247_v40, %v21246_v41  ;;  %v17710_v58 = vpop.f32.mrb[2].mxu0  ;;  %v17732_v19 = vpop.f32.mrb[4].mxu1 }
 0x11a   : > { %v5058_v7 = vcombine.low %v5049_v36, %v5056_v44  ;;  %14739 = vmatmul.mubr.msk.bf16.gmra.mrb[48].mxu1 %vm1479_vm1, %v4284_v26  ;;  %v5024_v45 = vcombine.low %v5016_v47, %v5023_v62  ;;  %v4292_v31 = vrot.slane %v4285_v23, %v15503_v9  ;;  %v5077_v43 = vcombine.low %v21248_v28, %v17337_v59  ;;  %v17718_v11 = vpop.f32.mrb[3].mxu0  ;;  %v17738_v53 = vpop.f32.mrb[5].mxu1 }
 0x11b   : > { %v5084_v46 = vrot.slane %v5074_v35, %v15503_v9  ;;  %14742 = vmatprep.mubr.msk.bf16.mxu1 %vm1479_vm1, %v17451_v12  ;;  %v5065_v15 = vrot.slane %v5057_v49, %v15503_v9  ;;  %v5091_v52 = vrot.slane %v5075_v20, %v15503_v9  ;;  %v5098_v47 = vrot.slane %v5076_v6, %v15503_v9 }
 0x11c   : > { %v5072_v32 = vrot.slane %v5058_v7, %v15503_v9  ;;  %14764 = vmatprep.mubr.msk.bf16.mxu0 %vm1479_vm1, %v5024_v45  ;;  %v4293_v59 = vcombine.low %v4292_v31, %v17471_v56  ;;  %v5105_v36 = vrot.slane %v5077_v43, %v15503_v9  ;;  %v4107_v44 = vcombine.high %v17436_v37, %v17436_v37  ;;  %v17750_v45 = vpop.f32.mrb[6].mxu1 }
 0x11d   : > { %v17727_v12 = vcombine.high %v17445_v5, %v17445_v5  ;;  %v5106_v62 = vcombine.low %v5084_v46, %v5091_v52  ;;  %v4116_v23 = vcombine.high %v13861_v39, %v13861_v39  ;;  %v17730_v48 = vrot.slane %v13861_v39, %v15503_v9  ;;  %v17759_v46 = vpop.f32.mrb[7].mxu1  ;;  %v13862_v52 = vld.sshfl [vmem:[%s15508_s30 + $0x80] sm:$0x11 pattern:$0x75316420] }
 0x11e   : > { %v5073_v26 = vcombine.low %v5065_v15, %v5072_v32  ;;  %v4300_v35 = vrot.slane %v4293_v59, %v15503_v9  ;;  %v5107_v49 = vcombine.low %v5098_v47, %v5105_v36  ;;  %v4302_v7 = vcombine.low %v21170_v63, %v17436_v37 }
 0x11f   : > { %v4303_v60 = vcombine.low %v17445_v5, %v4107_v44  ;;  %v5114_v20 = vrot.slane %v5106_v62, %v15503_v9  ;;  %v17742_v41 = vrot.slane %v4116_v23, %v15503_v9  ;;  %v17746_v40 = vcombine.high %v17730_v48, %v17730_v48 }
 0x120   : > { %v4304_v6 = vcombine.low %v17727_v12, %v17730_v48  ;;  %14765 = vmatmul.mubr.msk.bf16.gmra.mrb[48].mxu0 %vm1479_vm1, %v5073_v26  ;;  %v4301_v63 = vcombine.low %v4300_v35, %v17514_v50  ;;  %v5121_v31 = vrot.slane %v5107_v49, %v15503_v9  ;;  %v4312_v28 = vrot.slane %v4302_v7, %v15503_v9 }
 0x121   : > { %v17757_v43 = vrot.slane %v4303_v60, %v15503_v9  ;;  %v4305_v39 = vcombine.low %v17742_v41, %v17746_v40  ;;  %v5123_v32 = vcombine.low %v17325_v24, %v17331_v61  ;;  %v5124_v50 = vcombine.low %v17344_v25, %v17351_v38 }
 0x122   : > { %v17764_v15 = vrot.slane %v4304_v6, %v15503_v9  ;;  %14743 = vmatmul.mubr.msk.bf16.gmra.mrb[52].mxu1 %vm1479_vm1, %v4301_v63  ;;  %v5122_v47 = vcombine.low %v5114_v20, %v5121_v31  ;;  %v5125_v36 = vcombine.low %v17360_v14, %v17370_v18  ;;  %v21251_v26 = vcombine.low %v17376_v29, %v17430_v42 }
 0x123   : > { %21249 = vst [vmem:[#allocation88_spill] sm:$0xff] %v17757_v43  ;;  %v4334_v59 = vcombine.low %v4312_v28, %v17757_v43  ;;  %v17780_v23 = vrot.slane %v4305_v39, %v15503_v9  ;;  %v5133_v24 = vrot.slane %v5123_v32, %v15503_v9  ;;  %v5140_v61 = vrot.slane %v5124_v50, %v15503_v9 }
 0x124   : > { %21250 = vst [vmem:[#allocation87_spill] sm:$0xff] %v17764_v15  ;;  %v5154_v62 = vrot.slane %v21251_v26, %v15503_v9  ;;  %v4132_v25 = vcombine.high %v17742_v41, %v17742_v41  ;;  %14768 = vmatprep.mubr.msk.bf16.mxu0 %vm1479_vm1, %v5122_v47  ;;  %v5147_v14 = vrot.slane %v5125_v36, %v15503_v9  ;;  %v4616_v29 = vshrl.u32 %v17445_v5, 16 }
 0x125   : > { %21252 = vst [vmem:[#allocation92_spill] sm:$0xff] %v17780_v23  ;;  %v4342_v38 = vrot.slane %v4334_v59, %v15503_v9  ;;  %v17790_v18 = vrot.slane %v13862_v52, %v15503_v9  ;;  %v4335_v42 = vcombine.low %v17764_v15, %v17780_v23  ;;  %v5155_v35 = vcombine.low %v5133_v24, %v5140_v61  ;;  %v21267_v23 = vld [vmem:[#allocation57_spill] sm:$0xff] }
 0x126   : > { %v4661_v49 = vshll.u32 %v4132_v25, 16  ;;  %v4621_v7 = vshll.u32 %v4107_v44, 16  ;;  %v5156_v60 = vcombine.low %v5147_v14, %v5154_v62  ;;  %v4624_v6 = vshrl.u32 %v4107_v44, 16  ;;  %v21275_v15 = vld [vmem:[#allocation93_spill] sm:$0xff] }
 0x127   : > { %v4351_v20 = vcombine.low %v4132_v25, %v17790_v18  ;;  %v4629_v63 = vshll.u32 %v17727_v12, 16  ;;  %v4349_v31 = vrot.slane %v4335_v42, %v15503_v9  ;;  %v5163_v28 = vrot.slane %v5155_v35, %v15503_v9 }
 0x128   : > { %v17801_v39 = vsel %vm16182_vm2, %v4616_v29, %v4621_v7  ;;  %v4632_v32 = vshrl.u32 %v17727_v12, 16  ;;  %v5170_v50 = vrot.slane %v5156_v60, %v15503_v9  ;;  %v4637_v59 = vshll.u32 %v17730_v48, 16 }
 0x129   : > { %21253 = vst [vmem:[#allocation106_spill] sm:$0xff] %v17801_v39  ;;  %v17806_v47 = vrot.slane %v4351_v20, %v15503_v9  ;;  %v17810_v44 = vsel %vm16182_vm2, %v4624_v6, %v4629_v63  ;;  %v4350_v36 = vcombine.low %v4342_v38, %v4349_v31  ;;  %v4640_v26 = vshrl.u32 %v17730_v48, 16  ;;  %v17835_v20 = vpop.f32.mrb[4].mxu0 }
 0x12a   : > { %21255 = vst [vmem:[#allocation117_spill] sm:$0xff] %v17810_v44  ;;  %v4645_v62 = vshll.u32 %v17742_v41, 16  ;;  %v4648_v24 = vshrl.u32 %v17742_v41, 16  ;;  %v5171_v61 = vcombine.low %v5163_v28, %v5170_v50  ;;  %v17820_v14 = vsel %vm16182_vm2, %v4632_v32, %v4637_v59  ;;  %v17845_v28 = vpop.f32.mrb[5].mxu0  ;;  %v21260_v32 = vld [vmem:[#allocation54_spill] sm:$0xff] }
 0x12b   : > { %21254 = vst [vmem:[#allocation94_spill] sm:$0xff] %v17806_v47  ;;  %v4365_v12 = vrot.slane %v17806_v47, %v15503_v9  ;;  %21256 = vst [vmem:[#allocation103_spill] sm:$0xff] %v17820_v14  ;;  %v4653_v29 = vshll.u32 %v17746_v40, 16  ;;  %14746 = vmatprep.mubr.msk.bf16.mxu1 %vm1479_vm1, %v4350_v36  ;;  %v4656_v42 = vshrl.u32 %v17746_v40, 16  ;;  %v5173_v35 = vcombine.low %v17801_v39, %v17810_v44  ;;  %v21280_v44 = vld [vmem:[#allocation59_spill] sm:$0xff]  ;;  %v21302_v39 = vld [vmem:[#allocation26_spill] sm:$0xff] }
 0x12c   : > { %v17826_v38 = vsel %vm16182_vm2, %v4640_v26, %v4645_v62  ;;  %v21258_v7 = vcombine.low %v17442_v1, %v17479_v17  ;;  %14769 = vmatmul.mubr.msk.bf16.gmra.mrb[52].mxu0 %vm1479_vm1, %v5171_v61  ;;  %v4599_v63 = vcombine.high %v13862_v52, %v13862_v52  ;;  %v4664_v31 = vshrl.u32 %v4132_v25, 16  ;;  %v21261_v1 = vld [vmem:[#allocation96_spill] sm:$0xff]  ;;  %v17855_v62 = vpop.f32.mrb[6].mxu0  ;;  %v21301_v17 = vld [vmem:[#allocation27_spill] sm:$0xff] }
 0x12d   : > { %21257 = vst [vmem:[#allocation120_spill] sm:$0xff] %v17826_v38  ;;  %14747 = vmatmul.mubr.msk.bf16.gmra.mrb[56].mxu1 %vm1479_vm1, %v4365_v12  ;;  %v17841_v6 = vsel %vm16182_vm2, %v4648_v24, %v4653_v29  ;;  %v5174_v40 = vcombine.low %v17820_v14, %v17826_v38  ;;  %v5499_v50 = vcombine.low %v21261_v1, %v21260_v32  ;;  %v4669_v26 = vshll.u32 %v17790_v18, 16  ;;  %v17864_v12 = vpop.f32.mrb[7].mxu0  ;;  %v21266_v1 = vld [vmem:[#allocation56_spill] sm:$0xff]  ;;  %v21277_v38 = vld [vmem:[#allocation77_spill] sm:$0xff] }
 0x12e   : > { %v5182_v60 = vrot.slane %v21258_v7, %v15503_v9  ;;  %21259 = vst [vmem:[#allocation5_spill] sm:$0xff] %v17841_v6  ;;  %v17851_v59 = vsel %vm16182_vm2, %v4656_v42, %v4661_v49  ;;  %v5189_v36 = vrot.slane %v5173_v35, %v15503_v9  ;;  %v17861_v25 = vrot.slane %v4599_v63, %v15503_v9  ;;  %v21264_v42 = vld [vmem:[#allocation31_spill] sm:$0xff]  ;;  %v21265_v35 = vld [vmem:[#allocation30_spill] sm:$0xff] }
 0x12f   : > { %21262 = vst [vmem:[#allocation80_spill] sm:$0xff] %v17851_v59  ;;  %v5175_v24 = vcombine.low %v17841_v6, %v17851_v59  ;;  %v5196_v52 = vrot.slane %v5174_v40, %v15503_v9  ;;  %v4672_v61 = vshrl.u32 %v17790_v18, 16  ;;  %v17868_v29 = vsel %vm16182_vm2, %v4664_v31, %v4669_v26  ;;  %v21279_v6 = vld [vmem:[#allocation62_spill] sm:$0xff] }
 0x130   : > { %v5204_v49 = vcombine.low %v5182_v60, %v5189_v36  ;;  %21263 = vst [vmem:[#allocation107_spill] sm:$0xff] %v17868_v29  ;;  %v5474_v7 = vcombine.low %v21265_v35, %v21264_v42  ;;  %v21268_v47 = vcombine.low %v21266_v1, %v21267_v23  ;;  %v4677_v43 = vshll.u32 %v17861_v25, 16  ;;  %v21269_v60 = vld [vmem:[#allocation52_spill] sm:$0xff] }
 0x131   : > { %v5203_v63 = vrot.slane %v5175_v24, %v15503_v9  ;;  %v21270_v36 = vld [vmem:[#allocation32_spill] sm:$0xff]  ;;  %v5507_v23 = vrot.slane %v5499_v50, %v15503_v9  ;;  %v21276_v50 = vld [vmem:[#allocation55_spill] sm:$0xff] }
 0x132   : > { %v5514_v40 = vrot.slane %v21268_v47, %v15503_v9  ;;  %v5475_v56 = vcombine.low %v21270_v36, %v21269_v60  ;;  %v5482_v31 = vrot.slane %v5474_v7, %v15503_v9  ;;  %v5212_v42 = vrot.slane %v5204_v49, %v15503_v9  ;;  %v17889_v47 = vpop.f32.mrb[8].mxu1  ;;  %v21272_v60 = vld [vmem:[#allocation53_spill] sm:$0xff] }
 0x133   : > { %v5205_v26 = vcombine.low %v5196_v52, %v5203_v63  ;;  %v17886_v35 = vsel %vm16182_vm2, %v4672_v61, %v4677_v43  ;;  %v6075_v36 = vcombine.low %v21272_v60, %v21260_v32  ;;  %v17896_v7 = vpop.f32.mrb[9].mxu1  ;;  %v21273_v52 = vld [vmem:[#allocation24_spill] sm:$0xff]  ;;  %v21274_v49 = vld [vmem:[#allocation21_spill] sm:$0xff]  ;;  %v5516_v34 = vcombine.low %v21276_v50, %v21275_v15  ;;  %v21284_v50 = vld [vmem:[#allocation83_spill] sm:$0xff]  ;;  %1672 = vst.msk [vmem:[#allocation2 + $0xb0] sm:$0xf] %vm1671_vm3, %v17889_v47 }
 0x134   : > { %21271 = vst [vmem:[#allocation105_spill] sm:$0xff] %v17886_v35  ;;  %v5221_v24 = vcombine.low %v17868_v29, %v17886_v35  ;;  %v5489_v1 = vrot.slane %v5475_v56, %v15503_v9  ;;  %v6111_v63 = vcombine.low %v21274_v49, %v21273_v52  ;;  %v5515_v61 = vcombine.low %v5507_v23, %v5514_v40  ;;  %v14671_v54 = vpop.f32.mrb[10].mxu1 }
 0x135   : > { %v5219_v43 = vrot.slane %v5205_v26, %v15503_v9  ;;  %v6847_v56 = vsel %vm1516_vm0, %v17562_v13, 0  ;;  %v6082_v32 = vrot.slane %v6075_v36, %v15503_v9  ;;  %v17907_v60 = vpop.f32.mrb[11].mxu1  ;;  %v5523_v49 = vrot.slane %v5516_v34, %v15503_v9  ;;  %v21278_v26 = vld [vmem:[#allocation64_spill] sm:$0xff]  ;;  %v21283_v36 = vld [vmem:[#allocation85_spill] sm:$0xff] }
 0x136   : > { %v5228_v59 = vrot.slane %v5221_v24, %v15503_v9  ;;  %v5490_v29 = vcombine.low %v5482_v31, %v5489_v1  ;;  %v5525_v23 = vcombine.low %v21278_v26, %v21277_v38  ;;  %v6084_v15 = vcombine.low %v21280_v44, %v21279_v6  ;;  %v21281_v24 = vld [vmem:[#allocation76_spill] sm:$0xff]  ;;  %v14658_v26 = vpop.f32.mrb[8].mxu0 }
 0x137   : > { %v5220_v3 = vcombine.low %v5212_v42, %v5219_v43  ;;  %v6083_v31 = vcombine.low %v6082_v32, %v5514_v40  ;;  %v21282_v13 = vld [vmem:[#allocation104_spill] sm:$0xff]  ;;  %v5550_v14 = vcombine.low %v21284_v50, %v21283_v36  ;;  %v5524_v34 = vcombine.low %v5523_v49, %v21279_v6  ;;  %v21286_v40 = vld [vmem:[#allocation81_spill] sm:$0xff]  ;;  %v21288_v32 = vld [vmem:[#allocation79_spill] sm:$0xff]  ;;  %v1586_v50 = vpop.f32.mrb[9].mxu0 }
 0x138   : > { %v5235_v54 = vrot.slane %v5228_v59, %v15503_v9  ;;  %14778 = vmatprep.mubr.msk.bf16.mxu1 %vm1479_vm1, %v5490_v29  ;;  %v5541_v1 = vcombine.low %v21282_v13, %v21281_v24  ;;  %v5539_v38 = vrot.slane %v5525_v23, %v15503_v9  ;;  %v6091_v44 = vrot.slane %v6084_v15, %v15503_v9  ;;  %v21285_v29 = vld [vmem:[#allocation82_spill] sm:$0xff]  ;;  %v21289_v15 = vld [vmem:[#allocation17_spill] sm:$0xff] }
 0x139   : > { %14772 = vmatprep.mubr.msk.bf16.mxu0 %vm1479_vm1, %v5220_v3  ;;  %14779 = vmatmul.mubr.msk.bf16.vlgmr.msra.gmra.mrb[60].mxu1 %vm1479_vm1, %v5515_v61  ;;  %v6093_v42 = vcombine.low %v21286_v40, %v21285_v29  ;;  %v5532_v3 = vrot.slane %v5524_v34, %v15503_v9  ;;  %v5564_v6 = vrot.slane %v5550_v14, %v15503_v9  ;;  %v21287_v61 = vld [vmem:[#allocation75_spill] sm:$0xff]  ;;  %v21295_v29 = vld [vmem:[#allocation20_spill] sm:$0xff] }
 0x13a   : > { %14773 = vmatmul.mubr.msk.bf16.gmra.mrb[56].mxu0 %vm1479_vm1, %v5235_v54  ;;  %14829 = vmatpush3.bf16.msra.mxu1 %v6847_v56  ;;  %v5548_v59 = vrot.slane %v5541_v1, %v15503_v9  ;;  %v6092_v43 = vcombine.low %v6091_v44, %v5539_v38  ;;  %v5566_v49 = vcombine.low %v21288_v32, %v21287_v61  ;;  %v21290_v54 = vld [vmem:[#allocation18_spill] sm:$0xff]  ;;  %v21294_v44 = vld [vmem:[#allocation16_spill] sm:$0xff] }
 0x13b   : > { %14804 = vmatprep.mubr.msk.bf16.mxu0 %vm1479_vm1, %v6083_v31  ;;  %v6100_v56 = vrot.slane %v6093_v42, %v15503_v9  ;;  %v21291_v24 = vcombine.low %v21289_v15, %v21290_v54  ;;  %v21292_v31 = vld [vmem:[#allocation15_spill] sm:$0xff]  ;;  %v21293_v1 = vld [vmem:[#allocation6_spill] sm:$0xff]  ;;  %v5540_v34 = vcombine.low %v5532_v3, %v5539_v38  ;;  %v21296_v61 = vcombine.low %v21294_v44, %v21295_v29  ;;  %v14659_v42 = vpop.f32.mrb[10].mxu0 }
 0x13c   : > { %v5549_v23 = vcombine.low %v21286_v40, %v5548_v59  ;;  %v5591_v36 = vcombine.low %v21293_v1, %v21292_v31  ;;  %v5573_v14 = vrot.slane %v5566_v49, %v15503_v9  ;;  %v17952_v40 = vrot.slane %v6111_v63, %v15503_v9  ;;  %v17955_v32 = vld.sshfl [vmem:[%s15508_s30 + $0x84] sm:$0x33 pattern:$0x75316420]  ;;  %v1589_v49 = vpop.f32.mrb[11].mxu0  ;;  %v21300_v29 = vld [vmem:[#allocation23_spill] sm:$0xff] }
 0x13d   : > { %v17940_v13 = vrot.slane %v21291_v24, %v15503_v9  ;;  %v17949_v59 = vrot.slane %v21296_v61, %v15503_v9  ;;  %v6101_v54 = vcombine.low %v6100_v56, %v5564_v6  ;;  %v21297_v24 = vld [vmem:[#allocation84_spill] sm:$0xff]  ;;  %v21298_v31 = vld [vmem:[#allocation86_spill] sm:$0xff]  ;;  %14782 = vmatprep.mubr.msk.bf16.mxu1 %vm1479_vm1, %v5540_v34  ;;  %v6120_v34 = vcombine.low %v21304_v16, %v21303_v21 }
 0x13e   : > { %v5557_v15 = vrot.slane %v5549_v23, %v15503_v9  ;;  %v6102_v38 = vcombine.low %v21298_v31, %v21297_v24  ;;  %v5598_v3 = vrot.slane %v5591_v36, %v15503_v9  ;;  %v5574_v1 = vcombine.low %v21298_v31, %v5573_v14  ;;  %v21299_v44 = vld [vmem:[#allocation146_spill] sm:$0xff] }
 0x13f   : > { %v5616_v61 = vcombine.low %v21300_v29, %v21299_v44  ;;  %v5624_v23 = vcombine.low %v21302_v39, %v21301_v17  ;;  %v7319_v24 = vsel %vm1516_vm0, %v17605_v51, 0  ;;  %v6018_v14 = vcombine.high %v17955_v32, %v17955_v32  ;;  %v21305_v44 = vld [vmem:[#allocation41_spill] sm:$0xff]  ;;  %v21306_v29 = vld [vmem:[#allocation162_spill] sm:$0xff] }
 0x140   : > { %v5565_v56 = vcombine.low %v5557_v15, %v5564_v6  ;;  %v5600_v36 = vcombine.low %v5598_v3, %v21273_v52  ;;  %v5582_v31 = vrot.slane %v5574_v1, %v15503_v9  ;;  %v5641_v35 = vcombine.low %v21306_v29, %v21305_v44  ;;  %v21321_v1 = vld [vmem:[#allocation51_spill] sm:$0xff] }
 0x141   : > { %v5623_v63 = vrot.slane %v5616_v61, %v15503_v9  ;;  %v6109_v17 = vrot.slane %v6102_v38, %v15503_v9  ;;  %v17985_v16 = vrot.slane %v5624_v23, %v15503_v9  ;;  %vm1648_vm0 = vcmask 64512   ;;  %v21322_v61 = vld [vmem:[#allocation72_spill] sm:$0xff]  ;;  %v21323_v23 = vld [vmem:[#allocation71_spill] sm:$0xff] }
 0x142   : > { %14805 = vmatmul.mubr.msk.bf16.vlgmr.msra.gmra.mrb[60].mxu0 %vm1479_vm1, %v6092_v43  ;;  %14783 = vmatmul.mubr.msk.bf16.gmra.mrb[64].mxu1 %vm1479_vm1, %v5565_v56  ;;  %v5614_v51 = vrot.slane %v5600_v36, %v15503_v9  ;;  %v5590_v39 = vcombine.low %v5582_v31, %v17940_v13  ;;  %v5648_v6 = vrot.slane %v5641_v35, %v15503_v9  ;;  %v21318_v43 = vld [vmem:[#allocation50_spill] sm:$0xff] }
 0x143   : > { %14855 = vmatpush3.bf16.msra.mxu0 %v7319_v24  ;;  %14808 = vmatprep.mubr.msk.bf16.mxu0 %vm1479_vm1, %v6101_v54  ;;  %v5625_v52 = vcombine.low %v5623_v63, %v21303_v21  ;;  %1663 = vst.msk [vmem:[#allocation2 + $0x70] sm:$0xff] %vm1648_vm0, %v17654_v57  ;;  %1661 = vst.msk [vmem:[#allocation2 + $0x60] sm:$0xff] %vm1648_vm0, %v17660_v10  ;;  %v18032_v21 = vrot.slane %v6120_v34, %v15503_v9  ;;  %v21307_v57 = vld [vmem:[#allocation46_spill] sm:$0xff]  ;;  %v21308_v10 = vld [vmem:[#allocation44_spill] sm:$0xff] }
 0x144   : > { %1664 = vst.msk [vmem:[#allocation2 + $0x78] sm:$0xff] %vm1648_vm0, %v17669_v33  ;;  %1662 = vst.msk [vmem:[#allocation2 + $0x68] sm:$0xff] %vm1648_vm0, %v17676_v55  ;;  %v21309_v33 = vld [vmem:[#allocation47_spill] sm:$0xff]  ;;  %v21310_v55 = vld [vmem:[#allocation49_spill] sm:$0xff]  ;;  %14786 = vmatprep.mubr.msk.bf16.mxu1 %vm1479_vm1, %v5590_v39  ;;  %v6110_v47 = vcombine.low %v6109_v17, %v17940_v13  ;;  %v18066_v15 = vrot.slane %v6018_v14, %v15503_v9  ;;  %v5691_v56 = vcombine.low %v21323_v23, %v21322_v61 }
 0x145   : > { %1651 = vst.msk [vmem:[#allocation2 + $0x10] sm:$0xff] %vm1648_vm0, %v17662_v0  ;;  %1649 = vst.msk [vmem:[#allocation2] sm:$0xff] %vm1648_vm0, %v17702_v8  ;;  %v5649_v0 = vcombine.low %v21308_v10, %v21307_v57  ;;  %v6129_v8 = vcombine.low %v21310_v55, %v21309_v33  ;;  %v6128_v13 = vcombine.low %v17985_v16, %v18032_v21  ;;  %v21325_v39 = vld [vmem:[#allocation74_spill] sm:$0xff] }
 0x146   : > { %1667 = vst.msk [vmem:[#allocation2 + $0x90] sm:$0xff] %vm1648_vm0, %v17732_v19  ;;  %1652 = vst.msk [vmem:[#allocation2 + $0x18] sm:$0xff] %vm1648_vm0, %v17710_v58  ;;  %v21311_v58 = vld [vmem:[#allocation97_spill] sm:$0xff]  ;;  %v5708_v24 = vcombine.low %v17417_v27, %v17445_v5  ;;  %v13899_v36 = vcombine.high %v17436_v37, %v17445_v5  ;;  %v5710_v31 = vcombine.low %v17730_v48, %v17742_v41 }
 0x147   : > { %1665 = vst.msk [vmem:[#allocation2 + $0x80] sm:$0xff] %vm1648_vm0, %v17738_v53  ;;  %1650 = vst.msk [vmem:[#allocation2 + $0x8] sm:$0xff] %vm1648_vm0, %v17718_v11  ;;  %v21312_v11 = vld [vmem:[#allocation98_spill] sm:$0xff]  ;;  %v5657_v38 = vrot.slane %v5649_v0, %v15503_v9  ;;  %v6136_v3 = vrot.slane %v6129_v8, %v15503_v9  ;;  %v21324_v44 = vcombine.low %v17949_v59, %v17952_v40 }
 0x148   : > { %1668 = vst.msk [vmem:[#allocation2 + $0x98] sm:$0xff] %vm1648_vm0, %v17750_v45  ;;  %1666 = vst.msk [vmem:[#allocation2 + $0x88] sm:$0xff] %vm1648_vm0, %v17759_v46  ;;  %v21313_v19 = vcombine.low %v21311_v58, %v21312_v11  ;;  %v21314_v45 = vld [vmem:[#allocation100_spill] sm:$0xff]  ;;  %v13900_v29 = vcombine.high %v17730_v48, %v17742_v41  ;;  %v5718_v17 = vrot.slane %v5708_v24, %v15503_v9 }
 0x149   : > { %1655 = vst.msk [vmem:[#allocation2 + $0x30] sm:$0xff] %vm1648_vm0, %v17835_v20  ;;  %1653 = vst.msk [vmem:[#allocation2 + $0x20] sm:$0xff] %vm1648_vm0, %v17845_v28  ;;  %v21315_v46 = vld [vmem:[#allocation112_spill] sm:$0xff]  ;;  %v5725_v21 = vrot.slane %v13899_v36, %v15503_v9  ;;  %v6147_v57 = vcombine.low %v17436_v37, %v17445_v5  ;;  %v18114_v48 = vcombine.high %v18066_v15, %v18066_v15  ;;  %v18116_v41 = vpop.f32.mrb[12].mxu1 }
 0x14a   : > { %1656 = vst.msk [vmem:[#allocation2 + $0x38] sm:$0xff] %vm1648_vm0, %v17855_v62  ;;  %1669 = vst.msk [vmem:[#allocation2 + $0xa0] sm:$0xff] %vm1648_vm0, %v17896_v7  ;;  %v18044_v53 = vrot.slane %v21313_v19, %v15503_v9  ;;  %v21316_v20 = vcombine.low %v21314_v45, %v21315_v46  ;;  %v5639_v62 = vrot.slane %v5625_v52, %v15503_v9  ;;  %14809 = vmatmul.mubr.msk.bf16.gmra.mrb[64].mxu0 %vm1479_vm1, %v6110_v47  ;;  %v21326_v52 = vld [vmem:[#allocation73_spill] sm:$0xff]  ;;  %v18119_v58 = vpop.f32.mrb[13].mxu1  ;;  %v21328_v46 = vld [vmem:[#allocation119_spill] sm:$0xff] }
 0x14b   : > { %1654 = vst.msk [vmem:[#allocation2 + $0x28] sm:$0xff] %vm1648_vm0, %v17864_v12  ;;  %1670 = vst.msk [vmem:[#allocation2 + $0xa8] sm:$0xff] %vm1648_vm0, %v17907_v60  ;;  %v21317_v12 = vld [vmem:[#allocation58_spill] sm:$0xff]  ;;  %v5615_v7 = vcombine.low %v17949_v59, %v5614_v51  ;;  %v5650_v60 = vcombine.low %v21310_v55, %v5648_v6  ;;  %14812 = vmatprep.mubr.msk.bf16.mxu0 %vm1479_vm1, %v21324_v44  ;;  %v5692_v6 = vcombine.low %v21326_v52, %v21325_v39  ;;  %v18128_v45 = vpop.f32.mrb[14].mxu1  ;;  %v21335_v39 = vld [vmem:[#allocation91_spill] sm:$0xff] }
 0x14c   : > { %1659 = vst.msk [vmem:[#allocation2 + $0x50] sm:$0xff] %vm1648_vm0, %v14658_v26  ;;  %1657 = vst.msk [vmem:[#allocation2 + $0x40] sm:$0xff] %vm1648_vm0, %v1586_v50  ;;  %v18050_v28 = vrot.slane %v21316_v20, %v15503_v9  ;;  %v5666_v35 = vcombine.low %v21317_v12, %v17311_v4  ;;  %v21319_v26 = vld [vmem:[#allocation48_spill] sm:$0xff]  ;;  %v5640_v54 = vcombine.low %v17985_v16, %v5639_v62  ;;  %v18137_v47 = vpop.f32.mrb[15].mxu1 }
 0x14d   : > { %1660 = vst.msk [vmem:[#allocation2 + $0x58] sm:$0xff] %vm1648_vm0, %v14659_v42  ;;  %1658 = vst.msk [vmem:[#allocation2 + $0x48] sm:$0xff] %vm1648_vm0, %v1589_v49  ;;  %v5674_v50 = vcombine.low %v21319_v26, %v21318_v43  ;;  %v18063_v42 = vrot.slane %v17955_v32, %v15503_v9  ;;  %v21320_v49 = vld [vmem:[#allocation70_spill] sm:$0xff]  ;;  %14787 = vmatmul.mubr.msk.bf16.gmra.mrb[68].mxu1 %vm1479_vm1, %v5615_v7  ;;  %v5664_v34 = vrot.slane %v5650_v60, %v15503_v9 }
 0x14e   : > { %v5673_v4 = vrot.slane %v5666_v35, %v15503_v9  ;;  %v6138_v63 = vcombine.low %v21321_v1, %v21320_v49  ;;  %14790 = vmatprep.mubr.msk.bf16.mxu1 %vm1479_vm1, %v5640_v54  ;;  %v13914_v51 = vld.sshfl [vmem:[%s15508_s30 + $0x88] sm:$0x33 pattern:$0x75316420]  ;;  %v6137_v16 = vcombine.low %v5657_v38, %v6136_v3  ;;  %v5732_v59 = vrot.slane %v5710_v31, %v15503_v9  ;;  %v21330_v49 = vld [vmem:[#allocation116_spill] sm:$0xff] }
 0x14f   : > { %v18087_v14 = vrot.slane %v5674_v50, %v15503_v9  ;;  %v5739_v40 = vrot.slane %v13900_v29, %v15503_v9  ;;  %v18110_v10 = vcombine.high %v18063_v42, %v18063_v42  ;;  %v5665_v0 = vcombine.low %v5657_v38, %v5664_v34  ;;  %v21329_v3 = vld [vmem:[#allocation115_spill] sm:$0xff] }
 0x150   : > { %v5675_v32 = vcombine.low %v21321_v1, %v5673_v4  ;;  %v5740_v55 = vcombine.low %v5718_v17, %v5725_v21  ;;  %v6042_v8 = vcombine.high %v13914_v51, %v13914_v51  ;;  %v18122_v37 = vrot.slane %v13914_v51, %v15503_v9  ;;  %v18174_v44 = vld.sshfl [vmem:[%s15508_s30 + $0x8c] sm:$0x11 pattern:$0x75316420]  ;;  %v21332_v17 = vld [vmem:[#allocation90_spill] sm:$0xff]  ;;  %v21333_v51 = vld [vmem:[#allocation89_spill] sm:$0xff] }
 0x151   : > { %v5741_v11 = vcombine.low %v5732_v59, %v5739_v40  ;;  %v6164_v5 = vcombine.low %v17790_v18, %v18063_v42  ;;  %v6165_v19 = vcombine.low %v18066_v15, %v18110_v10  ;;  %v7066_v20 = vcombine.low %v21328_v46, %v21186_v22 }
 0x152   : > { %v5689_v27 = vrot.slane %v5675_v32, %v15503_v9  ;;  %21327 = vst [vmem:[#allocation109_spill] sm:$0xff] %v18122_v37  ;;  %v6145_v62 = vrot.slane %v6138_v63, %v15503_v9  ;;  %v5699_v12 = vrot.slane %v5691_v56, %v15503_v9  ;;  %v18135_v35 = vrot.slane %v6042_v8, %v15503_v9 }
 0x153   : > { %v5706_v7 = vrot.slane %v5692_v6, %v15503_v9  ;;  %v6154_v60 = vrot.slane %v6147_v57, %v15503_v9  ;;  %v18143_v43 = vcombine.high %v18122_v37, %v18122_v37  ;;  %v6166_v22 = vcombine.low %v18114_v48, %v18122_v37  ;;  %14813 = vmatmul.mubr.msk.bf16.gmra.mrb[68].mxu0 %vm1479_vm1, %v6128_v13 }
 0x154   : > { %v5690_v33 = vcombine.low %v18087_v14, %v5689_v27  ;;  %v5748_v26 = vrot.slane %v5740_v55, %v15503_v9  ;;  %v6174_v50 = vrot.slane %v6164_v5, %v15503_v9  ;;  %v6181_v54 = vrot.slane %v6165_v19, %v15503_v9  ;;  %14816 = vmatprep.mubr.msk.bf16.mxu0 %vm1479_vm1, %v6137_v16  ;;  %v21334_v16 = vld [vmem:[#allocation95_spill] sm:$0xff] }
 0x155   : > { %14791 = vmatmul.mubr.msk.bf16.gmra.mrb[72].mxu1 %vm1479_vm1, %v5665_v0  ;;  %v5755_v4 = vrot.slane %v5741_v11, %v15503_v9  ;;  %v6167_v38 = vcombine.low %v18135_v35, %v18143_v43  ;;  %v6188_v13 = vrot.slane %v6166_v22, %v15503_v9  ;;  %v21331_v1 = vcombine.low %v21329_v3, %v21330_v49  ;;  %v21395_v0 = vld [vmem:[#allocation186_spill] sm:$0xff] }
 0x156   : > { %14794 = vmatprep.mubr.msk.bf16.mxu1 %vm1479_vm1, %v5690_v33  ;;  %v5757_v32 = vcombine.low %v17790_v18, %v17861_v25  ;;  %v18167_v61 = vrot.slane %v7066_v20, %v15503_v9  ;;  %v6155_v23 = vcombine.low %v6154_v60, %v5725_v21  ;;  %v6577_v24 = vcombine.low %v18044_v53, %v18050_v28  ;;  %v21338_v60 = vld [vmem:[#allocation102_spill] sm:$0xff]  ;;  %v21376_v53 = vld [vmem:[#allocation181_spill] sm:$0xff]  ;;  %v21377_v28 = vld [vmem:[#allocation172_spill] sm:$0xff] }
 0x157   : > { %v18162_v63 = vrot.slane %v21331_v1, %v15503_v9  ;;  %v6195_v56 = vrot.slane %v6167_v38, %v15503_v9  ;;  %v6146_v36 = vcombine.low %v18087_v14, %v6145_v62  ;;  %v5707_v34 = vcombine.low %v5699_v12, %v5706_v7  ;;  %v21336_v62 = vld [vmem:[#allocation101_spill] sm:$0xff]  ;;  %v21337_v12 = vld [vmem:[#allocation99_spill] sm:$0xff]  ;;  %v21341_v38 = vld [vmem:[#allocation126_spill] sm:$0xff] }
 0x158   : > { %v6196_v31 = vcombine.low %v6174_v50, %v6181_v54  ;;  %v5756_v27 = vcombine.low %v5748_v26, %v5755_v4  ;;  %v6544_v18 = vcombine.low %v21333_v51, %v21332_v17  ;;  %v6545_v52 = vcombine.low %v21335_v39, %v21334_v16  ;;  %v21339_v26 = vld [vmem:[#allocation114_spill] sm:$0xff]  ;;  %v21340_v50 = vld [vmem:[#allocation113_spill] sm:$0xff]  ;;  %v18217_v49 = vpop.f32.mrb[12].mxu0 }
 0x159   : > { %v6197_v29 = vcombine.low %v6188_v13, %v6195_v56  ;;  %v6470_v6 = vshrl.u32 %v18063_v42, 16  ;;  %v6475_v21 = vshll.u32 %v18066_v15, 16  ;;  %v5764_v59 = vrot.slane %v5757_v32, %v15503_v9  ;;  %v21342_v13 = vld [vmem:[#allocation118_spill] sm:$0xff]  ;;  %21343 = vst [vmem:[#allocation108_spill] sm:$0xff] %v18217_v49  ;;  %v21344_v32 = vld [vmem:[#allocation128_spill] sm:$0xff]  ;;  %v21353_v39 = vld [vmem:[#allocation141_spill] sm:$0xff] }
 0x15a   : > { %v6162_v14 = vrot.slane %v6155_v23, %v15503_v9  ;;  %v18186_v40 = vcombine.high %v18135_v35, %v18135_v35  ;;  %v18190_v57 = vrot.slane %v18174_v44, %v15503_v9  ;;  %v6204_v33 = vrot.slane %v6196_v31, %v15503_v9  ;;  %v21345_v23 = vld [vmem:[#allocation127_spill] sm:$0xff]  ;;  %v21351_v51 = vld [vmem:[#allocation142_spill] sm:$0xff] }
 0x15b   : > { %14817 = vmatmul.mubr.msk.bf16.gmra.mrb[72].mxu0 %vm1479_vm1, %v6146_v36  ;;  %v6211_v55 = vrot.slane %v6197_v29, %v15503_v9  ;;  %v6552_v8 = vrot.slane %v6544_v18, %v15503_v9  ;;  %v6559_v11 = vrot.slane %v6545_v52, %v15503_v9  ;;  %v18204_v5 = vsel %vm16182_vm2, %v6470_v6, %v6475_v21  ;;  %v21346_v36 = vld [vmem:[#allocation139_spill] sm:$0xff]  ;;  %v21349_v29 = vld [vmem:[#allocation130_spill] sm:$0xff]  ;;  %v21354_v52 = vld [vmem:[#allocation140_spill] sm:$0xff] }
 0x15c   : > { %14820 = vmatprep.mubr.msk.bf16.mxu0 %vm1479_vm1, %v5707_v34  ;;  %v6163_v19 = vcombine.low %v6162_v14, %v5755_v4  ;;  %v5771_v46 = vrot.slane %v5764_v59, %v15503_v9  ;;  %v6213_v20 = vcombine.low %v18186_v40, %v18190_v57  ;;  %v7048_v7 = vcombine.low %v21337_v12, %v21336_v62  ;;  %v21352_v18 = vld [vmem:[#allocation131_spill] sm:$0xff]  ;;  %v21355_v21 = vld [vmem:[#allocation154_spill] sm:$0xff]  ;;  %v21356_v59 = vld [vmem:[#allocation145_spill] sm:$0xff] }
 0x15d   : > { %14795 = vmatmul.mubr.msk.bf16.gmra.mrb[76].mxu1 %vm1479_vm1, %v5707_v34  ;;  %v7049_v22 = vcombine.low %v21338_v60, %v16675_v2  ;;  %v6578_v54 = vcombine.low %v21340_v50, %v21339_v26  ;;  %v6579_v3 = vcombine.low %v21342_v13, %v21341_v38  ;;  %v6212_v4 = vcombine.low %v6204_v33, %v6211_v55  ;;  %v21347_v34 = vld [vmem:[#allocation132_spill] sm:$0xff]  ;;  %v21350_v2 = vld [vmem:[#allocation129_spill] sm:$0xff]  ;;  %v21360_v12 = vld [vmem:[#allocation143_spill] sm:$0xff] }
 0x15e   : > { %14798 = vmatprep.mubr.msk.bf16.mxu1 %vm1479_vm1, %v5756_v27  ;;  %v6560_v1 = vcombine.low %v6552_v8, %v6559_v11  ;;  %v6595_v56 = vcombine.low %v21345_v23, %v21344_v32  ;;  %v6596_v31 = vcombine.low %v21347_v34, %v21346_v36  ;;  %v18223_v27 = vpop.f32.mrb[13].mxu0  ;;  %v7082_v17 = vcombine.low %v21350_v2, %v21349_v29  ;;  %v21358_v55 = vld [vmem:[#allocation105_spill] sm:$0xff]  ;;  %v21359_v62 = vld [vmem:[#allocation144_spill] sm:$0xff]  ;;  %v21362_v50 = vld [vmem:[#allocation19_spill] sm:$0xff] }
 0x15f   : > { %21348 = vst [vmem:[#allocation78_spill] sm:$0xff] %v18223_v27  ;;  %v7083_v16 = vcombine.low %v21352_v18, %v21351_v51  ;;  %v6612_v6 = vcombine.low %v21354_v52, %v21353_v39  ;;  %v6613_v14 = vcombine.low %v21356_v59, %v21355_v21  ;;  %v18233_v33 = vpop.f32.mrb[14].mxu0  ;;  %v6220_v11 = vrot.slane %v6213_v20, %v15503_v9  ;;  %v21361_v26 = vld [vmem:[#allocation156_spill] sm:$0xff]  ;;  %v21366_v51 = vld [vmem:[#allocation166_spill] sm:$0xff]  ;;  %v21367_v18 = vld [vmem:[#allocation159_spill] sm:$0xff] }
 0x160   : > { %21357 = vst [vmem:[#allocation110_spill] sm:$0xff] %v18233_v33  ;;  %v7099_v60 = vcombine.low %v21360_v12, %v21359_v62  ;;  %v7100_v38 = vcombine.low %v21362_v50, %v21361_v26  ;;  %v18242_v13 = vpop.f32.mrb[15].mxu0  ;;  %v7056_v32 = vrot.slane %v7048_v7, %v15503_v9  ;;  %v7063_v23 = vrot.slane %v7049_v22, %v15503_v9  ;;  %v21368_v39 = vld [vmem:[#allocation160_spill] sm:$0xff]  ;;  %v21369_v52 = vld [vmem:[#allocation158_spill] sm:$0xff]  ;;  %v21370_v21 = vld [vmem:[#allocation169_spill] sm:$0xff] }
 0x161   : > { %21363 = vst [vmem:[#allocation11_spill] sm:$0xff] %v18242_v13  ;;  %v6586_v36 = vrot.slane %v6578_v54, %v15503_v9  ;;  %v6593_v20 = vrot.slane %v6579_v3, %v15503_v9  ;;  %v18253_v34 = vrot.slane %v6595_v56, %v15503_v9  ;;  %v18256_v29 = vrot.slane %v6596_v31, %v15503_v9  ;;  %v21365_v56 = vld [vmem:[#allocation155_spill] sm:$0xff]  ;;  %v21371_v59 = vld [vmem:[#allocation161_spill] sm:$0xff] }
 0x162   : > { %v18263_v7 = vrot.slane %v7083_v16, %v15503_v9  ;;  %v18266_v22 = vrot.slane %v6612_v6, %v15503_v9  ;;  %v18269_v54 = vrot.slane %v6613_v14, %v15503_v9  ;;  %v18272_v3 = vrot.slane %v7099_v60, %v15503_v9 }
 0x163   : > { %14821 = vmatmul.mubr.msk.bf16.gmra.mrb[76].mxu0 %vm1479_vm1, %v6163_v19  ;;  %v6478_v19 = vshrl.u32 %v18066_v15, 16  ;;  %v6483_v2 = vshll.u32 %v18110_v10, 16  ;;  %v6630_v16 = vcombine.low %v21367_v18, %v21366_v51  ;;  %v7116_v6 = vcombine.low %v21369_v52, %v21368_v39  ;;  %v21381_v39 = vld [vmem:[#allocation120_spill] sm:$0xff] }
 0x164   : > { %14824 = vmatprep.mubr.msk.bf16.mxu0 %vm1479_vm1, %v6212_v4  ;;  %v18275_v4 = vrot.slane %v7100_v38, %v15503_v9  ;;  %v7117_v14 = vcombine.low %v21371_v59, %v21370_v21  ;;  %v6523_v62 = vshll.u32 %v18186_v40, 16  ;;  %v7064_v12 = vcombine.low %v7056_v32, %v7063_v23  ;;  %v21372_v32 = vld [vmem:[#allocation168_spill] sm:$0xff]  ;;  %v21373_v23 = vld [vmem:[#allocation167_spill] sm:$0xff]  ;;  %v21384_v59 = vld [vmem:[#allocation170_spill] sm:$0xff] }
 0x165   : > { %14799 = vmatmul.mubr.msk.bf16.gmra.mrb[80].mxu1 %vm1479_vm1, %v5771_v46  ;;  %v18260_v46 = vrot.slane %v7082_v17, %v15503_v9  ;;  %v6227_v17 = vrot.slane %v6220_v11, %v15503_v9  ;;  %v6594_v60 = vcombine.low %v6586_v36, %v6593_v20  ;;  %v6486_v26 = vshrl.u32 %v18110_v10, 16  ;;  %v21374_v36 = vld [vmem:[#allocation106_spill] sm:$0xff]  ;;  %v21375_v20 = vld [vmem:[#allocation192_spill] sm:$0xff] }
 0x166   : > { %14830 = vmatprep.mubr.msk.bf16.mxu1 %vm1479_vm1, %v6560_v1  ;;  %v21364_v1 = vld [vmem:[#allocation157_spill] sm:$0xff]  ;;  %v6611_v50 = vcombine.low %v18253_v34, %v18256_v29  ;;  %v6628_v38 = vcombine.low %v18266_v22, %v18269_v54  ;;  %v6646_v10 = vcombine.low %v21373_v23, %v21372_v32  ;;  %v6697_v34 = vcombine.low %v21375_v20, %v21374_v36  ;;  %v18320_v54 = vpop.f32.mrb[16].mxu1  ;;  %v21386_v32 = vld [vmem:[#allocation107_spill] sm:$0xff] }
 0x167   : > { %v6629_v31 = vcombine.low %v21365_v56, %v21364_v1  ;;  %v7098_v11 = vcombine.low %v18260_v46, %v18263_v7  ;;  %v6491_v1 = vshll.u32 %v18114_v48, 16  ;;  %v18311_v29 = vrot.slane %v6630_v16, %v15503_v9  ;;  %v21380_v16 = vld [vmem:[#allocation5_spill] sm:$0xff]  ;;  %v18331_v21 = vpop.f32.mrb[17].mxu1 }
 0x168   : > { %v18314_v46 = vrot.slane %v7116_v6, %v15503_v9  ;;  %v18317_v7 = vrot.slane %v7117_v14, %v15503_v9  ;;  %v6494_v22 = vshrl.u32 %v18114_v48, 16  ;;  %v6699_v52 = vcombine.low %v21381_v39, %v21380_v16  ;;  %21382 = vst [vmem:[#allocation121_spill] sm:$0xff] %v18331_v21  ;;  %v21383_v48 = vld [vmem:[#allocation171_spill] sm:$0xff]  ;;  %v21392_v39 = vld [vmem:[#allocation182_spill] sm:$0xff] }
 0x169   : > { %v18299_v51 = vrot.slane %v6629_v31, %v15503_v9  ;;  %v21378_v31 = vld [vmem:[#allocation103_spill] sm:$0xff]  ;;  %v6499_v6 = vshll.u32 %v18122_v37, 16  ;;  %v7133_v14 = vcombine.low %v21384_v59, %v21383_v48  ;;  %v6502_v20 = vshrl.u32 %v18122_v37, 16  ;;  %v21394_v59 = vld [vmem:[#allocation60_spill] sm:$0xff] }
 0x16a   : > { %v21391_v16 = vld [vmem:[#allocation183_spill] sm:$0xff]  ;;  %v6721_v48 = vrot.slane %v6699_v52, %v15503_v9  ;;  %v6507_v33 = vshll.u32 %v18135_v35, 16  ;;  %v6510_v27 = vshrl.u32 %v18135_v35, 16 }
 0x16b   : > { %14825 = vmatmul.mubr.msk.bf16.gmra.mrb[80].mxu0 %vm1479_vm1, %v6227_v17  ;;  %v21379_v17 = vld [vmem:[#allocation117_spill] sm:$0xff]  ;;  %v6663_v56 = vcombine.low %v21392_v39, %v21391_v16  ;;  %v21400_v16 = vld [vmem:[#allocation63_spill] sm:$0xff] }
 0x16c   : > { %14856 = vmatprep.mubr.msk.bf16.mxu0 %vm1479_vm1, %v7064_v12  ;;  %v6698_v18 = vcombine.low %v21379_v17, %v21378_v31  ;;  %v6707_v12 = vrot.slane %v6697_v34, %v15503_v9  ;;  %v21390_v31 = vld [vmem:[#allocation173_spill] sm:$0xff] }
 0x16d   : > { %14831 = vmatmul.mubr.msk.bf16.vlgmr.msra.gmra.mrb[84].mxu1 %vm1479_vm1, %v6577_v24  ;;  %v6647_v24 = vcombine.low %v21377_v28, %v21376_v53  ;;  %v18341_v53 = vpop.f32.mrb[18].mxu1  ;;  %v21389_v28 = vld [vmem:[#allocation184_spill] sm:$0xff]  ;;  %v21401_v39 = vld [vmem:[#allocation61_spill] sm:$0xff] }
 0x16e   : > { %14834 = vmatprep.mubr.msk.bf16.mxu1 %vm1479_vm1, %v6594_v60  ;;  %v21385_v60 = vld [vmem:[#allocation80_spill] sm:$0xff]  ;;  %21388 = vst [vmem:[#allocation111_spill] sm:$0xff] %v18341_v53  ;;  %v7134_v17 = vcombine.low %v21390_v31, %v21389_v28  ;;  %v6714_v8 = vrot.slane %v6698_v18, %v15503_v9  ;;  %v18349_v34 = vpop.f32.mrb[19].mxu1  ;;  %v21398_v28 = vld [vmem:[#allocation65_spill] sm:$0xff]  ;;  %v6680_v18 = vcombine.low %v21401_v39, %v21400_v16  ;;  %v21402_v53 = vld [vmem:[#allocation190_spill] sm:$0xff] }
 0x16f   : > { %v21387_v23 = vcombine.low %v21385_v60, %v21386_v32  ;;  %21393 = vst [vmem:[#allocation13_spill] sm:$0xff] %v18349_v34  ;;  %v6664_v60 = vcombine.low %v21395_v0, %v21394_v59  ;;  %v21396_v32 = vld [vmem:[#allocation187_spill] sm:$0xff]  ;;  %v21399_v31 = vld [vmem:[#allocation188_spill] sm:$0xff]  ;;  %v6485_v0 = vsel %vm16182_vm2, %v6478_v19, %v6483_v2  ;;  %v6515_v59 = vshll.u32 %v18143_v43, 16 }
 0x170   : > { %v7151_v49 = vcombine.low %v21399_v31, %v21398_v28  ;;  %v6729_v37 = vcombine.low %v6707_v12, %v6714_v8  ;;  %v21403_v34 = vld [vmem:[#allocation67_spill] sm:$0xff]  ;;  %v6493_v8 = vsel %vm16182_vm2, %v6486_v26, %v6491_v1  ;;  %v6501_v12 = vsel %vm16182_vm2, %v6494_v22, %v6499_v6  ;;  %v3223_v31 = vld [vmem:[#allocation2 + $0x10] sm:$0xff] }
 0x171   : > { %v6728_v36 = vrot.slane %v21387_v23, %v15503_v9  ;;  %v21397_v23 = vld [vmem:[#allocation185_spill] sm:$0xff]  ;;  %v6681_v21 = vcombine.low %v21403_v34, %v21402_v53  ;;  %v6654_v2 = vrot.slane %v6646_v10, %v15503_v9  ;;  %v18397_v26 = vrot.slane %v7133_v14, %v15503_v9 }
 0x172   : > { %v7150_v13 = vcombine.low %v21397_v23, %v21396_v32  ;;  %v6518_v32 = vshrl.u32 %v18143_v43, 16  ;;  %v18368_v23 = vrot.slane %v6729_v37, %v15503_v9  ;;  %v6509_v37 = vsel %vm16182_vm2, %v6502_v20, %v6507_v33  ;;  %v21405_v14 = vld [vmem:[#allocation69_spill] sm:$0xff]  ;;  %v21406_v20 = vld [vmem:[#allocation66_spill] sm:$0xff] }
 0x173   : > { %v6730_v52 = vcombine.low %v6721_v48, %v6728_v36  ;;  %v21404_v36 = vcombine.low %v18162_v63, %v18167_v61  ;;  %v6517_v43 = vsel %vm16182_vm2, %v6510_v27, %v6515_v59  ;;  %v6661_v63 = vrot.slane %v6647_v24, %v15503_v9  ;;  %v21409_v48 = vld [vmem:[#allocation189_spill] sm:$0xff]  ;;  %v21414_v59 = vld [vmem:[#allocation194_spill] sm:$0xff] }
 0x174   : > { %v6525_v19 = vsel %vm16182_vm2, %v6518_v32, %v6523_v62  ;;  %v6645_v33 = vcombine.low %v18299_v51, %v18311_v29  ;;  %v18400_v27 = vrot.slane %v7134_v17, %v15503_v9  ;;  %v6747_v62 = vcombine.low %v6485_v0, %v6493_v8  ;;  %v21413_v0 = vld [vmem:[#allocation195_spill] sm:$0xff] }
 0x175   : > { %v18371_v28 = vrot.slane %v6730_v52, %v15503_v9  ;;  %14857 = vmatmul.mubr.msk.bf16.vlgmr.msra.gmra.mrb[84].mxu0 %vm1479_vm1, %v21404_v36  ;;  %14835 = vmatmul.mubr.msk.bf16.gmra.mrb[88].mxu1 %vm1479_vm1, %v6611_v50  ;;  %v18403_v50 = vrot.slane %v6663_v56, %v15503_v9  ;;  %v6749_v1 = vcombine.low %v6517_v43, %v6525_v19  ;;  %v21411_v52 = vld [vmem:[#allocation193_spill] sm:$0xff]  ;;  %v3221_v36 = vld [vmem:[#allocation2] sm:$0xff]  ;;  %v6531_v19 = vshll.u32 %v18190_v57, 16 }
 0x176   : > { %14860 = vmatprep.mubr.msk.bf16.mxu0 %vm1479_vm1, %v7098_v11  ;;  %14838 = vmatprep.mubr.msk.bf16.mxu1 %vm1479_vm1, %v6628_v38  ;;  %v18406_v11 = vrot.slane %v6664_v60, %v15503_v9  ;;  %v6748_v38 = vcombine.low %v6501_v12, %v6509_v37  ;;  %v18409_v10 = vrot.slane %v7150_v13, %v15503_v9  ;;  %v6526_v12 = vshrl.u32 %v18186_v40, 16  ;;  %v3224_v37 = vld [vmem:[#allocation2 + $0x18] sm:$0xff] }
 0x177   : > { %v6745_v61 = vcombine.low %v18368_v23, %v18371_v28  ;;  %v18412_v51 = vrot.slane %v7151_v49, %v15503_v9  ;;  %v18415_v29 = vrot.slane %v6680_v18, %v15503_v9  ;;  %v18418_v22 = vrot.slane %v6681_v21, %v15503_v9  ;;  %v18449_v18 = vpop.f32.mrb[16].mxu0 }
 0x178   : > { %v7132_v56 = vcombine.low %v18314_v46, %v18317_v7  ;;  %v6662_v24 = vcombine.low %v6654_v2, %v6661_v63  ;;  %v6461_v6 = vcombine.high %v18174_v44, %v18174_v44  ;;  %v7149_v13 = vcombine.low %v18397_v26, %v18400_v27  ;;  %v21408_v7 = vld [vmem:[#allocation68_spill] sm:$0xff] }
 0x179   : > { %v7167_v49 = vcombine.low %v21406_v20, %v21405_v14  ;;  %v21407_v53 = vcombine.low %v21358_v55, %v18204_v5  ;;  %v6763_v21 = vrot.slane %v6747_v62, %v15503_v9  ;;  %v6679_v46 = vcombine.low %v18403_v50, %v18406_v11  ;;  %v3227_v26 = vld [vmem:[#allocation2 + $0x30] sm:$0xff] }
 0x17a   : > { %v7168_v34 = vcombine.low %v21409_v48, %v21408_v7  ;;  %v6770_v44 = vrot.slane %v6748_v38, %v15503_v9  ;;  %v6777_v60 = vrot.slane %v6749_v1, %v15503_v9  ;;  %v21410_v16 = vcombine.low %v18272_v3, %v18275_v4  ;;  %v21412_v3 = vld [vmem:[#allocation191_spill] sm:$0xff]  ;;  %v3225_v38 = vld [vmem:[#allocation2 + $0x20] sm:$0xff]  ;;  %v3228_v1 = vld [vmem:[#allocation2 + $0x38] sm:$0xff] }
 0x17b   : > { %v6756_v17 = vrot.slane %v21407_v53, %v15503_v9  ;;  %v7166_v5 = vcombine.low %v18409_v10, %v18412_v51  ;;  %v6696_v55 = vcombine.low %v18415_v29, %v18418_v22  ;;  %v3246_v39 = vadd.f32 %v18116_v41, %v3223_v31  ;;  %v18461_v41 = vpop.f32.mrb[17].mxu0  ;;  %v3226_v10 = vld [vmem:[#allocation2 + $0x28] sm:$0xff]  ;;  %v21419_v31 = vld [vmem:[#allocation108_spill] sm:$0xff] }
 0x17c   : > { %v7184_v4 = vcombine.low %v21412_v3, %v21411_v52  ;;  %v7185_v32 = vcombine.low %v21414_v59, %v21413_v0  ;;  %v18458_v8 = vrot.slane %v6461_v6, %v15503_v9  ;;  %v3244_v2 = vadd.f32 %v3221_v36, %v18119_v58  ;;  %v18467_v27 = vpop.f32.mrb[18].mxu0  ;;  %v21416_v22 = vld [vmem:[#allocation111_spill] sm:$0xff]  ;;  %v21418_v6 = vld [vmem:[#allocation109_spill] sm:$0xff]  ;;  %v21421_v3 = vld [vmem:[#allocation88_spill] sm:$0xff] }
 0x17d   : > { %14861 = vmatmul.mubr.msk.bf16.gmra.mrb[88].mxu0 %vm1479_vm1, %v21410_v16  ;;  %14839 = vmatmul.mubr.msk.bf16.gmra.mrb[92].mxu1 %vm1479_vm1, %v6645_v33  ;;  %v6778_v43 = vcombine.low %v6756_v17, %v6763_v21  ;;  %3269 = vst.msk [vmem:[#allocation2 + $0x10] sm:$0xff] %vm1648_vm0, %v3246_v39  ;;  %v3247_v63 = vadd.f32 %v18128_v45, %v3224_v37  ;;  %v3222_v33 = vld [vmem:[#allocation2 + $0x8] sm:$0xff]  ;;  %v3938_v51 = vpop.f32.mrb[19].mxu0  ;;  %v21415_v45 = vld [vmem:[#allocation121_spill] sm:$0xff]  ;;  %v21422_v0 = vld [vmem:[#allocation94_spill] sm:$0xff] }
 0x17e   : > { %14864 = vmatprep.mubr.msk.bf16.mxu0 %vm1479_vm1, %v7132_v56  ;;  %14842 = vmatprep.mubr.msk.bf16.mxu1 %vm1479_vm1, %v6662_v24  ;;  %v6779_v62 = vcombine.low %v6770_v44, %v6777_v60  ;;  %v7218_v40 = vcombine.low %v17861_v25, %v18066_v15  ;;  %v3245_v50 = vadd.f32 %v3222_v33, %v18137_v47  ;;  %v21417_v25 = vld [vmem:[#allocation13_spill] sm:$0xff]  ;;  %v6534_v47 = vshrl.u32 %v18190_v57, 16  ;;  %v21420_v52 = vld [vmem:[#allocation87_spill] sm:$0xff]  ;;  %v21423_v59 = vld [vmem:[#allocation92_spill] sm:$0xff] }
 0x17f   : > { %v3250_v11 = vadd.f32 %v18320_v54, %v3227_v26  ;;  %v13952_v58 = vcombine.high %v18063_v42, %v18066_v15  ;;  %3267 = vst.msk [vmem:[#allocation2] sm:$0xff] %vm1648_vm0, %v3244_v2  ;;  %3270 = vst.msk [vmem:[#allocation2 + $0x18] sm:$0xff] %vm1648_vm0, %v3247_v63  ;;  %v3248_v29 = vadd.f32 %v3225_v38, %v21415_v45  ;;  %v6539_v54 = vshll.u32 %v18458_v8, 16  ;;  %v21424_v36 = vld [vmem:[#allocation78_spill] sm:$0xff] }
 0x180   : > { %v3251_v56 = vadd.f32 %v21416_v22, %v3228_v1  ;;  %v3249_v24 = vadd.f32 %v3226_v10, %v21417_v25  ;;  %v7220_v14 = vcombine.low %v21418_v6, %v18135_v35  ;;  %v13953_v42 = vcombine.high %v21418_v6, %v18135_v35  ;;  %3268 = vst.msk [vmem:[#allocation2 + $0x8] sm:$0xff] %vm1648_vm0, %v3245_v50  ;;  %v3229_v25 = vld [vmem:[#allocation2 + $0x40] sm:$0xff] }
 0x181   : > { %3273 = vst.msk [vmem:[#allocation2 + $0x30] sm:$0xff] %vm1648_vm0, %v3250_v11  ;;  %v7175_v15 = vrot.slane %v7167_v49, %v15503_v9  ;;  %v7182_v20 = vrot.slane %v7168_v34, %v15503_v9  ;;  %3271 = vst.msk [vmem:[#allocation2 + $0x20] sm:$0xff] %vm1648_vm0, %v3248_v29  ;;  %v7192_v53 = vrot.slane %v7184_v4, %v15503_v9 }
 0x182   : > { %3274 = vst.msk [vmem:[#allocation2 + $0x38] sm:$0xff] %vm1648_vm0, %v3251_v56  ;;  %3272 = vst.msk [vmem:[#allocation2 + $0x28] sm:$0xff] %vm1648_vm0, %v3249_v24  ;;  %v7199_v17 = vrot.slane %v7185_v32, %v15503_v9  ;;  %v6786_v35 = vrot.slane %v6778_v43, %v15503_v9  ;;  %v6533_v21 = vsel %vm16182_vm2, %v6526_v12, %v6531_v19  ;;  %v21425_v43 = vld [vmem:[#allocation110_spill] sm:$0xff] }
 0x183   : > { %v6793_v49 = vrot.slane %v6779_v62, %v15503_v9  ;;  %v7228_v7 = vrot.slane %v7218_v40, %v15503_v9  ;;  %v7235_v48 = vrot.slane %v13952_v58, %v15503_v9  ;;  %v6541_v34 = vsel %vm16182_vm2, %v6534_v47, %v6539_v54  ;;  %v21426_v62 = vld [vmem:[#allocation11_spill] sm:$0xff]  ;;  %v3232_v47 = vld [vmem:[#allocation2 + $0x58] sm:$0xff] }
 0x184   : > { %v7242_v44 = vrot.slane %v7220_v14, %v15503_v9  ;;  %v7249_v60 = vrot.slane %v13953_v42, %v15503_v9  ;;  %v7183_v16 = vcombine.low %v7175_v15, %v7182_v20  ;;  %v7200_v39 = vcombine.low %v7192_v53, %v7199_v17  ;;  %v3230_v14 = vld [vmem:[#allocation2 + $0x48] sm:$0xff] }
 0x185   : > { %14865 = vmatmul.mubr.msk.bf16.gmra.mrb[92].mxu0 %vm1479_vm1, %v7149_v13  ;;  %14843 = vmatmul.mubr.msk.bf16.gmra.mrb[96].mxu1 %vm1479_vm1, %v6679_v46  ;;  %v4015_v13 = vld [vmem:[#allocation2 + $0x10] sm:$0xff]  ;;  %v7201_v4 = vcombine.low %v21421_v3, %v21420_v52  ;;  %v6794_v12 = vcombine.low %v6786_v35, %v6793_v49  ;;  %v6795_v30 = vcombine.low %v6533_v21, %v6541_v34  ;;  %v14684_v22 = vpop.f32.mrb[20].mxu1 }
 0x186   : > { %14868 = vmatprep.mubr.msk.bf16.mxu0 %vm1479_vm1, %v7166_v5  ;;  %14846 = vmatprep.mubr.msk.bf16.mxu1 %vm1479_vm1, %v6696_v55  ;;  %v4038_v46 = vadd.f32 %v21419_v31, %v4015_v13  ;;  %v7202_v5 = vcombine.low %v21423_v59, %v21422_v0  ;;  %v4013_v32 = vld [vmem:[#allocation2] sm:$0xff]  ;;  %v4016_v55 = vld [vmem:[#allocation2 + $0x18] sm:$0xff]  ;;  %v7250_v33 = vcombine.low %v7228_v7, %v7235_v48  ;;  %v3159_v56 = vpop.f32.mrb[21].mxu1 }
 0x187   : > { %v4036_v37 = vadd.f32 %v4013_v32, %v21424_v36  ;;  %v4039_v19 = vadd.f32 %v21425_v43, %v4016_v55  ;;  %v4014_v2 = vld [vmem:[#allocation2 + $0x8] sm:$0xff]  ;;  %v7251_v26 = vcombine.low %v7242_v44, %v7249_v60  ;;  %v7209_v29 = vrot.slane %v7201_v4, %v15503_v9  ;;  %v14685_v24 = vpop.f32.mrb[22].mxu1  ;;  %v3233_v4 = vld [vmem:[#allocation2 + $0x60] sm:$0xff] }
 0x188   : > { %4061 = vst.msk [vmem:[#allocation2 + $0x10] sm:$0xff] %vm1648_vm0, %v4038_v46  ;;  %v4019_v63 = vld [vmem:[#allocation2 + $0x30] sm:$0xff]  ;;  %v4037_v40 = vadd.f32 %v4014_v2, %v21426_v62  ;;  %v4017_v11 = vld [vmem:[#allocation2 + $0x20] sm:$0xff]  ;;  %v7258_v23 = vrot.slane %v7250_v33, %v15503_v9  ;;  %v3255_v54 = vadd.f32 %v14685_v24, %v3232_v47  ;;  %v3162_v6 = vpop.f32.mrb[23].mxu1  ;;  %v7267_v53 = vcombine.low %v18190_v57, %v18458_v8 }
 0x189   : > { %v4042_v50 = vadd.f32 %v18449_v18, %v4019_v63  ;;  %v4020_v38 = vld [vmem:[#allocation2 + $0x38] sm:$0xff]  ;;  %v4018_v1 = vld [vmem:[#allocation2 + $0x28] sm:$0xff]  ;;  %4059 = vst.msk [vmem:[#allocation2] sm:$0xff] %vm1648_vm0, %v4036_v37  ;;  %4062 = vst.msk [vmem:[#allocation2 + $0x18] sm:$0xff] %vm1648_vm0, %v4039_v19  ;;  %v4040_v10 = vadd.f32 %v4017_v11, %v18461_v41  ;;  %v7216_v41 = vrot.slane %v7202_v5, %v15503_v9 }
 0x18a   : > { %v4043_v58 = vadd.f32 %v18467_v27, %v4020_v38  ;;  %v4041_v45 = vadd.f32 %v4018_v1, %v3938_v51  ;;  %4060 = vst.msk [vmem:[#allocation2 + $0x8] sm:$0xff] %vm1648_vm0, %v4037_v40  ;;  %v3231_v18 = vld [vmem:[#allocation2 + $0x50] sm:$0xff]  ;;  %v6802_v27 = vrot.slane %v6795_v30, %v15503_v9  ;;  %v7265_v28 = vrot.slane %v7251_v26, %v15503_v9  ;;  %v3236_v5 = vld [vmem:[#allocation2 + $0x78] sm:$0xff] }
 0x18b   : > { %4065 = vst.msk [vmem:[#allocation2 + $0x30] sm:$0xff] %vm1648_vm0, %v4042_v50  ;;  %v3254_v51 = vadd.f32 %v14684_v22, %v3231_v18  ;;  %4063 = vst.msk [vmem:[#allocation2 + $0x20] sm:$0xff] %vm1648_vm0, %v4040_v10  ;;  %v3253_v42 = vadd.f32 %v3230_v14, %v3162_v6  ;;  %v7217_v15 = vcombine.low %v7209_v29, %v7216_v41  ;;  %v3239_v1 = vld [vmem:[#allocation2 + $0x90] sm:$0xff]  ;;  %v3240_v18 = vld [vmem:[#allocation2 + $0x98] sm:$0xff] }
 0x18c   : > { %4066 = vst.msk [vmem:[#allocation2 + $0x38] sm:$0xff] %vm1648_vm0, %v4043_v58  ;;  %4064 = vst.msk [vmem:[#allocation2 + $0x28] sm:$0xff] %vm1648_vm0, %v4041_v45  ;;  %v6809_v20 = vrot.slane %v6802_v27, %v15503_v9  ;;  %v7266_v17 = vcombine.low %v7258_v23, %v7265_v28  ;;  %v7274_v35 = vrot.slane %v7267_v53, %v15503_v9  ;;  %v3237_v45 = vld [vmem:[#allocation2 + $0x80] sm:$0xff]  ;;  %v3243_v53 = vld [vmem:[#allocation2 + $0xb0] sm:$0xf] }
 0x18d   : > { %14869 = vmatmul.mubr.msk.bf16.gmra.mrb[96].mxu0 %vm1479_vm1, %v7183_v16  ;;  %14847 = vmatmul.mubr.msk.bf16.gmra.mrb[100].mxu1 %vm1479_vm1, %v6745_v61  ;;  %v3252_v61 = vadd.f32 %v3229_v25, %v3159_v56  ;;  %3277 = vst.msk [vmem:[#allocation2 + $0x50] sm:$0xff] %vm1648_vm0, %v3254_v51  ;;  %3278 = vst.msk [vmem:[#allocation2 + $0x58] sm:$0xff] %vm1648_vm0, %v3255_v54  ;;  %v3238_v51 = vld [vmem:[#allocation2 + $0x88] sm:$0xff] }
 0x18e   : > { %14872 = vmatprep.mubr.msk.bf16.mxu0 %vm1479_vm1, %v7200_v39  ;;  %14850 = vmatprep.mubr.msk.bf16.mxu1 %vm1479_vm1, %v6794_v12  ;;  %3276 = vst.msk [vmem:[#allocation2 + $0x48] sm:$0xff] %vm1648_vm0, %v3253_v42  ;;  %v7281_v34 = vrot.slane %v7274_v35, %v15503_v9  ;;  %v3235_v9 = vld [vmem:[#allocation2 + $0x70] sm:$0xff]  ;;  %v3234_v12 = vld [vmem:[#allocation2 + $0x68] sm:$0xff] }
 0x18f   : > { %3275 = vst.msk [vmem:[#allocation2 + $0x40] sm:$0xff] %vm1648_vm0, %v3252_v61 }
 0x192   : > { %v14710_v7 = vpop.f32.mrb[20].mxu0 }
 0x193   : > { %v3951_v8 = vpop.f32.mrb[21].mxu0 }
 0x194   : > { %v4023_v21 = vld [vmem:[#allocation2 + $0x50] sm:$0xff]  ;;  %v4024_v48 = vld [vmem:[#allocation2 + $0x58] sm:$0xff]  ;;  %v14711_v13 = vpop.f32.mrb[22].mxu0 }
 0x195   : > { %14873 = vmatmul.mubr.msk.bf16.gmra.mrb[100].mxu0 %vm1479_vm1, %v7217_v15  ;;  %14851 = vmatmul.mubr.msk.bf16.gmra.mrb[104].mxu1 %vm1479_vm1, %v6809_v20  ;;  %v4046_v57 = vadd.f32 %v14710_v7, %v4023_v21  ;;  %v4022_v44 = vld [vmem:[#allocation2 + $0x48] sm:$0xff]  ;;  %v4047_v31 = vadd.f32 %v14711_v13, %v4024_v48  ;;  %v3954_v46 = vpop.f32.mrb[23].mxu0 }
 0x196   : > { %14876 = vmatprep.mubr.msk.bf16.mxu0 %vm1479_vm1, %v7266_v17  ;;  %v4021_v49 = vld [vmem:[#allocation2 + $0x40] sm:$0xff]  ;;  %v4045_v16 = vadd.f32 %v4022_v44, %v3954_v46 }
 0x197   : > { %v4044_v60 = vadd.f32 %v4021_v49, %v3951_v8  ;;  %4069 = vst.msk [vmem:[#allocation2 + $0x50] sm:$0xff] %vm1648_vm0, %v4046_v57  ;;  %4070 = vst.msk [vmem:[#allocation2 + $0x58] sm:$0xff] %vm1648_vm0, %v4047_v31  ;;  %v3241_v49 = vld [vmem:[#allocation2 + $0xa0] sm:$0xff]  ;;  %v3242_v57 = vld [vmem:[#allocation2 + $0xa8] sm:$0xff] }
 0x198   : > { %4068 = vst.msk [vmem:[#allocation2 + $0x48] sm:$0xff] %vm1648_vm0, %v4045_v16  ;;  %v4532_v31 = vld [vmem:[#allocation2 + $0x10] sm:$0xff] }
 0x199   : > { %4067 = vst.msk [vmem:[#allocation2 + $0x40] sm:$0xff] %vm1648_vm0, %v4044_v60 }
 0x19d   : > { %14877 = vmatmul.mubr.msk.bf16.gmra.mrb[104].mxu0 %vm1479_vm1, %v7281_v34 }
 0x19f   : > { %v14688_v39 = vpop.f32.mrb[24].mxu1 }
 0x1a0   : > { %v3258_v52 = vadd.f32 %v14688_v39, %v3235_v9  ;;  %v3175_v3 = vpop.f32.mrb[25].mxu1  ;;  %v4530_v9 = vld [vmem:[#allocation2] sm:$0xff] }
 0x1a1   : > { %v3256_v0 = vadd.f32 %v3233_v4, %v3175_v3  ;;  %v14689_v59 = vpop.f32.mrb[26].mxu1 }
 0x1a2   : > { %3281 = vst.msk [vmem:[#allocation2 + $0x70] sm:$0xff] %vm1648_vm0, %v3258_v52  ;;  %v3259_v32 = vadd.f32 %v14689_v59, %v3236_v5  ;;  %v3178_v55 = vpop.f32.mrb[27].mxu1  ;;  %v4533_v59 = vld [vmem:[#allocation2 + $0x18] sm:$0xff] }
 0x1a3   : > { %3279 = vst.msk [vmem:[#allocation2 + $0x60] sm:$0xff] %vm1648_vm0, %v3256_v0  ;;  %v3257_v30 = vadd.f32 %v3234_v12, %v3178_v55 }
 0x1a4   : > { %3282 = vst.msk [vmem:[#allocation2 + $0x78] sm:$0xff] %vm1648_vm0, %v3259_v32 }
 0x1a5   : > { %3280 = vst.msk [vmem:[#allocation2 + $0x68] sm:$0xff] %vm1648_vm0, %v3257_v30  ;;  %v4531_v30 = vld [vmem:[#allocation2 + $0x8] sm:$0xff] }
 0x1a9   : > { %v4027_v36 = vld [vmem:[#allocation2 + $0x70] sm:$0xff] }
 0x1aa   : > { %v4025_v37 = vld [vmem:[#allocation2 + $0x60] sm:$0xff] }
 0x1ab   : > { %v4028_v19 = vld [vmem:[#allocation2 + $0x78] sm:$0xff] }
 0x1ac   : > { %v4026_v33 = vld [vmem:[#allocation2 + $0x68] sm:$0xff] }
 0x1ad   : > { %v14714_v43 = vpop.f32.mrb[24].mxu0 }
 0x1ae   : > { %v4050_v2 = vadd.f32 %v14714_v43, %v4027_v36  ;;  %v3967_v63 = vpop.f32.mrb[25].mxu0 }
 0x1af   : > { %v4048_v26 = vadd.f32 %v4025_v37, %v3967_v63  ;;  %v14715_v62 = vpop.f32.mrb[26].mxu0 }
 0x1b0   : > { %4073 = vst.msk [vmem:[#allocation2 + $0x70] sm:$0xff] %vm1648_vm0, %v4050_v2  ;;  %v4051_v40 = vadd.f32 %v14715_v62, %v4028_v19  ;;  %v3970_v50 = vpop.f32.mrb[27].mxu0 }
 0x1b1   : > { %4071 = vst.msk [vmem:[#allocation2 + $0x60] sm:$0xff] %vm1648_vm0, %v4048_v26  ;;  %v4049_v11 = vadd.f32 %v4026_v33, %v3970_v50  ;;  %v4536_v26 = vld [vmem:[#allocation2 + $0x30] sm:$0xff] }
 0x1b2   : > { %4074 = vst.msk [vmem:[#allocation2 + $0x78] sm:$0xff] %vm1648_vm0, %v4051_v40 }
 0x1b3   : > { %4072 = vst.msk [vmem:[#allocation2 + $0x68] sm:$0xff] %vm1648_vm0, %v4049_v11  ;;  %v4534_v11 = vld [vmem:[#allocation2 + $0x20] sm:$0xff] }
 0x1ba   : > { %v14692_v38 = vpop.f32.mrb[28].mxu1 }
 0x1bb   : > { %v3262_v10 = vadd.f32 %v14692_v38, %v3239_v1  ;;  %v3191_v58 = vpop.f32.mrb[29].mxu1 }
 0x1bc   : > { %v3260_v29 = vadd.f32 %v3237_v45, %v3191_v58  ;;  %v14693_v22 = vpop.f32.mrb[30].mxu1  ;;  %v4537_v45 = vld [vmem:[#allocation2 + $0x38] sm:$0xff] }
 0x1bd   : > { %3285 = vst.msk [vmem:[#allocation2 + $0x90] sm:$0xff] %vm1648_vm0, %v3262_v10  ;;  %v3263_v41 = vadd.f32 %v14693_v22, %v3240_v18  ;;  %v3194_v27 = vpop.f32.mrb[31].mxu1 }
 0x1be   : > { %3283 = vst.msk [vmem:[#allocation2 + $0x80] sm:$0xff] %vm1648_vm0, %v3260_v29  ;;  %v3261_v56 = vadd.f32 %v3238_v51, %v3194_v27  ;;  %v4535_v27 = vld [vmem:[#allocation2 + $0x28] sm:$0xff] }
 0x1bf   : > { %3286 = vst.msk [vmem:[#allocation2 + $0x98] sm:$0xff] %vm1648_vm0, %v3263_v41 }
 0x1c0   : > { %3284 = vst.msk [vmem:[#allocation2 + $0x88] sm:$0xff] %vm1648_vm0, %v3261_v56 }
 0x1c4   : > { %v4031_v25 = vld [vmem:[#allocation2 + $0x90] sm:$0xff] }
 0x1c5   : > { %v4029_v23 = vld [vmem:[#allocation2 + $0x80] sm:$0xff] }
 0x1c6   : > { %v4032_v61 = vld [vmem:[#allocation2 + $0x98] sm:$0xff] }
 0x1c7   : > { %v14718_v28 = vpop.f32.mrb[28].mxu0  ;;  %v4030_v54 = vld [vmem:[#allocation2 + $0x88] sm:$0xff] }
 0x1c8   : > { %v4054_v24 = vadd.f32 %v14718_v28, %v4031_v25  ;;  %v3983_v47 = vpop.f32.mrb[29].mxu0 }
 0x1c9   : > { %v4052_v6 = vadd.f32 %v4029_v23, %v3983_v47  ;;  %v14719_v14 = vpop.f32.mrb[30].mxu0 }
 0x1ca   : > { %4077 = vst.msk [vmem:[#allocation2 + $0x90] sm:$0xff] %vm1648_vm0, %v4054_v24  ;;  %v4055_v42 = vadd.f32 %v14719_v14, %v4032_v61  ;;  %v3986_v15 = vpop.f32.mrb[31].mxu0 }
 0x1cb   : > { %v14696_v20 = vpop.f32.mrb[32].mxu1  ;;  %4075 = vst.msk [vmem:[#allocation2 + $0x80] sm:$0xff] %vm1648_vm0, %v4052_v6  ;;  %v4053_v17 = vadd.f32 %v4030_v54, %v3986_v15  ;;  %v4540_v6 = vld [vmem:[#allocation2 + $0x50] sm:$0xff] }
 0x1cc   : > { %v3266_v35 = vadd.f32 %v14696_v20, %v3243_v53  ;;  %v3207_v21 = vpop.f32.mrb[33].mxu1  ;;  %4078 = vst.msk [vmem:[#allocation2 + $0x98] sm:$0xff] %vm1648_vm0, %v4055_v42  ;;  %v4538_v20 = vld [vmem:[#allocation2 + $0x40] sm:$0xff] }
 0x1cd   : > { %v3264_v7 = vadd.f32 %v3241_v49, %v3207_v21  ;;  %v14697_v48 = vpop.f32.mrb[34].mxu1  ;;  %4076 = vst.msk [vmem:[#allocation2 + $0x88] sm:$0xff] %vm1648_vm0, %v4053_v17  ;;  %v4541_v49 = vld [vmem:[#allocation2 + $0x58] sm:$0xff] }
 0x1ce   : > { %3289 = vst.msk [vmem:[#allocation2 + $0xb0] sm:$0xf] %vm1671_vm3, %v3266_v35  ;;  %v3210_v34 = vpop.f32.mrb[35].mxu1 }
 0x1cf   : > { %3287 = vst.msk [vmem:[#allocation2 + $0xa0] sm:$0xff] %vm1648_vm0, %v3264_v7  ;;  %v3265_v8 = vadd.f32 %v3242_v57, %v3210_v34 }
 0x1d1   : > { %3288 = vst.msk [vmem:[#allocation2 + $0xa8] sm:$0xff] %vm1648_vm0, %v3265_v8  ;;  %v14722_v44 = vpop.f32.mrb[32].mxu0  ;;  %v4539_v8 = vld [vmem:[#allocation2 + $0x48] sm:$0xff] }
 0x1d2   : > { %v3999_v60 = vpop.f32.mrb[33].mxu0 }
 0x1d3   : > { %v14723_v46 = vpop.f32.mrb[34].mxu0 }
 0x1d4   : > { %v4002_v52 = vpop.f32.mrb[35].mxu0 }
 0x1d5   : > { %v14728_v13 = vpop.f32.mrb[36].mxu1  ;;  %v4035_v3 = vld [vmem:[#allocation2 + $0xb0] sm:$0xf] }
 0x1d6   : > { %v4555_v16 = vadd.f32 %v14728_v13, %v4532_v31  ;;  %v4436_v39 = vpop.f32.mrb[37].mxu1  ;;  %v4058_v5 = vadd.f32 %v14722_v44, %v4035_v3  ;;  %v4033_v32 = vld [vmem:[#allocation2 + $0xa0] sm:$0xff]  ;;  %v4544_v3 = vld [vmem:[#allocation2 + $0x70] sm:$0xff] }
 0x1d7   : > { %v4553_v4 = vadd.f32 %v4530_v9, %v4436_v39  ;;  %v14729_v0 = vpop.f32.mrb[38].mxu1  ;;  %v4056_v36 = vadd.f32 %v4033_v32, %v3999_v60  ;;  %v4542_v32 = vld [vmem:[#allocation2 + $0x60] sm:$0xff] }
 0x1d8   : > { %4578 = vst.msk [vmem:[#allocation2 + $0x10] sm:$0xff] %vm1648_vm0, %v4555_v16  ;;  %v4556_v55 = vadd.f32 %v14729_v0, %v4533_v59  ;;  %v4439_v12 = vpop.f32.mrb[39].mxu1  ;;  %v4034_v43 = vld [vmem:[#allocation2 + $0xa8] sm:$0xff] }
 0x1d9   : > { %4576 = vst.msk [vmem:[#allocation2] sm:$0xff] %vm1648_vm0, %v4553_v4  ;;  %v4554_v37 = vadd.f32 %v4531_v30, %v4439_v12  ;;  %4079 = vst.msk [vmem:[#allocation2 + $0xa0] sm:$0xff] %vm1648_vm0, %v4056_v36  ;;  %v4057_v19 = vadd.f32 %v4034_v43, %v4002_v52  ;;  %v14754_v2 = vpop.f32.mrb[36].mxu0  ;;  %v4545_v43 = vld [vmem:[#allocation2 + $0x78] sm:$0xff] }
 0x1da   : > { %4081 = vst.msk [vmem:[#allocation2 + $0xb0] sm:$0xf] %vm1671_vm3, %v4058_v5  ;;  %v5309_v63 = vpop.f32.mrb[37].mxu0 }
 0x1db   : > { %4579 = vst.msk [vmem:[#allocation2 + $0x18] sm:$0xff] %vm1648_vm0, %v4556_v55  ;;  %4577 = vst.msk [vmem:[#allocation2 + $0x8] sm:$0xff] %vm1648_vm0, %v4554_v37  ;;  %v14755_v62 = vpop.f32.mrb[38].mxu0 }
 0x1dc   : > { %4080 = vst.msk [vmem:[#allocation2 + $0xa8] sm:$0xff] %vm1648_vm0, %v4057_v19  ;;  %v5312_v38 = vpop.f32.mrb[39].mxu0 }
 0x1dd   : > { %v14732_v33 = vpop.f32.mrb[40].mxu1 }
 0x1de   : > { %v4559_v40 = vadd.f32 %v14732_v33, %v4536_v26  ;;  %v4452_v50 = vpop.f32.mrb[41].mxu1  ;;  %v4543_v26 = vld [vmem:[#allocation2 + $0x68] sm:$0xff] }
 0x1df   : > { %v5405_v1 = vld [vmem:[#allocation2 + $0x10] sm:$0xff]  ;;  %v4557_v10 = vadd.f32 %v4534_v11, %v4452_v50  ;;  %v14733_v58 = vpop.f32.mrb[42].mxu1 }
 0x1e0   : > { %v5428_v29 = vadd.f32 %v14754_v2, %v5405_v1  ;;  %4582 = vst.msk [vmem:[#allocation2 + $0x30] sm:$0xff] %vm1648_vm0, %v4559_v40  ;;  %v5403_v22 = vld [vmem:[#allocation2] sm:$0xff]  ;;  %v4560_v18 = vadd.f32 %v14733_v58, %v4537_v45  ;;  %v4455_v41 = vpop.f32.mrb[43].mxu1  ;;  %v14074_v58 = vld [vmem:[%s20583_s3 + $0x14] sm:$0xf] }
 0x1e1   : > { %v5426_v51 = vadd.f32 %v5403_v22, %v5309_v63  ;;  %4580 = vst.msk [vmem:[#allocation2 + $0x20] sm:$0xff] %vm1648_vm0, %v4557_v10  ;;  %v4558_v25 = vadd.f32 %v4535_v27, %v4455_v41  ;;  %v13997_v10 = vld [vmem:[%s20583_s3 + $0x4] sm:$0xf]  ;;  %15376 = vmatprep.subr.msk.bf16.mxu0 %vm8951_vm4, %v14074_v58  ;;  %v10212_v41 = vsel %vm8951_vm4, %v14074_v58, 0 }
 0x1e2   : > { %v5406_v56 = vld [vmem:[#allocation2 + $0x18] sm:$0xff]  ;;  %5451 = vst.msk [vmem:[#allocation2 + $0x10] sm:$0xff] %vm1648_vm0, %v5428_v29  ;;  %4583 = vst.msk [vmem:[#allocation2 + $0x38] sm:$0xff] %vm1648_vm0, %v4560_v18  ;;  %v5404_v28 = vld [vmem:[#allocation2 + $0x8] sm:$0xff]  ;;  %v14758_v24 = vpop.f32.mrb[40].mxu0  ;;  %15372 = vmatprep.subr.msk.bf16.mxu1 %vm8951_vm4, %v13997_v10  ;;  %v8953_v18 = vsel %vm8951_vm4, %v13997_v10, 0  ;;  %14953 = vmatpush3.bf16.msra.mxu0 %v10212_v41 }
 0x1e3   : > { %v5429_v23 = vadd.f32 %v14755_v62, %v5406_v56  ;;  %5449 = vst.msk [vmem:[#allocation2] sm:$0xff] %vm1648_vm0, %v5426_v51  ;;  %v5427_v61 = vadd.f32 %v5404_v28, %v5312_v38  ;;  %4581 = vst.msk [vmem:[#allocation2 + $0x28] sm:$0xff] %vm1648_vm0, %v4558_v25  ;;  %v5325_v47 = vpop.f32.mrb[41].mxu0  ;;  %v4548_v29 = vld [vmem:[#allocation2 + $0x90] sm:$0xff]  ;;  %v4546_v56 = vld [vmem:[#allocation2 + $0x80] sm:$0xff]  ;;  %14881 = vmatpush3.bf16.msra.mxu1 %v8953_v18 }
 0x1e4   : > { %v14759_v14 = vpop.f32.mrb[42].mxu0 }
 0x1e5   : > { %5452 = vst.msk [vmem:[#allocation2 + $0x18] sm:$0xff] %vm1648_vm0, %v5429_v23  ;;  %5450 = vst.msk [vmem:[#allocation2 + $0x8] sm:$0xff] %vm1648_vm0, %v5427_v61  ;;  %v14736_v54 = vpop.f32.mrb[44].mxu1  ;;  %v5328_v53 = vpop.f32.mrb[43].mxu0 }
 0x1e6   : > { %v4563_v42 = vadd.f32 %v14736_v54, %v4540_v6  ;;  %v4468_v15 = vpop.f32.mrb[45].mxu1 }
 0x1e7   : > { %v5409_v17 = vld [vmem:[#allocation2 + $0x30] sm:$0xff]  ;;  %v4561_v35 = vadd.f32 %v4538_v20, %v4468_v15  ;;  %v14737_v21 = vpop.f32.mrb[46].mxu1 }
 0x1e8   : > { %v5432_v7 = vadd.f32 %v14758_v24, %v5409_v17  ;;  %4586 = vst.msk [vmem:[#allocation2 + $0x50] sm:$0xff] %vm1648_vm0, %v4563_v42  ;;  %v5407_v48 = vld [vmem:[#allocation2 + $0x20] sm:$0xff]  ;;  %v4564_v34 = vadd.f32 %v14737_v21, %v4541_v49  ;;  %v4471_v57 = vpop.f32.mrb[47].mxu1  ;;  %v4549_v24 = vld [vmem:[#allocation2 + $0x98] sm:$0xff]  ;;  %v4547_v42 = vld [vmem:[#allocation2 + $0x88] sm:$0xff] }
 0x1e9   : > { %v5430_v44 = vadd.f32 %v5407_v48, %v5325_v47  ;;  %4584 = vst.msk [vmem:[#allocation2 + $0x40] sm:$0xff] %vm1648_vm0, %v4561_v35  ;;  %v5410_v60 = vld [vmem:[#allocation2 + $0x38] sm:$0xff]  ;;  %v4562_v13 = vadd.f32 %v4539_v8, %v4471_v57 }
 0x1ea   : > { %5455 = vst.msk [vmem:[#allocation2 + $0x30] sm:$0xff] %vm1648_vm0, %v5432_v7  ;;  %v5433_v31 = vadd.f32 %v14759_v14, %v5410_v60  ;;  %4587 = vst.msk [vmem:[#allocation2 + $0x58] sm:$0xff] %vm1648_vm0, %v4564_v34  ;;  %v5408_v46 = vld [vmem:[#allocation2 + $0x28] sm:$0xff]  ;;  %v4552_v34 = vld [vmem:[#allocation2 + $0xb0] sm:$0xf] }
 0x1eb   : > { %5453 = vst.msk [vmem:[#allocation2 + $0x20] sm:$0xff] %vm1648_vm0, %v5430_v44  ;;  %v5431_v16 = vadd.f32 %v5408_v46, %v5328_v53  ;;  %4585 = vst.msk [vmem:[#allocation2 + $0x48] sm:$0xff] %vm1648_vm0, %v4562_v13  ;;  %v14762_v39 = vpop.f32.mrb[44].mxu0 }
 0x1ec   : > { %5456 = vst.msk [vmem:[#allocation2 + $0x38] sm:$0xff] %vm1648_vm0, %v5433_v31  ;;  %v5341_v9 = vpop.f32.mrb[45].mxu0  ;;  %v4550_v31 = vld [vmem:[#allocation2 + $0xa0] sm:$0xff] }
 0x1ed   : > { %5454 = vst.msk [vmem:[#allocation2 + $0x28] sm:$0xff] %vm1648_vm0, %v5431_v16  ;;  %v14740_v52 = vpop.f32.mrb[48].mxu1  ;;  %v14763_v4 = vpop.f32.mrb[46].mxu0 }
 0x1ee   : > { %v4567_v59 = vadd.f32 %v14740_v52, %v4544_v3  ;;  %v4484_v5 = vpop.f32.mrb[49].mxu1  ;;  %v5344_v55 = vpop.f32.mrb[47].mxu0 }
 0x1ef   : > { %v5413_v0 = vld [vmem:[#allocation2 + $0x50] sm:$0xff]  ;;  %v4565_v36 = vadd.f32 %v4542_v32, %v4484_v5  ;;  %v14741_v37 = vpop.f32.mrb[50].mxu1  ;;  %v4551_v5 = vld [vmem:[#allocation2 + $0xa8] sm:$0xff] }
 0x1f0   : > { %v5436_v12 = vadd.f32 %v14762_v39, %v5413_v0  ;;  %v5411_v30 = vld [vmem:[#allocation2 + $0x40] sm:$0xff]  ;;  %4590 = vst.msk [vmem:[#allocation2 + $0x70] sm:$0xff] %vm1648_vm0, %v4567_v59  ;;  %v4568_v63 = vadd.f32 %v14741_v37, %v4545_v43  ;;  %v4487_v33 = vpop.f32.mrb[51].mxu1  ;;  %v5941_v37 = vld [vmem:[#allocation2 + $0x10] sm:$0xff] }
 0x1f1   : > { %v5434_v19 = vadd.f32 %v5411_v30, %v5341_v9  ;;  %v5414_v2 = vld [vmem:[#allocation2 + $0x58] sm:$0xff]  ;;  %4588 = vst.msk [vmem:[#allocation2 + $0x60] sm:$0xff] %vm1648_vm0, %v4565_v36  ;;  %v4566_v50 = vadd.f32 %v4543_v26, %v4487_v33 }
 0x1f2   : > { %5459 = vst.msk [vmem:[#allocation2 + $0x50] sm:$0xff] %vm1648_vm0, %v5436_v12  ;;  %v5437_v62 = vadd.f32 %v14763_v4, %v5414_v2  ;;  %v5412_v40 = vld [vmem:[#allocation2 + $0x48] sm:$0xff]  ;;  %4591 = vst.msk [vmem:[#allocation2 + $0x78] sm:$0xff] %vm1648_vm0, %v4568_v63  ;;  %v5939_v63 = vld [vmem:[#allocation2] sm:$0xff] }
 0x1f3   : > { %5457 = vst.msk [vmem:[#allocation2 + $0x40] sm:$0xff] %vm1648_vm0, %v5434_v19  ;;  %v5435_v11 = vadd.f32 %v5412_v40, %v5344_v55  ;;  %4589 = vst.msk [vmem:[#allocation2 + $0x68] sm:$0xff] %vm1648_vm0, %v4566_v50  ;;  %v14766_v38 = vpop.f32.mrb[48].mxu0 }
 0x1f4   : > { %5460 = vst.msk [vmem:[#allocation2 + $0x58] sm:$0xff] %vm1648_vm0, %v5437_v62  ;;  %v5357_v1 = vpop.f32.mrb[49].mxu0 }
 0x1f5   : > { %5458 = vst.msk [vmem:[#allocation2 + $0x48] sm:$0xff] %vm1648_vm0, %v5435_v11  ;;  %v14744_v45 = vpop.f32.mrb[52].mxu1  ;;  %v14767_v22 = vpop.f32.mrb[50].mxu0  ;;  %v5942_v11 = vld [vmem:[#allocation2 + $0x18] sm:$0xff] }
 0x1f6   : > { %v4571_v27 = vadd.f32 %v14744_v45, %v4548_v29  ;;  %v4500_v51 = vpop.f32.mrb[53].mxu1  ;;  %v5360_v25 = vpop.f32.mrb[51].mxu0  ;;  %v5940_v45 = vld [vmem:[#allocation2 + $0x8] sm:$0xff] }
 0x1f7   : > { %v5417_v23 = vld [vmem:[#allocation2 + $0x70] sm:$0xff]  ;;  %v4569_v28 = vadd.f32 %v4546_v56, %v4500_v51  ;;  %v14745_v61 = vpop.f32.mrb[54].mxu1 }
 0x1f8   : > { %v5440_v47 = vadd.f32 %v14766_v38, %v5417_v23  ;;  %4594 = vst.msk [vmem:[#allocation2 + $0x90] sm:$0xff] %vm1648_vm0, %v4571_v27  ;;  %v5415_v54 = vld [vmem:[#allocation2 + $0x60] sm:$0xff]  ;;  %v4572_v6 = vadd.f32 %v14745_v61, %v4549_v24  ;;  %v4503_v14 = vpop.f32.mrb[55].mxu1  ;;  %v5945_v51 = vld [vmem:[#allocation2 + $0x30] sm:$0xff] }
 0x1f9   : > { %v5438_v15 = vadd.f32 %v5415_v54, %v5357_v1  ;;  %4592 = vst.msk [vmem:[#allocation2 + $0x80] sm:$0xff] %vm1648_vm0, %v4569_v28  ;;  %v5418_v20 = vld [vmem:[#allocation2 + $0x78] sm:$0xff]  ;;  %v4570_v53 = vadd.f32 %v4547_v42, %v4503_v14  ;;  %v5943_v61 = vld [vmem:[#allocation2 + $0x20] sm:$0xff] }
 0x1fa   : > { %5463 = vst.msk [vmem:[#allocation2 + $0x70] sm:$0xff] %vm1648_vm0, %v5440_v47  ;;  %v5441_v17 = vadd.f32 %v14767_v22, %v5418_v20  ;;  %4595 = vst.msk [vmem:[#allocation2 + $0x98] sm:$0xff] %vm1648_vm0, %v4572_v6  ;;  %v5416_v35 = vld [vmem:[#allocation2 + $0x68] sm:$0xff]  ;;  %v5946_v42 = vld [vmem:[#allocation2 + $0x38] sm:$0xff] }
 0x1fb   : > { %5461 = vst.msk [vmem:[#allocation2 + $0x60] sm:$0xff] %vm1648_vm0, %v5438_v15  ;;  %v5439_v21 = vadd.f32 %v5416_v35, %v5360_v25  ;;  %4593 = vst.msk [vmem:[#allocation2 + $0x88] sm:$0xff] %vm1648_vm0, %v4570_v53 }
 0x1fc   : > { %5464 = vst.msk [vmem:[#allocation2 + $0x78] sm:$0xff] %vm1648_vm0, %v5441_v17 }
 0x1fd   : > { %5462 = vst.msk [vmem:[#allocation2 + $0x68] sm:$0xff] %vm1648_vm0, %v5439_v21  ;;  %v5944_v21 = vld [vmem:[#allocation2 + $0x28] sm:$0xff] }
 0x1ff   : > { %v14770_v49 = vpop.f32.mrb[52].mxu0  ;;  %v5421_v7 = vld [vmem:[#allocation2 + $0x90] sm:$0xff] }
 0x200   : > { %v14748_v48 = vpop.f32.mrb[56].mxu1  ;;  %v5444_v57 = vadd.f32 %v14770_v49, %v5421_v7  ;;  %v5373_v44 = vpop.f32.mrb[53].mxu0  ;;  %v5419_v60 = vld [vmem:[#allocation2 + $0x80] sm:$0xff] }
 0x201   : > { %v4575_v8 = vadd.f32 %v14748_v48, %v4552_v34  ;;  %v4516_v13 = vpop.f32.mrb[57].mxu1  ;;  %v5442_v46 = vadd.f32 %v5419_v60, %v5373_v44  ;;  %v14771_v39 = vpop.f32.mrb[54].mxu0  ;;  %v5422_v9 = vld [vmem:[#allocation2 + $0x98] sm:$0xff]  ;;  %v5949_v44 = vld [vmem:[#allocation2 + $0x50] sm:$0xff] }
 0x202   : > { %v4573_v16 = vadd.f32 %v4550_v31, %v4516_v13  ;;  %v14749_v52 = vpop.f32.mrb[58].mxu1  ;;  %5467 = vst.msk [vmem:[#allocation2 + $0x90] sm:$0xff] %vm1648_vm0, %v5444_v57  ;;  %v5445_v3 = vadd.f32 %v14771_v39, %v5422_v9  ;;  %v5376_v4 = vpop.f32.mrb[55].mxu0  ;;  %v5420_v0 = vld [vmem:[#allocation2 + $0x88] sm:$0xff] }
 0x203   : > { %4598 = vst.msk [vmem:[#allocation2 + $0xb0] sm:$0xf] %vm1671_vm3, %v4575_v8  ;;  %v4519_v59 = vpop.f32.mrb[59].mxu1  ;;  %v5443_v32 = vadd.f32 %v5420_v0, %v5376_v4 }
 0x204   : > { %5465 = vst.msk [vmem:[#allocation2 + $0x80] sm:$0xff] %vm1648_vm0, %v5442_v46  ;;  %4596 = vst.msk [vmem:[#allocation2 + $0xa0] sm:$0xff] %vm1648_vm0, %v4573_v16  ;;  %v4574_v55 = vadd.f32 %v4551_v5, %v4519_v59  ;;  %v5947_v46 = vld [vmem:[#allocation2 + $0x40] sm:$0xff] }
 0x205   : > { %5468 = vst.msk [vmem:[#allocation2 + $0x98] sm:$0xff] %vm1648_vm0, %v5445_v3  ;;  %5466 = vst.msk [vmem:[#allocation2 + $0x88] sm:$0xff] %vm1648_vm0, %v5443_v32  ;;  %v5950_v3 = vld [vmem:[#allocation2 + $0x58] sm:$0xff] }
 0x206   : > { %4597 = vst.msk [vmem:[#allocation2 + $0xa8] sm:$0xff] %vm1648_vm0, %v4574_v55  ;;  %v5948_v55 = vld [vmem:[#allocation2 + $0x48] sm:$0xff] }
 0x20a   : > { %v5425_v12 = vld [vmem:[#allocation2 + $0xb0] sm:$0xf] }
 0x20b   : > { %v5423_v30 = vld [vmem:[#allocation2 + $0xa0] sm:$0xff] }
 0x20c   : > { %v14780_v36 = vpop.f32.mrb[60].mxu1 }
 0x20d   : > { %v14774_v43 = vpop.f32.mrb[56].mxu0  ;;  %v5964_v19 = vadd.f32 %v14780_v36, %v5941_v37  ;;  %v5845_v2 = vpop.f32.mrb[61].mxu1  ;;  %v5424_v40 = vld [vmem:[#allocation2 + $0xa8] sm:$0xff] }
 0x20e   : > { %v5448_v33 = vadd.f32 %v14774_v43, %v5425_v12  ;;  %v5389_v26 = vpop.f32.mrb[57].mxu0  ;;  %v5962_v62 = vadd.f32 %v5939_v63, %v5845_v2  ;;  %v14781_v50 = vpop.f32.mrb[62].mxu1 }
 0x20f   : > { %v5446_v38 = vadd.f32 %v5423_v30, %v5389_v26  ;;  %5987 = vst.msk [vmem:[#allocation2 + $0x10] sm:$0xff] %vm1648_vm0, %v5964_v19  ;;  %v14775_v1 = vpop.f32.mrb[58].mxu0  ;;  %v5965_v10 = vadd.f32 %v14781_v50, %v5942_v11  ;;  %v5848_v58 = vpop.f32.mrb[63].mxu1  ;;  %v5951_v50 = vld [vmem:[#allocation2 + $0x60] sm:$0xff] }
 0x210   : > { %5471 = vst.msk [vmem:[#allocation2 + $0xb0] sm:$0xf] %vm1671_vm3, %v5448_v33  ;;  %v5392_v29 = vpop.f32.mrb[59].mxu0  ;;  %v5963_v22 = vadd.f32 %v5940_v45, %v5848_v58  ;;  %v5953_v33 = vld [vmem:[#allocation2 + $0x70] sm:$0xff]  ;;  %v5954_v58 = vld [vmem:[#allocation2 + $0x78] sm:$0xff] }
 0x211   : > { %5985 = vst.msk [vmem:[#allocation2] sm:$0xff] %vm1648_vm0, %v5962_v62  ;;  %5469 = vst.msk [vmem:[#allocation2 + $0xa0] sm:$0xff] %vm1648_vm0, %v5446_v38  ;;  %v5447_v18 = vadd.f32 %v5424_v40, %v5392_v29 }
 0x212   : > { %5988 = vst.msk [vmem:[#allocation2 + $0x18] sm:$0xff] %vm1648_vm0, %v5965_v10  ;;  %5986 = vst.msk [vmem:[#allocation2 + $0x8] sm:$0xff] %vm1648_vm0, %v5963_v22 }
 0x213   : > { %5470 = vst.msk [vmem:[#allocation2 + $0xa8] sm:$0xff] %vm1648_vm0, %v5447_v18 }
 0x215   : > { %v14806_v41 = vpop.f32.mrb[60].mxu0  ;;  %v14784_v27 = vpop.f32.mrb[64].mxu1 }
 0x216   : > { %v6394_v56 = vld [vmem:[#allocation2 + $0x10] sm:$0xff]  ;;  %v5968_v25 = vadd.f32 %v14784_v27, %v5945_v51  ;;  %v6298_v23 = vpop.f32.mrb[61].mxu0  ;;  %v5861_v28 = vpop.f32.mrb[65].mxu1  ;;  %v5952_v27 = vld [vmem:[#allocation2 + $0x68] sm:$0xff] }
 0x217   : > { %v6417_v24 = vadd.f32 %v14806_v41, %v6394_v56  ;;  %v5966_v54 = vadd.f32 %v5943_v61, %v5861_v28  ;;  %v14807_v6 = vpop.f32.mrb[62].mxu0  ;;  %v14785_v14 = vpop.f32.mrb[66].mxu1 }
 0x218   : > { %v6392_v47 = vld [vmem:[#allocation2] sm:$0xff]  ;;  %5991 = vst.msk [vmem:[#allocation2 + $0x30] sm:$0xff] %vm1648_vm0, %v5968_v25  ;;  %v5969_v53 = vadd.f32 %v14785_v14, %v5946_v42  ;;  %v6301_v17 = vpop.f32.mrb[63].mxu0  ;;  %v5864_v35 = vpop.f32.mrb[67].mxu1 }
 0x219   : > { %v6415_v15 = vadd.f32 %v6392_v47, %v6298_v23  ;;  %v6395_v20 = vld [vmem:[#allocation2 + $0x18] sm:$0xff]  ;;  %6440 = vst.msk [vmem:[#allocation2 + $0x10] sm:$0xff] %vm1648_vm0, %v6417_v24  ;;  %5989 = vst.msk [vmem:[#allocation2 + $0x20] sm:$0xff] %vm1648_vm0, %v5966_v54  ;;  %v6393_v7 = vld [vmem:[#allocation2 + $0x8] sm:$0xff]  ;;  %v5967_v48 = vadd.f32 %v5944_v21, %v5864_v35 }
 0x21a   : > { %v6418_v49 = vadd.f32 %v14807_v6, %v6395_v20  ;;  %5992 = vst.msk [vmem:[#allocation2 + $0x38] sm:$0xff] %vm1648_vm0, %v5969_v53  ;;  %v6416_v34 = vadd.f32 %v6393_v7, %v6301_v17  ;;  %v5957_v54 = vld [vmem:[#allocation2 + $0x90] sm:$0xff]  ;;  %v5958_v21 = vld [vmem:[#allocation2 + $0x98] sm:$0xff] }
 0x21b   : > { %6438 = vst.msk [vmem:[#allocation2] sm:$0xff] %vm1648_vm0, %v6415_v15  ;;  %5990 = vst.msk [vmem:[#allocation2 + $0x28] sm:$0xff] %vm1648_vm0, %v5967_v48  ;;  %v5955_v15 = vld [vmem:[#allocation2 + $0x80] sm:$0xff] }
 0x21c   : > { %6441 = vst.msk [vmem:[#allocation2 + $0x18] sm:$0xff] %vm1648_vm0, %v6418_v49  ;;  %6439 = vst.msk [vmem:[#allocation2 + $0x8] sm:$0xff] %vm1648_vm0, %v6416_v34 }
 0x21d   : > { %v14810_v57 = vpop.f32.mrb[64].mxu0 }
 0x21e   : > { %v6314_v13 = vpop.f32.mrb[65].mxu0 }
 0x21f   : > { %v6398_v16 = vld [vmem:[#allocation2 + $0x30] sm:$0xff]  ;;  %v14811_v9 = vpop.f32.mrb[66].mxu0 }
 0x220   : > { %v14788_v8 = vpop.f32.mrb[68].mxu1  ;;  %v6421_v4 = vadd.f32 %v14810_v57, %v6398_v16  ;;  %v6396_v0 = vld [vmem:[#allocation2 + $0x20] sm:$0xff]  ;;  %v6317_v5 = vpop.f32.mrb[67].mxu0 }
 0x221   : > { %v5972_v60 = vadd.f32 %v14788_v8, %v5949_v44  ;;  %v5877_v31 = vpop.f32.mrb[69].mxu1  ;;  %v6419_v12 = vadd.f32 %v6396_v0, %v6314_v13  ;;  %v6399_v30 = vld [vmem:[#allocation2 + $0x38] sm:$0xff]  ;;  %v5956_v8 = vld [vmem:[#allocation2 + $0x88] sm:$0xff] }
 0x222   : > { %v5970_v39 = vadd.f32 %v5947_v46, %v5877_v31  ;;  %v14789_v52 = vpop.f32.mrb[70].mxu1  ;;  %6444 = vst.msk [vmem:[#allocation2 + $0x30] sm:$0xff] %vm1648_vm0, %v6421_v4  ;;  %v6422_v37 = vadd.f32 %v14811_v9, %v6399_v30  ;;  %v6397_v43 = vld [vmem:[#allocation2 + $0x28] sm:$0xff] }
 0x223   : > { %5995 = vst.msk [vmem:[#allocation2 + $0x50] sm:$0xff] %vm1648_vm0, %v5972_v60  ;;  %v5973_v59 = vadd.f32 %v14789_v52, %v5950_v3  ;;  %v5880_v32 = vpop.f32.mrb[71].mxu1  ;;  %6442 = vst.msk [vmem:[#allocation2 + $0x20] sm:$0xff] %vm1648_vm0, %v6419_v12  ;;  %v6420_v19 = vadd.f32 %v6397_v43, %v6317_v5  ;;  %v5961_v52 = vld [vmem:[#allocation2 + $0xb0] sm:$0xf] }
 0x224   : > { %5993 = vst.msk [vmem:[#allocation2 + $0x40] sm:$0xff] %vm1648_vm0, %v5970_v39  ;;  %v5971_v36 = vadd.f32 %v5948_v55, %v5880_v32  ;;  %6445 = vst.msk [vmem:[#allocation2 + $0x38] sm:$0xff] %vm1648_vm0, %v6422_v37 }
 0x225   : > { %5996 = vst.msk [vmem:[#allocation2 + $0x58] sm:$0xff] %vm1648_vm0, %v5973_v59  ;;  %6443 = vst.msk [vmem:[#allocation2 + $0x28] sm:$0xff] %vm1648_vm0, %v6420_v19  ;;  %v5959_v59 = vld [vmem:[#allocation2 + $0xa0] sm:$0xff]  ;;  %v5960_v19 = vld [vmem:[#allocation2 + $0xa8] sm:$0xff] }
 0x226   : > { %5994 = vst.msk [vmem:[#allocation2 + $0x48] sm:$0xff] %vm1648_vm0, %v5971_v36  ;;  %v14814_v2 = vpop.f32.mrb[68].mxu0 }
 0x227   : > { %v6330_v62 = vpop.f32.mrb[69].mxu0 }
 0x228   : > { %v14792_v63 = vpop.f32.mrb[72].mxu1  ;;  %v14815_v1 = vpop.f32.mrb[70].mxu0 }
 0x229   : > { %v5976_v26 = vadd.f32 %v14792_v63, %v5953_v33  ;;  %v5893_v40 = vpop.f32.mrb[73].mxu1  ;;  %v6333_v18 = vpop.f32.mrb[71].mxu0 }
 0x22a   : > { %v6402_v11 = vld [vmem:[#allocation2 + $0x50] sm:$0xff]  ;;  %v5974_v38 = vadd.f32 %v5951_v50, %v5893_v40  ;;  %v14793_v10 = vpop.f32.mrb[74].mxu1 }
 0x22b   : > { %v6425_v45 = vadd.f32 %v14814_v2, %v6402_v11  ;;  %5999 = vst.msk [vmem:[#allocation2 + $0x70] sm:$0xff] %vm1648_vm0, %v5976_v26  ;;  %v6400_v29 = vld [vmem:[#allocation2 + $0x40] sm:$0xff]  ;;  %v5977_v22 = vadd.f32 %v14793_v10, %v5954_v58  ;;  %v5896_v41 = vpop.f32.mrb[75].mxu1 }
 0x22c   : > { %v6423_v51 = vadd.f32 %v6400_v29, %v6330_v62  ;;  %5997 = vst.msk [vmem:[#allocation2 + $0x60] sm:$0xff] %vm1648_vm0, %v5974_v38  ;;  %v6403_v56 = vld [vmem:[#allocation2 + $0x58] sm:$0xff]  ;;  %v5975_v25 = vadd.f32 %v5952_v27, %v5896_v41  ;;  %v6979_v38 = vld [vmem:[#allocation2 + $0x10] sm:$0xff] }
 0x22d   : > { %6448 = vst.msk [vmem:[#allocation2 + $0x50] sm:$0xff] %vm1648_vm0, %v6425_v45  ;;  %v6426_v23 = vadd.f32 %v14815_v1, %v6403_v56  ;;  %6000 = vst.msk [vmem:[#allocation2 + $0x78] sm:$0xff] %vm1648_vm0, %v5977_v22  ;;  %v6401_v28 = vld [vmem:[#allocation2 + $0x48] sm:$0xff]  ;;  %v6977_v45 = vld [vmem:[#allocation2] sm:$0xff] }
 0x22e   : > { %6446 = vst.msk [vmem:[#allocation2 + $0x40] sm:$0xff] %vm1648_vm0, %v6423_v51  ;;  %v6424_v61 = vadd.f32 %v6401_v28, %v6333_v18  ;;  %5998 = vst.msk [vmem:[#allocation2 + $0x68] sm:$0xff] %vm1648_vm0, %v5975_v25  ;;  %v14818_v24 = vpop.f32.mrb[72].mxu0  ;;  %v6980_v27 = vld [vmem:[#allocation2 + $0x18] sm:$0xff] }
 0x22f   : > { %6449 = vst.msk [vmem:[#allocation2 + $0x58] sm:$0xff] %vm1648_vm0, %v6426_v23  ;;  %v6346_v14 = vpop.f32.mrb[73].mxu0 }
 0x230   : > { %6447 = vst.msk [vmem:[#allocation2 + $0x48] sm:$0xff] %vm1648_vm0, %v6424_v61  ;;  %v14796_v47 = vpop.f32.mrb[76].mxu1  ;;  %v14819_v17 = vpop.f32.mrb[74].mxu0  ;;  %v6978_v61 = vld [vmem:[#allocation2 + $0x8] sm:$0xff] }
 0x231   : > { %v5980_v6 = vadd.f32 %v14796_v47, %v5957_v54  ;;  %v5909_v42 = vpop.f32.mrb[77].mxu1  ;;  %v6349_v34 = vpop.f32.mrb[75].mxu0 }
 0x232   : > { %v6406_v20 = vld [vmem:[#allocation2 + $0x70] sm:$0xff]  ;;  %v5978_v53 = vadd.f32 %v5955_v15, %v5909_v42  ;;  %v14797_v35 = vpop.f32.mrb[78].mxu1 }
 0x233   : > { %v6429_v49 = vadd.f32 %v14818_v24, %v6406_v20  ;;  %6003 = vst.msk [vmem:[#allocation2 + $0x90] sm:$0xff] %vm1648_vm0, %v5980_v6  ;;  %v6404_v7 = vld [vmem:[#allocation2 + $0x60] sm:$0xff]  ;;  %v5981_v48 = vadd.f32 %v14797_v35, %v5958_v21  ;;  %v5912_v57 = vpop.f32.mrb[79].mxu1  ;;  %v18704_v42 = vld [vmem:[%s20583_s3 + $0x10] sm:$0xf] }
 0x234   : > { %v6427_v44 = vadd.f32 %v6404_v7, %v6346_v14  ;;  %6001 = vst.msk [vmem:[#allocation2 + $0x80] sm:$0xff] %vm1648_vm0, %v5978_v53  ;;  %v6407_v60 = vld [vmem:[#allocation2 + $0x78] sm:$0xff]  ;;  %v5979_v13 = vadd.f32 %v5956_v8, %v5912_v57  ;;  %v18695_v6 = vld [vmem:[%s20583_s3] sm:$0xf]  ;;  %15377 = vmatprep.subr.msk.bf16.mxu0 %vm8951_vm4, %v18704_v42  ;;  %v6983_v53 = vld [vmem:[#allocation2 + $0x30] sm:$0xff] }
 0x235   : > { %6452 = vst.msk [vmem:[#allocation2 + $0x70] sm:$0xff] %vm1648_vm0, %v6429_v49  ;;  %v6430_v31 = vadd.f32 %v14819_v17, %v6407_v60  ;;  %6004 = vst.msk [vmem:[#allocation2 + $0x98] sm:$0xff] %vm1648_vm0, %v5981_v48  ;;  %v6405_v46 = vld [vmem:[#allocation2 + $0x68] sm:$0xff]  ;;  %15373 = vmatprep.subr.msk.bf16.mxu1 %vm8951_vm4, %v18695_v6  ;;  %v6981_v49 = vld [vmem:[#allocation2 + $0x20] sm:$0xff] }
 0x236   : > { %6450 = vst.msk [vmem:[#allocation2 + $0x60] sm:$0xff] %vm1648_vm0, %v6427_v44  ;;  %v6428_v16 = vadd.f32 %v6405_v46, %v6349_v34  ;;  %6002 = vst.msk [vmem:[#allocation2 + $0x88] sm:$0xff] %vm1648_vm0, %v5979_v13  ;;  %v14822_v39 = vpop.f32.mrb[76].mxu0  ;;  %v6984_v8 = vld [vmem:[#allocation2 + $0x38] sm:$0xff] }
 0x237   : > { %6453 = vst.msk [vmem:[#allocation2 + $0x78] sm:$0xff] %vm1648_vm0, %v6430_v31  ;;  %v6362_v4 = vpop.f32.mrb[77].mxu0 }
 0x238   : > { %6451 = vst.msk [vmem:[#allocation2 + $0x68] sm:$0xff] %vm1648_vm0, %v6428_v16  ;;  %v14800_v9 = vpop.f32.mrb[80].mxu1  ;;  %v14823_v55 = vpop.f32.mrb[78].mxu0  ;;  %v6982_v16 = vld [vmem:[#allocation2 + $0x28] sm:$0xff] }
 0x239   : > { %v5984_v3 = vadd.f32 %v14800_v9, %v5961_v52  ;;  %v5925_v0 = vpop.f32.mrb[81].mxu1  ;;  %v6365_v37 = vpop.f32.mrb[79].mxu0 }
 0x23a   : > { %v6410_v5 = vld [vmem:[#allocation2 + $0x90] sm:$0xff]  ;;  %v5982_v32 = vadd.f32 %v5959_v59, %v5925_v0  ;;  %v14801_v12 = vpop.f32.mrb[82].mxu1 }
 0x23b   : > { %v6433_v30 = vadd.f32 %v14822_v39, %v6410_v5  ;;  %6007 = vst.msk [vmem:[#allocation2 + $0xb0] sm:$0xf] %vm1671_vm3, %v5984_v3  ;;  %v6408_v36 = vld [vmem:[#allocation2 + $0x80] sm:$0xff]  ;;  %v5928_v43 = vpop.f32.mrb[83].mxu1  ;;  %v15440_v3 = vmov 1983009808  }
 0x23c   : > { %v6431_v2 = vadd.f32 %v6408_v36, %v6362_v4  ;;  %6005 = vst.msk [vmem:[#allocation2 + $0xa0] sm:$0xff] %vm1648_vm0, %v5982_v32  ;;  %v6411_v63 = vld [vmem:[#allocation2 + $0x98] sm:$0xff]  ;;  %v5983_v33 = vadd.f32 %v5960_v19, %v5928_v43  ;;  %v7619_v4 = vunpack.c.l.s4 %v15440_v3  ;;  %v6987_v12 = vld [vmem:[#allocation2 + $0x50] sm:$0xff] }
 0x23d   : > { %6456 = vst.msk [vmem:[#allocation2 + $0x90] sm:$0xff] %vm1648_vm0, %v6433_v30  ;;  %v6434_v26 = vadd.f32 %v14823_v55, %v6411_v63  ;;  %v6409_v62 = vld [vmem:[#allocation2 + $0x88] sm:$0xff]  ;;  %v18731_v30 = vld [vmem:[%s20582_s2] ss:$0 sm:$0xff]  ;;  %v21427_v63 = vld [vmem:[#allocation4_spill] sm:$0xff] }
 0x23e   : > { %6454 = vst.msk [vmem:[#allocation2 + $0x80] sm:$0xff] %vm1648_vm0, %v6431_v2  ;;  %v6432_v40 = vadd.f32 %v6409_v62, %v6365_v37  ;;  %6006 = vst.msk [vmem:[#allocation2 + $0xa8] sm:$0xff] %vm1648_vm0, %v5983_v33  ;;  %v14826_v50 = vpop.f32.mrb[80].mxu0  ;;  %v7620_v36 = vunpack.c.0.s8 %v7619_v4  ;;  %v6985_v2 = vld [vmem:[#allocation2 + $0x40] sm:$0xff]  ;;  %v18734_v33 = vadd.s32 16, %v21427_v63  ;;  %vm8003_vm9 = vcmp.ge.s32.totalorder %v21427_v63, 1 }
 0x23f   : > { %6457 = vst.msk [vmem:[#allocation2 + $0x98] sm:$0xff] %vm1648_vm0, %v6434_v26  ;;  %v6378_v1 = vpop.f32.mrb[81].mxu0 }
 0x240   : > { %6455 = vst.msk [vmem:[#allocation2 + $0x88] sm:$0xff] %vm1648_vm0, %v6432_v40  ;;  %v14832_v11 = vpop.f32.mrb[84].mxu1  ;;  %v14827_v22 = vpop.f32.mrb[82].mxu0  ;;  %vm8008_vm5 = vcmp.le.s32.totalorder %v18734_v33, 16 }
 0x241   : > { %v7002_v10 = vadd.f32 %v14832_v11, %v6979_v38  ;;  %v6883_v58 = vpop.f32.mrb[85].mxu1  ;;  %v6381_v25 = vpop.f32.mrb[83].mxu0  ;;  %v6988_v11 = vld [vmem:[#allocation2 + $0x58] sm:$0xff] }
 0x242   : > { %v6414_v29 = vld [vmem:[#allocation2 + $0xb0] sm:$0xf]  ;;  %v7000_v18 = vadd.f32 %v6977_v45, %v6883_v58  ;;  %v14833_v41 = vpop.f32.mrb[86].mxu1 }
 0x243   : > { %v6437_v51 = vadd.f32 %v14826_v50, %v6414_v29  ;;  %v6412_v56 = vld [vmem:[#allocation2 + $0xa0] sm:$0xff]  ;;  %7025 = vst.msk [vmem:[#allocation2 + $0x10] sm:$0xff] %vm1648_vm0, %v7002_v10  ;;  %v7003_v23 = vadd.f32 %v14833_v41, %v6980_v27  ;;  %v6886_v28 = vpop.f32.mrb[87].mxu1  ;;  %v6986_v29 = vld [vmem:[#allocation2 + $0x48] sm:$0xff] }
 0x244   : > { %v6435_v24 = vadd.f32 %v6412_v56, %v6378_v1  ;;  %7023 = vst.msk [vmem:[#allocation2] sm:$0xff] %vm1648_vm0, %v7000_v18  ;;  %v7001_v47 = vadd.f32 %v6978_v61, %v6886_v28  ;;  %v8014_v18 = vstv %s18723_s8 }
 0x245   : > { %6460 = vst.msk [vmem:[#allocation2 + $0xb0] sm:$0xf] %vm1671_vm3, %v6437_v51  ;;  %v6413_v54 = vld [vmem:[#allocation2 + $0xa8] sm:$0xff]  ;;  %vm18753_vm6 = vcmp.eq.s32.totalorder %v8014_v18, 1  ;;  %v18802_v18 = vsel %vm8951_vm4, %v18704_v42, 0 }
 0x246   : > { %7026 = vst.msk [vmem:[#allocation2 + $0x18] sm:$0xff] %vm1648_vm0, %v7003_v23  ;;  %6458 = vst.msk [vmem:[#allocation2 + $0xa0] sm:$0xff] %vm1648_vm0, %v6435_v24  ;;  %v6436_v14 = vadd.f32 %v6413_v54, %v6381_v25  ;;  %v18745_v25 = vsub.s32 %v7620_v36, %v21427_v63 }
 0x247   : > { %7024 = vst.msk [vmem:[#allocation2 + $0x8] sm:$0xff] %vm1648_vm0, %v7001_v47  ;;  %vm18775_vm8 = vmand %vm8008_vm5, %vm18753_vm6 }
 0x248   : > { %6459 = vst.msk [vmem:[#allocation2 + $0xa8] sm:$0xff] %vm1648_vm0, %v6436_v14  ;;  %v14858_v15 = vpop.f32.mrb[84].mxu0  ;;  %v14836_v20 = vpop.f32.mrb[88].mxu1  ;;  %vm18911_vm10 = vmand %vm8003_vm9, %vm18753_vm6 }
 0x249   : > { %v7006_v17 = vadd.f32 %v14836_v20, %v6983_v53  ;;  %v7355_v35 = vpop.f32.mrb[85].mxu0  ;;  %v6899_v21 = vpop.f32.mrb[89].mxu1 }
 0x24a   : > { %v7451_v7 = vld [vmem:[#allocation2 + $0x10] sm:$0xff]  ;;  %v7004_v48 = vadd.f32 %v6981_v49, %v6899_v21  ;;  %v14859_v34 = vpop.f32.mrb[86].mxu0  ;;  %v14837_v57 = vpop.f32.mrb[90].mxu1 }
 0x24b   : > { %v7474_v44 = vadd.f32 %v14858_v15, %v7451_v7  ;;  %7029 = vst.msk [vmem:[#allocation2 + $0x30] sm:$0xff] %vm1648_vm0, %v7006_v17  ;;  %v7449_v60 = vld [vmem:[#allocation2] sm:$0xff]  ;;  %v7007_v13 = vadd.f32 %v14837_v57, %v6984_v8  ;;  %v7358_v31 = vpop.f32.mrb[87].mxu0  ;;  %v6902_v46 = vpop.f32.mrb[91].mxu1  ;;  %v6991_v7 = vld [vmem:[#allocation2 + $0x70] sm:$0xff] }
 0x24c   : > { %v7472_v39 = vadd.f32 %v7449_v60, %v7355_v35  ;;  %7027 = vst.msk [vmem:[#allocation2 + $0x20] sm:$0xff] %vm1648_vm0, %v7004_v48  ;;  %v7005_v52 = vadd.f32 %v6982_v16, %v6902_v46  ;;  %v8024_v48 = vstv %s18741_s11  ;;  %v6989_v46 = vld [vmem:[#allocation2 + $0x60] sm:$0xff] }
 0x24d   : > { %v7452_v9 = vld [vmem:[#allocation2 + $0x18] sm:$0xff]  ;;  %7497 = vst.msk [vmem:[#allocation2 + $0x10] sm:$0xff] %vm1648_vm0, %v7474_v44  ;;  %7030 = vst.msk [vmem:[#allocation2 + $0x38] sm:$0xff] %vm1648_vm0, %v7007_v13  ;;  %vm19164_vm2 = vcmp.eq.s32.totalorder %v8024_v48, 1 }
 0x24e   : > { %v7475_v0 = vadd.f32 %v14859_v34, %v7452_v9  ;;  %v7450_v59 = vld [vmem:[#allocation2 + $0x8] sm:$0xff]  ;;  %7495 = vst.msk [vmem:[#allocation2] sm:$0xff] %vm1648_vm0, %v7472_v39  ;;  %7028 = vst.msk [vmem:[#allocation2 + $0x28] sm:$0xff] %vm1648_vm0, %v7005_v52  ;;  %v18766_v34 = vsel %vm8951_vm4, %v18695_v6, 0 }
 0x24f   : > { %v7473_v5 = vadd.f32 %v7450_v59, %v7358_v31 }
 0x250   : > { %7498 = vst.msk [vmem:[#allocation2 + $0x18] sm:$0xff] %vm1648_vm0, %v7475_v0  ;;  %v14862_v32 = vpop.f32.mrb[88].mxu0  ;;  %v14840_v55 = vpop.f32.mrb[92].mxu1 }
 0x251   : > { %7496 = vst.msk [vmem:[#allocation2 + $0x8] sm:$0xff] %vm1648_vm0, %v7473_v5  ;;  %v7010_v37 = vadd.f32 %v14840_v55, %v6987_v12  ;;  %v7371_v43 = vpop.f32.mrb[89].mxu0  ;;  %v6915_v19 = vpop.f32.mrb[93].mxu1 }
 0x252   : > { %v7455_v26 = vld [vmem:[#allocation2 + $0x30] sm:$0xff]  ;;  %v7008_v62 = vadd.f32 %v6985_v2, %v6915_v19  ;;  %v14863_v40 = vpop.f32.mrb[90].mxu0  ;;  %v14841_v50 = vpop.f32.mrb[94].mxu1 }
 0x253   : > { %v7478_v38 = vadd.f32 %v14862_v32, %v7455_v26  ;;  %7033 = vst.msk [vmem:[#allocation2 + $0x50] sm:$0xff] %vm1648_vm0, %v7010_v37  ;;  %v7453_v1 = vld [vmem:[#allocation2 + $0x20] sm:$0xff]  ;;  %v7011_v10 = vadd.f32 %v14841_v50, %v6988_v11  ;;  %v7374_v58 = vpop.f32.mrb[91].mxu0  ;;  %v6918_v45 = vpop.f32.mrb[95].mxu1 }
 0x254   : > { %v7520_v22 = vld [vmem:[#allocation2 + $0x10] sm:$0xff]  ;;  %v7476_v41 = vadd.f32 %v7453_v1, %v7371_v43  ;;  %7031 = vst.msk [vmem:[#allocation2 + $0x40] sm:$0xff] %vm1648_vm0, %v7008_v62  ;;  %v7456_v27 = vld [vmem:[#allocation2 + $0x38] sm:$0xff]  ;;  %v7009_v51 = vadd.f32 %v6986_v29, %v6918_v45 }
 0x255   : > { %v7550_v56 = vadd.f32 %v18731_v30, %v7520_v22  ;;  %v7518_v23 = vld [vmem:[#allocation2] sm:$0xff]  ;;  %7501 = vst.msk [vmem:[#allocation2 + $0x30] sm:$0xff] %vm1648_vm0, %v7478_v38  ;;  %v7479_v28 = vadd.f32 %v14863_v40, %v7456_v27  ;;  %7034 = vst.msk [vmem:[#allocation2 + $0x58] sm:$0xff] %vm1648_vm0, %v7011_v10  ;;  %v7454_v61 = vld [vmem:[#allocation2 + $0x28] sm:$0xff] }
 0x256   : > { %v7548_v24 = vadd.f32 %v18731_v30, %v7518_v23  ;;  %7499 = vst.msk [vmem:[#allocation2 + $0x20] sm:$0xff] %vm1648_vm0, %v7476_v41  ;;  %v7477_v54 = vadd.f32 %v7454_v61, %v7374_v58  ;;  %7032 = vst.msk [vmem:[#allocation2 + $0x48] sm:$0xff] %vm1648_vm0, %v7009_v51 }
 0x257   : > { %v7521_v47 = vld [vmem:[#allocation2 + $0x18] sm:$0xff]  ;;  %v7573_v14 = vmax.f32 %v7550_v56, 0.0  ;;  %7502 = vst.msk [vmem:[#allocation2 + $0x38] sm:$0xff] %vm1648_vm0, %v7479_v28 }
 0x258   : > { %v7551_v20 = vadd.f32 %v18731_v30, %v7521_v47  ;;  %v7519_v53 = vld [vmem:[#allocation2 + $0x8] sm:$0xff]  ;;  %v7571_v17 = vmax.f32 %v7548_v24, 0.0  ;;  %7500 = vst.msk [vmem:[#allocation2 + $0x28] sm:$0xff] %vm1648_vm0, %v7477_v54  ;;  %v18761_v21 = vpop.f32.mrb[92].mxu0  ;;  %v14844_v49 = vpop.f32.mrb[96].mxu1 }
 0x259   : > { %v7549_v35 = vadd.f32 %v18731_v30, %v7519_v53  ;;  %v7651_v57 = vcombine.high %v7573_v14, %v7573_v14  ;;  %v7658_v8 = vrot.slane %v7573_v14, %v18745_v25  ;;  %v7014_v60 = vadd.f32 %v14844_v49, %v6991_v7  ;;  %v18769_v13 = vpop.f32.mrb[93].mxu0  ;;  %v6931_v31 = vpop.f32.mrb[97].mxu1 }
 0x25a   : > { %v7574_v44 = vmax.f32 %v7551_v20, 0.0  ;;  %v7617_v39 = vcombine.high %v7571_v17, %v7571_v17  ;;  %v7624_v6 = vrot.slane %v7571_v17, %v18745_v25  ;;  %v7012_v52 = vadd.f32 %v6989_v46, %v6931_v31  ;;  %v18781_v3 = vpop.f32.mrb[94].mxu0  ;;  %v18783_v4 = vpop.f32.mrb[98].mxu1 }
 0x25b   : > { %v7572_v9 = vmax.f32 %v7549_v35, 0.0  ;;  %v7665_v0 = vrot.slane %v7651_v57, %v18745_v25  ;;  %v7666_v59 = vcombine.high %v7658_v8, %v7658_v8  ;;  %v8090_v5 = vrot.slane %v7658_v8, %v18745_v25  ;;  %7037 = vst.msk [vmem:[#allocation2 + $0x70] sm:$0xff] %vm1648_vm0, %v7014_v60  ;;  %v18788_v55 = vpop.f32.mrb[95].mxu0  ;;  %v18790_v12 = vpop.f32.mrb[99].mxu1 }
 0x25c   : > { %v7668_v32 = vcombine.high %v7574_v44, %v7574_v44  ;;  %v7631_v36 = vrot.slane %v7617_v39, %v18745_v25  ;;  %v7632_v37 = vcombine.high %v7624_v6, %v7624_v6  ;;  %v7675_v43 = vrot.slane %v7574_v44, %v18745_v25  ;;  %7035 = vst.msk [vmem:[#allocation2 + $0x60] sm:$0xff] %vm1648_vm0, %v7012_v52  ;;  %v7524_v50 = vld [vmem:[#allocation2 + $0x30] sm:$0xff] }
 0x25d   : > { %v7634_v19 = vcombine.high %v7572_v9, %v7572_v9  ;;  %v8091_v2 = vcombine.low %v7666_v59, %v7665_v0  ;;  %v8492_v26 = vsel %vm18775_vm8, %v8090_v5, 0.0  ;;  %v7667_v62 = vcombine.high %v7665_v0, %v7665_v0  ;;  %v7522_v58 = vld [vmem:[#allocation2 + $0x20] sm:$0xff]  ;;  %vm8029_vm8 = vmand %vm8003_vm9, %vm19164_vm2 }
 0x25e   : > { %v7682_v40 = vrot.slane %v7668_v32, %v18745_v25  ;;  %v14357_v11 = vpack.c.bf16 %v8492_v26, %v8492_v26  ;;  %v7633_v38 = vcombine.high %v7631_v36, %v7631_v36  ;;  %v8050_v1 = vcombine.low %v7624_v6, %v7632_v37  ;;  %v7525_v54 = vld [vmem:[#allocation2 + $0x38] sm:$0xff] }
 0x25f   : > { %v7683_v10 = vcombine.high %v7675_v43, %v7675_v43  ;;  %v8092_v45 = vcombine.low %v7667_v62, %v7675_v43  ;;  %v7641_v29 = vrot.slane %v7572_v9, %v18745_v25  ;;  %v7648_v22 = vrot.slane %v7634_v19, %v18745_v25 }
 0x260   : > { %v8099_v41 = vrot.slane %v8091_v2, %v18745_v25  ;;  %v8051_v27 = vcombine.low %v7631_v36, %v7633_v38  ;;  %v7554_v56 = vadd.f32 %v18731_v30, %v7524_v50  ;;  %8653 = vst.msk [vmem:[#allocation3 + $0x8] sm:$0x1] %vm8652_vm7, %v14357_v11  ;;  %v18809_v23 = vpop.f32.mrb[96].mxu0  ;;  %v18811_v28 = vpop.f32.mrb[100].mxu1  ;;  %v7552_v42 = vadd.f32 %v18731_v30, %v7522_v58  ;;  %v7523_v36 = vld [vmem:[#allocation2 + $0x28] sm:$0xff] }
 0x261   : > { %v18805_v51 = vcombine.low %v7683_v10, %v7682_v40  ;;  %v8106_v61 = vrot.slane %v8092_v45, %v18745_v25  ;;  %v7649_v24 = vcombine.high %v7641_v29, %v7641_v29  ;;  %v7650_v47 = vcombine.high %v7648_v22, %v7648_v22  ;;  %v18815_v14 = vpop.f32.mrb[97].mxu0  ;;  %v18817_v20 = vpop.f32.mrb[101].mxu1 }
 0x262   : > { %v8058_v53 = vrot.slane %v8050_v1, %v18745_v25  ;;  %v8065_v17 = vrot.slane %v8051_v27, %v18745_v25  ;;  %v7577_v49 = vmax.f32 %v7554_v56, 0.0  ;;  %v18823_v7 = vpop.f32.mrb[98].mxu0  ;;  %v18825_v57 = vpop.f32.mrb[102].mxu1  ;;  %v7575_v31 = vmax.f32 %v7552_v42, 0.0 }
 0x263   : > { %v8116_v35 = vrot.slane %v18805_v51, %v18745_v25  ;;  %v8107_v8 = vcombine.low %v8099_v41, %v8106_v61  ;;  %v8067_v44 = vcombine.low %v7641_v29, %v7649_v24  ;;  %v8068_v60 = vcombine.low %v7648_v22, %v7650_v47  ;;  %v18827_v46 = vpop.f32.mrb[99].mxu0  ;;  %v18829_v16 = vpop.f32.mrb[103].mxu1  ;;  %v7459_v51 = vld [vmem:[#allocation2 + $0x50] sm:$0xff] }
 0x264   : > { %v7719_v39 = vcombine.high %v7577_v49, %v7577_v49  ;;  %v7726_v6 = vrot.slane %v7577_v49, %v18745_v25  ;;  %v7684_v9 = vcombine.high %v7682_v40, %v7682_v40  ;;  %v7555_v52 = vadd.f32 %v18731_v30, %v7525_v54 }
 0x265   : > { %v8493_v0 = vsel %vm8003_vm9, %v8107_v8, 0.0  ;;  %v8075_v59 = vrot.slane %v8067_v44, %v18745_v25  ;;  %v8082_v5 = vrot.slane %v8068_v60, %v18745_v25  ;;  %v7685_v32 = vcombine.high %v7575_v31, %v7575_v31 }
 0x266   : > { %v14358_v37 = vpack.c.bf16 %v8493_v0, %v8493_v0  ;;  %v7733_v43 = vrot.slane %v7719_v39, %v18745_v25  ;;  %v7734_v19 = vcombine.high %v7726_v6, %v7726_v6  ;;  %v7692_v2 = vrot.slane %v7575_v31, %v18745_v25  ;;  %v7457_v31 = vld [vmem:[#allocation2 + $0x40] sm:$0xff] }
 0x267   : > { %v18839_v26 = vcombine.low %v8058_v53, %v8065_v17  ;;  %v8083_v62 = vcombine.low %v8075_v59, %v8082_v5  ;;  %v7699_v40 = vrot.slane %v7685_v32, %v18745_v25  ;;  %v7578_v50 = vmax.f32 %v7555_v52, 0.0  ;;  %v7460_v5 = vld [vmem:[#allocation2 + $0x58] sm:$0xff]  ;;  %v18919_v15 = vld [vmem:[#allocation3 + $0x8] sm:$0x1] }
 0x268   : > { %8654 = vst.msk [vmem:[#allocation3 + $0xc] sm:$0xf] %vm1671_vm3, %v14358_v37  ;;  %v8172_v11 = vrot.slane %v7733_v43, %v18745_v25  ;;  %v7700_v38 = vcombine.high %v7692_v2, %v7692_v2  ;;  %v8109_v1 = vcombine.low %v7684_v9, %v7692_v2  ;;  %v7553_v10 = vadd.f32 %v18731_v30, %v7523_v36  ;;  %v18845_v58 = vpop.f32.mrb[100].mxu0  ;;  %v18847_v45 = vpop.f32.mrb[104].mxu1 }
 0x269   : > { %v18849_v29 = vcombine.low %v7726_v6, %v7734_v19  ;;  %v7701_v22 = vcombine.high %v7699_v40, %v7699_v40  ;;  %v7735_v41 = vcombine.high %v7733_v43, %v7733_v43  ;;  %v7736_v27 = vcombine.high %v7578_v50, %v7578_v50  ;;  %v18851_v56 = vpop.f32.mrb[101].mxu0  ;;  %v18853_v61 = vpop.f32.mrb[105].mxu1  ;;  %v7458_v19 = vld [vmem:[#allocation2 + $0x48] sm:$0xff] }
 0x26a   : > { %v18857_v24 = vsel %vm18753_vm6, %v8083_v62, 0.0  ;;  %v8498_v47 = vsel %vm8008_vm5, %v8172_v11, 0.0  ;;  %v8123_v42 = vrot.slane %v8109_v1, %v18745_v25  ;;  %v8131_v54 = vrot.slane %v7700_v38, %v18745_v25  ;;  %v18863_v53 = vpop.f32.mrb[102].mxu0  ;;  %v14853_v17 = vpop.f32.mrb[106].mxu1  ;;  %vm19188_vm6 = vmor %vm8706_vm14, %vm8707_vm15 }
 0x26b   : > { %v14363_v49 = vpack.c.bf16 %v8498_v47, %v8498_v47  ;;  %v18865_v8 = vcombine.low %v7699_v40, %v7701_v22  ;;  %v7743_v44 = vrot.slane %v7578_v50, %v18745_v25  ;;  %v18869_v60 = vrot.slane %v7736_v27, %v18745_v25  ;;  %v18871_v39 = vpop.f32.mrb[103].mxu0  ;;  %v18873_v6 = vpop.f32.mrb[107].mxu1  ;;  %v7461_v22 = vld [vmem:[#allocation2 + $0x60] sm:$0xff]  ;;  %v6990_v47 = vld [vmem:[#allocation2 + $0x68] sm:$0xff] }
 0x26c   : > { %v8124_v9 = vcombine.low %v8116_v35, %v8123_v42  ;;  %v8495_v52 = vsel %vm8008_vm5, %v8131_v54, 0.0  ;;  %v7576_v0 = vmax.f32 %v7553_v10, 0.0  ;;  %v7482_v59 = vadd.f32 %v18761_v21, %v7459_v51  ;;  %v7463_v21 = vld [vmem:[#allocation2 + $0x70] sm:$0xff]  ;;  %v6992_v10 = vld [vmem:[#allocation2 + $0x78] sm:$0xff] }
 0x26d   : > { %v8164_v32 = vrot.slane %v18849_v29, %v18745_v25  ;;  %v14360_v36 = vpack.c.bf16 %v8495_v52, %v8495_v52  ;;  %8659 = vst.msk [vmem:[#allocation3 + $0x20] sm:$0x1] %vm8652_vm7, %v14363_v49  ;;  %v7751_v37 = vcombine.high %v7743_v44, %v7743_v44  ;;  %v18881_v43 = vcombine.low %v7735_v41, %v7743_v44  ;;  %v6995_v42 = vld [vmem:[#allocation2 + $0x90] sm:$0xff] }
 0x26e   : > { %v14359_v2 = vpack.c.bf16 %v8124_v9, %v8124_v9  ;;  %v7702_v62 = vcombine.high %v7576_v0, %v7576_v0  ;;  %v7709_v35 = vrot.slane %v7576_v0, %v18745_v25  ;;  %7505 = vst.msk [vmem:[#allocation2 + $0x50] sm:$0xff] %vm1648_vm0, %v7482_v59  ;;  %v7480_v40 = vadd.f32 %v7457_v31, %v18769_v13  ;;  %v6993_v31 = vld [vmem:[#allocation2 + $0x80] sm:$0xff]  ;;  %v6996_v9 = vld [vmem:[#allocation2 + $0x98] sm:$0xff]  ;;  %v6999_v59 = vld [vmem:[#allocation2 + $0xb0] sm:$0xf] }
 0x26f   : > { %v8140_v50 = vrot.slane %v18865_v8, %v18745_v25  ;;  %8656 = vst.msk [vmem:[#allocation3 + $0x14] sm:$0x1] %vm8652_vm7, %v14360_v36  ;;  %v8174_v11 = vcombine.low %v7751_v37, %v18869_v60  ;;  %v8181_v38 = vrot.slane %v18881_v43, %v18745_v25  ;;  %v7483_v1 = vadd.f32 %v18781_v3, %v7460_v5  ;;  %v6997_v43 = vld [vmem:[#allocation2 + $0xa0] sm:$0xff] }
 0x270   : > { %8655 = vst.msk [vmem:[#allocation3 + $0x10] sm:$0xf] %vm1671_vm3, %v14359_v2  ;;  %v7716_v41 = vrot.slane %v7702_v62, %v18745_v25  ;;  %v7717_v13 = vcombine.high %v7709_v35, %v7709_v35  ;;  %v7015_v27 = vadd.f32 %v18783_v4, %v6992_v10  ;;  %v7481_v51 = vadd.f32 %v7458_v19, %v18788_v55  ;;  %v18898_v54 = vpop.f32.mrb[104].mxu0  ;;  %v6998_v19 = vld [vmem:[#allocation2 + $0xa8] sm:$0xff]  ;;  %v18931_v62 = vld [vmem:[#allocation3 + $0xc] sm:$0xe] }
 0x271   : > { %7503 = vst.msk [vmem:[#allocation2 + $0x40] sm:$0xff] %vm1648_vm0, %v7480_v40  ;;  %v8188_v17 = vrot.slane %v8174_v11, %v18745_v25  ;;  %7506 = vst.msk [vmem:[#allocation2 + $0x58] sm:$0xff] %vm1648_vm0, %v7483_v1  ;;  %v7013_v3 = vadd.f32 %v6990_v47, %v18790_v12  ;;  %v7486_v49 = vadd.f32 %v18809_v23, %v7463_v21  ;;  %v18905_v52 = vpop.f32.mrb[105].mxu0  ;;  %v18938_v11 = vld [vmem:[#allocation3 + $0xc] sm:$0xf]  ;;  %v8490_v10 = vsel %vm18911_vm10, %v18839_v26, 0.0 }
 0x272   : > { %v7018_v44 = vadd.f32 %v18811_v28, %v6995_v42  ;;  %v7718_v55 = vcombine.high %v7716_v41, %v7716_v41  ;;  %v8133_v0 = vcombine.low %v7709_v35, %v7717_v13  ;;  %7038 = vst.msk [vmem:[#allocation2 + $0x78] sm:$0xff] %vm1648_vm0, %v7015_v27  ;;  %7504 = vst.msk [vmem:[#allocation2 + $0x48] sm:$0xff] %vm1648_vm0, %v7481_v51  ;;  %v6994_v28 = vld [vmem:[#allocation2 + $0x88] sm:$0xff]  ;;  %v14879_v5 = vpop.f32.mrb[106].mxu0  ;;  %v14067_v27 = vrot.slane %v18931_v62, 9 }
 0x273   : > { %v7484_v12 = vadd.f32 %v7461_v22, %v18815_v14  ;;  %v7016_v23 = vadd.f32 %v6993_v31, %v18817_v20  ;;  %v7752_v36 = vcombine.high %v18869_v60, %v18869_v60  ;;  %7036 = vst.msk [vmem:[#allocation2 + $0x68] sm:$0xff] %vm1648_vm0, %v7013_v3  ;;  %7509 = vst.msk [vmem:[#allocation2 + $0x70] sm:$0xff] %vm1648_vm0, %v7486_v49  ;;  %v18929_v2 = vpop.f32.mrb[107].mxu0  ;;  %v8737_v29 = vshll.u32 %v18938_v11, 16 }
 0x274   : > { %7041 = vst.msk [vmem:[#allocation2 + $0x90] sm:$0xff] %vm1648_vm0, %v7018_v44  ;;  %v7019_v37 = vadd.f32 %v18825_v57, %v6996_v9  ;;  %v7017_v14 = vadd.f32 %v6994_v28, %v18829_v16  ;;  %v7022_v20 = vadd.f32 %v18847_v45, %v6999_v59  ;;  %v8147_v35 = vrot.slane %v8133_v0, %v18745_v25  ;;  %v8698_v16 = vld [vmem:[#allocation3 + $0x8] sm:$0x1] }
 0x275   : > { %v8149_v40 = vcombine.low %v7716_v41, %v7718_v55  ;;  %7507 = vst.msk [vmem:[#allocation2 + $0x60] sm:$0xff] %vm1648_vm0, %v7484_v12  ;;  %7039 = vst.msk [vmem:[#allocation2 + $0x80] sm:$0xff] %vm1648_vm0, %v7016_v23  ;;  %v7020_v21 = vadd.f32 %v6997_v43, %v18853_v61  ;;  %v7021_v57 = vadd.f32 %v6998_v19, %v18873_v6  ;;  %v7528_v1 = vld [vmem:[#allocation2 + $0x50] sm:$0xff]  ;;  %v10110_v6 = vrot.slane %v18919_v15, 5 }
 0x276   : > { %v18940_v45 = vcombine.low %v8181_v38, %v8188_v17  ;;  %7042 = vst.msk [vmem:[#allocation2 + $0x98] sm:$0xff] %vm1648_vm0, %v7019_v37  ;;  %7040 = vst.msk [vmem:[#allocation2 + $0x88] sm:$0xff] %vm1648_vm0, %v7017_v14  ;;  %v14356_v61 = vpack.c.bf16 %v18857_v24, %v18857_v24  ;;  %v7558_v38 = vadd.f32 %v18731_v30, %v7528_v1  ;;  %v18955_v13 = vld [vmem:[#allocation3 + $0x14] sm:$0x1]  ;;  %v8729_v42 = vshll.u32 %v8698_v16, 16 }
 0x277   : > { %7045 = vst.msk [vmem:[#allocation2 + $0xb0] sm:$0xf] %vm1671_vm3, %v7022_v20  ;;  %v8157_v22 = vrot.slane %v8149_v40, %v18745_v25  ;;  %v14355_v41 = vpack.c.bf16 %v8490_v10, %v8490_v10  ;;  %v18961_v26 = vcombine.low %v8140_v50, %v8147_v35  ;;  %v18964_v51 = vld [vmem:[#allocation3 + $0x10] sm:$0xf]  ;;  %v10117_v47 = vrot.slane %v18955_v13, 5 }
 0x278   : > { %7043 = vst.msk [vmem:[#allocation2 + $0xa0] sm:$0xff] %vm1648_vm0, %v7020_v21  ;;  %7044 = vst.msk [vmem:[#allocation2 + $0xa8] sm:$0xff] %vm1648_vm0, %v7021_v57  ;;  %v7526_v24 = vld [vmem:[#allocation2 + $0x40] sm:$0xff]  ;;  %v8734_v17 = vshrl.u32 %v18938_v11, 16  ;;  %v7581_v49 = vmax.f32 %v7558_v38, 0.0  ;;  %v7529_v50 = vld [vmem:[#allocation2 + $0x58] sm:$0xff] }
 0x279   : > { %8651 = vst.msk [vmem:[#allocation3 + $0x4] sm:$0xf] %vm1671_vm3, %v14356_v61  ;;  %v18971_v3 = vcombine.low %v8157_v22, %v8164_v32  ;;  %v7556_v8 = vadd.f32 %v18731_v30, %v7526_v24  ;;  %8650 = vst.msk [vmem:[#allocation3] sm:$0xf] %vm1671_vm3, %v14355_v41  ;;  %v10114_v44 = vrot.slane %v18964_v51, 5  ;;  %v7559_v31 = vadd.f32 %v18731_v30, %v7529_v50  ;;  %v7527_v9 = vld [vmem:[#allocation2 + $0x48] sm:$0xff] }
 0x27a   : > { %v7464_v4 = vld [vmem:[#allocation2 + $0x78] sm:$0xff]  ;;  %v18977_v55 = vrot.slane %v8729_v42, 5  ;;  %v18979_v0 = vrot.slane %v8734_v17, 4  ;;  %v7787_v32 = vcombine.high %v7581_v49, %v7581_v49  ;;  %v7794_v12 = vrot.slane %v7581_v49, %v18745_v25  ;;  %v7532_v59 = vld [vmem:[#allocation2 + $0x70] sm:$0xff]  ;;  %v7462_v5 = vld [vmem:[#allocation2 + $0x68] sm:$0xff] }
 0x27b   : > { %v7579_v23 = vmax.f32 %v7556_v8, 0.0  ;;  %v7557_v28 = vadd.f32 %v18731_v30, %v7527_v9  ;;  %v7582_v37 = vmax.f32 %v7559_v31, 0.0  ;;  %v7562_v14 = vadd.f32 %v18731_v30, %v7532_v59 }
 0x27c   : > { %v7487_v20 = vadd.f32 %v18823_v7, %v7464_v4  ;;  %v7485_v43 = vadd.f32 %v7462_v5, %v18827_v46  ;;  %v7801_v19 = vrot.slane %v7787_v32, %v18745_v25  ;;  %v7802_v35 = vcombine.high %v7794_v12, %v7794_v12  ;;  %v7530_v60 = vld [vmem:[#allocation2 + $0x60] sm:$0xff] }
 0x27d   : > { %v7753_v40 = vcombine.high %v7579_v23, %v7579_v23  ;;  %v7760_v21 = vrot.slane %v7579_v23, %v18745_v25  ;;  %v7804_v57 = vcombine.high %v7582_v37, %v7582_v37  ;;  %v7811_v16 = vrot.slane %v7582_v37, %v18745_v25 }
 0x27e   : > { %v7580_v1 = vmax.f32 %v7557_v28, 0.0  ;;  %v7585_v10 = vmax.f32 %v7562_v14, 0.0  ;;  %7510 = vst.msk [vmem:[#allocation2 + $0x78] sm:$0xff] %vm1648_vm0, %v7487_v20  ;;  %7508 = vst.msk [vmem:[#allocation2 + $0x68] sm:$0xff] %vm1648_vm0, %v7485_v43  ;;  %v7803_v61 = vcombine.high %v7801_v19, %v7801_v19  ;;  %v8231_v22 = vcombine.low %v7794_v12, %v7802_v35 }
 0x27f   : > { %v7767_v7 = vrot.slane %v7753_v40, %v18745_v25  ;;  %v7768_v46 = vcombine.high %v7760_v21, %v7760_v21  ;;  %v8190_v38 = vcombine.low %v7752_v36, %v7760_v21  ;;  %v7818_v41 = vrot.slane %v7804_v57, %v18745_v25 }
 0x280   : > { %v7819_v24 = vcombine.high %v7811_v16, %v7811_v16  ;;  %v8254_v42 = vrot.slane %v7811_v16, %v18745_v25  ;;  %v8232_v17 = vcombine.low %v7801_v19, %v7803_v61  ;;  %v8239_v49 = vrot.slane %v8231_v22, %v18745_v25 }
 0x281   : > { %v7769_v8 = vcombine.high %v7767_v7, %v7767_v7  ;;  %v8191_v50 = vcombine.low %v7768_v46, %v7767_v7  ;;  %v8198_v31 = vrot.slane %v8190_v38, %v18745_v25  ;;  %v7770_v32 = vcombine.high %v7580_v1, %v7580_v1 }
 0x282   : > { %v19000_v9 = vcombine.low %v7819_v24, %v7818_v41  ;;  %v8504_v4 = vsel %vm8008_vm5, %v8254_v42, 0.0  ;;  %v8246_v36 = vrot.slane %v8232_v17, %v18745_v25  ;;  %v7777_v5 = vrot.slane %v7580_v1, %v18745_v25 }
 0x283   : > { %v8205_v12 = vrot.slane %v8191_v50, %v18745_v25  ;;  %v19007_v23 = vrot.slane %v7769_v8, %v18745_v25  ;;  %v14369_v28 = vpack.c.bf16 %v8504_v4, %v8504_v4  ;;  %v7784_v37 = vrot.slane %v7770_v32, %v18745_v25 }
 0x284   : > { %v8263_v59 = vrot.slane %v19000_v9, %v18745_v25  ;;  %v7855_v14 = vcombine.high %v7585_v10, %v7585_v10  ;;  %v8247_v20 = vcombine.low %v8239_v49, %v8246_v36  ;;  %v7862_v19 = vrot.slane %v7585_v10, %v18745_v25 }
 0x285   : > { %v8206_v43 = vcombine.low %v8198_v31, %v8205_v12  ;;  %8665 = vst.msk [vmem:[#allocation3 + $0x38] sm:$0x1] %vm8652_vm7, %v14369_v28  ;;  %v7560_v35 = vadd.f32 %v18731_v30, %v7530_v60  ;;  %v7533_v40 = vld [vmem:[#allocation2 + $0x78] sm:$0xff]  ;;  %v7785_v21 = vcombine.high %v7777_v5, %v7777_v5  ;;  %v7786_v57 = vcombine.high %v7784_v37, %v7784_v37  ;;  %v7531_v22 = vld [vmem:[#allocation2 + $0x68] sm:$0xff] }
 0x286   : > { %v7869_v16 = vrot.slane %v7855_v14, %v18745_v25  ;;  %v7820_v61 = vcombine.high %v7818_v41, %v7818_v41  ;;  %v14368_v7 = vpack.c.bf16 %v8247_v20, %v8247_v20  ;;  %v7870_v46 = vcombine.high %v7862_v19, %v7862_v19 }
 0x287   : > { %v14365_v1 = vpack.c.bf16 %v8206_v43, %v8206_v43  ;;  %v7583_v38 = vmax.f32 %v7560_v35, 0.0  ;;  %v8214_v24 = vcombine.low %v7777_v5, %v7785_v21  ;;  %v8215_v42 = vcombine.low %v7784_v37, %v7786_v57  ;;  %v7467_v5 = vld [vmem:[#allocation2 + $0x90] sm:$0xff]  ;;  %v7465_v37 = vld [vmem:[#allocation2 + $0x80] sm:$0xff] }
 0x288   : > { %v7871_v17 = vcombine.high %v7869_v16, %v7869_v16  ;;  %v7563_v10 = vadd.f32 %v18731_v30, %v7533_v40  ;;  %8664 = vst.msk [vmem:[#allocation3 + $0x34] sm:$0xf] %vm1671_vm3, %v14368_v7  ;;  %v19020_v49 = vcombine.low %v7862_v19, %v7870_v46  ;;  %v7561_v50 = vadd.f32 %v18731_v30, %v7531_v22  ;;  %v7466_v46 = vld [vmem:[#allocation2 + $0x88] sm:$0xff] }
 0x289   : > { %8661 = vst.msk [vmem:[#allocation3 + $0x28] sm:$0xf] %vm1671_vm3, %v14365_v1  ;;  %v7821_v8 = vcombine.high %v7583_v38, %v7583_v38  ;;  %v7828_v41 = vrot.slane %v7583_v38, %v18745_v25  ;;  %v8222_v31 = vrot.slane %v8214_v24, %v18745_v25  ;;  %v8229_v9 = vrot.slane %v8215_v42, %v18745_v25 }
 0x28a   : > { %v8313_v4 = vcombine.low %v7869_v16, %v7871_v17  ;;  %v7586_v32 = vmax.f32 %v7563_v10, 0.0  ;;  %v8311_v60 = vrot.slane %v19020_v49, %v18745_v25  ;;  %v7584_v21 = vmax.f32 %v7561_v50, 0.0  ;;  %v7468_v16 = vld [vmem:[#allocation2 + $0x98] sm:$0xff]  ;;  %v7471_v10 = vld [vmem:[#allocation2 + $0xb0] sm:$0xf] }
 0x28b   : > { %v7835_v36 = vrot.slane %v7821_v8, %v18745_v25  ;;  %v7836_v12 = vcombine.high %v7828_v41, %v7828_v41  ;;  %v8256_v28 = vcombine.low %v7820_v61, %v7828_v41  ;;  %v19029_v14 = vcombine.low %v8222_v31, %v8229_v9  ;;  %v7469_v8 = vld [vmem:[#allocation2 + $0xa0] sm:$0xff]  ;;  %v19118_v49 = vld [vmem:[%s20583_s3 + $0x18] sm:$0xf] }
 0x28c   : > { %v8321_v20 = vrot.slane %v8313_v4, %v18745_v25  ;;  %v7872_v43 = vcombine.high %v7586_v32, %v7586_v32  ;;  %v7879_v19 = vrot.slane %v7586_v32, %v18745_v25  ;;  %v7490_v61 = vadd.f32 %v18845_v58, %v7467_v5 }
 0x28d   : > { %v8270_v35 = vrot.slane %v8256_v28, %v18745_v25  ;;  %v8272_v40 = vcombine.low %v7836_v12, %v7835_v36  ;;  %v7837_v57 = vcombine.high %v7835_v36, %v7835_v36  ;;  %v7488_v1 = vadd.f32 %v7465_v37, %v18851_v56  ;;  %v19052_v36 = vld [vmem:[#allocation3 + $0x4] sm:$0xf]  ;;  %v10070_v12 = vld [vmem:[#allocation3] sm:$0xe] }
 0x28e   : > { %v19035_v22 = vrot.slane %v7872_v43, %v18745_v25  ;;  %v7887_v7 = vcombine.high %v7879_v19, %v7879_v19  ;;  %v7838_v42 = vcombine.high %v7584_v21, %v7584_v21  ;;  %v7845_v17 = vrot.slane %v7584_v21, %v18745_v25  ;;  %7513 = vst.msk [vmem:[#allocation2 + $0x90] sm:$0xff] %vm1648_vm0, %v7490_v61 }
 0x28f   : > { %v19039_v38 = vcombine.low %v8263_v59, %v8270_v35  ;;  %v8280_v24 = vrot.slane %v8272_v40, %v18745_v25  ;;  %7511 = vst.msk [vmem:[#allocation2 + $0x80] sm:$0xff] %vm1648_vm0, %v7488_v1  ;;  %v7491_v56 = vadd.f32 %v18863_v53, %v7468_v16  ;;  %v7470_v59 = vld [vmem:[#allocation2 + $0xa8] sm:$0xff]  ;;  %v7489_v32 = vadd.f32 %v7466_v46, %v18871_v39  ;;  %v19073_v16 = vld [vmem:[#allocation3] sm:$0xf] }
 0x290   : > { %v8314_v41 = vcombine.low %v7879_v19, %v7887_v7  ;;  %v8336_v50 = vrot.slane %v19035_v22, %v18745_v25  ;;  %v7888_v58 = vcombine.high %v19035_v22, %v19035_v22  ;;  %v7852_v31 = vrot.slane %v7838_v42, %v18745_v25 }
 0x291   : > { %v7853_v9 = vcombine.high %v7845_v17, %v7845_v17  ;;  %v8273_v4 = vcombine.low %v7837_v57, %v7845_v17  ;;  %7514 = vst.msk [vmem:[#allocation2 + $0x98] sm:$0xff] %vm1648_vm0, %v7491_v56  ;;  %v7494_v37 = vadd.f32 %v18898_v54, %v7471_v10  ;;  %v7492_v53 = vadd.f32 %v7469_v8, %v18905_v52 }
 0x292   : > { %v8328_v28 = vrot.slane %v8314_v41, %v18745_v25  ;;  %v8510_v5 = vsel %vm8008_vm5, %v8336_v50, 0.0  ;;  %v7854_v19 = vcombine.high %v7852_v31, %v7852_v31  ;;  %7512 = vst.msk [vmem:[#allocation2 + $0x88] sm:$0xff] %vm1648_vm0, %v7489_v32  ;;  %v7493_v54 = vadd.f32 %v7470_v59, %v18929_v2 }
 0x293   : > { %v14375_v39 = vpack.c.bf16 %v8510_v5, %v8510_v5  ;;  %v8287_v35 = vrot.slane %v8273_v4, %v18745_v25  ;;  %v8295_v40 = vrot.slane %v7853_v9, %v18745_v25  ;;  %7517 = vst.msk [vmem:[#allocation2 + $0xb0] sm:$0xf] %vm1671_vm3, %v7494_v37  ;;  %v14066_v52 = vrot.slane %v10070_v12, 9 }
 0x294   : > { %v8329_v21 = vcombine.low %v8321_v20, %v8328_v28  ;;  %7515 = vst.msk [vmem:[#allocation2 + $0xa0] sm:$0xff] %vm1648_vm0, %v7492_v53  ;;  %v10107_v57 = vrot.slane %v19052_v36, 5  ;;  %v8296_v61 = vcombine.low %v7852_v31, %v7854_v19  ;;  %v10115_v20 = vsel %vm19062_vm13, %v14067_v27, %v10114_v44  ;;  %7516 = vst.msk [vmem:[#allocation2 + $0xa8] sm:$0xff] %vm1648_vm0, %v7493_v54  ;;  %v19099_v31 = vld [vmem:[#allocation3 + $0x4] sm:$0xf] }
 0x295   : > { %8671 = vst.msk [vmem:[#allocation3 + $0x50] sm:$0x1] %vm8652_vm7, %v14375_v39  ;;  %v8288_v7 = vcombine.low %v8280_v24, %v8287_v35  ;;  %v8507_v1 = vsel %vm8008_vm5, %v8295_v40, 0.0  ;;  %v7536_v8 = vld [vmem:[#allocation2 + $0x90] sm:$0xff]  ;;  %v10116_v50 = vrot.slane %v10114_v44, 4  ;;  %v8710_v62 = vshrl.u32 %v19073_v16, 16 }
 0x296   : > { %v14374_v2 = vpack.c.bf16 %v8329_v21, %v8329_v21  ;;  %v14372_v46 = vpack.c.bf16 %v8507_v1, %v8507_v1  ;;  %v10108_v42 = vsel %vm19062_vm13, %v14066_v52, %v10107_v57  ;;  %v10109_v17 = vrot.slane %v10107_v57, 4  ;;  %v7534_v41 = vld [vmem:[#allocation2 + $0x80] sm:$0xff] }
 0x297   : > { %v8304_v24 = vrot.slane %v8296_v61, %v18745_v25  ;;  %v14371_v10 = vpack.c.bf16 %v8288_v7, %v8288_v7  ;;  %v7566_v27 = vadd.f32 %v18731_v30, %v7536_v8  ;;  %v7564_v56 = vadd.f32 %v18731_v30, %v7534_v41 }
 0x298   : > { %8670 = vst.msk [vmem:[#allocation3 + $0x4c] sm:$0xf] %vm1671_vm3, %v14374_v2  ;;  %v10111_v59 = vsel %vm19062_vm13, %v10109_v17, %v10110_v6  ;;  %v8713_v51 = vshll.u32 %v19073_v16, 16  ;;  %v7537_v9 = vld [vmem:[#allocation2 + $0x98] sm:$0xff]  ;;  %v10118_v15 = vsel %vm19062_vm13, %v10116_v50, %v10117_v47  ;;  %v19112_v32 = vrot.slane %v8710_v62, 4 }
 0x299   : > { %8668 = vst.msk [vmem:[#allocation3 + $0x44] sm:$0x1] %vm8652_vm7, %v14372_v46  ;;  %v19105_v44 = vcombine.low %v8304_v24, %v8311_v60  ;;  %v14075_v4 = vcombine.low %v10108_v42, %v10111_v59  ;;  %v7589_v6 = vmax.f32 %v7566_v27, 0.0  ;;  %v7587_v12 = vmax.f32 %v7564_v56, 0.0  ;;  %v7535_v5 = vld [vmem:[#allocation2 + $0x88] sm:$0xff] }
 0x29a   : > { %8667 = vst.msk [vmem:[#allocation3 + $0x40] sm:$0xf] %vm1671_vm3, %v14371_v10  ;;  %v7567_v28 = vadd.f32 %v18731_v30, %v7537_v9  ;;  %v14076_v37 = vcombine.low %v10115_v20, %v10118_v15  ;;  %v7565_v60 = vadd.f32 %v18731_v30, %v7535_v5  ;;  %v7540_v13 = vld [vmem:[#allocation2 + $0xb0] sm:$0xf]  ;;  %v19122_v47 = vrot.slane %v8713_v51, 5 }
 0x29b   : > { %v7538_v53 = vld [vmem:[#allocation2 + $0xa0] sm:$0xff]  ;;  %14954 = vmatprep.mubr.msk.bf16.mxu0 %vm1648_vm0, %v14075_v4  ;;  %v8719_v39 = vshll.u32 %v19099_v31, 16  ;;  %v8723_v19 = vshrl.u32 %v19099_v31, 16  ;;  %v7923_v35 = vcombine.high %v7589_v6, %v7589_v6  ;;  %v7930_v40 = vrot.slane %v7589_v6, %v18745_v25 }
 0x29c   : > { %v7889_v21 = vcombine.high %v7587_v12, %v7587_v12  ;;  %v7896_v54 = vrot.slane %v7587_v12, %v18745_v25  ;;  %14955 = vmatmul.mubr.msk.bf16.vlgmr.msra.gmra.mrb[108].mxu0 %vm1648_vm0, %v14076_v37  ;;  %v7590_v52 = vmax.f32 %v7567_v28, 0.0  ;;  %v7588_v57 = vmax.f32 %v7565_v60, 0.0 }
 0x29d   : > { %v7568_v7 = vadd.f32 %v18731_v30, %v7538_v53  ;;  %v7570_v61 = vadd.f32 %v18731_v30, %v7540_v13  ;;  %14971 = vmatpush3.bf16.msra.mxu0 %v18802_v18  ;;  %v7937_v1 = vrot.slane %v7923_v35, %v18745_v25  ;;  %v7938_v20 = vcombine.high %v7930_v40, %v7930_v40  ;;  %v7539_v53 = vld [vmem:[#allocation2 + $0xa8] sm:$0xff] }
 0x29e   : > { %v7903_v2 = vrot.slane %v7889_v21, %v18745_v25  ;;  %v7904_v46 = vcombine.high %v7896_v54, %v7896_v54  ;;  %15378 = vmatprep.subr.msk.bf16.mxu0 %vm8951_vm4, %v19118_v49  ;;  %v8337_v42 = vcombine.low %v7888_v58, %v7896_v54  ;;  %v7940_v17 = vcombine.high %v7590_v52, %v7590_v52 }
 0x29f   : > { %v7947_v24 = vrot.slane %v7590_v52, %v18745_v25  ;;  %v7906_v10 = vcombine.high %v7588_v57, %v7588_v57  ;;  %v7939_v8 = vcombine.high %v7937_v1, %v7937_v1  ;;  %v8378_v41 = vcombine.low %v7930_v40, %v7938_v20 }
 0x2a0   : > { %v8338_v18 = vcombine.low %v7904_v46, %v7903_v2  ;;  %v7905_v50 = vcombine.high %v7903_v2, %v7903_v2  ;;  %v8345_v62 = vrot.slane %v8337_v42, %v18745_v25  ;;  %v7954_v27 = vrot.slane %v7940_v17, %v18745_v25 }
 0x2a1   : > { %v7955_v56 = vcombine.high %v7947_v24, %v7947_v24  ;;  %v7913_v59 = vrot.slane %v7588_v57, %v18745_v25  ;;  %v8379_v51 = vcombine.low %v7937_v1, %v7939_v8  ;;  %v8386_v9 = vrot.slane %v8378_v41, %v18745_v25 }
 0x2a2   : > { %v8352_v22 = vrot.slane %v8338_v18, %v18745_v25  ;;  %v7920_v58 = vrot.slane %v7906_v10, %v18745_v25  ;;  %v7956_v4 = vcombine.high %v7954_v27, %v7954_v27  ;;  %v7591_v60 = vmax.f32 %v7568_v7, 0.0 }
 0x2a3   : > { %v8395_v15 = vcombine.low %v7947_v24, %v7955_v56  ;;  %v7921_v6 = vcombine.high %v7913_v59, %v7913_v59  ;;  %v8354_v12 = vcombine.low %v7905_v50, %v7913_v59  ;;  %v8393_v28 = vrot.slane %v8379_v51, %v18745_v25 }
 0x2a4   : > { %v19147_v5 = vcombine.low %v8345_v62, %v8352_v22  ;;  %v7922_v37 = vcombine.high %v7920_v58, %v7920_v58  ;;  %v8396_v13 = vcombine.low %v7954_v27, %v7956_v4  ;;  %v7957_v57 = vcombine.high %v7591_v60, %v7591_v60  ;;  %v19174_v22 = vld [vmem:[#allocation3 + $0x10] sm:$0xf] }
 0x2a5   : > { %v8403_v35 = vrot.slane %v8395_v15, %v18745_v25  ;;  %v8355_v40 = vcombine.low %v7921_v6, %v7920_v58  ;;  %v8362_v21 = vrot.slane %v8354_v12, %v18745_v25  ;;  %v8394_v54 = vcombine.low %v8386_v9, %v8393_v28 }
 0x2a6   : > { %v19152_v52 = vrot.slane %v7922_v37, %v18745_v25  ;;  %v7964_v1 = vrot.slane %v7591_v60, %v18745_v25  ;;  %v8410_v20 = vrot.slane %v8396_v13, %v18745_v25  ;;  %v7569_v7 = vadd.f32 %v18731_v30, %v7539_v53 }
 0x2a7   : > { %v8369_v2 = vrot.slane %v8355_v40, %v18745_v25  ;;  %v7593_v46 = vmax.f32 %v7570_v61, 0.0  ;;  %v8514_v42 = vsel %vm8003_vm9, %v8394_v54, 0.0  ;;  %v7971_v17 = vrot.slane %v7957_v57, %v18745_v25  ;;  %v8699_v54 = vld [vmem:[#allocation3 + $0x14] sm:$0x1] }
 0x2a8   : > { %v7972_v24 = vcombine.high %v7964_v1, %v7964_v1  ;;  %v8418_v10 = vrot.slane %v7964_v1, %v18745_v25  ;;  %v14379_v41 = vpack.c.bf16 %v8514_v42, %v8514_v42  ;;  %v8411_v18 = vcombine.low %v8403_v35, %v8410_v20 }
 0x2a9   : > { %v8370_v50 = vcombine.low %v8362_v21, %v8369_v2  ;;  %v7592_v62 = vmax.f32 %v7569_v7, 0.0  ;;  %v7973_v61 = vcombine.high %v7971_v17, %v7971_v17  ;;  %v19171_v56 = vrot.slane %v7593_v46, %v18745_v25 }
 0x2aa   : > { %v8419_v27 = vcombine.low %v7972_v24, %v7971_v17  ;;  %v8516_v30 = vsel %vm8008_vm5, %v8418_v10, 0.0  ;;  %8675 = vst.msk [vmem:[#allocation3 + $0x60] sm:$0xf] %vm1671_vm3, %v14379_v41  ;;  %v14380_v59 = vpack.c.bf16 %v8411_v18, %v8411_v18  ;;  %v8716_v6 = vor.u32 %v19122_v47, %v19112_v32 }
 0x2ab   : > { %21438 = vst [vmem:[#allocation10_spill] sm:$0xff] %v19171_v56  ;;  %v14377_v51 = vpack.c.bf16 %v8370_v50, %v8370_v50  ;;  %v14381_v48 = vpack.c.bf16 %v8516_v30, %v8516_v30  ;;  %v7974_v9 = vcombine.high %v7592_v62, %v7592_v62  ;;  %v7981_v4 = vrot.slane %v7592_v62, %v18745_v25  ;;  %v8700_v30 = vld [vmem:[#allocation3 + $0x20] sm:$0x1] }
 0x2ac   : > { %v8427_v58 = vrot.slane %v8419_v27, %v18745_v25  ;;  %8676 = vst.msk [vmem:[#allocation3 + $0x64] sm:$0xf] %vm1671_vm3, %v14380_v59  ;;  %v8721_v37 = vrot.slane %v8719_v39, 5  ;;  %v8725_v32 = vrot.slane %v8723_v19, 4  ;;  %v8739_v47 = vrot.slane %v8737_v29, 5 }
 0x2ad   : > { %8673 = vst.msk [vmem:[#allocation3 + $0x58] sm:$0xf] %vm1671_vm3, %v14377_v51  ;;  %v7988_v12 = vrot.slane %v7974_v9, %v18745_v25  ;;  %v7989_v60 = vcombine.high %v7981_v4, %v7981_v4  ;;  %v8420_v53 = vcombine.low %v7973_v61, %v7981_v4  ;;  %v8717_v13 = vrot.slane %v8716_v6, 4  ;;  %v19219_v27 = vld [vmem:[#allocation3 + $0x20] sm:$0x1] }
 0x2ae   : > { %8677 = vst.msk [vmem:[#allocation3 + $0x68] sm:$0x1] %vm8652_vm7, %v14381_v48  ;;  %v8743_v35 = vshll.u32 %v19174_v22, 16  ;;  %v8726_v21 = vor.u32 %v8725_v32, %v8721_v37  ;;  %v8740_v57 = vor.u32 %v8739_v47, %v18979_v0  ;;  %v8747_v1 = vshrl.u32 %v19174_v22, 16  ;;  %v19221_v9 = vld [vmem:[#allocation3 + $0x28] sm:$0xf] }
 0x2af   : > { %v7990_v40 = vcombine.high %v7988_v12, %v7988_v12  ;;  %v8434_v39 = vrot.slane %v8420_v53, %v18745_v25  ;;  %v8436_v20 = vcombine.low %v7989_v60, %v7988_v12  ;;  %v8722_v19 = vsel %vm19188_vm6, %v8717_v13, %v8721_v37  ;;  %v19229_v12 = vld [vmem:[#allocation3 + $0x34] sm:$0xf]  ;;  %v19240_v53 = vld [vmem:[#allocation3 + $0x28] sm:$0xf] }
 0x2b0   : > { %v8745_v2 = vrot.slane %v8743_v35, 5  ;;  %v8727_v7 = vrot.slane %v8726_v21, 4  ;;  %v8741_v46 = vrot.slane %v8740_v57, 4  ;;  %v8749_v42 = vrot.slane %v8747_v1, 4 }
 0x2b1   : > { %v8437_v29 = vcombine.low %v7990_v40, %v19171_v56  ;;  %v8435_v0 = vcombine.low %v8427_v58, %v8434_v39  ;;  %v8444_v17 = vrot.slane %v8436_v20, %v18745_v25  ;;  %v8753_v24 = vshll.u32 %v8699_v54, 16  ;;  %v19247_v54 = vld [vmem:[#allocation3 + $0x34] sm:$0xf]  ;;  %v19255_v39 = vld [vmem:[#allocation3 + $0x40] sm:$0xf] }
 0x2b2   : > { %v8496_v10 = vsel %vm8003_vm9, %v18961_v26, 0.0  ;;  %v8732_v18 = vsel %vm19188_vm6, %v8727_v7, %v18977_v55  ;;  %v8746_v50 = vsel %vm19188_vm6, %v8741_v46, %v8745_v2  ;;  %v8750_v62 = vor.u32 %v8749_v42, %v8745_v2  ;;  %v19223_v26 = vld [vmem:[#allocation3 + $0x38] sm:$0x1] }
 0x2b3   : > { %v8451_v41 = vrot.slane %v8437_v29, %v18745_v25  ;;  %v8517_v61 = vsel %vm8029_vm8, %v8435_v0, 0.0  ;;  %v13998_v59 = vcombine.low %v8722_v19, %v8732_v18  ;;  %v8755_v51 = vrot.slane %v8753_v24, 5 }
 0x2b4   : > { %v14361_v48 = vpack.c.bf16 %v8496_v10, %v8496_v10  ;;  %v14382_v4 = vpack.c.bf16 %v8517_v61, %v8517_v61  ;;  %v8751_v6 = vrot.slane %v8750_v62, 4  ;;  %v14362_v55 = vpack.c.bf16 %v18971_v3, %v18971_v3  ;;  %v8702_v3 = vld [vmem:[#allocation3 + $0x38] sm:$0x1] }
 0x2b5   : > { %v19225_v58 = vcombine.low %v8444_v17, %v8451_v41  ;;  %14882 = vmatprep.mubr.msk.bf16.mxu1 %vm1648_vm0, %v13998_v59  ;;  %v10124_v37 = vrot.slane %v19219_v27, 5  ;;  %v8777_v32 = vshll.u32 %v8700_v30, 16  ;;  %v8499_v47 = vsel %vm8003_vm9, %v18940_v45, 0.0 }
 0x2b6   : > { %8657 = vst.msk [vmem:[#allocation3 + $0x18] sm:$0xf] %vm1671_vm3, %v14361_v48  ;;  %v8501_v60 = vsel %vm8008_vm5, %v19007_v23, 0.0  ;;  %8678 = vst.msk [vmem:[#allocation3 + $0x6c] sm:$0xf] %vm1671_vm3, %v14382_v4  ;;  %v8756_v13 = vsel %vm19188_vm6, %v8751_v6, %v8755_v51  ;;  %v14364_v35 = vpack.c.bf16 %v8499_v47, %v8499_v47  ;;  %v10128_v21 = vrot.slane %v19221_v9, 5 }
 0x2b7   : > { %21441 = vst [vmem:[#allocation8_spill] sm:$0xff] %v19225_v58  ;;  %8658 = vst.msk [vmem:[#allocation3 + $0x1c] sm:$0xf] %vm1671_vm3, %v14362_v55  ;;  %v14366_v40 = vpack.c.bf16 %v8501_v60, %v8501_v60  ;;  %v13999_v45 = vcombine.low %v8746_v50, %v8756_v13  ;;  %v19249_v57 = vrot.slane %v8777_v32, 5  ;;  %v8502_v23 = vsel %vm8003_vm9, %v19029_v14, 0.0 }
 0x2b8   : > { %v10135_v1 = vrot.slane %v19229_v12, 5  ;;  %8660 = vst.msk [vmem:[#allocation3 + $0x24] sm:$0xf] %vm1671_vm3, %v14364_v35  ;;  %v19261_v20 = vrot.slane %v10128_v21, 4  ;;  %v14367_v19 = vpack.c.bf16 %v8502_v23, %v8502_v23  ;;  %v10138_v2 = vrot.slane %v19223_v26, 5 }
 0x2b9   : > { %8662 = vst.msk [vmem:[#allocation3 + $0x2c] sm:$0x1] %vm8652_vm7, %v14366_v40  ;;  %v8791_v29 = vshll.u32 %v19240_v53, 16  ;;  %v19268_v14 = vld [vmem:[%s20583_s3 + $0x8] sm:$0xf]  ;;  %14883 = vmatmul.mubr.msk.bf16.vlgmr.msra.gmra.mrb[108].mxu1 %vm1648_vm0, %v13999_v45  ;;  %v8795_v46 = vshrl.u32 %v19240_v53, 16 }
 0x2ba   : > { %v10137_v7 = vrot.slane %v10135_v1, 4  ;;  %v8815_v42 = vshll.u32 %v19247_v54, 16  ;;  %v8819_v0 = vshrl.u32 %v19247_v54, 16  ;;  %14899 = vmatpush3.bf16.msra.mxu1 %v18766_v34  ;;  %8663 = vst.msk [vmem:[#allocation3 + $0x30] sm:$0xf] %vm1671_vm3, %v14367_v19  ;;  %v8825_v24 = vshll.u32 %v8702_v3, 16 }
 0x2bb   : > { %v19278_v17 = vrot.slane %v8791_v29, 5  ;;  %v8505_v10 = vsel %vm8003_vm9, %v19039_v38, 0.0  ;;  %v10142_v41 = vrot.slane %v19255_v39, 5  ;;  %v8797_v50 = vrot.slane %v8795_v46, 4  ;;  %15374 = vmatprep.subr.msk.bf16.mxu1 %vm8951_vm4, %v19268_v14 }
 0x2bc   : > { %v19286_v18 = vsel %vm19062_vm13, %v10137_v7, %v10138_v2  ;;  %v19288_v62 = vrot.slane %v8815_v42, 5  ;;  %v8821_v30 = vrot.slane %v8819_v0, 4  ;;  %v19294_v59 = vrot.slane %v8825_v24, 5 }
 0x2bd   : > { %v10072_v34 = vld [vmem:[#allocation3 + $0x18] sm:$0xe]  ;;  %v14370_v51 = vpack.c.bf16 %v8505_v10, %v8505_v10  ;;  %v19298_v38 = vrot.slane %v10142_v41, 4  ;;  %v8798_v47 = vor.u32 %v8797_v50, %v19278_v17 }
 0x2be   : > { %v19292_v61 = vld [vmem:[#allocation3 + $0x18] sm:$0xf]  ;;  %v19302_v4 = vld [vmem:[#allocation3 + $0x1c] sm:$0xf]  ;;  %v14068_v6 = vrot.slane %v10072_v34, 9  ;;  %v8822_v60 = vor.u32 %v8821_v30, %v19288_v62 }
 0x2bf   : > { %v19304_v55 = vld [vmem:[#allocation3 + $0x1c] sm:$0xf]  ;;  %v8758_v32 = vshrl.u32 %v19292_v61, 16  ;;  %v10121_v3 = vrot.slane %v19302_v4, 5  ;;  %v8761_v13 = vshll.u32 %v19292_v61, 16  ;;  %v19316_v2 = vrot.slane %v8798_v47, 4 }
 0x2c0   : > { %v8767_v35 = vshll.u32 %v19304_v55, 16  ;;  %v8771_v40 = vshrl.u32 %v19304_v55, 16  ;;  %8666 = vst.msk [vmem:[#allocation3 + $0x3c] sm:$0xf] %vm1671_vm3, %v14370_v51  ;;  %v19314_v23 = vld [vmem:[#allocation3 + $0x2c] sm:$0x1] }
 0x2c1   : > { %v8760_v45 = vrot.slane %v8758_v32, 4  ;;  %v10073_v19 = vld [vmem:[#allocation3 + $0x24] sm:$0xe]  ;;  %v10122_v46 = vsel %vm19062_vm13, %v14068_v6, %v10121_v3  ;;  %v10123_v42 = vrot.slane %v10121_v3, 4  ;;  %v8763_v0 = vrot.slane %v8761_v13, 5 }
 0x2c2   : > { %v8769_v24 = vrot.slane %v8767_v35, 5  ;;  %v19324_v10 = vld [vmem:[#allocation3 + $0x24] sm:$0xf]  ;;  %v8773_v50 = vrot.slane %v8771_v40, 4  ;;  %v14069_v30 = vrot.slane %v10073_v19, 9  ;;  %v10131_v34 = vrot.slane %v19314_v23, 5 }
 0x2c3   : > { %v10074_v51 = vld [vmem:[#allocation3 + $0x30] sm:$0xe]  ;;  %v8782_v32 = vshrl.u32 %v19324_v10, 16  ;;  %v10125_v47 = vsel %vm19062_vm13, %v10123_v42, %v10124_v37  ;;  %v8764_v15 = vor.u32 %v8763_v0, %v8760_v45  ;;  %v8701_v6 = vld [vmem:[#allocation3 + $0x2c] sm:$0x1]  ;;  %v8785_v3 = vshll.u32 %v19324_v10, 16 }
 0x2c4   : > { %v14070_v7 = vrot.slane %v10074_v51, 9  ;;  %v14077_v13 = vcombine.low %v10122_v46, %v10125_v47  ;;  %v8774_v35 = vor.u32 %v8773_v50, %v8769_v24  ;;  %v10129_v40 = vsel %vm19062_vm13, %v14069_v30, %v10128_v21  ;;  %v19340_v29 = vld [vmem:[#allocation3 + $0x30] sm:$0xf] }
 0x2c5   : > { %v10132_v19 = vsel %vm19062_vm13, %v19261_v20, %v10131_v34  ;;  %v8765_v48 = vrot.slane %v8764_v15, 4  ;;  %v8784_v46 = vrot.slane %v8782_v32, 4  ;;  %v8787_v21 = vrot.slane %v8785_v3, 5  ;;  %v19348_v51 = vld [vmem:[#allocation3 + $0x50] sm:$0x1] }
 0x2c6   : > { %v14078_v37 = vcombine.low %v10129_v40, %v10132_v19  ;;  %v10136_v45 = vsel %vm19062_vm13, %v14070_v7, %v10135_v1  ;;  %14958 = vmatprep.mubr.msk.bf16.mxu0 %vm1648_vm0, %v14077_v13  ;;  %v8775_v42 = vrot.slane %v8774_v35, 4  ;;  %v8801_v50 = vshll.u32 %v8701_v6, 16  ;;  %v19355_v34 = vld [vmem:[#allocation3 + $0x44] sm:$0x1]  ;;  %v19361_v3 = vld [vmem:[#allocation3 + $0x4c] sm:$0xf] }
 0x2c7   : > { %v14079_v0 = vcombine.low %v10136_v45, %v19286_v18  ;;  %v10075_v30 = vld [vmem:[#allocation3 + $0x3c] sm:$0xe]  ;;  %v8770_v15 = vsel %vm19188_vm6, %v8765_v48, %v8769_v24  ;;  %v8806_v20 = vshrl.u32 %v19340_v29, 16  ;;  %v8809_v1 = vshll.u32 %v19340_v29, 16  ;;  %v19376_v45 = vld [vmem:[#allocation3 + $0x40] sm:$0xf] }
 0x2c8   : > { %14959 = vmatmul.mubr.msk.bf16.gmra.mrb[112].mxu0 %vm1648_vm0, %v14078_v37  ;;  %v8823_v7 = vrot.slane %v8822_v60, 4  ;;  %v8780_v18 = vsel %vm19188_vm6, %v8775_v42, %v19249_v57  ;;  %v8788_v32 = vor.u32 %v8787_v21, %v8784_v46  ;;  %v8803_v47 = vrot.slane %v8801_v50, 5  ;;  %v19363_v48 = vld [vmem:[#allocation3 + $0x3c] sm:$0xf]  ;;  %v8703_v46 = vld [vmem:[#allocation3 + $0x44] sm:$0x1] }
 0x2c9   : > { %14962 = vmatprep.mubr.msk.bf16.mxu0 %vm1648_vm0, %v14079_v0  ;;  %v14071_v6 = vrot.slane %v10075_v30, 9  ;;  %v14000_v24 = vcombine.low %v8770_v15, %v8780_v18  ;;  %v8808_v13 = vrot.slane %v8806_v20, 4  ;;  %v8811_v35 = vrot.slane %v8809_v1, 5  ;;  %v19384_v21 = vld [vmem:[#allocation3 + $0x4c] sm:$0xf] }
 0x2ca   : > { %v8828_v60 = vsel %vm19188_vm6, %v8823_v7, %v19294_v59  ;;  %v8789_v40 = vrot.slane %v8788_v32, 4  ;;  %v8804_v57 = vsel %vm19188_vm6, %v19316_v2, %v8803_v47  ;;  %v10145_v37 = vrot.slane %v19355_v34, 5 }
 0x2cb   : > { %v10143_v19 = vsel %vm19062_vm13, %v14071_v6, %v10142_v41  ;;  %14886 = vmatprep.mubr.msk.bf16.mxu1 %vm1648_vm0, %v14000_v24  ;;  %v8812_v42 = vor.u32 %v8811_v35, %v8808_v13  ;;  %v8508_v59 = vsel %vm8003_vm9, %v19105_v44, 0.0  ;;  %v10149_v0 = vrot.slane %v19361_v3, 5  ;;  %v8704_v6 = vld [vmem:[#allocation3 + $0x50] sm:$0x1] }
 0x2cc   : > { %v10152_v2 = vrot.slane %v19348_v51, 5  ;;  %v8794_v41 = vsel %vm19188_vm6, %v8789_v40, %v19278_v17  ;;  %v10146_v50 = vsel %vm19062_vm13, %v19298_v38, %v10145_v37  ;;  %v14373_v30 = vpack.c.bf16 %v8508_v59, %v8508_v59 }
 0x2cd   : > { %v8830_v15 = vshrl.u32 %v19363_v48, 16  ;;  %v14001_v20 = vcombine.low %v8794_v41, %v8804_v57  ;;  %v8813_v1 = vrot.slane %v8812_v42, 4  ;;  %v14080_v44 = vcombine.low %v10143_v19, %v10146_v50  ;;  %v9852_v42 = vld [vmem:[#allocation3] sm:$0xf] }
 0x2ce   : > { %v10151_v7 = vrot.slane %v10149_v0, 4  ;;  %8669 = vst.msk [vmem:[#allocation3 + $0x48] sm:$0xf] %vm1671_vm3, %v14373_v30  ;;  %v8833_v32 = vshll.u32 %v19363_v48, 16  ;;  %v8839_v17 = vshll.u32 %v19376_v45, 16  ;;  %v8843_v47 = vshrl.u32 %v19376_v45, 16 }
 0x2cf   : > { %v8832_v18 = vrot.slane %v8830_v15, 4  ;;  %14887 = vmatmul.mubr.msk.bf16.gmra.mrb[112].mxu1 %vm1648_vm0, %v14001_v20  ;;  %v8818_v38 = vsel %vm19188_vm6, %v8813_v1, %v19288_v62  ;;  %v8849_v13 = vshll.u32 %v8703_v46, 16  ;;  %v8863_v35 = vshll.u32 %v19384_v21, 16  ;;  %v19410_v62 = vld [vmem:[#allocation3 + $0x58] sm:$0xf] }
 0x2d0   : > { %14963 = vmatmul.mubr.msk.bf16.gmra.mrb[116].mxu0 %vm1648_vm0, %v14080_v44  ;;  %v10153_v24 = vsel %vm19062_vm13, %v10151_v7, %v10152_v2  ;;  %v14002_v40 = vcombine.low %v8818_v38, %v8828_v60  ;;  %v8835_v57 = vrot.slane %v8833_v32, 5  ;;  %v8841_v19 = vrot.slane %v8839_v17, 5 }
 0x2d1   : > { %v8845_v37 = vrot.slane %v8843_v47, 4  ;;  %v8851_v59 = vrot.slane %v8849_v13, 5  ;;  %v19407_v41 = vrot.slane %v8863_v35, 5  ;;  %v8867_v50 = vshrl.u32 %v19384_v21, 16 }
 0x2d2   : > { %v8873_v30 = vshll.u32 %v8704_v6, 16  ;;  %14890 = vmatprep.mubr.msk.bf16.mxu1 %vm1648_vm0, %v14002_v40  ;;  %v8836_v15 = vor.u32 %v8835_v57, %v8832_v18  ;;  %v8511_v60 = vsel %vm8003_vm9, %v19147_v5, 0.0  ;;  %v8513_v46 = vsel %vm8008_vm5, %v19152_v52, 0.0 }
 0x2d3   : > { %v8846_v2 = vor.u32 %v8845_v37, %v8841_v19  ;;  %v8869_v20 = vrot.slane %v8867_v50, 4  ;;  %v14376_v44 = vpack.c.bf16 %v8511_v60, %v8511_v60  ;;  %v14378_v7 = vpack.c.bf16 %v8513_v46, %v8513_v46  ;;  %v19435_v50 = vld [vmem:[#allocation3 + $0x58] sm:$0xf] }
 0x2d4   : > { %v19419_v1 = vrot.slane %v8873_v30, 5  ;;  %v8837_v32 = vrot.slane %v8836_v15, 4  ;;  %v10156_v47 = vrot.slane %v19410_v62, 5  ;;  %v9877_v6 = vshrl.u32 %v9852_v42, 16 }
 0x2d5   : > { %v8847_v17 = vrot.slane %v8846_v2, 4  ;;  %v10076_v18 = vld [vmem:[#allocation3 + $0x48] sm:$0xe]  ;;  %v8870_v63 = vor.u32 %v8869_v20, %v19407_v41  ;;  %8672 = vst.msk [vmem:[#allocation3 + $0x54] sm:$0xf] %vm1671_vm3, %v14376_v44  ;;  %v9880_v5 = vshll.u32 %v9852_v42, 16 }
 0x2d6   : > { %v19422_v38 = vld [vmem:[#allocation3 + $0x48] sm:$0xf]  ;;  %8674 = vst.msk [vmem:[#allocation3 + $0x5c] sm:$0x1] %vm8652_vm7, %v14378_v7  ;;  %v9886_v52 = vshll.u32 %v19052_v36, 16  ;;  %v14072_v35 = vrot.slane %v10076_v18, 9  ;;  %v8842_v40 = vsel %vm19188_vm6, %v8837_v32, %v8841_v19 }
 0x2d7   : > { %v8852_v57 = vsel %vm19188_vm6, %v8847_v17, %v8851_v59  ;;  %v8854_v37 = vshrl.u32 %v19422_v38, 16  ;;  %v8857_v15 = vshll.u32 %v19422_v38, 16  ;;  %v8871_v42 = vrot.slane %v8870_v63, 4  ;;  %v9855_v44 = vld [vmem:[#allocation3 + $0xc] sm:$0xf] }
 0x2d8   : > { %v14003_v30 = vcombine.low %v8842_v40, %v8852_v57  ;;  %v10158_v2 = vrot.slane %v10156_v47, 4  ;;  %v10150_v60 = vsel %vm19062_vm13, %v14072_v35, %v10149_v0  ;;  %v9879_v20 = vrot.slane %v9877_v6, 4  ;;  %v15428_v40 = vld [vmem:[#allocation3 + $0x8] sm:$0x1] }
 0x2d9   : > { %v8856_v46 = vrot.slane %v8854_v37, 4  ;;  %v9882_v19 = vrot.slane %v9880_v5, 5  ;;  %v14081_v7 = vcombine.low %v10150_v60, %v10153_v24  ;;  %v8859_v59 = vrot.slane %v8857_v15, 5 }
 0x2da   : > { %14891 = vmatmul.mubr.msk.bf16.gmra.mrb[116].mxu1 %vm1648_vm0, %v14003_v30  ;;  %v8876_v32 = vsel %vm19188_vm6, %v8871_v42, %v19419_v1  ;;  %v9888_v17 = vrot.slane %v9886_v52, 5  ;;  %v9890_v63 = vshrl.u32 %v19052_v36, 16  ;;  %v9896_v57 = vshll.u32 %v15428_v40, 16 }
 0x2db   : > { %v9883_v18 = vor.u32 %v9882_v19, %v9879_v20  ;;  %v8887_v0 = vshll.u32 %v19435_v50, 16  ;;  %14966 = vmatprep.mubr.msk.bf16.mxu0 %vm1648_vm0, %v14081_v7  ;;  %v8860_v6 = vor.u32 %v8859_v59, %v8856_v46  ;;  %v8891_v24 = vshrl.u32 %v19435_v50, 16 }
 0x2dc   : > { %v9901_v5 = vshrl.u32 %v9855_v44, 16  ;;  %v9904_v35 = vshll.u32 %v9855_v44, 16  ;;  %v10077_v30 = vld [vmem:[#allocation3 + $0x54] sm:$0xe]  ;;  %v9892_v1 = vrot.slane %v9890_v63, 4  ;;  %v9898_v46 = vrot.slane %v9896_v57, 5 }
 0x2dd   : > { %v19450_v37 = vld [vmem:[#allocation3 + $0x5c] sm:$0x1]  ;;  %v9884_v15 = vrot.slane %v9883_v18, 4  ;;  %v8861_v42 = vrot.slane %v8860_v6, 4  ;;  %v14073_v60 = vrot.slane %v10077_v30, 9  ;;  %v8889_v30 = vrot.slane %v8887_v0, 5 }
 0x2de   : > { %v10159_v20 = vrot.slane %v19450_v37, 5  ;;  %v19457_v19 = vld [vmem:[#allocation3 + $0x54] sm:$0xf]  ;;  %v9893_v7 = vor.u32 %v9892_v1, %v9888_v17  ;;  %v8705_v59 = vld [vmem:[#allocation3 + $0x5c] sm:$0x1]  ;;  %v8893_v13 = vrot.slane %v8891_v24, 4 }
 0x2df   : > { %v9889_v44 = vsel %vm19188_vm6, %v9884_v15, %v9888_v17  ;;  %v8878_v18 = vshrl.u32 %v19457_v19, 16  ;;  %v8881_v63 = vshll.u32 %v19457_v19, 16  ;;  %v8866_v40 = vsel %vm19188_vm6, %v8861_v42, %v19407_v41  ;;  %v15429_v42 = vld [vmem:[#allocation3 + $0x10] sm:$0xf]  ;;  %v9858_v0 = vld [vmem:[#allocation3 + $0x18] sm:$0xf] }
 0x2e0   : > { %v10157_v6 = vsel %vm19062_vm13, %v14073_v60, %v10156_v47  ;;  %v10160_v57 = vsel %vm19062_vm13, %v10158_v2, %v10159_v20  ;;  %v14004_v36 = vcombine.low %v8866_v40, %v8876_v32  ;;  %v9894_v15 = vrot.slane %v9893_v7, 4 }
 0x2e1   : > { %v14082_v52 = vcombine.low %v10157_v6, %v10160_v57  ;;  %v8880_v17 = vrot.slane %v8878_v18, 4  ;;  %v8883_v1 = vrot.slane %v8881_v63, 5  ;;  %v8897_v58 = vshll.u32 %v8705_v59, 16 }
 0x2e2   : > { %v9903_v56 = vrot.slane %v9901_v5, 4  ;;  %14894 = vmatprep.mubr.msk.bf16.mxu1 %vm1648_vm0, %v14004_v36  ;;  %v9899_v41 = vsel %vm19188_vm6, %v9894_v15, %v9898_v46  ;;  %v9906_v47 = vrot.slane %v9904_v35, 5  ;;  %v9910_v60 = vshll.u32 %v15429_v42, 16  ;;  %v15430_v5 = vld [vmem:[#allocation3 + $0x14] sm:$0x1] }
 0x2e3   : > { %14967 = vmatmul.mubr.msk.bf16.gmra.mrb[120].mxu0 %vm1648_vm0, %v14082_v52  ;;  %v9914_v2 = vshrl.u32 %v15429_v42, 16  ;;  %v14091_v32 = vcombine.low %v9889_v44, %v9899_v41  ;;  %v8884_v20 = vor.u32 %v8883_v1, %v8880_v17  ;;  %v8894_v7 = vor.u32 %v8893_v13, %v8889_v30  ;;  %v9861_v17 = vld [vmem:[#allocation3 + $0x24] sm:$0xf] }
 0x2e4   : > { %v8899_v18 = vrot.slane %v8897_v58, 5  ;;  %v9907_v63 = vor.u32 %v9906_v47, %v9903_v56  ;;  %v9912_v24 = vrot.slane %v9910_v60, 5  ;;  %v9920_v40 = vshll.u32 %v15430_v5, 16 }
 0x2e5   : > { %v9916_v59 = vrot.slane %v9914_v2, 4  ;;  %14972 = vmatprep.mubr.msk.bf16.mxu0 %vm1648_vm0, %v14091_v32  ;;  %v8885_v52 = vrot.slane %v8884_v20, 4  ;;  %v8895_v36 = vrot.slane %v8894_v7, 4  ;;  %v9925_v6 = vshrl.u32 %v9858_v0, 16 }
 0x2e6   : > { %v9928_v46 = vshll.u32 %v9858_v0, 16  ;;  %v9908_v35 = vrot.slane %v9907_v63, 4  ;;  %v9922_v15 = vrot.slane %v9920_v40, 5  ;;  %v9934_v42 = vshll.u32 %v19302_v4, 16 }
 0x2e7   : > { %v9917_v57 = vor.u32 %v9916_v59, %v9912_v24  ;;  %v8890_v13 = vsel %vm19188_vm6, %v8885_v52, %v8889_v30  ;;  %v8900_v56 = vsel %vm19188_vm6, %v8895_v36, %v8899_v18  ;;  %v9927_v58 = vrot.slane %v9925_v6, 4 }
 0x2e8   : > { %v9930_v44 = vrot.slane %v9928_v46, 5  ;;  %v14005_v1 = vcombine.low %v8890_v13, %v8900_v56  ;;  %v9913_v41 = vsel %vm19188_vm6, %v9908_v35, %v9912_v24  ;;  %v9936_v60 = vrot.slane %v9934_v42, 5  ;;  %v9864_v24 = vld [vmem:[#allocation3 + $0x30] sm:$0xf] }
 0x2e9   : > { %v9918_v47 = vrot.slane %v9917_v57, 4  ;;  %v9938_v0 = vshrl.u32 %v19302_v4, 16  ;;  %v9944_v32 = vshll.u32 %v19219_v27, 16  ;;  %v9300_v30 = vsel %vm8951_vm4, %v19268_v14, 0 }
 0x2ea   : > { %v9931_v2 = vor.u32 %v9930_v44, %v9927_v58  ;;  %14895 = vmatmul.mubr.msk.bf16.gmra.mrb[120].mxu1 %vm1648_vm0, %v14005_v1  ;;  %v10726_v7 = vsel %vm8951_vm4, %v19118_v49, 0  ;;  %v9949_v18 = vshrl.u32 %v9861_v17, 16  ;;  %v9952_v63 = vshll.u32 %v9861_v17, 16  ;;  %v19500_v49 = vld [vmem:[%s20583_s3 + $0x1c] sm:$0xf] }
 0x2eb   : > { %v9923_v20 = vsel %vm19188_vm6, %v9918_v47, %v9922_v15  ;;  %v21442_v59 = vcombine.low %v19073_v16, %v19099_v31  ;;  %v9940_v5 = vrot.slane %v9938_v0, 4  ;;  %v9946_v14 = vrot.slane %v9944_v32, 5 }
 0x2ec   : > { %v14092_v27 = vcombine.low %v9913_v41, %v9923_v20  ;;  %v9932_v4 = vrot.slane %v9931_v2, 4  ;;  %v9951_v40 = vrot.slane %v9949_v18, 4  ;;  %v9954_v52 = vrot.slane %v9952_v63, 5  ;;  %v19516_v20 = vld [vmem:[%s20583_s3 + $0xc] sm:$0xf] }
 0x2ed   : > { %14900 = vmatprep.mubr.msk.bf16.mxu1 %vm1648_vm0, %v21442_v59  ;;  %v9958_v36 = vshll.u32 %v19221_v9, 16  ;;  %v9962_v6 = vshrl.u32 %v19221_v9, 16  ;;  %v9941_v31 = vor.u32 %v9940_v5, %v9936_v60  ;;  %v9968_v46 = vshll.u32 %v19314_v23, 16  ;;  %v9867_v9 = vld [vmem:[#allocation3 + $0x3c] sm:$0xf] }
 0x2ee   : > { %14973 = vmatmul.mubr.msk.bf16.vlgmr.msra.gmra.mrb[108].mxu0 %vm1648_vm0, %v14092_v27  ;;  %v9937_v16 = vsel %vm19188_vm6, %v9932_v4, %v9936_v60  ;;  %v9973_v35 = vshrl.u32 %v9864_v24, 16  ;;  %v9955_v57 = vor.u32 %v9954_v52, %v9951_v40  ;;  %v9976_v13 = vshll.u32 %v9864_v24, 16 }
 0x2ef   : > { %14989 = vmatpush3.bf16.msra.mxu0 %v10726_v7  ;;  %v9960_v15 = vrot.slane %v9958_v36, 5  ;;  %v9964_v42 = vrot.slane %v9962_v6, 4  ;;  %v9942_v56 = vrot.slane %v9941_v31, 4  ;;  %v9970_v58 = vrot.slane %v9968_v46, 5 }
 0x2f0   : > { %v9975_v44 = vrot.slane %v9973_v35, 4  ;;  %v9982_v17 = vshll.u32 %v19229_v12, 16  ;;  %15379 = vmatprep.subr.msk.bf16.mxu0 %vm8951_vm4, %v19500_v49  ;;  %v9956_v1 = vrot.slane %v9955_v57, 4  ;;  %v9978_v47 = vrot.slane %v9976_v13, 5 }
 0x2f1   : > { %v9965_v41 = vor.u32 %v9964_v42, %v9960_v15  ;;  %v9986_v23 = vshrl.u32 %v19229_v12, 16  ;;  %v9947_v60 = vsel %vm19188_vm6, %v9942_v56, %v9946_v14  ;;  %v9992_v0 = vshll.u32 %v19223_v26, 16  ;;  %v9870_v14 = vld [vmem:[#allocation3 + $0x48] sm:$0xf] }
 0x2f2   : > { %v9984_v2 = vrot.slane %v9982_v17, 5  ;;  %v9997_v32 = vshrl.u32 %v9867_v9, 16  ;;  %v14093_v7 = vcombine.low %v9937_v16, %v9947_v60  ;;  %v21443_v18 = vcombine.low %v18938_v11, %v19174_v22 }
 0x2f3   : > { %v9961_v12 = vsel %vm19188_vm6, %v9956_v1, %v9960_v15  ;;  %v9966_v63 = vrot.slane %v9965_v41, 4  ;;  %v9979_v24 = vor.u32 %v9978_v47, %v9975_v44  ;;  %v21444_v26 = vcombine.low %v19292_v61, %v19304_v55  ;;  %v9873_v1 = vld [vmem:[#allocation3 + $0x54] sm:$0xf] }
 0x2f4   : > { %14901 = vmatmul.mubr.msk.bf16.vlgmr.msra.gmra.mrb[108].mxu1 %vm1648_vm0, %v21443_v18  ;;  %v9988_v59 = vrot.slane %v9986_v23, 4  ;;  %v9994_v27 = vrot.slane %v9992_v0, 5  ;;  %v9999_v4 = vrot.slane %v9997_v32, 4  ;;  %v10000_v5 = vshll.u32 %v9867_v9, 16  ;;  %14976 = vmatprep.mubr.msk.bf16.mxu0 %vm1648_vm0, %v14093_v7 }
 0x2f5   : > { %14917 = vmatpush3.bf16.msra.mxu1 %v9300_v30  ;;  %14904 = vmatprep.mubr.msk.bf16.mxu1 %vm1648_vm0, %v21444_v26  ;;  %v9971_v11 = vsel %vm19188_vm6, %v9966_v63, %v9970_v58  ;;  %v9980_v22 = vrot.slane %v9979_v24, 4  ;;  %v10006_v40 = vshll.u32 %v19255_v39, 16  ;;  %v10010_v30 = vshrl.u32 %v19255_v39, 16  ;;  %v10459_v63 = vld [vmem:[#allocation3 + $0xc] sm:$0xf] }
 0x2f6   : > { %15375 = vmatprep.subr.msk.bf16.mxu1 %vm8951_vm4, %v19516_v20  ;;  %v14094_v61 = vcombine.low %v9961_v12, %v9971_v11  ;;  %v9989_v55 = vor.u32 %v9988_v59, %v9984_v2  ;;  %v10002_v52 = vrot.slane %v10000_v5, 5  ;;  %v10016_v36 = vshll.u32 %v19355_v34, 16 }
 0x2f7   : > { %v9985_v6 = vsel %vm19188_vm6, %v9980_v22, %v9984_v2  ;;  %v10008_v16 = vrot.slane %v10006_v40, 5  ;;  %v10012_v31 = vrot.slane %v10010_v30, 4  ;;  %v10021_v46 = vshrl.u32 %v9870_v14, 16  ;;  %v19567_v22 = vld [vmem:[#allocation3 + $0x14] sm:$0x1] }
 0x2f8   : > { %14977 = vmatmul.mubr.msk.bf16.gmra.mrb[112].mxu0 %vm1648_vm0, %v14094_v61  ;;  %v9990_v35 = vrot.slane %v9989_v55, 4  ;;  %v10003_v57 = vor.u32 %v10002_v52, %v9999_v4  ;;  %v10018_v15 = vrot.slane %v10016_v36, 5  ;;  %v10024_v39 = vshll.u32 %v9870_v14, 16  ;;  %v10462_v52 = vld [vmem:[#allocation3 + $0x18] sm:$0xf] }
 0x2f9   : > { %v10013_v42 = vor.u32 %v10012_v31, %v10008_v16  ;;  %v10023_v13 = vrot.slane %v10021_v46, 4  ;;  %v10030_v9 = vshll.u32 %v19361_v3, 16  ;;  %v10034_v56 = vshrl.u32 %v19361_v3, 16 }
 0x2fa   : > { %v9995_v34 = vsel %vm19188_vm6, %v9990_v35, %v9994_v27  ;;  %v10004_v58 = vrot.slane %v10003_v57, 4  ;;  %v10026_v44 = vrot.slane %v10024_v39, 5  ;;  %v10040_v17 = vshll.u32 %v19348_v51, 16  ;;  %v19578_v39 = vld [vmem:[#allocation3 + $0x1c] sm:$0xf] }
 0x2fb   : > { %v14095_v41 = vcombine.low %v9985_v6, %v9995_v34  ;;  %v21445_v47 = vcombine.low %v19324_v10, %v19240_v53  ;;  %v10014_v23 = vrot.slane %v10013_v42, 4  ;;  %v10032_v60 = vrot.slane %v10030_v9, 5 }
 0x2fc   : > { %v10036_v2 = vrot.slane %v10034_v56, 4  ;;  %v21446_v3 = vcombine.low %v19340_v29, %v19247_v54  ;;  %v10009_v0 = vsel %vm19188_vm6, %v10004_v58, %v10008_v16  ;;  %v10027_v32 = vor.u32 %v10026_v44, %v10023_v13  ;;  %v19586_v44 = vld [vmem:[#allocation3 + $0x20] sm:$0x1] }
 0x2fd   : > { %14905 = vmatmul.mubr.msk.bf16.gmra.mrb[112].mxu1 %vm1648_vm0, %v21445_v47  ;;  %v10042_v51 = vrot.slane %v10040_v17, 5  ;;  %v14020_v7 = vcombine.low %v19422_v38, %v19384_v21  ;;  %14980 = vmatprep.mubr.msk.bf16.mxu0 %vm1648_vm0, %v14095_v41  ;;  %v10019_v53 = vsel %vm19188_vm6, %v10014_v23, %v10018_v15  ;;  %v10045_v18 = vshrl.u32 %v9873_v1, 16  ;;  %v19562_v38 = vld [vmem:[#allocation3 + $0x10] sm:$0xf]  ;;  %v10465_v17 = vld [vmem:[#allocation3 + $0x24] sm:$0xf] }
 0x2fe   : > { %14908 = vmatprep.mubr.msk.bf16.mxu1 %vm1648_vm0, %v21446_v3  ;;  %v10037_v10 = vor.u32 %v10036_v2, %v10032_v60  ;;  %v10048_v12 = vshll.u32 %v9873_v1, 16  ;;  %v14096_v54 = vcombine.low %v10009_v0, %v10019_v53  ;;  %v10028_v29 = vrot.slane %v10027_v32, 4  ;;  %v19592_v3 = vld [vmem:[#allocation3 + $0x28] sm:$0xf] }
 0x2ff   : > { %v10054_v24 = vshll.u32 %v19410_v62, 16  ;;  %v10058_v26 = vshrl.u32 %v19410_v62, 16  ;;  %v10047_v27 = vrot.slane %v10045_v18, 4  ;;  %v10064_v21 = vshll.u32 %v19450_v37, 16 }
 0x300   : > { %v10038_v59 = vrot.slane %v10037_v10, 4  ;;  %v10050_v4 = vrot.slane %v10048_v12, 5  ;;  %14981 = vmatmul.mubr.msk.bf16.gmra.mrb[116].mxu0 %vm1648_vm0, %v14096_v54  ;;  %v10033_v5 = vsel %vm19188_vm6, %v10028_v29, %v10032_v60  ;;  %v10484_v40 = vshrl.u32 %v10459_v63, 16  ;;  %v19598_v12 = vld [vmem:[#allocation3 + $0x2c] sm:$0x1] }
 0x301   : > { %v10056_v14 = vrot.slane %v10054_v24, 5  ;;  %v10060_v11 = vrot.slane %v10058_v26, 4  ;;  %v10066_v61 = vrot.slane %v10064_v21, 5  ;;  %v10487_v55 = vshll.u32 %v10459_v63, 16  ;;  %v15400_v54 = vld [vmem:[#allocation3 + $0xc] sm:$0xff]  }
 0x302   : > { %v10043_v62 = vsel %vm19188_vm6, %v10038_v59, %v10042_v51  ;;  %v10051_v30 = vor.u32 %v10050_v4, %v10047_v27  ;;  %v10486_v6 = vrot.slane %v10484_v40, 4  ;;  %v10493_v16 = vshll.u32 %v19562_v38, 16 }
 0x303   : > { %v14097_v37 = vcombine.low %v10033_v5, %v10043_v62  ;;  %v10061_v36 = vor.u32 %v10060_v11, %v10056_v14  ;;  %v21447_v31 = vcombine.low %v19363_v48, %v19376_v45  ;;  %v10489_v35 = vrot.slane %v10487_v55, 5 }
 0x304   : > { %v10052_v46 = vrot.slane %v10051_v30, 4  ;;  %v10497_v57 = vshrl.u32 %v19562_v38, 16  ;;  %v10503_v15 = vshll.u32 %v19567_v22, 16  ;;  %v10495_v13 = vrot.slane %v10493_v16, 5 }
 0x305   : > { %14909 = vmatmul.mubr.msk.bf16.gmra.mrb[116].mxu1 %vm1648_vm0, %v21447_v31  ;;  %14984 = vmatprep.mubr.msk.bf16.mxu0 %vm1648_vm0, %v14097_v37  ;;  %v10062_v42 = vrot.slane %v10061_v36, 4  ;;  %v14021_v9 = vcombine.low %v19457_v19, %v19435_v50  ;;  %v10508_v48 = vshrl.u32 %v10462_v52, 16  ;;  %v10490_v56 = vor.u32 %v10489_v35, %v10486_v6 }
 0x306   : > { %14912 = vmatprep.mubr.msk.bf16.mxu1 %vm1648_vm0, %v14020_v7  ;;  %v10057_v45 = vsel %vm19188_vm6, %v10052_v46, %v10056_v14  ;;  %v10499_v34 = vrot.slane %v10497_v57, 4  ;;  %v10505_v58 = vrot.slane %v10503_v15, 5  ;;  %v10511_v47 = vshll.u32 %v10462_v52, 16  ;;  %v10468_v14 = vld [vmem:[#allocation3 + $0x30] sm:$0xf] }
 0x307   : > { %v10067_v1 = vsel %vm19188_vm6, %v10062_v42, %v10066_v61  ;;  %v10510_v41 = vrot.slane %v10508_v48, 4  ;;  %v10517_v23 = vshll.u32 %v19578_v39, 16  ;;  %v10491_v2 = vrot.slane %v10490_v56, 4  ;;  %v19607_v61 = vld [vmem:[#allocation3 + $0x34] sm:$0xf] }
 0x308   : > { %v14098_v60 = vcombine.low %v10057_v45, %v10067_v1  ;;  %v10500_v50 = vor.u32 %v10499_v34, %v10495_v13  ;;  %v10521_v19 = vshrl.u32 %v19578_v39, 16  ;;  %v10513_v0 = vrot.slane %v10511_v47, 5  ;;  %v19616_v46 = vld [vmem:[#allocation3 + $0x38] sm:$0x1]  ;;  %v19634_v1 = vld [vmem:[%s20583_s3 + $0x34] sm:$0xf] }
 0x309   : > { %v10519_v32 = vrot.slane %v10517_v23, 5  ;;  %v10527_v51 = vshll.u32 %v19586_v44, 16  ;;  %v10532_v7 = vshrl.u32 %v10465_v17, 16  ;;  %v10496_v53 = vsel %vm19188_vm6, %v10491_v2, %v10495_v13  ;;  %v15401_v45 = vld [vmem:[#allocation3 + $0x18] sm:$0xff]   ;;  %v15402_v23 = vld [vmem:[#allocation3 + $0x24] sm:$0xff]  }
 0x30a   : > { %14985 = vmatmul.mubr.msk.bf16.gmra.mrb[120].mxu0 %vm1648_vm0, %v14098_v60  ;;  %v10501_v10 = vrot.slane %v10500_v50, 4  ;;  %v10523_v18 = vrot.slane %v10521_v19, 4  ;;  %v10535_v63 = vshll.u32 %v10465_v17, 16  ;;  %v10514_v29 = vor.u32 %v10513_v0, %v10510_v41  ;;  %v19629_v17 = vld [vmem:[%s20583_s3 + $0x24] sm:$0xf] }
 0x30b   : > { %v10529_v24 = vrot.slane %v10527_v51, 5  ;;  %v10534_v26 = vrot.slane %v10532_v7, 4  ;;  %v10541_v59 = vshll.u32 %v19592_v3, 16  ;;  %v10545_v5 = vshrl.u32 %v19592_v3, 16 }
 0x30c   : > { %v10506_v27 = vsel %vm19188_vm6, %v10501_v10, %v10505_v58  ;;  %v10524_v4 = vor.u32 %v10523_v18, %v10519_v32  ;;  %v10537_v21 = vrot.slane %v10535_v63, 5  ;;  %v10515_v40 = vrot.slane %v10514_v29, 4  ;;  %v10474_v18 = vld [vmem:[#allocation3 + $0x48] sm:$0xf] }
 0x30d   : > { %14913 = vmatmul.mubr.msk.bf16.gmra.mrb[120].mxu1 %vm1648_vm0, %v14021_v9  ;;  %v14108_v11 = vcombine.low %v10496_v53, %v10506_v27  ;;  %v10543_v62 = vrot.slane %v10541_v59, 5  ;;  %v10551_v30 = vshll.u32 %v19598_v12, 16  ;;  %v10547_v37 = vrot.slane %v10545_v5, 4  ;;  %v10471_v9 = vld [vmem:[#allocation3 + $0x3c] sm:$0xf] }
 0x30e   : > { %14918 = vmatprep.mubr.msk.bf16.mxu1 %vm1648_vm0, %v15400_v54  ;;  %v10525_v55 = vrot.slane %v10524_v4, 4  ;;  %v10538_v52 = vor.u32 %v10537_v21, %v10534_v26  ;;  %v9682_v36 = vsel %vm8951_vm4, %v19516_v20, 0  ;;  %v10520_v6 = vsel %vm19188_vm6, %v10515_v40, %v10519_v32  ;;  %v19620_v20 = vld [vmem:[#allocation3 + $0x40] sm:$0xf]  ;;  %v19645_v26 = vld [vmem:[#allocation3 + $0x4c] sm:$0xf] }
 0x30f   : > { %14990 = vmatprep.mubr.msk.bf16.mxu0 %vm1648_vm0, %v14108_v11  ;;  %v10553_v16 = vrot.slane %v10551_v30, 5  ;;  %v10980_v31 = vsel %vm8951_vm4, %v19500_v49, 0  ;;  %v10556_v35 = vshrl.u32 %v10468_v14, 16  ;;  %v10548_v42 = vor.u32 %v10547_v37, %v10543_v62  ;;  %v19624_v49 = vld [vmem:[#allocation3 + $0x44] sm:$0x1] }
 0x310   : > { %v10530_v57 = vsel %vm19188_vm6, %v10525_v55, %v10529_v24  ;;  %v10539_v15 = vrot.slane %v10538_v52, 4  ;;  %v10559_v13 = vshll.u32 %v10468_v14, 16  ;;  %v10565_v34 = vshll.u32 %v19607_v61, 16  ;;  %v19649_v5 = vld [vmem:[#allocation3 + $0x50] sm:$0x1] }
 0x311   : > { %v14109_v48 = vcombine.low %v10520_v6, %v10530_v57  ;;  %v10558_v56 = vrot.slane %v10556_v35, 4  ;;  %v10569_v58 = vshrl.u32 %v19607_v61, 16  ;;  %v10549_v47 = vrot.slane %v10548_v42, 4  ;;  %v10477_v14 = vld [vmem:[#allocation3 + $0x54] sm:$0xf] }
 0x312   : > { %v10544_v41 = vsel %vm19188_vm6, %v10539_v15, %v10543_v62  ;;  %v10561_v60 = vrot.slane %v10559_v13, 5  ;;  %v10575_v2 = vshll.u32 %v19616_v46, 16  ;;  %v10567_v50 = vrot.slane %v10565_v34, 5  ;;  %v19656_v55 = vld [vmem:[#allocation3 + $0x58] sm:$0xf]  ;;  %v15403_v13 = vld [vmem:[#allocation3 + $0x30] sm:$0xff]  }
 0x313   : > { %14991 = vmatmul.mubr.msk.bf16.vlgmr.msra.gmra.mrb[108].mxu0 %vm1648_vm0, %v14109_v48  ;;  %v10571_v19 = vrot.slane %v10569_v58, 4  ;;  %v10580_v0 = vshrl.u32 %v10471_v9, 16  ;;  %v10583_v32 = vshll.u32 %v10471_v9, 16  ;;  %v10554_v51 = vsel %vm19188_vm6, %v10549_v47, %v10553_v16 }
 0x314   : > { %15007 = vmatpush3.bf16.msra.mxu0 %v10980_v31  ;;  %v10562_v7 = vor.u32 %v10561_v60, %v10558_v56  ;;  %v10577_v53 = vrot.slane %v10575_v2, 5  ;;  %v10589_v10 = vshll.u32 %v19620_v20, 16  ;;  %v14110_v63 = vcombine.low %v10544_v41, %v10554_v51  ;;  %v15404_v56 = vld [vmem:[#allocation3 + $0x3c] sm:$0xff]  }
 0x315   : > { %14919 = vmatmul.mubr.msk.bf16.vlgmr.msra.gmra.mrb[108].mxu1 %vm1648_vm0, %v15401_v45  ;;  %v10572_v54 = vor.u32 %v10571_v19, %v10567_v50  ;;  %v10582_v29 = vrot.slane %v10580_v0, 4  ;;  %v10585_v24 = vrot.slane %v10583_v32, 5  ;;  %v10593_v4 = vshrl.u32 %v19620_v20, 16  ;;  %15384 = vmatprep.subr.msk.bf16.mxu0 %vm8951_vm4, %v19634_v1  ;;  %v19669_v60 = vld [vmem:[#allocation3 + $0x5c] sm:$0x1] }
 0x316   : > { %14935 = vmatpush3.bf16.msra.mxu1 %v9682_v36  ;;  %14922 = vmatprep.mubr.msk.bf16.mxu1 %vm1648_vm0, %v15402_v23  ;;  %v10563_v59 = vrot.slane %v10562_v7, 4  ;;  %v10591_v27 = vrot.slane %v10589_v10, 5  ;;  %v10599_v21 = vshll.u32 %v19624_v49, 16  ;;  %v10604_v62 = vshrl.u32 %v10474_v18, 16  ;;  %v10480_v7 = vld [vmem:[#allocation3 + $0x60] sm:$0xf] }
 0x317   : > { %15380 = vmatprep.subr.msk.bf16.mxu1 %vm8951_vm4, %v19629_v17  ;;  %14994 = vmatprep.mubr.msk.bf16.mxu0 %vm1648_vm0, %v14110_v63  ;;  %v10573_v11 = vrot.slane %v10572_v54, 4  ;;  %v10586_v40 = vor.u32 %v10585_v24, %v10582_v29  ;;  %v10607_v30 = vshll.u32 %v10474_v18, 16  ;;  %v10595_v37 = vrot.slane %v10593_v4, 4  ;;  %v19676_v54 = vld [vmem:[#allocation3 + $0x64] sm:$0xf] }
 0x318   : > { %v10568_v52 = vsel %vm19188_vm6, %v10563_v59, %v10567_v50  ;;  %v10601_v36 = vrot.slane %v10599_v21, 5  ;;  %v10613_v6 = vshll.u32 %v19645_v26, 16  ;;  %v10606_v35 = vrot.slane %v10604_v62, 4 }
 0x319   : > { %v10578_v16 = vsel %vm19188_vm6, %v10573_v11, %v10577_v53  ;;  %v10587_v31 = vrot.slane %v10586_v40, 4  ;;  %v10609_v57 = vrot.slane %v10607_v30, 5  ;;  %v10596_v42 = vor.u32 %v10595_v37, %v10591_v27  ;;  %v10841_v40 = vld [vmem:[#allocation3 + $0xc] sm:$0xe] }
 0x31a   : > { %v14111_v15 = vcombine.low %v10568_v52, %v10578_v16  ;;  %v10615_v9 = vrot.slane %v10613_v6, 5  ;;  %v10617_v48 = vshrl.u32 %v19645_v26, 16  ;;  %v10623_v58 = vshll.u32 %v19649_v5, 16  ;;  %v19682_v52 = vld [vmem:[#allocation3 + $0x68] sm:$0x1] }
 0x31b   : > { %v10592_v45 = vsel %vm19188_vm6, %v10587_v31, %v10591_v27  ;;  %v10610_v34 = vor.u32 %v10609_v57, %v10606_v35  ;;  %v10628_v41 = vshrl.u32 %v10477_v14, 16  ;;  %v10597_v47 = vrot.slane %v10596_v42, 4  ;;  %v15405_v31 = vld [vmem:[#allocation3 + $0x48] sm:$0xff]  }
 0x31c   : > { %14995 = vmatmul.mubr.msk.bf16.gmra.mrb[112].mxu0 %vm1648_vm0, %v14111_v15  ;;  %v10619_v23 = vrot.slane %v10617_v48, 4  ;;  %v10631_v2 = vshll.u32 %v10477_v14, 16  ;;  %v10637_v50 = vshll.u32 %v19656_v55, 16  ;;  %v10625_v0 = vrot.slane %v10623_v58, 5 }
 0x31d   : > { %14923 = vmatmul.mubr.msk.bf16.gmra.mrb[112].mxu1 %vm1648_vm0, %v15403_v13  ;;  %v10611_v19 = vrot.slane %v10610_v34, 4  ;;  %v10630_v32 = vrot.slane %v10628_v41, 4  ;;  %v10641_v51 = vshrl.u32 %v19656_v55, 16  ;;  %v10602_v53 = vsel %vm19188_vm6, %v10597_v47, %v10601_v36  ;;  %v15406_v13 = vld [vmem:[#allocation3 + $0x54] sm:$0xff]  }
 0x31e   : > { %14926 = vmatprep.mubr.msk.bf16.mxu1 %vm1648_vm0, %v15404_v56  ;;  %v10620_v10 = vor.u32 %v10619_v23, %v10615_v9  ;;  %v10633_v18 = vrot.slane %v10631_v2, 5  ;;  %v10639_v63 = vrot.slane %v10637_v50, 5  ;;  %v14112_v29 = vcombine.low %v10592_v45, %v10602_v53  ;;  %v9415_v45 = vld [vmem:[#allocation3 + $0xc] sm:$0xf] }
 0x31f   : > { %v10616_v24 = vsel %vm19188_vm6, %v10611_v19, %v10615_v9  ;;  %v10643_v59 = vrot.slane %v10641_v51, 4  ;;  %v10647_v27 = vshll.u32 %v19669_v60, 16  ;;  %v10652_v14 = vshrl.u32 %v10480_v7, 16  ;;  %v9416_v19 = vld [vmem:[#allocation3 + $0x10] sm:$0xf] }
 0x320   : > { %v10621_v4 = vrot.slane %v10620_v10, 4  ;;  %v10634_v21 = vor.u32 %v10633_v18, %v10630_v32  ;;  %v10655_v11 = vshll.u32 %v10480_v7, 16  ;;  %14998 = vmatprep.mubr.msk.bf16.mxu0 %vm1648_vm0, %v14112_v29  ;;  %v10661_v37 = vshll.u32 %v19676_v54, 16  ;;  %v9417_v7 = vld [vmem:[#allocation3 + $0x14] sm:$0x1] }
 0x321   : > { %v10644_v62 = vor.u32 %v10643_v59, %v10639_v63  ;;  %v10649_v30 = vrot.slane %v10647_v27, 5  ;;  %v10665_v36 = vshrl.u32 %v19676_v54, 16  ;;  %v10654_v35 = vrot.slane %v10652_v14, 4  ;;  %v10842_v27 = vld [vmem:[#allocation3 + $0x18] sm:$0xe] }
 0x322   : > { %v10626_v6 = vsel %vm19188_vm6, %v10621_v4, %v10625_v0  ;;  %v10635_v16 = vrot.slane %v10634_v21, 4  ;;  %v10657_v57 = vrot.slane %v10655_v11, 5  ;;  %v10663_v9 = vrot.slane %v10661_v37, 5  ;;  %v15407_v37 = vld [vmem:[#allocation3 + $0x60] sm:$0xff]  }
 0x323   : > { %v14113_v15 = vcombine.low %v10616_v24, %v10626_v6  ;;  %v10645_v42 = vrot.slane %v10644_v62, 4  ;;  %v10667_v48 = vrot.slane %v10665_v36, 4  ;;  %v10671_v58 = vshll.u32 %v19682_v52, 16 }
 0x324   : > { %v10640_v56 = vsel %vm19188_vm6, %v10635_v16, %v10639_v63  ;;  %v10658_v34 = vor.u32 %v10657_v57, %v10654_v35  ;;  %v14124_v41 = vrot.slane %v10841_v40, 9  ;;  %v10875_v2 = vrot.slane %v19562_v38, 5  ;;  %v10843_v40 = vld [vmem:[#allocation3 + $0x24] sm:$0xe] }
 0x325   : > { %14927 = vmatmul.mubr.msk.bf16.gmra.mrb[116].mxu1 %vm1648_vm0, %v15405_v31  ;;  %14999 = vmatmul.mubr.msk.bf16.gmra.mrb[116].mxu0 %vm1648_vm0, %v14113_v15  ;;  %v10650_v47 = vsel %vm19188_vm6, %v10645_v42, %v10649_v30  ;;  %v10668_v23 = vor.u32 %v10667_v48, %v10663_v9  ;;  %v10878_v50 = vrot.slane %v19567_v22, 5  ;;  %v10673_v51 = vrot.slane %v10671_v58, 5  ;;  %v9418_v15 = vld [vmem:[#allocation3 + $0x18] sm:$0xf] }
 0x326   : > { %14930 = vmatprep.mubr.msk.bf16.mxu1 %vm1648_vm0, %v15406_v13  ;;  %v14114_v0 = vcombine.low %v10640_v56, %v10650_v47  ;;  %v10659_v32 = vrot.slane %v10658_v34, 4  ;;  %v9440_v53 = vshrl.u32 %v9415_v45, 16  ;;  %v10876_v18 = vsel %vm19062_vm13, %v14124_v41, %v10875_v2 }
 0x327   : > { %v10669_v10 = vrot.slane %v10668_v23, 4  ;;  %v10877_v63 = vrot.slane %v10875_v2, 4  ;;  %v9443_v29 = vshll.u32 %v9415_v45, 16  ;;  %v9449_v59 = vshll.u32 %v9416_v19, 16  ;;  %v9419_v45 = vld [vmem:[#allocation3 + $0x1c] sm:$0xf] }
 0x328   : > { %15002 = vmatprep.mubr.msk.bf16.mxu0 %vm1648_vm0, %v14114_v0  ;;  %v10664_v24 = vsel %vm19188_vm6, %v10659_v32, %v10663_v9  ;;  %v9442_v38 = vrot.slane %v9440_v53, 4  ;;  %v9453_v22 = vshrl.u32 %v9416_v19, 16  ;;  %v9459_v11 = vshll.u32 %v9417_v7, 16  ;;  %v9421_v53 = vld [vmem:[#allocation3 + $0x24] sm:$0xf] }
 0x329   : > { %v10674_v4 = vsel %vm19188_vm6, %v10669_v10, %v10673_v51  ;;  %v10879_v21 = vsel %vm19062_vm13, %v10877_v63, %v10878_v50  ;;  %v9445_v14 = vrot.slane %v9443_v29, 5  ;;  %v9451_v36 = vrot.slane %v9449_v59, 5  ;;  %v9420_v50 = vld [vmem:[#allocation3 + $0x20] sm:$0x1]  ;;  %v9422_v10 = vld [vmem:[#allocation3 + $0x28] sm:$0xf] }
 0x32a   : > { %v14115_v62 = vcombine.low %v10664_v24, %v10674_v4  ;;  %v14133_v30 = vcombine.low %v10876_v18, %v10879_v21  ;;  %v9455_v6 = vrot.slane %v9453_v22, 4  ;;  %v9461_v31 = vrot.slane %v9459_v11, 5 }
 0x32b   : > { %v9446_v16 = vor.u32 %v9445_v14, %v9442_v38  ;;  %v14125_v35 = vrot.slane %v10842_v27, 9  ;;  %v10882_v57 = vrot.slane %v19578_v39, 5  ;;  %v10885_v13 = vrot.slane %v19586_v44, 5  ;;  %v9423_v38 = vld [vmem:[#allocation3 + $0x2c] sm:$0x1] }
 0x32c   : > { %v9456_v42 = vor.u32 %v9455_v6, %v9451_v36  ;;  %v14126_v9 = vrot.slane %v10843_v40, 9  ;;  %v10889_v48 = vrot.slane %v19592_v3, 5  ;;  %v10892_v41 = vrot.slane %v19598_v12, 5 }
 0x32d   : > { %14931 = vmatmul.mubr.msk.bf16.gmra.mrb[120].mxu1 %vm1648_vm0, %v15407_v37  ;;  %15003 = vmatmul.mubr.msk.bf16.gmra.mrb[120].mxu0 %vm1648_vm0, %v14115_v62  ;;  %v9447_v56 = vrot.slane %v9446_v16, 4  ;;  %v10883_v34 = vsel %vm19062_vm13, %v14125_v35, %v10882_v57  ;;  %v10884_v58 = vrot.slane %v10882_v57, 4  ;;  %v9464_v23 = vshrl.u32 %v9418_v15, 16  ;;  %v10844_v62 = vld [vmem:[#allocation3 + $0x30] sm:$0xe] }
 0x32e   : > { %15008 = vmatprep.mubr.msk.bf16.mxu0 %vm1648_vm0, %v14133_v30  ;;  %v9457_v39 = vrot.slane %v9456_v42, 4  ;;  %v10890_v47 = vsel %vm19062_vm13, %v14126_v9, %v10889_v48  ;;  %v10891_v44 = vrot.slane %v10889_v48, 4  ;;  %v9467_v19 = vshll.u32 %v9418_v15, 16  ;;  %v19734_v16 = vld [vmem:[%s20583_s3 + $0x30] sm:$0xf] }
 0x32f   : > { %v9452_v3 = vsel %vm19188_vm6, %v9447_v56, %v9451_v36  ;;  %v10886_v2 = vsel %vm19062_vm13, %v10884_v58, %v10885_v13  ;;  %v9473_v0 = vshll.u32 %v9419_v45, 16  ;;  %v9466_v7 = vrot.slane %v9464_v23, 4  ;;  %v10845_v57 = vld [vmem:[#allocation3 + $0x3c] sm:$0xe] }
 0x330   : > { %v9462_v12 = vsel %vm19188_vm6, %v9457_v39, %v9461_v31  ;;  %v14134_v32 = vcombine.low %v10883_v34, %v10886_v2  ;;  %v10893_v51 = vsel %vm19062_vm13, %v10891_v44, %v10892_v41  ;;  %v9469_v29 = vrot.slane %v9467_v19, 5  ;;  %v9424_v44 = vld [vmem:[#allocation3 + $0x30] sm:$0xf] }
 0x331   : > { %v14048_v18 = vcombine.low %v9452_v3, %v9462_v12  ;;  %v14135_v63 = vcombine.low %v10890_v47, %v10893_v51  ;;  %v9475_v24 = vrot.slane %v9473_v0, 5  ;;  %v9477_v59 = vshrl.u32 %v9419_v45, 16  ;;  %v9425_v12 = vld [vmem:[#allocation3 + $0x34] sm:$0xf] }
 0x332   : > { %v9483_v22 = vshll.u32 %v9420_v50, 16  ;;  %v11420_v27 = vsel %vm8951_vm4, %v19629_v17, 0  ;;  %v12677_v4 = vsel %vm8951_vm4, %v19634_v1, 0  ;;  %v9470_v21 = vor.u32 %v9469_v29, %v9466_v7  ;;  %v9426_v7 = vld [vmem:[#allocation3 + $0x38] sm:$0x1] }
 0x333   : > { %14936 = vmatprep.mubr.msk.bf16.mxu1 %vm1648_vm0, %v14048_v18  ;;  %v9488_v14 = vshrl.u32 %v9421_v53, 16  ;;  %v9491_v11 = vshll.u32 %v9421_v53, 16  ;;  %v9497_v40 = vshll.u32 %v9422_v10, 16  ;;  %v9479_v30 = vrot.slane %v9477_v59, 4 }
 0x334   : > { %v9485_v37 = vrot.slane %v9483_v22, 5  ;;  %v9501_v36 = vshrl.u32 %v9422_v10, 16  ;;  %v9507_v6 = vshll.u32 %v9423_v38, 16  ;;  %v9471_v17 = vrot.slane %v9470_v21, 4  ;;  %v9427_v10 = vld [vmem:[#allocation3 + $0x3c] sm:$0xf] }
 0x335   : > { %15009 = vmatmul.mubr.msk.bf16.vlgmr.msra.gmra.mrb[108].mxu0 %vm1648_vm0, %v14134_v32  ;;  %v9490_v1 = vrot.slane %v9488_v14, 4  ;;  %v9493_v31 = vrot.slane %v9491_v11, 5  ;;  %v9499_v35 = vrot.slane %v9497_v40, 5  ;;  %v9480_v15 = vor.u32 %v9479_v30, %v9475_v24  ;;  %v19764_v21 = vld [vmem:[%s20583_s3 + $0x20] sm:$0xf] }
 0x336   : > { %15012 = vmatprep.mubr.msk.bf16.mxu0 %vm1648_vm0, %v14135_v63  ;;  %15097 = vmatpush3.bf16.msra.mxu0 %v12677_v4  ;;  %v9503_v42 = vrot.slane %v9501_v36, 4  ;;  %v9509_v13 = vrot.slane %v9507_v6, 5  ;;  %v14127_v9 = vrot.slane %v10844_v62, 9  ;;  %v9476_v48 = vsel %vm19188_vm6, %v9471_v17, %v9475_v24  ;;  %v9428_v24 = vld [vmem:[#allocation3 + $0x40] sm:$0xf] }
 0x337   : > { %v9494_v45 = vor.u32 %v9493_v31, %v9490_v1  ;;  %v10896_v56 = vrot.slane %v19607_v61, 5  ;;  %v10899_v34 = vrot.slane %v19616_v46, 5  ;;  %15385 = vmatprep.subr.msk.bf16.mxu0 %vm8951_vm4, %v19734_v16  ;;  %v9481_v58 = vrot.slane %v9480_v15, 4  ;;  %v9429_v62 = vld [vmem:[#allocation3 + $0x44] sm:$0x1] }
 0x338   : > { %v9504_v41 = vor.u32 %v9503_v42, %v9499_v35  ;;  %v14128_v39 = vrot.slane %v10845_v57, 9  ;;  %v10903_v47 = vrot.slane %v19620_v20, 5  ;;  %v10906_v50 = vrot.slane %v19624_v49, 5  ;;  %v10846_v1 = vld [vmem:[#allocation3 + $0x48] sm:$0xe] }
 0x339   : > { %v9495_v23 = vrot.slane %v9494_v45, 4  ;;  %v10897_v3 = vsel %vm19062_vm13, %v14127_v9, %v10896_v56  ;;  %v10898_v2 = vrot.slane %v10896_v56, 4  ;;  %v9486_v61 = vsel %vm19188_vm6, %v9481_v58, %v9485_v37  ;;  %v10847_v58 = vld [vmem:[#allocation3 + $0x54] sm:$0xe] }
 0x33a   : > { %v9505_v46 = vrot.slane %v9504_v41, 4  ;;  %v10904_v19 = vsel %vm19062_vm13, %v14128_v39, %v10903_v47  ;;  %v10905_v0 = vrot.slane %v10903_v47, 4  ;;  %v14049_v32 = vcombine.low %v9476_v48, %v9486_v61 }
 0x33b   : > { %v9500_v20 = vsel %vm19188_vm6, %v9495_v23, %v9499_v35  ;;  %v10900_v51 = vsel %vm19062_vm13, %v10898_v2, %v10899_v34  ;;  %v9512_v53 = vshrl.u32 %v9424_v44, 16  ;;  %v9515_v29 = vshll.u32 %v9424_v44, 16  ;;  %v9430_v23 = vld [vmem:[#allocation3 + $0x48] sm:$0xf] }
 0x33c   : > { %v9510_v49 = vsel %vm19188_vm6, %v9505_v46, %v9509_v13  ;;  %v14136_v18 = vcombine.low %v10897_v3, %v10900_v51  ;;  %v10907_v63 = vsel %vm19062_vm13, %v10905_v0, %v10906_v50  ;;  %14937 = vmatmul.mubr.msk.bf16.vlgmr.msra.gmra.mrb[108].mxu1 %vm1648_vm0, %v14049_v32  ;;  %v9521_v4 = vshll.u32 %v9425_v12, 16  ;;  %v9432_v51 = vld [vmem:[#allocation3 + $0x50] sm:$0x1] }
 0x33d   : > { %v14050_v38 = vcombine.low %v9500_v20, %v9510_v49  ;;  %v14137_v59 = vcombine.low %v10904_v19, %v10907_v63  ;;  %v9514_v22 = vrot.slane %v9512_v53, 4  ;;  %15025 = vmatpush3.bf16.msra.mxu1 %v11420_v27  ;;  %v9517_v14 = vrot.slane %v9515_v29, 5  ;;  %v9431_v20 = vld [vmem:[#allocation3 + $0x4c] sm:$0xf]  ;;  %v9434_v63 = vld [vmem:[#allocation3 + $0x58] sm:$0xf] }
 0x33e   : > { %15013 = vmatmul.mubr.msk.bf16.gmra.mrb[112].mxu0 %vm1648_vm0, %v14136_v18  ;;  %v9525_v11 = vshrl.u32 %v9425_v12, 16  ;;  %v9531_v40 = vshll.u32 %v9426_v7, 16  ;;  %v9536_v30 = vshrl.u32 %v9427_v10, 16  ;;  %v9523_v37 = vrot.slane %v9521_v4, 5  ;;  %15381 = vmatprep.subr.msk.bf16.mxu1 %vm8951_vm4, %v19764_v21 }
 0x33f   : > { %14940 = vmatprep.mubr.msk.bf16.mxu1 %vm1648_vm0, %v14050_v38  ;;  %15016 = vmatprep.mubr.msk.bf16.mxu0 %vm1648_vm0, %v14137_v59  ;;  %v9539_v36 = vshll.u32 %v9427_v10, 16  ;;  %v9545_v6 = vshll.u32 %v9428_v24, 16  ;;  %v9549_v17 = vshrl.u32 %v9428_v24, 16  ;;  %v9518_v31 = vor.u32 %v9517_v14, %v9514_v22 }
 0x340   : > { %v9527_v35 = vrot.slane %v9525_v11, 4  ;;  %v9533_v57 = vrot.slane %v9531_v40, 5  ;;  %v9538_v27 = vrot.slane %v9536_v30, 4  ;;  %v9555_v9 = vshll.u32 %v9429_v62, 16  ;;  %v9435_v40 = vld [vmem:[#allocation3 + $0x5c] sm:$0x1] }
 0x341   : > { %v9541_v15 = vrot.slane %v9539_v36, 5  ;;  %v9547_v42 = vrot.slane %v9545_v6, 5  ;;  %v9551_v13 = vrot.slane %v9549_v17, 4  ;;  %v9519_v48 = vrot.slane %v9518_v31, 4  ;;  %v10848_v31 = vld [vmem:[#allocation3 + $0x60] sm:$0xe] }
 0x342   : > { %v9528_v45 = vor.u32 %v9527_v35, %v9523_v37  ;;  %v14129_v56 = vrot.slane %v10846_v1, 9  ;;  %v10910_v34 = vrot.slane %v19645_v26, 5  ;;  %v9557_v47 = vrot.slane %v9555_v9, 5 }
 0x343   : > { %v9542_v41 = vor.u32 %v9541_v15, %v9538_v27  ;;  %v9552_v39 = vor.u32 %v9551_v13, %v9547_v42  ;;  %v10913_v44 = vrot.slane %v19649_v5, 5  ;;  %v9524_v3 = vsel %vm19188_vm6, %v9519_v48, %v9523_v37 }
 0x344   : > { %v9529_v2 = vrot.slane %v9528_v45, 4  ;;  %v10911_v50 = vsel %vm19062_vm13, %v14129_v56, %v10910_v34  ;;  %v10912_v61 = vrot.slane %v10910_v34, 4  ;;  %v14130_v0 = vrot.slane %v10847_v58, 9  ;;  %v12538_v45 = vld [vmem:[#allocation3 + $0xc] sm:$0xe] }
 0x345   : > { %v9543_v46 = vrot.slane %v9542_v41, 4  ;;  %v9553_v19 = vrot.slane %v9552_v39, 4  ;;  %v10917_v26 = vrot.slane %v19656_v55, 5  ;;  %v10920_v32 = vrot.slane %v19669_v60, 5  ;;  %v9433_v55 = vld [vmem:[#allocation3 + $0x54] sm:$0xf] }
 0x346   : > { %v9534_v12 = vsel %vm19188_vm6, %v9529_v2, %v9533_v57  ;;  %v10914_v5 = vsel %vm19062_vm13, %v10912_v61, %v10913_v44  ;;  %v9560_v7 = vshrl.u32 %v9430_v23, 16  ;;  %v9563_v60 = vshll.u32 %v9430_v23, 16  ;;  %v19797_v39 = vld [vmem:[#allocation3 + $0x10] sm:$0xf]  ;;  %v19799_v2 = vld [vmem:[#allocation3 + $0x14] sm:$0x1] }
 0x347   : > { %v14051_v53 = vcombine.low %v9524_v3, %v9534_v12  ;;  %v9548_v10 = vsel %vm19188_vm6, %v9543_v46, %v9547_v42  ;;  %v9558_v49 = vsel %vm19188_vm6, %v9553_v19, %v9557_v47  ;;  %v14138_v18 = vcombine.low %v10911_v50, %v10914_v5  ;;  %v9436_v12 = vld [vmem:[#allocation3 + $0x60] sm:$0xf]  ;;  %v9437_v5 = vld [vmem:[#allocation3 + $0x64] sm:$0xf] }
 0x348   : > { %v14052_v29 = vcombine.low %v9548_v10, %v9558_v49  ;;  %v10918_v24 = vsel %vm19062_vm13, %v14130_v0, %v10917_v26  ;;  %v10919_v38 = vrot.slane %v10917_v26, 4  ;;  %v9562_v59 = vrot.slane %v9560_v7, 4  ;;  %v19813_v10 = vld [vmem:[#allocation3 + $0xc] sm:$0xf] }
 0x349   : > { %14941 = vmatmul.mubr.msk.bf16.gmra.mrb[112].mxu1 %vm1648_vm0, %v14051_v53  ;;  %15017 = vmatmul.mubr.msk.bf16.gmra.mrb[116].mxu0 %vm1648_vm0, %v14138_v18  ;;  %v9569_v22 = vshll.u32 %v9431_v20, 16  ;;  %v9573_v4 = vshrl.u32 %v9431_v20, 16  ;;  %v9579_v14 = vshll.u32 %v9432_v51, 16  ;;  %v9584_v62 = vshrl.u32 %v9433_v55, 16  ;;  %v9438_v53 = vld [vmem:[#allocation3 + $0x68] sm:$0x1] }
 0x34a   : > { %14944 = vmatprep.mubr.msk.bf16.mxu1 %vm1648_vm0, %v14052_v29  ;;  %v10921_v11 = vsel %vm19062_vm13, %v10919_v38, %v10920_v32  ;;  %v9587_v30 = vshll.u32 %v9433_v55, 16  ;;  %v9593_v37 = vshll.u32 %v9434_v63, 16  ;;  %v9565_v6 = vrot.slane %v9563_v60, 5 }
 0x34b   : > { %v14139_v36 = vcombine.low %v10918_v24, %v10921_v11  ;;  %v9571_v17 = vrot.slane %v9569_v22, 5  ;;  %v9575_v1 = vrot.slane %v9573_v4, 4  ;;  %v9581_v35 = vrot.slane %v9579_v14, 5  ;;  %v19823_v14 = vld [vmem:[#allocation3 + $0x10] sm:$0xf] }
 0x34c   : > { %v9586_v57 = vrot.slane %v9584_v62, 4  ;;  %v9589_v27 = vrot.slane %v9587_v30, 5  ;;  %v9595_v15 = vrot.slane %v9593_v37, 5  ;;  %v9566_v42 = vor.u32 %v9565_v6, %v9562_v59  ;;  %v11169_v11 = vld [vmem:[#allocation3 + $0x14] sm:$0x1] }
 0x34d   : > { %15020 = vmatprep.mubr.msk.bf16.mxu0 %vm1648_vm0, %v14139_v36  ;;  %v9576_v13 = vor.u32 %v9575_v1, %v9571_v17  ;;  %v9597_v9 = vshrl.u32 %v9434_v63, 16  ;;  %v9603_v48 = vshll.u32 %v9435_v40, 16  ;;  %v14131_v34 = vrot.slane %v10848_v31, 9  ;;  %v19826_v6 = vld [vmem:[#allocation3 + $0x1c] sm:$0xf] }
 0x34e   : > { %v9590_v56 = vor.u32 %v9589_v27, %v9586_v57  ;;  %v10924_v58 = vrot.slane %v19676_v54, 5  ;;  %v10927_v41 = vrot.slane %v19682_v52, 5  ;;  %v9567_v47 = vrot.slane %v9566_v42, 4  ;;  %v19828_v27 = vld [vmem:[#allocation3 + $0x20] sm:$0x1] }
 0x34f   : > { %v9577_v44 = vrot.slane %v9576_v13, 4  ;;  %v9599_v23 = vrot.slane %v9597_v9, 4  ;;  %v9605_v3 = vrot.slane %v9603_v48, 5  ;;  %v14252_v19 = vrot.slane %v12538_v45, 9  ;;  %v19835_v48 = vld [vmem:[#allocation3 + $0x28] sm:$0xf] }
 0x350   : > { %v9591_v50 = vrot.slane %v9590_v56, 4  ;;  %v10925_v61 = vsel %vm19062_vm13, %v14131_v34, %v10924_v58  ;;  %v10926_v46 = vrot.slane %v10924_v58, 4  ;;  %v9572_v0 = vsel %vm19188_vm6, %v9567_v47, %v9571_v17  ;;  %v12539_v17 = vld [vmem:[#allocation3 + $0x18] sm:$0xe] }
 0x351   : > { %v9582_v54 = vsel %vm19188_vm6, %v9577_v44, %v9581_v35  ;;  %v9600_v52 = vor.u32 %v9599_v23, %v9595_v15  ;;  %v12572_v26 = vrot.slane %v19797_v39, 5  ;;  %v12575_v7 = vrot.slane %v19799_v2, 5 }
 0x352   : > { %v14053_v32 = vcombine.low %v9572_v0, %v9582_v54  ;;  %v9596_v20 = vsel %vm19188_vm6, %v9591_v50, %v9595_v15  ;;  %v10928_v51 = vsel %vm19062_vm13, %v10926_v46, %v10927_v41  ;;  %v9608_v29 = vshrl.u32 %v9436_v12, 16  ;;  %v19838_v41 = vld [vmem:[#allocation3 + $0x2c] sm:$0x1]  ;;  %v12540_v50 = vld [vmem:[#allocation3 + $0x24] sm:$0xe] }
 0x353   : > { %v9601_v49 = vrot.slane %v9600_v52, 4  ;;  %v14140_v18 = vcombine.low %v10925_v61, %v10928_v51  ;;  %v12573_v55 = vsel %vm19062_vm13, %v14252_v19, %v12572_v26  ;;  %v12574_v63 = vrot.slane %v12572_v26, 4 }
 0x354   : > { %14945 = vmatmul.mubr.msk.bf16.gmra.mrb[116].mxu1 %vm1648_vm0, %v14053_v32  ;;  %v9611_v24 = vshll.u32 %v9436_v12, 16  ;;  %v9617_v38 = vshll.u32 %v9437_v5, 16  ;;  %v9621_v59 = vshrl.u32 %v9437_v5, 16  ;;  %v9627_v4 = vshll.u32 %v9438_v53, 16  ;;  %v19845_v5 = vld [vmem:[#allocation3 + $0x18] sm:$0xf] }
 0x355   : > { %v9606_v60 = vsel %vm19188_vm6, %v9601_v49, %v9605_v3  ;;  %15021 = vmatmul.mubr.msk.bf16.gmra.mrb[120].mxu0 %vm1648_vm0, %v14140_v18  ;;  %v12576_v22 = vsel %vm19062_vm13, %v12574_v63, %v12575_v7  ;;  %v11178_v40 = vshrl.u32 %v19813_v10, 16  ;;  %v9610_v37 = vrot.slane %v9608_v29, 4  ;;  %v19851_v53 = vld [vmem:[#allocation3 + $0x1c] sm:$0xf] }
 0x356   : > { %v14054_v62 = vcombine.low %v9596_v20, %v9606_v60  ;;  %v14261_v30 = vcombine.low %v12573_v55, %v12576_v22  ;;  %v9613_v36 = vrot.slane %v9611_v24, 5  ;;  %v9619_v1 = vrot.slane %v9617_v38, 5 }
 0x357   : > { %v9623_v31 = vrot.slane %v9621_v59, 4  ;;  %v9629_v35 = vrot.slane %v9627_v4, 5  ;;  %v11180_v57 = vrot.slane %v11178_v40, 4  ;;  %v11181_v42 = vshll.u32 %v19813_v10, 16  ;;  %v11170_v59 = vld [vmem:[#allocation3 + $0x20] sm:$0x1] }
 0x358   : > { %14948 = vmatprep.mubr.msk.bf16.mxu1 %vm1648_vm0, %v14054_v62  ;;  %15098 = vmatprep.mubr.msk.bf16.mxu0 %vm1648_vm0, %v14261_v30  ;;  %v9614_v15 = vor.u32 %v9613_v36, %v9610_v37  ;;  %v11187_v13 = vshll.u32 %v19823_v14, 16  ;;  %v11191_v9 = vshrl.u32 %v19823_v14, 16  ;;  %v11197_v56 = vshll.u32 %v11169_v11, 16  ;;  %v19865_v62 = vld [vmem:[#allocation3 + $0x24] sm:$0xf] }
 0x359   : > { %v9624_v45 = vor.u32 %v9623_v31, %v9619_v1  ;;  %v14253_v34 = vrot.slane %v12539_v17, 9  ;;  %v12579_v58 = vrot.slane %v19826_v6, 5  ;;  %v11183_v44 = vrot.slane %v11181_v42, 5  ;;  %v11171_v31 = vld [vmem:[#allocation3 + $0x2c] sm:$0x1] }
 0x35a   : > { %v9615_v47 = vrot.slane %v9614_v15, 4  ;;  %v11189_v23 = vrot.slane %v11187_v13, 5  ;;  %v11193_v3 = vrot.slane %v11191_v9, 4  ;;  %v11199_v46 = vrot.slane %v11197_v56, 5  ;;  %v19873_v13 = vld [vmem:[#allocation3 + $0x34] sm:$0xf] }
 0x35b   : > { %v9625_v61 = vrot.slane %v9624_v45, 4  ;;  %v12580_v19 = vsel %vm19062_vm13, %v14253_v34, %v12579_v58  ;;  %v12581_v0 = vrot.slane %v12579_v58, 4  ;;  %v11184_v52 = vor.u32 %v11183_v44, %v11180_v57  ;;  %v19878_v9 = vld [vmem:[%s20583_s3 + $0x38] sm:$0xf] }
 0x35c   : > { %v9620_v54 = vsel %vm19188_vm6, %v9615_v47, %v9619_v1  ;;  %v11194_v26 = vor.u32 %v11193_v3, %v11189_v23  ;;  %v12582_v12 = vrot.slane %v19828_v27, 5  ;;  %v14254_v20 = vrot.slane %v12540_v50, 9  ;;  %v19871_v1 = vld [vmem:[#allocation3 + $0x28] sm:$0xf]  ;;  %v12541_v47 = vld [vmem:[#allocation3 + $0x30] sm:$0xe] }
 0x35d   : > { %v9630_v32 = vsel %vm19188_vm6, %v9625_v61, %v9629_v35  ;;  %v12586_v51 = vrot.slane %v19835_v48, 5  ;;  %v12589_v7 = vrot.slane %v19838_v41, 5  ;;  %v11185_v18 = vrot.slane %v11184_v52, 4  ;;  %v19889_v61 = vld [vmem:[#allocation3 + $0x38] sm:$0x1] }
 0x35e   : > { %v14055_v49 = vcombine.low %v9620_v54, %v9630_v32  ;;  %v11195_v55 = vrot.slane %v11194_v26, 4  ;;  %v12583_v63 = vsel %vm19062_vm13, %v12581_v0, %v12582_v12  ;;  %v11202_v60 = vshrl.u32 %v19845_v5, 16  ;;  %v19894_v32 = vld [vmem:[#allocation3 + $0x40] sm:$0xf] }
 0x35f   : > { %v14262_v29 = vcombine.low %v12580_v19, %v12583_v63  ;;  %v12587_v24 = vsel %vm19062_vm13, %v14254_v20, %v12586_v51  ;;  %v12588_v38 = vrot.slane %v12586_v51, 4  ;;  %v11190_v22 = vsel %vm19188_vm6, %v11185_v18, %v11189_v23  ;;  %v19897_v18 = vld [vmem:[#allocation3 + $0x44] sm:$0x1] }
 0x360   : > { %14949 = vmatmul.mubr.msk.bf16.gmra.mrb[120].mxu1 %vm1648_vm0, %v14055_v49  ;;  %v11200_v4 = vsel %vm19188_vm6, %v11195_v55, %v11199_v46  ;;  %v11205_v11 = vshll.u32 %v19845_v5, 16  ;;  %v11211_v40 = vshll.u32 %v19851_v53, 16  ;;  %v11204_v36 = vrot.slane %v11202_v60, 4 }
 0x361   : > { %v14168_v30 = vcombine.low %v11190_v22, %v11200_v4  ;;  %15099 = vmatmul.mubr.msk.bf16.vlgmr.msra.gmra.mrb[124].mxu0 %vm1648_vm0, %v14262_v29  ;;  %v12590_v37 = vsel %vm19062_vm13, %v12588_v38, %v12589_v7  ;;  %v11215_v17 = vshrl.u32 %v19851_v53, 16  ;;  %v11221_v42 = vshll.u32 %v11170_v59, 16  ;;  %v19902_v38 = vld [vmem:[#allocation3 + $0x30] sm:$0xf] }
 0x362   : > { %v14263_v35 = vcombine.low %v12587_v24, %v12590_v37  ;;  %v11207_v57 = vrot.slane %v11205_v11, 5  ;;  %v11213_v15 = vrot.slane %v11211_v40, 5  ;;  %v11584_v56 = vsel %vm8951_vm4, %v19764_v21, 0  ;;  %v19908_v11 = vld [vmem:[#allocation3 + $0x34] sm:$0xf] }
 0x363   : > { %15026 = vmatprep.mubr.msk.bf16.mxu1 %vm1648_vm0, %v14168_v30  ;;  %v11217_v45 = vrot.slane %v11215_v17, 4  ;;  %v12825_v34 = vsel %vm8951_vm4, %v19734_v16, 0  ;;  %v11226_v58 = vshrl.u32 %v19865_v62, 16  ;;  %v11223_v23 = vrot.slane %v11221_v42, 5  ;;  %v12542_v16 = vld [vmem:[#allocation3 + $0x3c] sm:$0xe] }
 0x364   : > { %15102 = vmatprep.mubr.msk.bf16.mxu0 %vm1648_vm0, %v14263_v35  ;;  %v11208_v44 = vor.u32 %v11207_v57, %v11204_v36  ;;  %15115 = vmatpush3.bf16.msra.mxu0 %v12825_v34  ;;  %v11229_v3 = vshll.u32 %v19865_v62, 16  ;;  %v11235_v50 = vshll.u32 %v19871_v1, 16  ;;  %v11239_v21 = vshrl.u32 %v19871_v1, 16  ;;  %v11172_v17 = vld [vmem:[#allocation3 + $0x38] sm:$0x1] }
 0x365   : > { %v11218_v46 = vor.u32 %v11217_v45, %v11213_v15  ;;  %v11228_v19 = vrot.slane %v11226_v58, 4  ;;  %v11245_v0 = vshll.u32 %v11171_v31, 16  ;;  %15386 = vmatprep.subr.msk.bf16.mxu0 %vm8951_vm4, %v19878_v9  ;;  %v14255_v12 = vrot.slane %v12541_v47, 9  ;;  %v19919_v42 = vld [vmem:[%s20583_s3 + $0x28] sm:$0xf] }
 0x366   : > { %v11209_v54 = vrot.slane %v11208_v44, 4  ;;  %v11231_v52 = vrot.slane %v11229_v3, 5  ;;  %v11237_v26 = vrot.slane %v11235_v50, 5  ;;  %v11241_v51 = vrot.slane %v11239_v21, 4  ;;  %v19926_v44 = vld [vmem:[#allocation3 + $0x3c] sm:$0xf] }
 0x367   : > { %v11219_v20 = vrot.slane %v11218_v46, 4  ;;  %v11247_v7 = vrot.slane %v11245_v0, 5  ;;  %v12593_v49 = vrot.slane %v19873_v13, 5  ;;  %v12596_v29 = vrot.slane %v19889_v61, 5 }
 0x368   : > { %v11214_v55 = vsel %vm19188_vm6, %v11209_v54, %v11213_v15  ;;  %v11232_v63 = vor.u32 %v11231_v52, %v11228_v19  ;;  %v14256_v24 = vrot.slane %v12542_v16, 9  ;;  %v11242_v60 = vor.u32 %v11241_v51, %v11237_v26  ;;  %v19931_v19 = vld [vmem:[#allocation3 + $0x40] sm:$0xf]  ;;  %v11173_v52 = vld [vmem:[#allocation3 + $0x44] sm:$0x1] }
 0x369   : > { %v11224_v59 = vsel %vm19188_vm6, %v11219_v20, %v11223_v23  ;;  %v12594_v22 = vsel %vm19062_vm13, %v14255_v12, %v12593_v49  ;;  %v12595_v4 = vrot.slane %v12593_v49, 4  ;;  %v12600_v37 = vrot.slane %v19894_v32, 5  ;;  %v12543_v49 = vld [vmem:[#allocation3 + $0x48] sm:$0xe] }
 0x36a   : > { %v14169_v40 = vcombine.low %v11214_v55, %v11224_v59  ;;  %v11233_v30 = vrot.slane %v11232_v63, 4  ;;  %v12603_v36 = vrot.slane %v19897_v18, 5  ;;  %v11243_v31 = vrot.slane %v11242_v60, 4  ;;  %v19947_v59 = vld [vmem:[#allocation3 + $0x58] sm:$0xf] }
 0x36b   : > { %v12597_v35 = vsel %vm19062_vm13, %v12595_v4, %v12596_v29  ;;  %v11250_v57 = vshrl.u32 %v19902_v38, 16  ;;  %v11253_v15 = vshll.u32 %v19902_v38, 16  ;;  %v12601_v58 = vsel %vm19062_vm13, %v14256_v24, %v12600_v37 }
 0x36c   : > { %15027 = vmatmul.mubr.msk.bf16.vlgmr.msra.gmra.mrb[124].mxu1 %vm1648_vm0, %v14169_v40  ;;  %v11238_v45 = vsel %vm19188_vm6, %v11233_v30, %v11237_v26  ;;  %v14264_v34 = vcombine.low %v12594_v22, %v12597_v35  ;;  %v12602_v47 = vrot.slane %v12600_v37, 4  ;;  %v11248_v23 = vsel %vm19188_vm6, %v11243_v31, %v11247_v7  ;;  %v19942_v7 = vld [vmem:[#allocation3 + $0x50] sm:$0x1]  ;;  %v12544_v30 = vld [vmem:[#allocation3 + $0x54] sm:$0xe] }
 0x36d   : > { %15043 = vmatpush3.bf16.msra.mxu1 %v11584_v56  ;;  %v11252_v3 = vrot.slane %v11250_v57, 4  ;;  %v11255_v50 = vrot.slane %v11253_v15, 5  ;;  %v11259_v46 = vshll.u32 %v19908_v11, 16  ;;  %v14170_v21 = vcombine.low %v11238_v45, %v11248_v23  ;;  %v19937_v56 = vld [vmem:[#allocation3 + $0x4c] sm:$0xf] }
 0x36e   : > { %15103 = vmatmul.mubr.msk.bf16.gmra.mrb[128].mxu0 %vm1648_vm0, %v14264_v34  ;;  %v12604_v0 = vsel %vm19062_vm13, %v12602_v47, %v12603_v36  ;;  %v11263_v16 = vshrl.u32 %v19908_v11, 16  ;;  %v11269_v54 = vshll.u32 %v11172_v17, 16  ;;  %15382 = vmatprep.subr.msk.bf16.mxu1 %vm8951_vm4, %v19919_v42  ;;  %v11274_v51 = vshrl.u32 %v19926_v44, 16  ;;  %v19951_v35 = vld [vmem:[#allocation3 + $0x5c] sm:$0x1] }
 0x36f   : > { %v14265_v26 = vcombine.low %v12601_v58, %v12604_v0  ;;  %v11256_v12 = vor.u32 %v11255_v50, %v11252_v3  ;;  %v11261_v20 = vrot.slane %v11259_v46, 5  ;;  %15030 = vmatprep.mubr.msk.bf16.mxu1 %vm1648_vm0, %v14170_v21  ;;  %v11277_v29 = vshll.u32 %v19926_v44, 16  ;;  %v19956_v58 = vld [vmem:[#allocation3 + $0x48] sm:$0xf] }
 0x370   : > { %v11265_v55 = vrot.slane %v11263_v16, 4  ;;  %v11271_v63 = vrot.slane %v11269_v54, 5  ;;  %v11283_v24 = vshll.u32 %v19931_v19, 16  ;;  %v11276_v22 = vrot.slane %v11274_v51, 4 }
 0x371   : > { %15106 = vmatprep.mubr.msk.bf16.mxu0 %vm1648_vm0, %v14265_v26  ;;  %v11257_v60 = vrot.slane %v11256_v12, 4  ;;  %v11287_v4 = vshrl.u32 %v19931_v19, 16  ;;  %v11293_v40 = vshll.u32 %v11173_v52, 16  ;;  %v11279_v36 = vrot.slane %v11277_v29, 5  ;;  %v19965_v12 = vld [vmem:[#allocation3 + $0x4c] sm:$0xf] }
 0x372   : > { %v11266_v37 = vor.u32 %v11265_v55, %v11261_v20  ;;  %v11285_v17 = vrot.slane %v11283_v24, 5  ;;  %v14257_v31 = vrot.slane %v12543_v49, 9  ;;  %v12607_v34 = vrot.slane %v19937_v56, 5  ;;  %v11174_v24 = vld [vmem:[#allocation3 + $0x50] sm:$0x1] }
 0x373   : > { %v11262_v57 = vsel %vm19188_vm6, %v11257_v60, %v11261_v20  ;;  %v11289_v15 = vrot.slane %v11287_v4, 4  ;;  %v11295_v45 = vrot.slane %v11293_v40, 5  ;;  %v11280_v23 = vor.u32 %v11279_v36, %v11276_v22  ;;  %v19972_v60 = vld [vmem:[#allocation3 + $0x54] sm:$0xf] }
 0x374   : > { %v11267_v47 = vrot.slane %v11266_v37, 4  ;;  %v12610_v3 = vrot.slane %v19942_v7, 5  ;;  %v14258_v50 = vrot.slane %v12544_v30, 9  ;;  %v12608_v21 = vsel %vm19062_vm13, %v14257_v31, %v12607_v34 }
 0x375   : > { %v11290_v46 = vor.u32 %v11289_v15, %v11285_v17  ;;  %v12609_v0 = vrot.slane %v12607_v34, 4  ;;  %v12614_v16 = vrot.slane %v19947_v59, 5  ;;  %v11281_v52 = vrot.slane %v11280_v23, 4 }
 0x376   : > { %v11272_v54 = vsel %vm19188_vm6, %v11267_v47, %v11271_v63  ;;  %v12617_v26 = vrot.slane %v19951_v35, 5  ;;  %v11298_v20 = vshrl.u32 %v19956_v58, 16  ;;  %v11301_v37 = vshll.u32 %v19956_v58, 16  ;;  %v11175_v47 = vld [vmem:[#allocation3 + $0x5c] sm:$0x1] }
 0x377   : > { %v14171_v51 = vcombine.low %v11262_v57, %v11272_v54  ;;  %v11291_v49 = vrot.slane %v11290_v46, 4  ;;  %v12611_v55 = vsel %vm19062_vm13, %v12609_v0, %v12610_v3  ;;  %v12615_v29 = vsel %vm19062_vm13, %v14258_v50, %v12614_v16  ;;  %v19982_v57 = vld [vmem:[#allocation3 + $0x58] sm:$0xf]  ;;  %v19988_v3 = vld [vmem:[#allocation3 + $0x64] sm:$0xf] }
 0x378   : > { %v11286_v63 = vsel %vm19188_vm6, %v11281_v52, %v11285_v17  ;;  %v14266_v22 = vcombine.low %v12608_v21, %v12611_v55  ;;  %v12616_v4 = vrot.slane %v12614_v16, 4  ;;  %v11300_v40 = vrot.slane %v11298_v20, 4  ;;  %v12545_v0 = vld [vmem:[#allocation3 + $0x60] sm:$0xe] }
 0x379   : > { %15031 = vmatmul.mubr.msk.bf16.gmra.mrb[128].mxu1 %vm1648_vm0, %v14171_v51  ;;  %v11296_v30 = vsel %vm19188_vm6, %v11291_v49, %v11295_v45  ;;  %v11307_v36 = vshll.u32 %v19965_v12, 16  ;;  %v11311_v31 = vshrl.u32 %v19965_v12, 16  ;;  %v11317_v34 = vshll.u32 %v11174_v24, 16 }
 0x37a   : > { %v14172_v15 = vcombine.low %v11286_v63, %v11296_v30  ;;  %15107 = vmatmul.mubr.msk.bf16.gmra.mrb[132].mxu0 %vm1648_vm0, %v14266_v22  ;;  %v12618_v17 = vsel %vm19062_vm13, %v12616_v4, %v12617_v26  ;;  %v11322_v23 = vshrl.u32 %v19972_v60, 16  ;;  %v11303_v50 = vrot.slane %v11301_v37, 5  ;;  %v12320_v30 = vld [vmem:[#allocation3 + $0xc] sm:$0xf] }
 0x37b   : > { %v14267_v45 = vcombine.low %v12615_v29, %v12618_v17  ;;  %v11309_v46 = vrot.slane %v11307_v36, 5  ;;  %v11313_v21 = vrot.slane %v11311_v31, 4  ;;  %v11319_v16 = vrot.slane %v11317_v34, 5  ;;  %v19995_v29 = vld [vmem:[#allocation3 + $0x68] sm:$0x1] }
 0x37c   : > { %15034 = vmatprep.mubr.msk.bf16.mxu1 %vm1648_vm0, %v14172_v15  ;;  %v11324_v54 = vrot.slane %v11322_v23, 4  ;;  %v11325_v52 = vshll.u32 %v19972_v60, 16  ;;  %v11331_v20 = vshll.u32 %v19982_v57, 16  ;;  %v11304_v26 = vor.u32 %v11303_v50, %v11300_v40 }
 0x37d   : > { %15110 = vmatprep.mubr.msk.bf16.mxu0 %vm1648_vm0, %v14267_v45  ;;  %v11314_v51 = vor.u32 %v11313_v21, %v11309_v46  ;;  %v11335_v49 = vshrl.u32 %v19982_v57, 16  ;;  %v11341_v55 = vshll.u32 %v11175_v47, 16  ;;  %v14259_v22 = vrot.slane %v12545_v0, 9 }
 0x37e   : > { %v11327_v24 = vrot.slane %v11325_v52, 5  ;;  %v11333_v63 = vrot.slane %v11331_v20, 5  ;;  %v12621_v4 = vrot.slane %v19988_v3, 5  ;;  %v11305_v37 = vrot.slane %v11304_v26, 4  ;;  %v20007_v26 = vld [vmem:[#allocation3 + $0x60] sm:$0xf] }
 0x37f   : > { %v11315_v36 = vrot.slane %v11314_v51, 4  ;;  %v11337_v31 = vrot.slane %v11335_v49, 4  ;;  %v11343_v15 = vrot.slane %v11341_v55, 5  ;;  %v12624_v23 = vrot.slane %v19995_v29, 5 }
 0x380   : > { %v11328_v17 = vor.u32 %v11327_v24, %v11324_v54  ;;  %v12622_v40 = vsel %vm19062_vm13, %v14259_v22, %v12621_v4  ;;  %v12623_v34 = vrot.slane %v12621_v4, 4  ;;  %v11310_v47 = vsel %vm19188_vm6, %v11305_v37, %v11309_v46  ;;  %v20015_v37 = vld [vmem:[#allocation3 + $0x64] sm:$0xf] }
 0x381   : > { %v11320_v45 = vsel %vm19188_vm6, %v11315_v36, %v11319_v16  ;;  %v11338_v50 = vor.u32 %v11337_v31, %v11333_v63  ;;  %v12345_v21 = vshrl.u32 %v12320_v30, 16  ;;  %v12348_v54 = vshll.u32 %v12320_v30, 16  ;;  %v11176_v31 = vld [vmem:[#allocation3 + $0x68] sm:$0x1] }
 0x382   : > { %v14173_v0 = vcombine.low %v11310_v47, %v11320_v45  ;;  %v11329_v52 = vrot.slane %v11328_v17, 4  ;;  %v12625_v20 = vsel %vm19062_vm13, %v12623_v34, %v12624_v23  ;;  %v12354_v24 = vshll.u32 %v19797_v39, 16 }
 0x383   : > { %v11339_v51 = vrot.slane %v11338_v50, 4  ;;  %v14268_v49 = vcombine.low %v12622_v40, %v12625_v20  ;;  %v12347_v55 = vrot.slane %v12345_v21, 4  ;;  %v12350_v16 = vrot.slane %v12348_v54, 5 }
 0x384   : > { %15035 = vmatmul.mubr.msk.bf16.gmra.mrb[132].mxu1 %vm1648_vm0, %v14173_v0  ;;  %v11334_v46 = vsel %vm19188_vm6, %v11329_v52, %v11333_v63  ;;  %v12358_v22 = vshrl.u32 %v19797_v39, 16  ;;  %v12364_v4 = vshll.u32 %v19799_v2, 16  ;;  %v12356_v36 = vrot.slane %v12354_v24, 5  ;;  %v12323_v39 = vld [vmem:[#allocation3 + $0x18] sm:$0xf] }
 0x385   : > { %v11344_v30 = vsel %vm19188_vm6, %v11339_v51, %v11343_v15  ;;  %15111 = vmatmul.mubr.msk.bf16.gmra.mrb[136].mxu0 %vm1648_vm0, %v14268_v49  ;;  %v11346_v17 = vshrl.u32 %v20007_v26, 16  ;;  %v11349_v40 = vshll.u32 %v20007_v26, 16  ;;  %v12351_v63 = vor.u32 %v12350_v16, %v12347_v55 }
 0x386   : > { %v14174_v34 = vcombine.low %v11334_v46, %v11344_v30  ;;  %v12360_v23 = vrot.slane %v12358_v22, 4  ;;  %v12366_v47 = vrot.slane %v12364_v4, 5  ;;  %v11355_v50 = vshll.u32 %v20015_v37, 16 }
 0x387   : > { %v11348_v45 = vrot.slane %v11346_v17, 4  ;;  %v11351_v2 = vrot.slane %v11349_v40, 5  ;;  %v11359_v21 = vshrl.u32 %v20015_v37, 16  ;;  %v12352_v15 = vrot.slane %v12351_v63, 4 }
 0x388   : > { %15038 = vmatprep.mubr.msk.bf16.mxu1 %vm1648_vm0, %v14174_v34  ;;  %v12361_v0 = vor.u32 %v12360_v23, %v12356_v36  ;;  %v11365_v52 = vshll.u32 %v11176_v31, 16  ;;  %v14184_v20 = vcombine.low %v19813_v10, %v19823_v14  ;;  %v11357_v51 = vrot.slane %v11355_v50, 5  ;;  %v12326_v34 = vld [vmem:[#allocation3 + $0x24] sm:$0xf] }
 0x389   : > { %v11352_v54 = vor.u32 %v11351_v2, %v11348_v45  ;;  %v11361_v49 = vrot.slane %v11359_v21, 4  ;;  %v12369_v55 = vshrl.u32 %v12323_v39, 16  ;;  %v12357_v24 = vsel %vm19188_vm6, %v12352_v15, %v12356_v36 }
 0x38a   : > { %v12362_v46 = vrot.slane %v12361_v0, 4  ;;  %v11367_v16 = vrot.slane %v11365_v52, 5  ;;  %v12372_v22 = vshll.u32 %v12323_v39, 16  ;;  %v12378_v40 = vshll.u32 %v19826_v6, 16 }
 0x38b   : > { %v11353_v4 = vrot.slane %v11352_v54, 4  ;;  %v11362_v30 = vor.u32 %v11361_v49, %v11357_v51  ;;  %v12371_v17 = vrot.slane %v12369_v55, 4  ;;  %v12382_v14 = vshrl.u32 %v19826_v6, 16 }
 0x38c   : > { %v12367_v31 = vsel %vm19188_vm6, %v12362_v46, %v12366_v47  ;;  %v12374_v10 = vrot.slane %v12372_v22, 5  ;;  %v12388_v63 = vshll.u32 %v19828_v27, 16  ;;  %v12380_v39 = vrot.slane %v12378_v40, 5 }
 0x38d   : > { %v14277_v23 = vcombine.low %v12357_v24, %v12367_v31  ;;  %v11358_v36 = vsel %vm19188_vm6, %v11353_v4, %v11357_v51  ;;  %v11363_v45 = vrot.slane %v11362_v30, 4  ;;  %v12384_v50 = vrot.slane %v12382_v14, 4  ;;  %v12329_v4 = vld [vmem:[#allocation3 + $0x30] sm:$0xf] }
 0x38e   : > { %v12375_v2 = vor.u32 %v12374_v10, %v12371_v17  ;;  %v12390_v21 = vrot.slane %v12388_v63, 5  ;;  %v12393_v15 = vshrl.u32 %v12326_v34, 16  ;;  %v12396_v0 = vshll.u32 %v12326_v34, 16 }
 0x38f   : > { %15116 = vmatprep.mubr.msk.bf16.mxu0 %vm1648_vm0, %v14277_v23  ;;  %v11368_v47 = vsel %vm19188_vm6, %v11363_v45, %v11367_v16  ;;  %v12402_v6 = vshll.u32 %v19835_v48, 16  ;;  %v12406_v27 = vshrl.u32 %v19835_v48, 16  ;;  %v12385_v49 = vor.u32 %v12384_v50, %v12380_v39  ;;  %v20062_v50 = vld [vmem:[%s20583_s3 + $0x3c] sm:$0xf] }
 0x390   : > { %v14175_v52 = vcombine.low %v11358_v36, %v11368_v47  ;;  %v12376_v54 = vrot.slane %v12375_v2, 4  ;;  %v12395_v51 = vrot.slane %v12393_v15, 4  ;;  %v12398_v55 = vrot.slane %v12396_v0, 5 }
 0x391   : > { %v12404_v24 = vrot.slane %v12402_v6, 5  ;;  %v12408_v46 = vrot.slane %v12406_v27, 4  ;;  %v12412_v22 = vshll.u32 %v19838_v41, 16  ;;  %v12386_v30 = vrot.slane %v12385_v49, 4  ;;  %v12335_v6 = vld [vmem:[#allocation3 + $0x48] sm:$0xf] }
 0x392   : > { %15039 = vmatmul.mubr.msk.bf16.gmra.mrb[136].mxu1 %vm1648_vm0, %v14175_v52  ;;  %v12381_v16 = vsel %vm19188_vm6, %v12376_v54, %v12380_v39  ;;  %v14185_v17 = vcombine.low %v19845_v5, %v19851_v53  ;;  %v11767_v48 = vsel %vm8951_vm4, %v19919_v42, 0  ;;  %v12399_v40 = vor.u32 %v12398_v55, %v12395_v51  ;;  %v12332_v5 = vld [vmem:[#allocation3 + $0x3c] sm:$0xf]  ;;  %v20074_v51 = vld [vmem:[%s20583_s3 + $0x2c] sm:$0xf] }
 0x393   : > { %15044 = vmatprep.mubr.msk.bf16.mxu1 %vm1648_vm0, %v14184_v20  ;;  %v12409_v34 = vor.u32 %v12408_v46, %v12404_v24  ;;  %v12414_v31 = vrot.slane %v12412_v22, 5  ;;  %v13191_v41 = vsel %vm8951_vm4, %v19878_v9, 0  ;;  %v12391_v10 = vsel %vm19188_vm6, %v12386_v30, %v12390_v21 }
 0x394   : > { %v14186_v14 = vcombine.low %v19865_v62, %v19871_v1  ;;  %v12417_v63 = vshrl.u32 %v12329_v4, 16  ;;  %v12420_v23 = vshll.u32 %v12329_v4, 16  ;;  %v14278_v53 = vcombine.low %v12381_v16, %v12391_v10 }
 0x395   : > { %v12400_v36 = vrot.slane %v12399_v40, 4  ;;  %v12410_v42 = vrot.slane %v12409_v34, 4  ;;  %v12426_v20 = vshll.u32 %v19873_v13, 16  ;;  %v12430_v2 = vshrl.u32 %v19873_v13, 16 }
 0x396   : > { %v12419_v45 = vrot.slane %v12417_v63, 4  ;;  %v12422_v39 = vrot.slane %v12420_v23, 5  ;;  %v12436_v9 = vshll.u32 %v19889_v61, 16  ;;  %15117 = vmatmul.mubr.msk.bf16.vlgmr.msra.gmra.mrb[124].mxu0 %vm1648_vm0, %v14278_v53  ;;  %v12441_v15 = vshrl.u32 %v12332_v5, 16 }
 0x397   : > { %v12405_v62 = vsel %vm19188_vm6, %v12400_v36, %v12404_v24  ;;  %v12415_v1 = vsel %vm19188_vm6, %v12410_v42, %v12414_v31  ;;  %v12428_v21 = vrot.slane %v12426_v20, 5  ;;  %15133 = vmatpush3.bf16.msra.mxu0 %v13191_v41  ;;  %v12432_v0 = vrot.slane %v12430_v2, 4  ;;  %v12338_v41 = vld [vmem:[#allocation3 + $0x54] sm:$0xf] }
 0x398   : > { %v14279_v47 = vcombine.low %v12405_v62, %v12415_v1  ;;  %v12423_v13 = vor.u32 %v12422_v39, %v12419_v45  ;;  %v12438_v61 = vrot.slane %v12436_v9, 5  ;;  %v12443_v27 = vrot.slane %v12441_v15, 4  ;;  %15387 = vmatprep.subr.msk.bf16.mxu0 %vm8951_vm4, %v20062_v50 }
 0x399   : > { %v12444_v52 = vshll.u32 %v12332_v5, 16  ;;  %v12450_v54 = vshll.u32 %v19894_v32, 16  ;;  %v12454_v49 = vshrl.u32 %v19894_v32, 16  ;;  %v12433_v24 = vor.u32 %v12432_v0, %v12428_v21 }
 0x39a   : > { %15120 = vmatprep.mubr.msk.bf16.mxu0 %vm1648_vm0, %v14279_v47  ;;  %15045 = vmatmul.mubr.msk.bf16.vlgmr.msra.gmra.mrb[124].mxu1 %vm1648_vm0, %v14185_v17  ;;  %v12424_v55 = vrot.slane %v12423_v13, 4  ;;  %v12460_v46 = vshll.u32 %v19897_v18, 16  ;;  %v14187_v22 = vcombine.low %v19902_v38, %v19908_v11  ;;  %v14188_v30 = vcombine.low %v19926_v44, %v19931_v19 }
 0x39b   : > { %15061 = vmatpush3.bf16.msra.mxu1 %v11767_v48  ;;  %15048 = vmatprep.mubr.msk.bf16.mxu1 %vm1648_vm0, %v14186_v14  ;;  %v12446_v32 = vrot.slane %v12444_v52, 5  ;;  %v12452_v4 = vrot.slane %v12450_v54, 5  ;;  %v12456_v16 = vrot.slane %v12454_v49, 4  ;;  %v12434_v17 = vrot.slane %v12433_v24, 4 }
 0x39c   : > { %v12429_v40 = vsel %vm19188_vm6, %v12424_v55, %v12428_v21  ;;  %v12462_v34 = vrot.slane %v12460_v46, 5  ;;  %v12465_v31 = vshrl.u32 %v12335_v6, 16  ;;  %15383 = vmatprep.subr.msk.bf16.mxu1 %vm8951_vm4, %v20074_v51  ;;  %v12468_v11 = vshll.u32 %v12335_v6, 16 }
 0x39d   : > { %v12447_v18 = vor.u32 %v12446_v32, %v12443_v27  ;;  %v12457_v38 = vor.u32 %v12456_v16, %v12452_v4  ;;  %v12474_v48 = vshll.u32 %v19937_v56, 16  ;;  %v12439_v10 = vsel %vm19188_vm6, %v12434_v17, %v12438_v61  ;;  %v12341_v61 = vld [vmem:[#allocation3 + $0x60] sm:$0xf] }
 0x39e   : > { %v12467_v14 = vrot.slane %v12465_v31, 4  ;;  %v12478_v44 = vshrl.u32 %v19937_v56, 16  ;;  %v12484_v19 = vshll.u32 %v19942_v7, 16  ;;  %v14280_v63 = vcombine.low %v12429_v40, %v12439_v10 }
 0x39f   : > { %v12448_v23 = vrot.slane %v12447_v18, 4  ;;  %v12458_v5 = vrot.slane %v12457_v38, 4  ;;  %v12470_v53 = vrot.slane %v12468_v11, 5  ;;  %v12476_v36 = vrot.slane %v12474_v48, 5 }
 0x3a0   : > { %v12480_v42 = vrot.slane %v12478_v44, 4  ;;  %v12486_v20 = vrot.slane %v12484_v19, 5  ;;  %v12489_v45 = vshrl.u32 %v12338_v41, 16  ;;  %15121 = vmatmul.mubr.msk.bf16.gmra.mrb[128].mxu0 %vm1648_vm0, %v14280_v63  ;;  %v12492_v56 = vshll.u32 %v12338_v41, 16 }
 0x3a1   : > { %v12453_v39 = vsel %vm19188_vm6, %v12448_v23, %v12452_v4  ;;  %v12463_v2 = vsel %vm19188_vm6, %v12458_v5, %v12462_v34  ;;  %v12471_v9 = vor.u32 %v12470_v53, %v12467_v14  ;;  %v12498_v21 = vshll.u32 %v19947_v59, 16  ;;  %v12924_v4 = vld [vmem:[#allocation3 + $0x18] sm:$0xf]  ;;  %v12927_v23 = vld [vmem:[#allocation3 + $0x24] sm:$0xf] }
 0x3a2   : > { %v14281_v62 = vcombine.low %v12453_v39, %v12463_v2  ;;  %15049 = vmatmul.mubr.msk.bf16.gmra.mrb[128].mxu1 %vm1648_vm0, %v14187_v22  ;;  %v12481_v7 = vor.u32 %v12480_v42, %v12476_v36  ;;  %v12491_v1 = vrot.slane %v12489_v45, 4  ;;  %v12494_v47 = vrot.slane %v12492_v56, 5 }
 0x3a3   : > { %15052 = vmatprep.mubr.msk.bf16.mxu1 %vm1648_vm0, %v14188_v30  ;;  %v12472_v15 = vrot.slane %v12471_v9, 4  ;;  %v12502_v13 = vshrl.u32 %v19947_v59, 16  ;;  %v12508_v0 = vshll.u32 %v19951_v35, 16  ;;  %v12500_v27 = vrot.slane %v12498_v21, 5 }
 0x3a4   : > { %15124 = vmatprep.mubr.msk.bf16.mxu0 %vm1648_vm0, %v14281_v62  ;;  %v12482_v6 = vrot.slane %v12481_v7, 4  ;;  %v14189_v52 = vcombine.low %v19956_v58, %v19965_v12  ;;  %v14190_v54 = vcombine.low %v19972_v60, %v19982_v57  ;;  %v12495_v55 = vor.u32 %v12494_v47, %v12491_v1  ;;  %v20116_v60 = vld [vmem:[#allocation3 + $0x1c] sm:$0xf]  ;;  %v20138_v7 = vld [vmem:[#allocation3 + $0x2c] sm:$0x1] }
 0x3a5   : > { %v12477_v49 = vsel %vm19188_vm6, %v12472_v15, %v12476_v36  ;;  %v12504_v24 = vrot.slane %v12502_v13, 4  ;;  %v12510_v46 = vrot.slane %v12508_v0, 5  ;;  %v12513_v35 = vshrl.u32 %v12341_v61, 16 }
 0x3a6   : > { %v12487_v59 = vsel %vm19188_vm6, %v12482_v6, %v12486_v20  ;;  %v12516_v22 = vshll.u32 %v12341_v61, 16  ;;  %v12522_v32 = vshll.u32 %v19988_v3, 16  ;;  %v12496_v30 = vrot.slane %v12495_v55, 4  ;;  %v20130_v20 = vld [vmem:[#allocation3 + $0x28] sm:$0xf] }
 0x3a7   : > { %v14282_v16 = vcombine.low %v12477_v49, %v12487_v59  ;;  %v12505_v58 = vor.u32 %v12504_v24, %v12500_v27  ;;  %v12526_v12 = vshrl.u32 %v19988_v3, 16  ;;  %v12515_v57 = vrot.slane %v12513_v35, 4  ;;  %v20123_v3 = vld [vmem:[#allocation3 + $0x20] sm:$0x1]  ;;  %v12930_v61 = vld [vmem:[#allocation3 + $0x30] sm:$0xf] }
 0x3a8   : > { %v12518_v40 = vrot.slane %v12516_v22, 5  ;;  %v12524_v17 = vrot.slane %v12522_v32, 5  ;;  %v12532_v34 = vshll.u32 %v19995_v29, 16  ;;  %v12501_v31 = vsel %vm19188_vm6, %v12496_v30, %v12500_v27  ;;  %v15416_v49 = vld [vmem:[#allocation3 + $0x18] sm:$0xff]  }
 0x3a9   : > { %15125 = vmatmul.mubr.msk.bf16.gmra.mrb[132].mxu0 %vm1648_vm0, %v14282_v16  ;;  %v12506_v18 = vrot.slane %v12505_v58, 4  ;;  %v12528_v38 = vrot.slane %v12526_v12, 4  ;;  %v12949_v11 = vshrl.u32 %v12924_v4, 16  ;;  %v12952_v10 = vshll.u32 %v12924_v4, 16  ;;  %v20151_v22 = vld [vmem:[#allocation3 + $0x38] sm:$0x1] }
 0x3aa   : > { %15053 = vmatmul.mubr.msk.bf16.gmra.mrb[132].mxu1 %vm1648_vm0, %v14189_v52  ;;  %v12519_v48 = vor.u32 %v12518_v40, %v12515_v57  ;;  %v12534_v41 = vrot.slane %v12532_v34, 5  ;;  %v12958_v14 = vshll.u32 %v20116_v60, 16  ;;  %v12962_v63 = vshrl.u32 %v20116_v60, 16  ;;  %v20143_v52 = vld [vmem:[#allocation3 + $0x34] sm:$0xf] }
 0x3ab   : > { %v12511_v29 = vsel %vm19188_vm6, %v12506_v18, %v12510_v46  ;;  %15056 = vmatprep.mubr.msk.bf16.mxu1 %vm1648_vm0, %v14190_v54  ;;  %v12529_v44 = vor.u32 %v12528_v38, %v12524_v17  ;;  %v12951_v19 = vrot.slane %v12949_v11, 4  ;;  %v12954_v36 = vrot.slane %v12952_v10, 5 }
 0x3ac   : > { %v14283_v5 = vcombine.low %v12501_v31, %v12511_v29  ;;  %v12520_v53 = vrot.slane %v12519_v48, 4  ;;  %v12960_v42 = vrot.slane %v12958_v14, 5  ;;  %v12964_v39 = vrot.slane %v12962_v63, 4  ;;  %v12933_v31 = vld [vmem:[#allocation3 + $0x3c] sm:$0xf] }
 0x3ad   : > { %v12530_v45 = vrot.slane %v12529_v44, 4  ;;  %v12968_v2 = vshll.u32 %v20123_v3, 16  ;;  %v14191_v9 = vcombine.low %v20007_v26, %v20015_v37  ;;  %v12955_v62 = vor.u32 %v12954_v36, %v12951_v19  ;;  %v20168_v19 = vld [vmem:[#allocation3 + $0x44] sm:$0x1] }
 0x3ae   : > { %15128 = vmatprep.mubr.msk.bf16.mxu0 %vm1648_vm0, %v14283_v5  ;;  %v12525_v56 = vsel %vm19188_vm6, %v12520_v53, %v12524_v17  ;;  %v12973_v1 = vshrl.u32 %v12927_v23, 16  ;;  %v12976_v21 = vshll.u32 %v12927_v23, 16  ;;  %v12965_v47 = vor.u32 %v12964_v39, %v12960_v42  ;;  %v15417_v53 = vld [vmem:[#allocation3 + $0x24] sm:$0xff]  }
 0x3af   : > { %v12535_v15 = vsel %vm19188_vm6, %v12530_v45, %v12534_v41  ;;  %v12970_v13 = vrot.slane %v12968_v2, 5  ;;  %v12982_v0 = vshll.u32 %v20130_v20, 16  ;;  %v12956_v26 = vrot.slane %v12955_v62, 4  ;;  %v20159_v41 = vld [vmem:[#allocation3 + $0x40] sm:$0xf]  ;;  %v15418_v62 = vld [vmem:[#allocation3 + $0x30] sm:$0xff]  }
 0x3b0   : > { %v14284_v6 = vcombine.low %v12525_v56, %v12535_v15  ;;  %v12975_v37 = vrot.slane %v12973_v1, 4  ;;  %v12978_v27 = vrot.slane %v12976_v21, 5  ;;  %v12966_v54 = vrot.slane %v12965_v47, 4  ;;  %v20175_v21 = vld [vmem:[#allocation3 + $0x4c] sm:$0xf] }
 0x3b1   : > { %v12984_v55 = vrot.slane %v12982_v0, 5  ;;  %v12986_v24 = vshrl.u32 %v20130_v20, 16  ;;  %v12992_v46 = vshll.u32 %v20138_v7, 16  ;;  %v12961_v59 = vsel %vm19188_vm6, %v12956_v26, %v12960_v42 }
 0x3b2   : > { %15129 = vmatmul.mubr.msk.bf16.gmra.mrb[136].mxu0 %vm1648_vm0, %v14284_v6  ;;  %15057 = vmatmul.mubr.msk.bf16.gmra.mrb[136].mxu1 %vm1648_vm0, %v14191_v9  ;;  %v12979_v35 = vor.u32 %v12978_v27, %v12975_v37  ;;  %v12997_v32 = vshrl.u32 %v12930_v61, 16  ;;  %v13000_v4 = vshll.u32 %v12930_v61, 16  ;;  %v12971_v16 = vsel %vm19188_vm6, %v12966_v54, %v12970_v13  ;;  %v12936_v9 = vld [vmem:[#allocation3 + $0x48] sm:$0xf]  ;;  %v20180_v61 = vld [vmem:[#allocation3 + $0x50] sm:$0x1] }
 0x3b3   : > { %15062 = vmatprep.mubr.msk.bf16.mxu1 %vm1648_vm0, %v15416_v49  ;;  %v12988_v30 = vrot.slane %v12986_v24, 4  ;;  %v12994_v58 = vrot.slane %v12992_v46, 5  ;;  %v13006_v12 = vshll.u32 %v20143_v52, 16  ;;  %v14294_v57 = vcombine.low %v12961_v59, %v12971_v16  ;;  %v12939_v46 = vld [vmem:[#allocation3 + $0x54] sm:$0xf] }
 0x3b4   : > { %v12980_v40 = vrot.slane %v12979_v35, 4  ;;  %v12999_v17 = vrot.slane %v12997_v32, 4  ;;  %v13002_v34 = vrot.slane %v13000_v4, 5  ;;  %v13010_v11 = vshrl.u32 %v20143_v52, 16  ;;  %v20189_v16 = vld [vmem:[#allocation3 + $0x58] sm:$0xf] }
 0x3b5   : > { %v12989_v18 = vor.u32 %v12988_v30, %v12984_v55  ;;  %v13008_v38 = vrot.slane %v13006_v12, 5  ;;  %v13016_v48 = vshll.u32 %v20151_v22, 16  ;;  %15134 = vmatprep.mubr.msk.bf16.mxu0 %vm1648_vm0, %v14294_v57  ;;  %v12149_v29 = vsel %vm8951_vm4, %v20074_v51, 0 }
 0x3b6   : > { %v12985_v10 = vsel %vm19188_vm6, %v12980_v40, %v12984_v55  ;;  %v13003_v14 = vor.u32 %v13002_v34, %v12999_v17  ;;  %v13445_v44 = vsel %vm8951_vm4, %v20062_v50, 0  ;;  %v13012_v23 = vrot.slane %v13010_v11, 4  ;;  %vm8031_vm4 = vmand %vm8008_vm5, %vm19164_vm2 }
 0x3b7   : > { %v12990_v63 = vrot.slane %v12989_v18, 4  ;;  %v13018_v5 = vrot.slane %v13016_v48, 5  ;;  %v13021_v36 = vshrl.u32 %v12933_v31, 16  ;;  %v13024_v45 = vshll.u32 %v12933_v31, 16  ;;  %v15419_v31 = vld [vmem:[#allocation3 + $0x3c] sm:$0xff]  }
 0x3b8   : > { %v13004_v42 = vrot.slane %v13003_v14, 4  ;;  %v13030_v39 = vshll.u32 %v20159_v41, 16  ;;  %v13034_v2 = vshrl.u32 %v20159_v41, 16  ;;  %v13013_v56 = vor.u32 %v13012_v23, %v13008_v38  ;;  %v20194_v48 = vld [vmem:[#allocation3 + $0x5c] sm:$0x1]  ;;  %v15420_v23 = vld [vmem:[#allocation3 + $0x48] sm:$0xff]  }
 0x3b9   : > { %v12995_v51 = vsel %vm19188_vm6, %v12990_v63, %v12994_v58  ;;  %v13023_v50 = vrot.slane %v13021_v36, 4  ;;  %v13040_v1 = vshll.u32 %v20168_v19, 16  ;;  %v13026_v13 = vrot.slane %v13024_v45, 5  ;;  %v20200_v36 = vld [vmem:[#allocation3 + $0x64] sm:$0xf] }
 0x3ba   : > { %v14295_v15 = vcombine.low %v12985_v10, %v12995_v51  ;;  %v13009_v47 = vsel %vm19188_vm6, %v13004_v42, %v13008_v38  ;;  %15063 = vmatmul.mubr.msk.bf16.vlgmr.msra.gmra.mrb[124].mxu1 %vm1648_vm0, %v15417_v53  ;;  %v13032_v0 = vrot.slane %v13030_v39, 5  ;;  %v13014_v6 = vrot.slane %v13013_v56, 4 }
 0x3bb   : > { %15079 = vmatpush3.bf16.msra.mxu1 %v12149_v29  ;;  %15066 = vmatprep.mubr.msk.bf16.mxu1 %vm1648_vm0, %v15418_v62  ;;  %v13036_v26 = vrot.slane %v13034_v2, 4  ;;  %v13042_v37 = vrot.slane %v13040_v1, 5  ;;  %v13045_v27 = vshrl.u32 %v12936_v9, 16  ;;  %v13027_v54 = vor.u32 %v13026_v13, %v13023_v50  ;;  %v12942_v29 = vld [vmem:[#allocation3 + $0x60] sm:$0xf] }
 0x3bc   : > { %15135 = vmatmul.mubr.msk.bf16.vlgmr.msra.gmra.mrb[124].mxu0 %vm1648_vm0, %v14295_v15  ;;  %v13048_v49 = vshll.u32 %v12936_v9, 16  ;;  %v13054_v55 = vshll.u32 %v20175_v21, 16  ;;  %v13058_v24 = vshrl.u32 %v20175_v21, 16  ;;  %v13019_v59 = vsel %vm19188_vm6, %v13014_v6, %v13018_v5  ;;  %v20208_v15 = vld [vmem:[#allocation3 + $0x68] sm:$0x1] }
 0x3bd   : > { %15151 = vmatpush3.bf16.msra.mxu0 %v13445_v44  ;;  %v13037_v35 = vor.u32 %v13036_v26, %v13032_v0  ;;  %v13047_v32 = vrot.slane %v13045_v27, 4  ;;  %v13064_v4 = vshll.u32 %v20180_v61, 16  ;;  %v14296_v30 = vcombine.low %v13009_v47, %v13019_v59  ;;  %v12945_v27 = vld [vmem:[#allocation3 + $0x6c] sm:$0xf] }
 0x3be   : > { %v13028_v58 = vrot.slane %v13027_v54, 4  ;;  %v13050_v12 = vrot.slane %v13048_v49, 5  ;;  %v13056_v57 = vrot.slane %v13054_v55, 5  ;;  %v13060_v17 = vrot.slane %v13058_v24, 4 }
 0x3bf   : > { %v13038_v40 = vrot.slane %v13037_v35, 4  ;;  %v13066_v34 = vrot.slane %v13064_v4, 5  ;;  %v13069_v18 = vshrl.u32 %v12939_v46, 16  ;;  %15138 = vmatprep.mubr.msk.bf16.mxu0 %vm1648_vm0, %v14296_v30  ;;  %v13072_v10 = vshll.u32 %v12939_v46, 16 }
 0x3c0   : > { %v13033_v38 = vsel %vm19188_vm6, %v13028_v58, %v13032_v0  ;;  %v13051_v11 = vor.u32 %v13050_v12, %v13047_v32  ;;  %v13078_v14 = vshll.u32 %v20189_v16, 16  ;;  %v13061_v63 = vor.u32 %v13060_v17, %v13056_v57  ;;  %v21448_v32 = vld [vmem:[#allocation10_spill] sm:$0xff] }
 0x3c1   : > { %v13043_v44 = vsel %vm19188_vm6, %v13038_v40, %v13042_v37  ;;  %v13071_v5 = vrot.slane %v13069_v18, 4  ;;  %v13082_v53 = vshrl.u32 %v20189_v16, 16  ;;  %v13074_v39 = vrot.slane %v13072_v10, 5  ;;  %v21450_v40 = vld [vmem:[#allocation8_spill] sm:$0xff] }
 0x3c2   : > { %v14297_v42 = vcombine.low %v13033_v38, %v13043_v44  ;;  %v13052_v45 = vrot.slane %v13051_v11, 4  ;;  %15067 = vmatmul.mubr.msk.bf16.gmra.mrb[128].mxu1 %vm1648_vm0, %v15419_v31  ;;  %v13080_v2 = vrot.slane %v13078_v14, 5  ;;  %v13062_v9 = vrot.slane %v13061_v63, 4  ;;  %v15422_v38 = vld [vmem:[#allocation3 + $0x60] sm:$0xff]   ;;  %v11883_v63 = vld [vmem:[#allocation3 + $0x1c] sm:$0xf] }
 0x3c3   : > { %15070 = vmatprep.mubr.msk.bf16.mxu1 %vm1648_vm0, %v15420_v23  ;;  %v13084_v51 = vrot.slane %v13082_v53, 4  ;;  %v13088_v56 = vshll.u32 %v20194_v48, 16  ;;  %v13093_v62 = vshrl.u32 %v12942_v29, 16  ;;  %v13075_v1 = vor.u32 %v13074_v39, %v13071_v5 }
 0x3c4   : > { %15139 = vmatmul.mubr.msk.bf16.gmra.mrb[128].mxu0 %vm1648_vm0, %v14297_v42  ;;  %v13057_v50 = vsel %vm19188_vm6, %v13052_v45, %v13056_v57  ;;  %v13096_v47 = vshll.u32 %v12942_v29, 16  ;;  %v13102_v13 = vshll.u32 %v20200_v36, 16  ;;  %v13067_v0 = vsel %vm19188_vm6, %v13062_v9, %v13066_v34  ;;  %v15421_v57 = vld [vmem:[#allocation3 + $0x54] sm:$0xff]  }
 0x3c5   : > { %v13085_v6 = vor.u32 %v13084_v51, %v13080_v2  ;;  %v13090_v26 = vrot.slane %v13088_v56, 5  ;;  %v13095_v37 = vrot.slane %v13093_v62, 4  ;;  %v14298_v54 = vcombine.low %v13057_v50, %v13067_v0  ;;  %v13306_v34 = vld [vmem:[#allocation3 + $0x18] sm:$0xe]  ;;  %v11884_v56 = vld [vmem:[#allocation3 + $0x20] sm:$0x1] }
 0x3c6   : > { %v13076_v49 = vrot.slane %v13075_v1, 4  ;;  %v13098_v55 = vrot.slane %v13096_v47, 5  ;;  %v13104_v24 = vrot.slane %v13102_v13, 5  ;;  %v13106_v59 = vshrl.u32 %v20200_v36, 16 }
 0x3c7   : > { %v13086_v46 = vrot.slane %v13085_v6, 4  ;;  %v13112_v35 = vshll.u32 %v20208_v15, 16  ;;  %v21449_v4 = vcombine.high %v21448_v32, %v21448_v32  ;;  %15142 = vmatprep.mubr.msk.bf16.mxu0 %vm1648_vm0, %v14298_v54  ;;  %v8518_v33 = vsel %vm19164_vm2, %v21450_v40, 0.0  ;;  %v13307_v6 = vld [vmem:[#allocation3 + $0x24] sm:$0xe] }
 0x3c8   : > { %v13081_v58 = vsel %vm19188_vm6, %v13076_v49, %v13080_v2  ;;  %v13099_v12 = vor.u32 %v13098_v55, %v13095_v37  ;;  %v13117_v17 = vshrl.u32 %v12945_v27, 16  ;;  %v13108_v18 = vrot.slane %v13106_v59, 4 }
 0x3c9   : > { %v8459_v30 = vrot.slane %v21449_v4, %v18745_v25  ;;  %v13091_v31 = vsel %vm19188_vm6, %v13086_v46, %v13090_v26  ;;  %v11882_v25 = vld [vmem:[#allocation3 + $0x18] sm:$0xf]  ;;  %v14383_v29 = vpack.c.bf16 %v8518_v33, %v8518_v33  ;;  %v13114_v5 = vrot.slane %v13112_v35, 5 }
 0x3ca   : > { %v14299_v10 = vcombine.low %v13081_v58, %v13091_v31  ;;  %v13100_v14 = vrot.slane %v13099_v12, 4  ;;  %15071 = vmatmul.mubr.msk.bf16.gmra.mrb[132].mxu1 %vm1648_vm0, %v15421_v57  ;;  %v13109_v23 = vor.u32 %v13108_v18, %v13104_v24  ;;  %v13119_v8 = vrot.slane %v13117_v17, 4  ;;  %v13308_v12 = vld [vmem:[#allocation3 + $0x30] sm:$0xe] }
 0x3cb   : > { %v8519_v11 = vsel %vm8031_vm4, %v8459_v30, 0.0  ;;  %15074 = vmatprep.mubr.msk.bf16.mxu1 %vm1648_vm0, %v15422_v38  ;;  %v13120_v53 = vshll.u32 %v12945_v27, 16  ;;  %8679 = vst.msk [vmem:[#allocation3 + $0x70] sm:$0xf] %vm1671_vm3, %v14383_v29  ;;  %v14310_v45 = vrot.slane %v13306_v34, 9  ;;  %v13340_v39 = vrot.slane %v20116_v60, 5 }
 0x3cc   : > { %v14384_v44 = vpack.c.bf16 %v8519_v11, %v8519_v11  ;;  %15143 = vmatmul.mubr.msk.bf16.gmra.mrb[132].mxu0 %vm1648_vm0, %v14299_v10  ;;  %v13105_v42 = vsel %vm19188_vm6, %v13100_v14, %v13104_v24  ;;  %v11907_v2 = vshrl.u32 %v11882_v25, 16  ;;  %v13110_v9 = vrot.slane %v13109_v23, 4 }
 0x3cd   : > { %v13122_v51 = vrot.slane %v13120_v53, 5  ;;  %v11910_v62 = vshll.u32 %v11882_v25, 16  ;;  %v11916_v50 = vshll.u32 %v11883_v63, 16  ;;  %v13342_v1 = vrot.slane %v13340_v39, 4 }
 0x3ce   : > { %8680 = vst.msk [vmem:[#allocation3 + $0x74] sm:$0x1] %vm8652_vm7, %v14384_v44  ;;  %v13343_v47 = vrot.slane %v20123_v3, 5  ;;  %v11909_v13 = vrot.slane %v11907_v2, 4  ;;  %v11920_v0 = vshrl.u32 %v11883_v63, 16  ;;  %v13115_v26 = vsel %vm19188_vm6, %v13110_v9, %v13114_v5 }
 0x3cf   : > { %v13123_v37 = vor.u32 %v13122_v51, %v13119_v8  ;;  %v11912_v27 = vrot.slane %v11910_v62, 5  ;;  %v11918_v54 = vrot.slane %v11916_v50, 5  ;;  %v14300_v49 = vcombine.low %v13105_v42, %v13115_v26  ;;  %v11885_v63 = vld [vmem:[#allocation3 + $0x24] sm:$0xf]  ;;  %v11886_v42 = vld [vmem:[#allocation3 + $0x28] sm:$0xf] }
 0x3d0   : > { %v20244_v60 = vsel %vm19062_vm13, %v13342_v1, %v13343_v47  ;;  %v11922_v55 = vrot.slane %v11920_v0, 4  ;;  %v11926_v24 = vshll.u32 %v11884_v56, 16  ;;  %v20248_v3 = vsel %vm19062_vm13, %v14310_v45, %v13340_v39  ;;  %v11887_v45 = vld [vmem:[#allocation3 + $0x2c] sm:$0x1]  ;;  %v11888_v56 = vld [vmem:[#allocation3 + $0x30] sm:$0xf] }
 0x3d1   : > { %v13124_v46 = vrot.slane %v13123_v37, 4  ;;  %v11913_v59 = vor.u32 %v11912_v27, %v11909_v13  ;;  %v14311_v35 = vrot.slane %v13307_v6, 9  ;;  %15146 = vmatprep.mubr.msk.bf16.mxu0 %vm1648_vm0, %v14300_v49  ;;  %v13347_v30 = vrot.slane %v20130_v20, 5  ;;  %v11889_v27 = vld [vmem:[#allocation3 + $0x34] sm:$0xf] }
 0x3d2   : > { %v11923_v32 = vor.u32 %v11922_v55, %v11918_v54  ;;  %v11928_v4 = vrot.slane %v11926_v24, 5  ;;  %v13350_v58 = vrot.slane %v20138_v7, 5  ;;  %v20253_v57 = vld [vmem:[#allocation3 + $0x70] sm:$0xf]  ;;  %v14319_v33 = vcombine.low %v20248_v3, %v20244_v60  ;;  %v13309_v3 = vld [vmem:[#allocation3 + $0x3c] sm:$0xe] }
 0x3d3   : > { %v13126_v17 = vshll.u32 %v20253_v57, 16  ;;  %v13130_v34 = vshrl.u32 %v20253_v57, 16  ;;  %v15423_v18 = vld [vmem:[#allocation3 + $0x6c] sm:$0xff]   ;;  %v11914_v38 = vrot.slane %v11913_v59, 4  ;;  %v20264_v20 = vsel %vm19062_vm13, %v14311_v35, %v13347_v30 }
 0x3d4   : > { %v11924_v11 = vrot.slane %v11923_v32, 4  ;;  %v13349_v7 = vrot.slane %v13347_v30, 4  ;;  %v14312_v25 = vrot.slane %v13308_v12, 9  ;;  %15075 = vmatmul.mubr.msk.bf16.gmra.mrb[136].mxu1 %vm1648_vm0, %v15423_v18  ;;  %v13354_v8 = vrot.slane %v20143_v52, 5 }
 0x3d5   : > { %v20255_v40 = vld [vmem:[#allocation3 + $0x74] sm:$0x1]  ;;  %v13128_v10 = vrot.slane %v13126_v17, 5  ;;  %v13132_v14 = vrot.slane %v13130_v34, 4  ;;  %v11919_v44 = vsel %vm19188_vm6, %v11914_v38, %v11918_v54  ;;  %v13357_v53 = vrot.slane %v20151_v22, 5 }
 0x3d6   : > { %v13136_v31 = vshll.u32 %v20255_v40, 16  ;;  %v11929_v23 = vsel %vm19188_vm6, %v11924_v11, %v11928_v4  ;;  %v20273_v5 = vsel %vm19062_vm13, %v13349_v7, %v13350_v58  ;;  %v20283_v62 = vsel %vm19062_vm13, %v14312_v25, %v13354_v8 }
 0x3d7   : > { %v13129_v39 = vsel %vm19188_vm6, %v13124_v46, %v13128_v10  ;;  %v13133_v2 = vor.u32 %v13132_v14, %v13128_v10  ;;  %v14218_v9 = vcombine.low %v11919_v44, %v11929_v23  ;;  %v14320_v51 = vcombine.low %v20264_v20, %v20273_v5  ;;  %v11890_v46 = vld [vmem:[#allocation3 + $0x38] sm:$0x1]  ;;  %v13310_v14 = vld [vmem:[#allocation3 + $0x48] sm:$0xe] }
 0x3d8   : > { %v13138_v29 = vrot.slane %v13136_v31, 5  ;;  %v13356_v50 = vrot.slane %v13354_v8, 4  ;;  %v11931_v1 = vshrl.u32 %v11885_v63, 16  ;;  %v11934_v52 = vshll.u32 %v11885_v63, 16  ;;  %v11891_v8 = vld [vmem:[#allocation3 + $0x3c] sm:$0xf] }
 0x3d9   : > { %v13134_v47 = vrot.slane %v13133_v2, 4  ;;  %15080 = vmatprep.mubr.msk.bf16.mxu1 %vm1648_vm0, %v14218_v9  ;;  %v11940_v22 = vshll.u32 %v11886_v42, 16  ;;  %v11944_v13 = vshrl.u32 %v11886_v42, 16  ;;  %v11950_v0 = vshll.u32 %v11887_v45, 16 }
 0x3da   : > { %v20288_v6 = vsel %vm19062_vm13, %v13356_v50, %v13357_v53  ;;  %v11933_v26 = vrot.slane %v11931_v1, 4  ;;  %v11936_v37 = vrot.slane %v11934_v52, 5  ;;  %v11955_v54 = vshrl.u32 %v11888_v56, 16 }
 0x3db   : > { %v13139_v49 = vsel %vm19188_vm6, %v13134_v47, %v13138_v29  ;;  %v14321_v60 = vcombine.low %v20283_v62, %v20288_v6  ;;  %v11942_v55 = vrot.slane %v11940_v22, 5  ;;  %v11946_v24 = vrot.slane %v11944_v13, 4  ;;  %v11893_v13 = vld [vmem:[#allocation3 + $0x44] sm:$0x1] }
 0x3dc   : > { %v14301_v59 = vcombine.low %v13129_v39, %v13139_v49  ;;  %v11937_v35 = vor.u32 %v11936_v37, %v11933_v26  ;;  %v11952_v32 = vrot.slane %v11950_v0, 5  ;;  %v11957_v4 = vrot.slane %v11955_v54, 4 }
 0x3dd   : > { %v11947_v30 = vor.u32 %v11946_v24, %v11942_v55  ;;  %v11958_v58 = vshll.u32 %v11888_v56, 16  ;;  %v11964_v12 = vshll.u32 %v11889_v27, 16  ;;  %v11968_v17 = vshrl.u32 %v11889_v27, 16  ;;  %v11892_v56 = vld [vmem:[#allocation3 + $0x40] sm:$0xf] }
 0x3de   : > { %15147 = vmatmul.mubr.msk.bf16.gmra.mrb[136].mxu0 %vm1648_vm0, %v14301_v59  ;;  %v11938_v34 = vrot.slane %v11937_v35, 4  ;;  %v11974_v31 = vshll.u32 %v11890_v46, 16  ;;  %v14313_v18 = vrot.slane %v13309_v3, 9  ;;  %v13361_v38 = vrot.slane %v20159_v41, 5  ;;  %v11895_v27 = vld [vmem:[#allocation3 + $0x4c] sm:$0xf] }
 0x3df   : > { %15152 = vmatprep.mubr.msk.bf16.mxu0 %vm1648_vm0, %v14319_v33  ;;  %v11948_v11 = vrot.slane %v11947_v30, 4  ;;  %v11960_v7 = vrot.slane %v11958_v58, 5  ;;  %v11966_v25 = vrot.slane %v11964_v12, 5  ;;  %v11970_v10 = vrot.slane %v11968_v17, 4  ;;  %v11896_v46 = vld [vmem:[#allocation3 + $0x50] sm:$0x1] }
 0x3e0   : > { %v11943_v29 = vsel %vm19188_vm6, %v11938_v34, %v11942_v55  ;;  %v11976_v44 = vrot.slane %v11974_v31, 5  ;;  %v20301_v63 = vsel %vm19062_vm13, %v14313_v18, %v13361_v38  ;;  %v13363_v23 = vrot.slane %v13361_v38, 4 }
 0x3e1   : > { %v11953_v41 = vsel %vm19188_vm6, %v11948_v11, %v11952_v32  ;;  %v11961_v53 = vor.u32 %v11960_v7, %v11957_v4  ;;  %v11971_v33 = vor.u32 %v11970_v10, %v11966_v25  ;;  %v13364_v42 = vrot.slane %v20168_v19, 5 }
 0x3e2   : > { %v14219_v45 = vcombine.low %v11943_v29, %v11953_v41  ;;  %v14314_v39 = vrot.slane %v13310_v14, 9  ;;  %v13368_v2 = vrot.slane %v20175_v21, 5  ;;  %v13371_v9 = vrot.slane %v20180_v61, 5  ;;  %v11894_v21 = vld [vmem:[#allocation3 + $0x48] sm:$0xf] }
 0x3e3   : > { %v11962_v62 = vrot.slane %v11961_v53, 4  ;;  %v11972_v50 = vrot.slane %v11971_v33, 4  ;;  %v13365_v1 = vsel %vm19062_vm13, %v13363_v23, %v13364_v42  ;;  %v11979_v52 = vshrl.u32 %v11891_v8, 16 }
 0x3e4   : > { %15081 = vmatmul.mubr.msk.bf16.vlgmr.msra.gmra.mrb[124].mxu1 %vm1648_vm0, %v14219_v45  ;;  %v14322_v47 = vcombine.low %v20301_v63, %v13365_v1  ;;  %v13369_v19 = vsel %vm19062_vm13, %v14314_v39, %v13368_v2  ;;  %v13370_v22 = vrot.slane %v13368_v2, 4  ;;  %v11982_v0 = vshll.u32 %v11891_v8, 16  ;;  %v11897_v8 = vld [vmem:[#allocation3 + $0x54] sm:$0xf] }
 0x3e5   : > { %v11967_v61 = vsel %vm19188_vm6, %v11962_v62, %v11966_v25  ;;  %v11977_v6 = vsel %vm19188_vm6, %v11972_v50, %v11976_v44  ;;  %v11981_v26 = vrot.slane %v11979_v52, 4  ;;  %v11988_v37 = vshll.u32 %v11892_v56, 16  ;;  %v11899_v50 = vld [vmem:[#allocation3 + $0x5c] sm:$0x1] }
 0x3e6   : > { %15153 = vmatmul.mubr.msk.bf16.vlgmr.msra.gmra.mrb[124].mxu0 %vm1648_vm0, %v14320_v51  ;;  %v14220_v54 = vcombine.low %v11967_v61, %v11977_v6  ;;  %v13372_v49 = vsel %vm19062_vm13, %v13370_v22, %v13371_v9  ;;  %v11984_v55 = vrot.slane %v11982_v0, 5  ;;  %v11992_v24 = vshrl.u32 %v11892_v56, 16  ;;  %v13311_v51 = vld [vmem:[#allocation3 + $0x54] sm:$0xe]  ;;  %v11898_v9 = vld [vmem:[#allocation3 + $0x58] sm:$0xf] }
 0x3e7   : > { %15156 = vmatprep.mubr.msk.bf16.mxu0 %vm1648_vm0, %v14321_v60  ;;  %v14323_v3 = vcombine.low %v13369_v19, %v13372_v49  ;;  %v11990_v59 = vrot.slane %v11988_v37, 5  ;;  %v11998_v35 = vshll.u32 %v11893_v13, 16  ;;  %v12003_v32 = vshrl.u32 %v11894_v21, 16  ;;  %v13312_v60 = vld [vmem:[#allocation3 + $0x60] sm:$0xe] }
 0x3e8   : > { %15084 = vmatprep.mubr.msk.bf16.mxu1 %vm1648_vm0, %v14220_v54  ;;  %v11985_v4 = vor.u32 %v11984_v55, %v11981_v26  ;;  %v11994_v30 = vrot.slane %v11992_v24, 4  ;;  %v12006_v20 = vshll.u32 %v11894_v21, 16  ;;  %v12012_v5 = vshll.u32 %v11895_v27, 16  ;;  %v11900_v22 = vld [vmem:[#allocation3 + $0x60] sm:$0xf] }
 0x3e9   : > { %v12000_v58 = vrot.slane %v11998_v35, 5  ;;  %v12005_v12 = vrot.slane %v12003_v32, 4  ;;  %v12016_v17 = vshrl.u32 %v11895_v27, 16  ;;  %v12022_v34 = vshll.u32 %v11896_v46, 16  ;;  %v11901_v61 = vld [vmem:[#allocation3 + $0x64] sm:$0xf] }
 0x3ea   : > { %v11986_v31 = vrot.slane %v11985_v4, 4  ;;  %v11995_v18 = vor.u32 %v11994_v30, %v11990_v59  ;;  %v12008_v38 = vrot.slane %v12006_v20, 5  ;;  %v12014_v11 = vrot.slane %v12012_v5, 5  ;;  %v11902_v54 = vld [vmem:[#allocation3 + $0x68] sm:$0x1] }
 0x3eb   : > { %v12018_v7 = vrot.slane %v12016_v17, 4  ;;  %v12024_v25 = vrot.slane %v12022_v34, 5  ;;  %v14315_v10 = vrot.slane %v13311_v51, 9  ;;  %v13375_v14 = vrot.slane %v20189_v16, 5 }
 0x3ec   : > { %v11991_v29 = vsel %vm19188_vm6, %v11986_v31, %v11990_v59  ;;  %v11996_v44 = vrot.slane %v11995_v18, 4  ;;  %v12009_v63 = vor.u32 %v12008_v38, %v12005_v12  ;;  %v13378_v23 = vrot.slane %v20194_v48, 5 }
 0x3ed   : > { %v12019_v41 = vor.u32 %v12018_v7, %v12014_v11  ;;  %v13376_v53 = vsel %vm19062_vm13, %v14315_v10, %v13375_v14  ;;  %v13377_v33 = vrot.slane %v13375_v14, 4  ;;  %v14316_v42 = vrot.slane %v13312_v60, 9  ;;  %v11904_v14 = vld [vmem:[#allocation3 + $0x70] sm:$0xf] }
 0x3ee   : > { %15157 = vmatmul.mubr.msk.bf16.gmra.mrb[128].mxu0 %vm1648_vm0, %v14322_v47  ;;  %v12001_v45 = vsel %vm19188_vm6, %v11996_v44, %v12000_v58  ;;  %v12010_v16 = vrot.slane %v12009_v63, 4  ;;  %v13382_v39 = vrot.slane %v20200_v36, 5  ;;  %v13385_v2 = vrot.slane %v20208_v15, 5  ;;  %v11903_v58 = vld [vmem:[#allocation3 + $0x6c] sm:$0xf] }
 0x3ef   : > { %15160 = vmatprep.mubr.msk.bf16.mxu0 %vm1648_vm0, %v14323_v3  ;;  %v14221_v48 = vcombine.low %v11991_v29, %v12001_v45  ;;  %v12020_v56 = vrot.slane %v12019_v41, 4  ;;  %v13379_v62 = vsel %vm19062_vm13, %v13377_v33, %v13378_v23  ;;  %v12027_v1 = vshrl.u32 %v11897_v8, 16  ;;  %v13313_v3 = vld [vmem:[#allocation3 + $0x6c] sm:$0xe] }
 0x3f0   : > { %v12015_v52 = vsel %vm19188_vm6, %v12010_v16, %v12014_v11  ;;  %v14324_v47 = vcombine.low %v13376_v53, %v13379_v62  ;;  %v13383_v19 = vsel %vm19062_vm13, %v14316_v42, %v13382_v39  ;;  %v13384_v36 = vrot.slane %v13382_v39, 4  ;;  %v11905_v16 = vld [vmem:[#allocation3 + $0x74] sm:$0x1] }
 0x3f1   : > { %15085 = vmatmul.mubr.msk.bf16.gmra.mrb[128].mxu1 %vm1648_vm0, %v14221_v48  ;;  %v12025_v15 = vsel %vm19188_vm6, %v12020_v56, %v12024_v25  ;;  %v12029_v13 = vrot.slane %v12027_v1, 4  ;;  %v12030_v0 = vshll.u32 %v11897_v8, 16  ;;  %v12036_v21 = vshll.u32 %v11898_v9, 16 }
 0x3f2   : > { %v14222_v6 = vcombine.low %v12015_v52, %v12025_v15  ;;  %v13386_v26 = vsel %vm19062_vm13, %v13384_v36, %v13385_v2  ;;  %v12040_v37 = vshrl.u32 %v11898_v9, 16  ;;  %v12046_v27 = vshll.u32 %v11899_v50, 16 }
 0x3f3   : > { %v14325_v49 = vcombine.low %v13383_v19, %v13386_v26  ;;  %v12032_v55 = vrot.slane %v12030_v0, 5  ;;  %v12038_v24 = vrot.slane %v12036_v21, 5  ;;  %v12051_v46 = vshrl.u32 %v11900_v22, 16 }
 0x3f4   : > { %15088 = vmatprep.mubr.msk.bf16.mxu1 %vm1648_vm0, %v14222_v6  ;;  %v12042_v59 = vrot.slane %v12040_v37, 4  ;;  %v12048_v35 = vrot.slane %v12046_v27, 5  ;;  %v12054_v32 = vshll.u32 %v11900_v22, 16  ;;  %v12060_v4 = vshll.u32 %v11901_v61, 16 }
 0x3f5   : > { %v12033_v30 = vor.u32 %v12032_v55, %v12029_v13  ;;  %v12053_v20 = vrot.slane %v12051_v46, 4  ;;  %v12064_v5 = vshrl.u32 %v11901_v61, 16  ;;  %v12070_v51 = vshll.u32 %v11902_v54, 16  ;;  %v20376_v61 = vld [vmem:[%s20584_s4] ss:$0 sm:$0xff] }
 0x3f6   : > { %15161 = vmatmul.mubr.msk.bf16.gmra.mrb[132].mxu0 %vm1648_vm0, %v14324_v47  ;;  %v12043_v12 = vor.u32 %v12042_v59, %v12038_v24  ;;  %v12056_v17 = vrot.slane %v12054_v32, 5  ;;  %v12062_v34 = vrot.slane %v12060_v4, 5  ;;  %v14317_v31 = vrot.slane %v13313_v3, 9 }
 0x3f7   : > { %15164 = vmatprep.mubr.msk.bf16.mxu0 %vm1648_vm0, %v14325_v49  ;;  %v12034_v18 = vrot.slane %v12033_v30, 4  ;;  %v12066_v38 = vrot.slane %v12064_v5, 4  ;;  %v12072_v11 = vrot.slane %v12070_v51, 5  ;;  %v13389_v60 = vrot.slane %v20253_v57, 5 }
 0x3f8   : > { %v12044_v7 = vrot.slane %v12043_v12, 4  ;;  %v12057_v25 = vor.u32 %v12056_v17, %v12053_v20  ;;  %v13392_v10 = vrot.slane %v20255_v40, 5  ;;  %v12075_v29 = vshrl.u32 %v11903_v58, 16 }
 0x3f9   : > { %v12039_v44 = vsel %vm19188_vm6, %v12034_v18, %v12038_v24  ;;  %v12067_v63 = vor.u32 %v12066_v38, %v12062_v34  ;;  %v13390_v23 = vsel %vm19062_vm13, %v14317_v31, %v13389_v60  ;;  %v13391_v8 = vrot.slane %v13389_v60, 4 }
 0x3fa   : > { %v12049_v41 = vsel %vm19188_vm6, %v12044_v7, %v12048_v35  ;;  %v12058_v53 = vrot.slane %v12057_v25, 4  ;;  %v12077_v33 = vrot.slane %v12075_v29, 4  ;;  %v12078_v57 = vshll.u32 %v11903_v58, 16 }
 0x3fb   : > { %v14223_v42 = vcombine.low %v12039_v44, %v12049_v41  ;;  %v12068_v45 = vrot.slane %v12067_v63, 4  ;;  %v13393_v40 = vsel %vm19062_vm13, %v13391_v8, %v13392_v10  ;;  %v12084_v39 = vshll.u32 %v11904_v14, 16 }
 0x3fc   : > { %v12063_v2 = vsel %vm19188_vm6, %v12058_v53, %v12062_v34  ;;  %v14326_v9 = vcombine.low %v13390_v23, %v13393_v40  ;;  %v12080_v48 = vrot.slane %v12078_v57, 5  ;;  %v12088_v56 = vshrl.u32 %v11904_v14, 16 }
 0x3fd   : > { %15089 = vmatmul.mubr.msk.bf16.gmra.mrb[132].mxu1 %vm1648_vm0, %v14223_v42  ;;  %v12073_v62 = vsel %vm19188_vm6, %v12068_v45, %v12072_v11  ;;  %v12086_v50 = vrot.slane %v12084_v39, 5  ;;  %v12094_v47 = vshll.u32 %v11905_v16, 16 }
 0x3fe   : > { %v14224_v1 = vcombine.low %v12063_v2, %v12073_v62  ;;  %15165 = vmatmul.mubr.msk.bf16.gmra.mrb[136].mxu0 %vm1648_vm0, %v14326_v9  ;;  %v12081_v43 = vor.u32 %v12080_v48, %v12077_v33  ;;  %v12090_v52 = vrot.slane %v12088_v56, 4 }
 0x3ff   : > { %v12096_v15 = vrot.slane %v12094_v47, 5 }
 0x400   : > { %15092 = vmatprep.mubr.msk.bf16.mxu1 %vm1648_vm0, %v14224_v1  ;;  %v12082_v19 = vrot.slane %v12081_v43, 4  ;;  %v12091_v36 = vor.u32 %v12090_v52, %v12086_v50 }
 0x402   : > { %v12092_v22 = vrot.slane %v12091_v36, 4  ;;  %v12087_v13 = vsel %vm19188_vm6, %v12082_v19, %v12086_v50 }
 0x404   : > { %v12097_v0 = vsel %vm19188_vm6, %v12092_v22, %v12096_v15 }
 0x405   : > { %v14225_v21 = vcombine.low %v12087_v13, %v12097_v0 }
 0x407   : > { %15093 = vmatmul.mubr.msk.bf16.gmra.mrb[136].mxu1 %vm1648_vm0, %v14225_v21 }
 0x408   : > { %v15010_v6 = vpop.f32.mrb[108].mxu0 }
 0x409   : > { %v11104_v26 = vadd.f32 %v15010_v6, %v20376_v61  ;;  %v11016_v37 = vpop.f32.mrb[109].mxu0 }
 0x40a   : > { %v11102_v28 = vadd.f32 %v20376_v61, %v11016_v37  ;;  %v15011_v27 = vpop.f32.mrb[110].mxu0 }
 0x40b   : > { %v11120_v54 = vmax.f32 %v11104_v26, 0.0  ;;  %v11105_v49 = vadd.f32 %v15011_v27, %v20376_v61  ;;  %v11019_v55 = vpop.f32.mrb[111].mxu0 }
 0x40c   : > { %v11118_v24 = vmax.f32 %v11102_v28, 0.0  ;;  %v11103_v46 = vadd.f32 %v20376_v61, %v11019_v55 }
 0x40d   : > { %14152 = vst.msk [vmem:[%s20384_s20 + $0x90] sm:$0xff] %vm1479_vm1, %v11120_v54  ;;  %v11121_v3 = vmax.f32 %v11105_v49, 0.0 }
 0x40e   : > { %14150 = vst.msk [vmem:[%s20384_s20 + $0x80] sm:$0xff] %vm1479_vm1, %v11118_v24  ;;  %v11119_v59 = vmax.f32 %v11103_v46, 0.0 }
 0x40f   : > { %14153 = vst.msk [vmem:[%s20384_s20 + $0x98] sm:$0xff] %vm1479_vm1, %v11121_v3  ;;  %v14938_v35 = vpop.f32.mrb[108].mxu1 }
 0x410   : > { %14151 = vst.msk [vmem:[%s20384_s20 + $0x88] sm:$0xff] %vm1479_vm1, %v11119_v59  ;;  %v9806_v32 = vadd.f32 %v14938_v35, %v20376_v61  ;;  %v9718_v4 = vpop.f32.mrb[109].mxu1 }
 0x411   : > { %v15014_v30 = vpop.f32.mrb[112].mxu0  ;;  %v9804_v20 = vadd.f32 %v20376_v61, %v9718_v4  ;;  %v14939_v5 = vpop.f32.mrb[110].mxu1 }
 0x412   : > { %v11108_v51 = vadd.f32 %v15014_v30, %v20376_v61  ;;  %v11032_v58 = vpop.f32.mrb[113].mxu0  ;;  %v9822_v12 = vmax.f32 %v9806_v32, 0.0  ;;  %v9807_v17 = vadd.f32 %v14939_v5, %v20376_v61  ;;  %v9721_v34 = vpop.f32.mrb[111].mxu1 }
 0x413   : > { %v11106_v31 = vadd.f32 %v20376_v61, %v11032_v58  ;;  %v15015_v18 = vpop.f32.mrb[114].mxu0  ;;  %v9820_v38 = vmax.f32 %v9804_v20, 0.0  ;;  %v9805_v11 = vadd.f32 %v20376_v61, %v9721_v34 }
 0x414   : > { %v11124_v60 = vmax.f32 %v11108_v51, 0.0  ;;  %v11109_v7 = vadd.f32 %v15015_v18, %v20376_v61  ;;  %v11035_v25 = vpop.f32.mrb[115].mxu0  ;;  %9838 = vst.msk [vmem:[%s20384_s20 + $0x10] sm:$0xff] %vm1479_vm1, %v9822_v12  ;;  %v9823_v10 = vmax.f32 %v9807_v17, 0.0 }
 0x415   : > { %v11122_v14 = vmax.f32 %v11106_v31, 0.0  ;;  %v11107_v29 = vadd.f32 %v20376_v61, %v11035_v25  ;;  %9836 = vst.msk [vmem:[%s20384_s20] sm:$0xff] %vm1479_vm1, %v9820_v38  ;;  %v9821_v44 = vmax.f32 %v9805_v11, 0.0 }
 0x416   : > { %14156 = vst.msk [vmem:[%s20384_s20 + $0xb0] sm:$0xff] %vm1479_vm1, %v11124_v60  ;;  %v11125_v63 = vmax.f32 %v11109_v7, 0.0  ;;  %9839 = vst.msk [vmem:[%s20384_s20 + $0x18] sm:$0xff] %vm1479_vm1, %v9823_v10 }
 0x417   : > { %14154 = vst.msk [vmem:[%s20384_s20 + $0xa0] sm:$0xff] %vm1479_vm1, %v11122_v14  ;;  %v11123_v23 = vmax.f32 %v11107_v29, 0.0  ;;  %9837 = vst.msk [vmem:[%s20384_s20 + $0x8] sm:$0xff] %vm1479_vm1, %v9821_v44 }
 0x418   : > { %14157 = vst.msk [vmem:[%s20384_s20 + $0xb8] sm:$0xff] %vm1479_vm1, %v11125_v63 }
 0x419   : > { %14155 = vst.msk [vmem:[%s20384_s20 + $0xa8] sm:$0xff] %vm1479_vm1, %v11123_v23 }
 0x41c   : > { %v14942_v8 = vpop.f32.mrb[112].mxu1  ;;  %v15018_v41 = vpop.f32.mrb[116].mxu0 }
 0x41d   : > { %v9810_v53 = vadd.f32 %v14942_v8, %v20376_v61  ;;  %v9734_v33 = vpop.f32.mrb[113].mxu1  ;;  %v11112_v57 = vadd.f32 %v15018_v41, %v20376_v61  ;;  %v11048_v42 = vpop.f32.mrb[117].mxu0 }
 0x41e   : > { %v9808_v45 = vadd.f32 %v20376_v61, %v9734_v33  ;;  %v14943_v40 = vpop.f32.mrb[114].mxu1  ;;  %v11110_v16 = vadd.f32 %v20376_v61, %v11048_v42  ;;  %v15019_v39 = vpop.f32.mrb[118].mxu0 }
 0x41f   : > { %v9826_v2 = vmax.f32 %v9810_v53, 0.0  ;;  %v9811_v9 = vadd.f32 %v14943_v40, %v20376_v61  ;;  %v9737_v48 = vpop.f32.mrb[115].mxu1  ;;  %v11128_v56 = vmax.f32 %v11112_v57, 0.0  ;;  %v11113_v62 = vadd.f32 %v15019_v39, %v20376_v61  ;;  %v11051_v50 = vpop.f32.mrb[119].mxu0 }
 0x420   : > { %v9824_v1 = vmax.f32 %v9808_v45, 0.0  ;;  %v9809_v43 = vadd.f32 %v20376_v61, %v9737_v48  ;;  %v11126_v52 = vmax.f32 %v11110_v16, 0.0  ;;  %v11111_v47 = vadd.f32 %v20376_v61, %v11051_v50 }
 0x421   : > { %9842 = vst.msk [vmem:[%s20384_s20 + $0x30] sm:$0xff] %vm1479_vm1, %v9826_v2  ;;  %v9827_v19 = vmax.f32 %v9811_v9, 0.0  ;;  %14160 = vst.msk [vmem:[%s20384_s20 + $0xd0] sm:$0xff] %vm1479_vm1, %v11128_v56  ;;  %v11129_v36 = vmax.f32 %v11113_v62, 0.0 }
 0x422   : > { %9840 = vst.msk [vmem:[%s20384_s20 + $0x20] sm:$0xff] %vm1479_vm1, %v9824_v1  ;;  %v9825_v22 = vmax.f32 %v9809_v43, 0.0  ;;  %14158 = vst.msk [vmem:[%s20384_s20 + $0xc0] sm:$0xff] %vm1479_vm1, %v11126_v52  ;;  %v11127_v15 = vmax.f32 %v11111_v47, 0.0 }
 0x423   : > { %9843 = vst.msk [vmem:[%s20384_s20 + $0x38] sm:$0xff] %vm1479_vm1, %v9827_v19  ;;  %14161 = vst.msk [vmem:[%s20384_s20 + $0xd8] sm:$0xff] %vm1479_vm1, %v11129_v36 }
 0x424   : > { %9841 = vst.msk [vmem:[%s20384_s20 + $0x28] sm:$0xff] %vm1479_vm1, %v9825_v22  ;;  %14159 = vst.msk [vmem:[%s20384_s20 + $0xc8] sm:$0xff] %vm1479_vm1, %v11127_v15 }
 0x427   : > { %v14946_v13 = vpop.f32.mrb[116].mxu1 }
 0x428   : > { %v9814_v0 = vadd.f32 %v14946_v13, %v20376_v61  ;;  %v9750_v21 = vpop.f32.mrb[117].mxu1  ;;  %v15022_v6 = vpop.f32.mrb[120].mxu0 }
 0x429   : > { %v9812_v26 = vadd.f32 %v20376_v61, %v9750_v21  ;;  %v14947_v37 = vpop.f32.mrb[118].mxu1  ;;  %v11116_v28 = vadd.f32 %v15022_v6, %v20376_v61  ;;  %v11064_v27 = vpop.f32.mrb[121].mxu0 }
 0x42a   : > { %v9830_v54 = vmax.f32 %v9814_v0, 0.0  ;;  %v9815_v49 = vadd.f32 %v14947_v37, %v20376_v61  ;;  %v9753_v55 = vpop.f32.mrb[119].mxu1  ;;  %v11114_v24 = vadd.f32 %v20376_v61, %v11064_v27  ;;  %v15023_v46 = vpop.f32.mrb[122].mxu0 }
 0x42b   : > { %v9828_v3 = vmax.f32 %v9812_v26, 0.0  ;;  %v9813_v59 = vadd.f32 %v20376_v61, %v9753_v55  ;;  %v11132_v35 = vmax.f32 %v11116_v28, 0.0  ;;  %v11117_v32 = vadd.f32 %v15023_v46, %v20376_v61  ;;  %v11067_v4 = vpop.f32.mrb[123].mxu0 }
 0x42c   : > { %9846 = vst.msk [vmem:[%s20384_s20 + $0x50] sm:$0xff] %vm1479_vm1, %v9830_v54  ;;  %v9831_v30 = vmax.f32 %v9815_v49, 0.0  ;;  %v11130_v20 = vmax.f32 %v11114_v24, 0.0  ;;  %v11115_v5 = vadd.f32 %v20376_v61, %v11067_v4 }
 0x42d   : > { %9844 = vst.msk [vmem:[%s20384_s20 + $0x40] sm:$0xff] %vm1479_vm1, %v9828_v3  ;;  %v9829_v51 = vmax.f32 %v9813_v59, 0.0  ;;  %14164 = vst.msk [vmem:[%s20384_s20 + $0xf0] sm:$0xff] %vm1479_vm1, %v11132_v35  ;;  %v11133_v58 = vmax.f32 %v11117_v32, 0.0 }
 0x42e   : > { %9847 = vst.msk [vmem:[%s20384_s20 + $0x58] sm:$0xff] %vm1479_vm1, %v9831_v30  ;;  %14162 = vst.msk [vmem:[%s20384_s20 + $0xe0] sm:$0xff] %vm1479_vm1, %v11130_v20  ;;  %v11131_v12 = vmax.f32 %v11115_v5, 0.0 }
 0x42f   : > { %9845 = vst.msk [vmem:[%s20384_s20 + $0x48] sm:$0xff] %vm1479_vm1, %v9829_v51  ;;  %14165 = vst.msk [vmem:[%s20384_s20 + $0xf8] sm:$0xff] %vm1479_vm1, %v11133_v58 }
 0x430   : > { %14163 = vst.msk [vmem:[%s20384_s20 + $0xe8] sm:$0xff] %vm1479_vm1, %v11131_v12 }
 0x433   : > { %v14950_v17 = vpop.f32.mrb[120].mxu1 }
 0x434   : > { %v9818_v34 = vadd.f32 %v14950_v17, %v20376_v61  ;;  %v9766_v31 = vpop.f32.mrb[121].mxu1 }
 0x435   : > { %v9816_v18 = vadd.f32 %v20376_v61, %v9766_v31  ;;  %v14951_v38 = vpop.f32.mrb[122].mxu1 }
 0x436   : > { %v9834_v11 = vmax.f32 %v9818_v34, 0.0  ;;  %v9819_v60 = vadd.f32 %v14951_v38, %v20376_v61  ;;  %v9769_v7 = vpop.f32.mrb[123].mxu1 }
 0x437   : > { %v9832_v25 = vmax.f32 %v9816_v18, 0.0  ;;  %v9817_v10 = vadd.f32 %v20376_v61, %v9769_v7 }
 0x438   : > { %9850 = vst.msk [vmem:[%s20384_s20 + $0x70] sm:$0xff] %vm1479_vm1, %v9834_v11  ;;  %v9835_v14 = vmax.f32 %v9819_v60, 0.0 }
 0x439   : > { %9848 = vst.msk [vmem:[%s20384_s20 + $0x60] sm:$0xff] %vm1479_vm1, %v9832_v25  ;;  %v9833_v29 = vmax.f32 %v9817_v10, 0.0 }
 0x43a   : > { %9851 = vst.msk [vmem:[%s20384_s20 + $0x78] sm:$0xff] %vm1479_vm1, %v9835_v14 }
 0x43b   : > { %9849 = vst.msk [vmem:[%s20384_s20 + $0x68] sm:$0xff] %vm1479_vm1, %v9833_v29 }
 0x4b7   : > { %v15082_v44 = vpop.f32.mrb[124].mxu1 }
 0x4b8   : > { %v12273_v63 = vadd.f32 %v15082_v44, %v20376_v61  ;;  %v12185_v23 = vpop.f32.mrb[125].mxu1 }
 0x4b9   : > { %v15154_v8 = vpop.f32.mrb[124].mxu0  ;;  %v12271_v41 = vadd.f32 %v20376_v61, %v12185_v23  ;;  %v15083_v53 = vpop.f32.mrb[126].mxu1 }
 0x4ba   : > { %v13569_v33 = vadd.f32 %v15154_v8, %v20376_v61  ;;  %v13481_v57 = vpop.f32.mrb[125].mxu0  ;;  %v12289_v42 = vmax.f32 %v12273_v63, 0.0  ;;  %v12274_v45 = vadd.f32 %v15083_v53, %v20376_v61  ;;  %v12188_v40 = vpop.f32.mrb[127].mxu1 }
 0x4bb   : > { %v13567_v16 = vadd.f32 %v20376_v61, %v13481_v57  ;;  %v15155_v39 = vpop.f32.mrb[126].mxu0  ;;  %v12287_v2 = vmax.f32 %v12271_v41, 0.0  ;;  %v12272_v9 = vadd.f32 %v20376_v61, %v12188_v40 }
 0x4bc   : > { %v13585_v48 = vmax.f32 %v13569_v33, 0.0  ;;  %v13570_v56 = vadd.f32 %v15155_v39, %v20376_v61  ;;  %v13484_v62 = vpop.f32.mrb[127].mxu0  ;;  %14237 = vst.msk [vmem:[%s20384_s20 + $0x110] sm:$0xff] %vm1479_vm1, %v12289_v42  ;;  %v12290_v50 = vmax.f32 %v12274_v45, 0.0 }
 0x4bd   : > { %v13583_v1 = vmax.f32 %v13567_v16, 0.0  ;;  %v13568_v43 = vadd.f32 %v20376_v61, %v13484_v62  ;;  %14235 = vst.msk [vmem:[%s20384_s20 + $0x100] sm:$0xff] %vm1479_vm1, %v12287_v2  ;;  %v12288_v52 = vmax.f32 %v12272_v9, 0.0 }
 0x4be   : > { %14338 = vst.msk [vmem:[%s20384_s20 + $0x190] sm:$0xff] %vm1479_vm1, %v13585_v48  ;;  %v13586_v47 = vmax.f32 %v13570_v56, 0.0  ;;  %14238 = vst.msk [vmem:[%s20384_s20 + $0x118] sm:$0xff] %vm1479_vm1, %v12290_v50 }
 0x4bf   : > { %14336 = vst.msk [vmem:[%s20384_s20 + $0x180] sm:$0xff] %vm1479_vm1, %v13583_v1  ;;  %v13584_v19 = vmax.f32 %v13568_v43, 0.0  ;;  %14236 = vst.msk [vmem:[%s20384_s20 + $0x108] sm:$0xff] %vm1479_vm1, %v12288_v52 }
 0x4c0   : > { %14339 = vst.msk [vmem:[%s20384_s20 + $0x198] sm:$0xff] %vm1479_vm1, %v13586_v47 }
 0x4c1   : > { %14337 = vst.msk [vmem:[%s20384_s20 + $0x188] sm:$0xff] %vm1479_vm1, %v13584_v19  ;;  %v15158_v36 = vpop.f32.mrb[128].mxu0 }
 0x4c2   : > { %v13573_v22 = vadd.f32 %v15158_v36, %v20376_v61  ;;  %v13497_v15 = vpop.f32.mrb[129].mxu0 }
 0x4c3   : > { %v13571_v13 = vadd.f32 %v20376_v61, %v13497_v15  ;;  %v15159_v0 = vpop.f32.mrb[130].mxu0 }
 0x4c4   : > { %v13589_v21 = vmax.f32 %v13573_v22, 0.0  ;;  %v13574_v6 = vadd.f32 %v15159_v0, %v20376_v61  ;;  %v13500_v26 = vpop.f32.mrb[131].mxu0  ;;  %v15086_v37 = vpop.f32.mrb[128].mxu1 }
 0x4c5   : > { %v13587_v28 = vmax.f32 %v13571_v13, 0.0  ;;  %v13572_v27 = vadd.f32 %v20376_v61, %v13500_v26  ;;  %v12277_v54 = vadd.f32 %v15086_v37, %v20376_v61  ;;  %v12201_v49 = vpop.f32.mrb[129].mxu1 }
 0x4c6   : > { %14342 = vst.msk [vmem:[%s20384_s20 + $0x1b0] sm:$0xff] %vm1479_vm1, %v13589_v21  ;;  %v13590_v55 = vmax.f32 %v13574_v6, 0.0  ;;  %v12275_v24 = vadd.f32 %v20376_v61, %v12201_v49  ;;  %v15087_v46 = vpop.f32.mrb[130].mxu1 }
 0x4c7   : > { %14340 = vst.msk [vmem:[%s20384_s20 + $0x1a0] sm:$0xff] %vm1479_vm1, %v13587_v28  ;;  %v13588_v3 = vmax.f32 %v13572_v27, 0.0  ;;  %v12293_v59 = vmax.f32 %v12277_v54, 0.0  ;;  %v12278_v35 = vadd.f32 %v15087_v46, %v20376_v61  ;;  %v12204_v32 = vpop.f32.mrb[131].mxu1 }
 0x4c8   : > { %14343 = vst.msk [vmem:[%s20384_s20 + $0x1b8] sm:$0xff] %vm1479_vm1, %v13590_v55  ;;  %v12291_v4 = vmax.f32 %v12275_v24, 0.0  ;;  %v12276_v30 = vadd.f32 %v20376_v61, %v12204_v32 }
 0x4c9   : > { %14341 = vst.msk [vmem:[%s20384_s20 + $0x1a8] sm:$0xff] %vm1479_vm1, %v13588_v3  ;;  %14241 = vst.msk [vmem:[%s20384_s20 + $0x130] sm:$0xff] %vm1479_vm1, %v12293_v59  ;;  %v12294_v20 = vmax.f32 %v12278_v35, 0.0  ;;  %v15162_v5 = vpop.f32.mrb[132].mxu0 }
 0x4ca   : > { %14239 = vst.msk [vmem:[%s20384_s20 + $0x120] sm:$0xff] %vm1479_vm1, %v12291_v4  ;;  %v12292_v51 = vmax.f32 %v12276_v30, 0.0  ;;  %v13577_v58 = vadd.f32 %v15162_v5, %v20376_v61  ;;  %v13513_v12 = vpop.f32.mrb[133].mxu0 }
 0x4cb   : > { %14242 = vst.msk [vmem:[%s20384_s20 + $0x138] sm:$0xff] %vm1479_vm1, %v12294_v20  ;;  %v13575_v17 = vadd.f32 %v20376_v61, %v13513_v12  ;;  %v15163_v34 = vpop.f32.mrb[134].mxu0 }
 0x4cc   : > { %14240 = vst.msk [vmem:[%s20384_s20 + $0x128] sm:$0xff] %vm1479_vm1, %v12292_v51  ;;  %v13593_v31 = vmax.f32 %v13577_v58, 0.0  ;;  %v13578_v18 = vadd.f32 %v15163_v34, %v20376_v61  ;;  %v13516_v38 = vpop.f32.mrb[135].mxu0 }
 0x4cd   : > { %v13591_v11 = vmax.f32 %v13575_v17, 0.0  ;;  %v13576_v60 = vadd.f32 %v20376_v61, %v13516_v38 }
 0x4ce   : > { %14346 = vst.msk [vmem:[%s20384_s20 + $0x1d0] sm:$0xff] %vm1479_vm1, %v13593_v31  ;;  %v13594_v7 = vmax.f32 %v13578_v18, 0.0 }
 0x4cf   : > { %14344 = vst.msk [vmem:[%s20384_s20 + $0x1c0] sm:$0xff] %vm1479_vm1, %v13591_v11  ;;  %v13592_v25 = vmax.f32 %v13576_v60, 0.0 }
 0x4d0   : > { %14347 = vst.msk [vmem:[%s20384_s20 + $0x1d8] sm:$0xff] %vm1479_vm1, %v13594_v7  ;;  %v15090_v10 = vpop.f32.mrb[132].mxu1 }
 0x4d1   : > { %14345 = vst.msk [vmem:[%s20384_s20 + $0x1c8] sm:$0xff] %vm1479_vm1, %v13592_v25  ;;  %v12281_v14 = vadd.f32 %v15090_v10, %v20376_v61  ;;  %v12217_v29 = vpop.f32.mrb[133].mxu1  ;;  %v15166_v44 = vpop.f32.mrb[136].mxu0 }
 0x4d2   : > { %v12279_v63 = vadd.f32 %v20376_v61, %v12217_v29  ;;  %v15091_v23 = vpop.f32.mrb[134].mxu1  ;;  %v13581_v8 = vadd.f32 %v15166_v44, %v20376_v61  ;;  %v13529_v41 = vpop.f32.mrb[137].mxu0 }
 0x4d3   : > { %v12297_v53 = vmax.f32 %v12281_v14, 0.0  ;;  %v12282_v33 = vadd.f32 %v15091_v23, %v20376_v61  ;;  %v12220_v57 = vpop.f32.mrb[135].mxu1  ;;  %v13579_v42 = vadd.f32 %v20376_v61, %v13529_v41  ;;  %v15167_v45 = vpop.f32.mrb[138].mxu0 }
 0x4d4   : > { %v12295_v40 = vmax.f32 %v12279_v63, 0.0  ;;  %v12280_v16 = vadd.f32 %v20376_v61, %v12220_v57  ;;  %v13597_v39 = vmax.f32 %v13581_v8, 0.0  ;;  %v13582_v2 = vadd.f32 %v15167_v45, %v20376_v61  ;;  %v13532_v9 = vpop.f32.mrb[139].mxu0 }
 0x4d5   : > { %14245 = vst.msk [vmem:[%s20384_s20 + $0x150] sm:$0xff] %vm1479_vm1, %v12297_v53  ;;  %v12298_v48 = vmax.f32 %v12282_v33, 0.0  ;;  %v13595_v56 = vmax.f32 %v13579_v42, 0.0  ;;  %v13580_v62 = vadd.f32 %v20376_v61, %v13532_v9 }
 0x4d6   : > { %14243 = vst.msk [vmem:[%s20384_s20 + $0x140] sm:$0xff] %vm1479_vm1, %v12295_v40  ;;  %v12296_v50 = vmax.f32 %v12280_v16, 0.0  ;;  %14350 = vst.msk [vmem:[%s20384_s20 + $0x1f0] sm:$0xff] %vm1479_vm1, %v13597_v39  ;;  %v13598_v1 = vmax.f32 %v13582_v2, 0.0 }
 0x4d7   : > { %14246 = vst.msk [vmem:[%s20384_s20 + $0x158] sm:$0xff] %vm1479_vm1, %v12298_v48  ;;  %14348 = vst.msk [vmem:[%s20384_s20 + $0x1e0] sm:$0xff] %vm1479_vm1, %v13595_v56  ;;  %v13596_v43 = vmax.f32 %v13580_v62, 0.0 }
 0x4d8   : > { %14244 = vst.msk [vmem:[%s20384_s20 + $0x148] sm:$0xff] %vm1479_vm1, %v12296_v50  ;;  %14351 = vst.msk [vmem:[%s20384_s20 + $0x1f8] sm:$0xff] %vm1479_vm1, %v13598_v1 }
 0x4d9   : > { %14349 = vst.msk [vmem:[%s20384_s20 + $0x1e8] sm:$0xff] %vm1479_vm1, %v13596_v43 }
 0x4da   : > { %v15094_v52 = vpop.f32.mrb[136].mxu1 }
 0x4db   : > { %v12285_v47 = vadd.f32 %v15094_v52, %v20376_v61  ;;  %v12233_v19 = vpop.f32.mrb[137].mxu1 }
 0x4dc   : > { %v12283_v36 = vadd.f32 %v20376_v61, %v12233_v19  ;;  %v15095_v22 = vpop.f32.mrb[138].mxu1 }
 0x4dd   : > { %v12301_v15 = vmax.f32 %v12285_v47, 0.0  ;;  %v12286_v13 = vadd.f32 %v15095_v22, %v20376_v61  ;;  %v12236_v0 = vpop.f32.mrb[139].mxu1 }
 0x4de   : > { %v12299_v21 = vmax.f32 %v12283_v36, 0.0  ;;  %v12284_v6 = vadd.f32 %v20376_v61, %v12236_v0 }
 0x4df   : > { %14249 = vst.msk [vmem:[%s20384_s20 + $0x170] sm:$0xff] %vm1479_vm1, %v12301_v15  ;;  %v12302_v26 = vmax.f32 %v12286_v13, 0.0 }
 0x4e0   : > { %14247 = vst.msk [vmem:[%s20384_s20 + $0x160] sm:$0xff] %vm1479_vm1, %v12299_v21  ;;  %v12300_v37 = vmax.f32 %v12284_v6, 0.0 }
 0x4e1   : > { %14250 = vst.msk [vmem:[%s20384_s20 + $0x178] sm:$0xff] %vm1479_vm1, %v12302_v26 }
 0x4e2   : > { %14248 = vst.msk [vmem:[%s20384_s20 + $0x168] sm:$0xff] %vm1479_vm1, %v12300_v37 }
 0x4e3 PF: > { %s15_s18 = sadd.s32 1, %s15437_s18  }
 0x4e4   : > { %p12_p8 = scmp.ge.s32.totalorder %s15_s18, 6  }
 0x4e6   :  { %14 = sbr.rel (!%p12_p8) target bundleno = 1 (0x1), region = 98 }

</bundles_post_ra>
